<compile_context>
chip_gen: v7x
topology: tpu7x:2x2x1
jax: 0.10.0
libtpu: 0.0.40
codegen_flags: <defaults>
</compile_context>

<pallas_src>
import functools

import jax
import jax.numpy as jnp
from jax.experimental import pallas as pl
from jax.experimental.pallas import tpu as pltpu

BN_EPS = 1e-5
EXPANSION = 1                      # BasicBlock
STAGE_CHANNELS = (64, 128, 256, 512)
STAGE_STRIDES = (1, 2, 2, 2)


# ----------------------------------------------------------------------------
# Tiling helpers
# ----------------------------------------------------------------------------
def _round_up(x, m):
    return ((x + m - 1) // m) * m


def _pick_tile(dim, unit, max_tile):
    """Return (padded_dim, tile) with tile a multiple of `unit`, <= max_tile, dividing padded_dim."""
    padded = _round_up(dim, unit)
    if padded <= max_tile:
        return padded, padded
    tile = unit
    t = unit
    while t <= max_tile:
        if padded % t == 0:
            tile = t
        t += unit
    return padded, tile


# ----------------------------------------------------------------------------
# Fused tiled Pallas matmul kernel:
#   out = [relu]( (x @ w) + bias [+ residual] )   (bf16 MXU, f32 accumulate)
# ----------------------------------------------------------------------------
def _fused_mm_kernel(*refs, relu, has_res):
    if has_res:
        x_ref, w_ref, b_ref, r_ref, o_ref, acc_ref = refs
    else:
        x_ref, w_ref, b_ref, o_ref, acc_ref = refs
        r_ref = None

    @pl.when(pl.program_id(2) == 0)
    def _():
        acc_ref[...] = jnp.zeros_like(acc_ref)

    acc_ref[...] += jnp.dot(x_ref[...], w_ref[...],
                            preferred_element_type=jnp.float32)

    @pl.when(pl.program_id(2) == pl.num_programs(2) - 1)
    def _():
        acc = acc_ref[...] + b_ref[...]
        if r_ref is not None:
            acc = acc + r_ref[...].astype(jnp.float32)
        if relu:
            acc = jnp.maximum(acc, 0.0)
        o_ref[...] = acc.astype(o_ref.dtype)


def fused_matmul(x, w, bias, residual=None, relu=False, out_dtype=jnp.bfloat16):
    """x: [M,K], w: [K,N], bias: [N], residual: [M,N] or None.  Returns [M,N] in out_dtype."""
    M, K = x.shape
    N = w.shape[1]

    # Lane/sublane-friendly padded sizes + tiles.
    Mp, tm = _pick_tile(M, 16, 256)       # 16-row unit keeps bf16 sublane packing happy
    Np, tn = _pick_tile(N, 128, 256)      # lane-dense (>=128) output -> unmasked vst
    Kp, tk = _pick_tile(K, 128, 512)

    xb = jnp.pad(x.astype(jnp.bfloat16), ((0, Mp - M), (0, Kp - K)))
    wb = jnp.pad(w.astype(jnp.bfloat16), ((0, Kp - K), (0, Np - N)))
    bb = jnp.pad(bias.astype(jnp.float32).reshape(1, N), ((0, 0), (0, Np - N)))

    inputs = [xb, wb, bb]
    in_specs = [
        pl.BlockSpec((tm, tk), lambda i, j, k: (i, k)),
        pl.BlockSpec((tk, tn), lambda i, j, k: (k, j)),
        pl.BlockSpec((1, tn), lambda i, j, k: (0, j)),
    ]

    has_res = residual is not None
    if has_res:
        rb = jnp.pad(residual.astype(jnp.bfloat16), ((0, Mp - M), (0, Np - N)))
        inputs.append(rb)
        in_specs.append(pl.BlockSpec((tm, tn), lambda i, j, k: (i, j)))

    kernel = functools.partial(_fused_mm_kernel, relu=relu, has_res=has_res)
    out = pl.pallas_call(
        kernel,
        out_shape=jax.ShapeDtypeStruct((Mp, Np), out_dtype),
        grid_spec=pltpu.PrefetchScalarGridSpec(
            num_scalar_prefetch=0,
            grid=(Mp // tm, Np // tn, Kp // tk),
            in_specs=in_specs,
            out_specs=pl.BlockSpec((tm, tn), lambda i, j, k: (i, j)),
            scratch_shapes=[pltpu.VMEM((tm, tn), jnp.float32)],
        ),
        compiler_params=pltpu.CompilerParams(
            dimension_semantics=("parallel", "parallel", "arbitrary"),
            vmem_limit_bytes=32 * 1024 * 1024,
        ),
    )(*inputs)
    return out[:M, :N]


# ----------------------------------------------------------------------------
# Conv via im2col (NHWC) + fused Pallas matmul
# ----------------------------------------------------------------------------
def _im2col_nhwc(x, kh, kw, stride, padding):
    B, H, W, C = x.shape
    Ho = (H + 2 * padding - kh) // stride + 1
    Wo = (W + 2 * padding - kw) // stride + 1
    xp = jnp.pad(x, ((0, 0), (padding, padding), (padding, padding), (0, 0)))
    cols = []
    for i in range(kh):
        for j in range(kw):
            cols.append(xp[:, i:i + stride * Ho:stride, j:j + stride * Wo:stride, :])
    col = jnp.concatenate(cols, axis=-1)          # (B, Ho, Wo, kh*kw*C), channel fastest
    return col.reshape(B * Ho * Wo, kh * kw * C), Ho, Wo


def conv_bn_act(x, conv, kh, kw, stride, padding, relu, residual=None):
    """x: NHWC bf16.  conv = {"w": [kh*kw*Cin, Cout] bf16 (BN scale folded), "b": [Cout] f32}."""
    col, Ho, Wo = _im2col_nhwc(x, kh, kw, stride, padding)
    cout = conv["w"].shape[1]
    res2 = residual.reshape(-1, cout) if residual is not None else None
    out = fused_matmul(col, conv["w"], conv["b"], residual=res2, relu=relu,
                       out_dtype=jnp.bfloat16)
    return out.reshape(x.shape[0], Ho, Wo, cout)


# ----------------------------------------------------------------------------
# Parameter init (deterministic, mirrors the PyTorch __init__; BN folded + weights
# pre-reshaped to matmul layout ONCE here, not per forward call)
# ----------------------------------------------------------------------------
def _kaiming_conv(key, cout, cin, kh, kw):
    fan_out = cout * kh * kw
    std = (2.0 / fan_out) ** 0.5                  # kaiming_normal_, mode='fan_out', relu
    return std * jax.random.normal(key, (cout, cin, kh, kw), jnp.float32)


def _bn_affine(c):
    # BatchNorm2d folded in inference mode (weight=1, bias=0, running_mean=0, running_var=1).
    scale = jnp.full((c,), 1.0 / (1.0 + BN_EPS) ** 0.5, jnp.float32)
    bias = jnp.zeros((c,), jnp.float32)
    return scale, bias


def init_backbone(key, image_channels, layers):
    keys = iter(jax.random.split(key, 1 + 3 * sum(layers)))

    def make_conv(cout, cin, kh, kw):
        w = _kaiming_conv(next(keys), cout, cin, kh, kw)          # (Cout, Cin, kh, kw)
        s, b = _bn_affine(cout)
        w = w * s[:, None, None, None]                            # fold BN scale into weights
        w_mat = w.transpose(2, 3, 1, 0).reshape(kh * kw * cin, cout)   # matches im2col ordering
        return {"w": w_mat.astype(jnp.bfloat16), "b": b}

    p = {"conv1": make_conv(64, image_channels, 7, 7)}
    in_c = 64
    stages = []
    for n_blocks, out_c, stride in zip(layers, STAGE_CHANNELS, STAGE_STRIDES):
        blocks = []
        for bi in range(n_blocks):
            s = stride if bi == 0 else 1
            blk = {}
            if s != 1 or in_c != out_c * EXPANSION:
                blk["down"] = make_conv(out_c * EXPANSION, in_c, 1, 1)
            blk["conv1"] = make_conv(out_c, in_c, 3, 3)
            blk["conv2"] = make_conv(out_c * EXPANSION, out_c, 3, 3)
            in_c = out_c * EXPANSION
            blocks.append(blk)
        stages.append(blocks)
    p["stages"] = stages
    return p


def _linear_init(key, in_f, out_f):
    kw_, kb = jax.random.split(key)
    lim = 1.0 / in_f ** 0.5                       # PyTorch nn.Linear default init
    w = jax.random.uniform(kw_, (in_f, out_f), jnp.float32, -lim, lim)
    b = jax.random.uniform(kb, (out_f,), jnp.float32, -lim, lim)
    return w, b


def init_gaze3inputs(key, image_channels, num_bins, layers=(1, 1, 1, 1)):
    kf, ke, kp, ky = jax.random.split(key, 4)
    feat = 512 * EXPANSION * 3
    pw, pb = _linear_init(kp, feat, num_bins)
    yw, yb = _linear_init(ky, feat, num_bins)
    return {
        "face": init_backbone(kf, image_channels, layers),
        "eye": init_backbone(ke, image_channels, layers),          # shared between left & right eye
        # pitch_fc and yaw_fc merged into one lane-padded matmul head
        "head": {"w": jnp.concatenate([pw, yw], axis=1),
                 "b": jnp.concatenate([pb, yb])},
    }


# ----------------------------------------------------------------------------
# Forward
# ----------------------------------------------------------------------------
def _maxpool_3x3_s2_p1(x):
    # glue: MaxPool2d(kernel=3, stride=2, padding=1) on NHWC; PyTorch pads with -inf for max pool.
    return jax.lax.reduce_window(
        x, jnp.array(-jnp.inf, x.dtype), jax.lax.max,
        window_dimensions=(1, 3, 3, 1),
        window_strides=(1, 2, 2, 1),
        padding=((0, 0), (1, 1), (1, 1), (0, 0)))


def _basic_block(blk, x, stride):
    identity = x
    if "down" in blk:
        identity = conv_bn_act(x, blk["down"], 1, 1, stride, 0, relu=False)
    out = conv_bn_act(x, blk["conv1"], 3, 3, stride, 1, relu=True)
    # residual add + final ReLU are fused into the Pallas kernel of the second conv
    out = conv_bn_act(out, blk["conv2"], 3, 3, 1, 1, relu=True, residual=identity)
    return out


def backbone_forward(p, x):
    x = conv_bn_act(x, p["conv1"], 7, 7, 2, 3, relu=True)
    x = _maxpool_3x3_s2_p1(x)
    for stage_idx, stage in enumerate(p["stages"]):
        for b_idx, blk in enumerate(stage):
            stride = STAGE_STRIDES[stage_idx] if b_idx == 0 else 1
            x = _basic_block(blk, x, stride)
    # AdaptiveAvgPool2d((1,1)) + view(B, -1) -> (B, 512*EXPANSION); pool in f32
    return jnp.mean(x.astype(jnp.float32), axis=(1, 2))


@jax.jit
def gaze3inputs_forward(params, x1, x2, x3):
    B = x1.shape[0]
    # NCHW -> NHWC once at the boundary; cast to bf16 so all im2col buffers are bf16.
    face_in = jnp.transpose(x1, (0, 2, 3, 1)).astype(jnp.bfloat16)
    # Stack the two eye crops: the eye backbone is shared, so one pass with 2B batch.
    eyes_in = jnp.transpose(jnp.concatenate([x2, x3], axis=0), (0, 2, 3, 1)).astype(jnp.bfloat16)

    face = backbone_forward(params["face"], face_in)          # (B, 512)
    eyes = backbone_forward(params["eye"], eyes_in)           # (2B, 512)
    left, right = eyes[:B], eyes[B:]

    feats = jnp.concatenate([face, left, right], axis=1)      # (B, 512*EXPANSION*3)
    head = params["head"]
    out = fused_matmul(feats, head["w"], head["b"], relu=False, out_dtype=jnp.float32)
    num_bins = head["w"].shape[1] // 2
    pre_pitch_gaze = out[:, :num_bins]
    pre_yaw_gaze = out[:, num_bins:]
    return pre_pitch_gaze, pre_yaw_gaze


if __name__ == "__main__":
    key = jax.random.PRNGKey(0)
    kp, k1, k2, k3 = jax.random.split(key, 4)
    image_channels, num_bins = 3, 8
    B, S = 2, 32                                  # small spatial size; 32 -> ... -> 1x1 at layer4

    params = init_gaze3inputs(kp, image_channels, num_bins, layers=(1, 1, 1, 1))
    x1 = jax.random.normal(k1, (B, image_channels, S, S), jnp.float32)  # face
    x2 = jax.random.normal(k2, (B, image_channels, S, S), jnp.float32)  # left eye
    x3 = jax.random.normal(k3, (B, image_channels, S, S), jnp.float32)  # right eye

    pitch, yaw = gaze3inputs_forward(params, x1, x2, x3)
    jax.block_until_ready((pitch, yaw))
    assert pitch.shape == (B, num_bins) and yaw.shape == (B, num_bins)
    assert bool(jnp.all(jnp.isfinite(pitch))) and bool(jnp.all(jnp.isfinite(yaw)))
    print("KERNEL_OK")
</pallas_src>

<mosaic_0001>
module attributes {stable_mosaic.version = 11 : i64} {
  func.func @_fused_mm_kernel(%arg0: i32, %arg1: i32, %arg2: i32, %arg3: memref<256x256xbf16, #tpu.memory_space<vmem>>, %arg4: memref<256x128xbf16, #tpu.memory_space<vmem>>, %arg5: memref<1x128xf32, #tpu.memory_space<vmem>>, %arg6: memref<256x128xbf16, #tpu.memory_space<vmem>>, %arg7: memref<256x128xf32, #tpu.memory_space<vmem>>) attributes {dimension_semantics = [#tpu.dimension_semantics<parallel>, #tpu.dimension_semantics<parallel>, #tpu.dimension_semantics<arbitrary>], iteration_bounds = array<i64: 2, 1, 1>, scalar_prefetch = 0 : i64, scratch_operands = 1 : i64, tpu.core_type = #tpu.core_type<tc>, window_params = [{transform_indices = @transform_0, window_bounds = array<i64: 256, 256>}, {transform_indices = @transform_1, window_bounds = array<i64: 256, 128>}, {transform_indices = @transform_2, window_bounds = array<i64: 1, 128>}, {transform_indices = @transform_3, window_bounds = array<i64: 256, 128>}]} {
    %c0_i32 = arith.constant 0 : i32
    %0 = arith.cmpi eq, %arg2, %c0_i32 : i32
    %1 = arith.extui %0 : i1 to i32
    %c0_i32_0 = arith.constant 0 : i32
    %2 = arith.cmpi ne, %1, %c0_i32_0 : i32
    scf.if %2 {
      %cst_10 = arith.constant 0.000000e+00 : f32
      %12 = vector.broadcast %cst_10 : f32 to vector<256x128xf32>
      %c0_11 = arith.constant 0 : index
      %c0_12 = arith.constant 0 : index
      %13 = vector.load %arg7[%c0_11, %c0_12] : memref<256x128xf32, #tpu.memory_space<vmem>>, vector<256x128xf32>
      tpu.vector_store %arg7[%c0_11, %c0_12], %12 {strides = array<i32>} : memref<256x128xf32, #tpu.memory_space<vmem>>, vector<256x128xf32>,
    } else {
    }
    %c0 = arith.constant 0 : index
    %c0_1 = arith.constant 0 : index
    %3 = vector.load %arg7[%c0, %c0_1] : memref<256x128xf32, #tpu.memory_space<vmem>>, vector<256x128xf32>
    %c0_2 = arith.constant 0 : index
    %c0_3 = arith.constant 0 : index
    %4 = vector.load %arg3[%c0_2, %c0_3] : memref<256x256xbf16, #tpu.memory_space<vmem>>, vector<256x256xbf16>
    %c0_4 = arith.constant 0 : index
    %c0_5 = arith.constant 0 : index
    %5 = vector.load %arg4[%c0_4, %c0_5] : memref<256x128xbf16, #tpu.memory_space<vmem>>, vector<256x128xbf16>
    %cst = arith.constant dense<0.000000e+00> : vector<256x128xf32>
    %6 = tpu.matmul %4, %5, %cst {dimension_numbers = #tpu.dot_dimension_numbers<[1], [0], [0], [1], [0, 0, 1, 1], [], []>} : vector<256x256xbf16>, vector<256x128xbf16>, vector<256x128xf32> -> vector<256x128xf32>
    %7 = arith.addf %3, %6 : vector<256x128xf32>
    %c0_6 = arith.constant 0 : index
    %c0_7 = arith.constant 0 : index
    %8 = vector.load %arg7[%c0_6, %c0_7] : memref<256x128xf32, #tpu.memory_space<vmem>>, vector<256x128xf32>
    tpu.vector_store %arg7[%c0_6, %c0_7], %7 {strides = array<i32>} : memref<256x128xf32, #tpu.memory_space<vmem>>, vector<256x128xf32>,
    %c0_i32_8 = arith.constant 0 : i32
    %9 = arith.cmpi eq, %arg2, %c0_i32_8 : i32
    %10 = arith.extui %9 : i1 to i32
    %c0_i32_9 = arith.constant 0 : i32
    %11 = arith.cmpi ne, %10, %c0_i32_9 : i32
    scf.if %11 {
      %c0_10 = arith.constant 0 : index
      %c0_11 = arith.constant 0 : index
      %12 = vector.load %arg7[%c0_10, %c0_11] : memref<256x128xf32, #tpu.memory_space<vmem>>, vector<256x128xf32>
      %c0_12 = arith.constant 0 : index
      %c0_13 = arith.constant 0 : index
      %13 = vector.load %arg5[%c0_12, %c0_13] : memref<1x128xf32, #tpu.memory_space<vmem>>, vector<1x128xf32>
      %14 = vector.broadcast %13 : vector<1x128xf32> to vector<256x128xf32>
      %15 = arith.addf %12, %14 : vector<256x128xf32>
      %cst_14 = arith.constant 0.000000e+00 : f32
      %16 = vector.broadcast %cst_14 : f32 to vector<256x128xf32>
      %17 = arith.maximumf %15, %16 : vector<256x128xf32>
      %18 = arith.truncf %17 : vector<256x128xf32> to vector<256x128xbf16>
      %c0_15 = arith.constant 0 : index
      %c0_16 = arith.constant 0 : index
      %19 = vector.load %arg6[%c0_15, %c0_16] : memref<256x128xbf16, #tpu.memory_space<vmem>>, vector<256x128xbf16>
      tpu.vector_store %arg6[%c0_15, %c0_16], %18 {strides = array<i32>} : memref<256x128xbf16, #tpu.memory_space<vmem>>, vector<256x128xbf16>,
    } else {
    }
    return
  }
  func.func @transform_0(%arg0: i32, %arg1: i32, %arg2: i32) -> (i32, i32) {
    %c0_i32 = arith.constant 0 : i32
    return %arg0, %arg2 : i32, i32
  }
  func.func @transform_1(%arg0: i32, %arg1: i32, %arg2: i32) -> (i32, i32) {
    %c0_i32 = arith.constant 0 : i32
    return %arg2, %arg1 : i32, i32
  }
  func.func @transform_2(%arg0: i32, %arg1: i32, %arg2: i32) -> (i32, i32) {
    %c0_i32 = arith.constant 0 : i32
    %c0_i32_0 = arith.constant 0 : i32
    return %c0_i32, %arg1 : i32, i32
  }
  func.func @transform_3(%arg0: i32, %arg1: i32, %arg2: i32) -> (i32, i32) {
    %c0_i32 = arith.constant 0 : i32
    return %arg0, %arg1 : i32, i32
  }
}

module attributes {stable_mosaic.version = 11 : i64} {
  func.func @_fused_mm_kernel(%arg0: i32, %arg1: i32, %arg2: i32, %arg3: memref<128x128xbf16, #tpu.memory_space<vmem>>, %arg4: memref<128x128xbf16, #tpu.memory_space<vmem>>, %arg5: memref<1x128xf32, #tpu.memory_space<vmem>>, %arg6: memref<128x128xbf16, #tpu.memory_space<vmem>>, %arg7: memref<128x128xf32, #tpu.memory_space<vmem>>) attributes {dimension_semantics = [#tpu.dimension_semantics<parallel>, #tpu.dimension_semantics<parallel>, #tpu.dimension_semantics<arbitrary>], iteration_bounds = array<i64: 1, 1, 5>, scalar_prefetch = 0 : i64, scratch_operands = 1 : i64, tpu.core_type = #tpu.core_type<tc>, window_params = [{transform_indices = @transform_0, window_bounds = array<i64: 128, 128>}, {transform_indices = @transform_1, window_bounds = array<i64: 128, 128>}, {transform_indices = @transform_2, window_bounds = array<i64: 1, 128>}, {transform_indices = @transform_3, window_bounds = array<i64: 128, 128>}]} {
    %c0_i32 = arith.constant 0 : i32
    %0 = arith.cmpi eq, %arg2, %c0_i32 : i32
    %1 = arith.extui %0 : i1 to i32
    %c0_i32_0 = arith.constant 0 : i32
    %2 = arith.cmpi ne, %1, %c0_i32_0 : i32
    scf.if %2 {
      %cst_9 = arith.constant 0.000000e+00 : f32
      %12 = vector.broadcast %cst_9 : f32 to vector<128x128xf32>
      %c0_10 = arith.constant 0 : index
      %c0_11 = arith.constant 0 : index
      %13 = vector.load %arg7[%c0_10, %c0_11] : memref<128x128xf32, #tpu.memory_space<vmem>>, vector<128x128xf32>
      tpu.vector_store %arg7[%c0_10, %c0_11], %12 {strides = array<i32>} : memref<128x128xf32, #tpu.memory_space<vmem>>, vector<128x128xf32>,
    } else {
    }
    %c0 = arith.constant 0 : index
    %c0_1 = arith.constant 0 : index
    %3 = vector.load %arg7[%c0, %c0_1] : memref<128x128xf32, #tpu.memory_space<vmem>>, vector<128x128xf32>
    %c0_2 = arith.constant 0 : index
    %c0_3 = arith.constant 0 : index
    %4 = vector.load %arg3[%c0_2, %c0_3] : memref<128x128xbf16, #tpu.memory_space<vmem>>, vector<128x128xbf16>
    %c0_4 = arith.constant 0 : index
    %c0_5 = arith.constant 0 : index
    %5 = vector.load %arg4[%c0_4, %c0_5] : memref<128x128xbf16, #tpu.memory_space<vmem>>, vector<128x128xbf16>
    %cst = arith.constant dense<0.000000e+00> : vector<128x128xf32>
    %6 = tpu.matmul %4, %5, %cst {dimension_numbers = #tpu.dot_dimension_numbers<[1], [0], [0], [1], [0, 0, 1, 1], [], []>} : vector<128x128xbf16>, vector<128x128xbf16>, vector<128x128xf32> -> vector<128x128xf32>
    %7 = arith.addf %3, %6 : vector<128x128xf32>
    %c0_6 = arith.constant 0 : index
    %c0_7 = arith.constant 0 : index
    %8 = vector.load %arg7[%c0_6, %c0_7] : memref<128x128xf32, #tpu.memory_space<vmem>>, vector<128x128xf32>
    tpu.vector_store %arg7[%c0_6, %c0_7], %7 {strides = array<i32>} : memref<128x128xf32, #tpu.memory_space<vmem>>, vector<128x128xf32>,
    %c4_i32 = arith.constant 4 : i32
    %9 = arith.cmpi eq, %arg2, %c4_i32 : i32
    %10 = arith.extui %9 : i1 to i32
    %c0_i32_8 = arith.constant 0 : i32
    %11 = arith.cmpi ne, %10, %c0_i32_8 : i32
    scf.if %11 {
      %c0_9 = arith.constant 0 : index
      %c0_10 = arith.constant 0 : index
      %12 = vector.load %arg7[%c0_9, %c0_10] : memref<128x128xf32, #tpu.memory_space<vmem>>, vector<128x128xf32>
      %c0_11 = arith.constant 0 : index
      %c0_12 = arith.constant 0 : index
      %13 = vector.load %arg5[%c0_11, %c0_12] : memref<1x128xf32, #tpu.memory_space<vmem>>, vector<1x128xf32>
      %14 = vector.broadcast %13 : vector<1x128xf32> to vector<128x128xf32>
      %15 = arith.addf %12, %14 : vector<128x128xf32>
      %cst_13 = arith.constant 0.000000e+00 : f32
      %16 = vector.broadcast %cst_13 : f32 to vector<128x128xf32>
      %17 = arith.maximumf %15, %16 : vector<128x128xf32>
      %18 = arith.truncf %17 : vector<128x128xf32> to vector<128x128xbf16>
      %c0_14 = arith.constant 0 : index
      %c0_15 = arith.constant 0 : index
      %19 = vector.load %arg6[%c0_14, %c0_15] : memref<128x128xbf16, #tpu.memory_space<vmem>>, vector<128x128xbf16>
      tpu.vector_store %arg6[%c0_14, %c0_15], %18 {strides = array<i32>} : memref<128x128xbf16, #tpu.memory_space<vmem>>, vector<128x128xbf16>,
    } else {
    }
    return
  }
  func.func @transform_0(%arg0: i32, %arg1: i32, %arg2: i32) -> (i32, i32) {
    %c0_i32 = arith.constant 0 : i32
    return %arg0, %arg2 : i32, i32
  }
  func.func @transform_1(%arg0: i32, %arg1: i32, %arg2: i32) -> (i32, i32) {
    %c0_i32 = arith.constant 0 : i32
    return %arg2, %arg1 : i32, i32
  }
  func.func @transform_2(%arg0: i32, %arg1: i32, %arg2: i32) -> (i32, i32) {
    %c0_i32 = arith.constant 0 : i32
    %c0_i32_0 = arith.constant 0 : i32
    return %c0_i32, %arg1 : i32, i32
  }
  func.func @transform_3(%arg0: i32, %arg1: i32, %arg2: i32) -> (i32, i32) {
    %c0_i32 = arith.constant 0 : i32
    return %arg0, %arg1 : i32, i32
  }
}

module attributes {stable_mosaic.version = 11 : i64} {
  func.func @_fused_mm_kernel(%arg0: i32, %arg1: i32, %arg2: i32, %arg3: memref<128x128xbf16, #tpu.memory_space<vmem>>, %arg4: memref<128x128xbf16, #tpu.memory_space<vmem>>, %arg5: memref<1x128xf32, #tpu.memory_space<vmem>>, %arg6: memref<128x128xbf16, #tpu.memory_space<vmem>>, %arg7: memref<128x128xbf16, #tpu.memory_space<vmem>>, %arg8: memref<128x128xf32, #tpu.memory_space<vmem>>) attributes {dimension_semantics = [#tpu.dimension_semantics<parallel>, #tpu.dimension_semantics<parallel>, #tpu.dimension_semantics<arbitrary>], iteration_bounds = array<i64: 1, 1, 5>, scalar_prefetch = 0 : i64, scratch_operands = 1 : i64, tpu.core_type = #tpu.core_type<tc>, window_params = [{transform_indices = @transform_0, window_bounds = array<i64: 128, 128>}, {transform_indices = @transform_1, window_bounds = array<i64: 128, 128>}, {transform_indices = @transform_2, window_bounds = array<i64: 1, 128>}, {transform_indices = @transform_3, window_bounds = array<i64: 128, 128>}, {transform_indices = @transform_4, window_bounds = array<i64: 128, 128>}]} {
    %c0_i32 = arith.constant 0 : i32
    %0 = arith.cmpi eq, %arg2, %c0_i32 : i32
    %1 = arith.extui %0 : i1 to i32
    %c0_i32_0 = arith.constant 0 : i32
    %2 = arith.cmpi ne, %1, %c0_i32_0 : i32
    scf.if %2 {
      %cst_9 = arith.constant 0.000000e+00 : f32
      %12 = vector.broadcast %cst_9 : f32 to vector<128x128xf32>
      %c0_10 = arith.constant 0 : index
      %c0_11 = arith.constant 0 : index
      %13 = vector.load %arg8[%c0_10, %c0_11] : memref<128x128xf32, #tpu.memory_space<vmem>>, vector<128x128xf32>
      tpu.vector_store %arg8[%c0_10, %c0_11], %12 {strides = array<i32>} : memref<128x128xf32, #tpu.memory_space<vmem>>, vector<128x128xf32>,
    } else {
    }
    %c0 = arith.constant 0 : index
    %c0_1 = arith.constant 0 : index
    %3 = vector.load %arg8[%c0, %c0_1] : memref<128x128xf32, #tpu.memory_space<vmem>>, vector<128x128xf32>
    %c0_2 = arith.constant 0 : index
    %c0_3 = arith.constant 0 : index
    %4 = vector.load %arg3[%c0_2, %c0_3] : memref<128x128xbf16, #tpu.memory_space<vmem>>, vector<128x128xbf16>
    %c0_4 = arith.constant 0 : index
    %c0_5 = arith.constant 0 : index
    %5 = vector.load %arg4[%c0_4, %c0_5] : memref<128x128xbf16, #tpu.memory_space<vmem>>, vector<128x128xbf16>
    %cst = arith.constant dense<0.000000e+00> : vector<128x128xf32>
    %6 = tpu.matmul %4, %5, %cst {dimension_numbers = #tpu.dot_dimension_numbers<[1], [0], [0], [1], [0, 0, 1, 1], [], []>} : vector<128x128xbf16>, vector<128x128xbf16>, vector<128x128xf32> -> vector<128x128xf32>
    %7 = arith.addf %3, %6 : vector<128x128xf32>
    %c0_6 = arith.constant 0 : index
    %c0_7 = arith.constant 0 : index
    %8 = vector.load %arg8[%c0_6, %c0_7] : memref<128x128xf32, #tpu.memory_space<vmem>>, vector<128x128xf32>
    tpu.vector_store %arg8[%c0_6, %c0_7], %7 {strides = array<i32>} : memref<128x128xf32, #tpu.memory_space<vmem>>, vector<128x128xf32>,
    %c4_i32 = arith.constant 4 : i32
    %9 = arith.cmpi eq, %arg2, %c4_i32 : i32
    %10 = arith.extui %9 : i1 to i32
    %c0_i32_8 = arith.constant 0 : i32
    %11 = arith.cmpi ne, %10, %c0_i32_8 : i32
    scf.if %11 {
      %c0_9 = arith.constant 0 : index
      %c0_10 = arith.constant 0 : index
      %12 = vector.load %arg8[%c0_9, %c0_10] : memref<128x128xf32, #tpu.memory_space<vmem>>, vector<128x128xf32>
      %c0_11 = arith.constant 0 : index
      %c0_12 = arith.constant 0 : index
      %13 = vector.load %arg5[%c0_11, %c0_12] : memref<1x128xf32, #tpu.memory_space<vmem>>, vector<1x128xf32>
      %14 = vector.broadcast %13 : vector<1x128xf32> to vector<128x128xf32>
      %15 = arith.addf %12, %14 : vector<128x128xf32>
      %c0_13 = arith.constant 0 : index
      %c0_14 = arith.constant 0 : index
      %16 = vector.load %arg6[%c0_13, %c0_14] : memref<128x128xbf16, #tpu.memory_space<vmem>>, vector<128x128xbf16>
      %17 = arith.extf %16 : vector<128x128xbf16> to vector<128x128xf32>
      %18 = arith.addf %15, %17 : vector<128x128xf32>
      %cst_15 = arith.constant 0.000000e+00 : f32
      %19 = vector.broadcast %cst_15 : f32 to vector<128x128xf32>
      %20 = arith.maximumf %18, %19 : vector<128x128xf32>
      %21 = arith.truncf %20 : vector<128x128xf32> to vector<128x128xbf16>
      %c0_16 = arith.constant 0 : index
      %c0_17 = arith.constant 0 : index
      %22 = vector.load %arg7[%c0_16, %c0_17] : memref<128x128xbf16, #tpu.memory_space<vmem>>, vector<128x128xbf16>
      tpu.vector_store %arg7[%c0_16, %c0_17], %21 {strides = array<i32>} : memref<128x128xbf16, #tpu.memory_space<vmem>>, vector<128x128xbf16>,
    } else {
    }
    return
  }
  func.func @transform_0(%arg0: i32, %arg1: i32, %arg2: i32) -> (i32, i32) {
    %c0_i32 = arith.constant 0 : i32
    return %arg0, %arg2 : i32, i32
  }
  func.func @transform_1(%arg0: i32, %arg1: i32, %arg2: i32) -> (i32, i32) {
    %c0_i32 = arith.constant 0 : i32
    return %arg2, %arg1 : i32, i32
  }
  func.func @transform_2(%arg0: i32, %arg1: i32, %arg2: i32) -> (i32, i32) {
    %c0_i32 = arith.constant 0 : i32
    %c0_i32_0 = arith.constant 0 : i32
    return %c0_i32, %arg1 : i32, i32
  }
  func.func @transform_3(%arg0: i32, %arg1: i32, %arg2: i32) -> (i32, i32) {
    %c0_i32 = arith.constant 0 : i32
    return %arg0, %arg1 : i32, i32
  }
  func.func @transform_4(%arg0: i32, %arg1: i32, %arg2: i32) -> (i32, i32) {
    %c0_i32 = arith.constant 0 : i32
    return %arg0, %arg1 : i32, i32
  }
}

module attributes {stable_mosaic.version = 11 : i64} {
  func.func @_fused_mm_kernel(%arg0: i32, %arg1: i32, %arg2: i32, %arg3: memref<32x128xbf16, #tpu.memory_space<vmem>>, %arg4: memref<128x128xbf16, #tpu.memory_space<vmem>>, %arg5: memref<1x128xf32, #tpu.memory_space<vmem>>, %arg6: memref<32x128xbf16, #tpu.memory_space<vmem>>, %arg7: memref<32x128xf32, #tpu.memory_space<vmem>>) attributes {dimension_semantics = [#tpu.dimension_semantics<parallel>, #tpu.dimension_semantics<parallel>, #tpu.dimension_semantics<arbitrary>], iteration_bounds = array<i64: 1, 1, 5>, scalar_prefetch = 0 : i64, scratch_operands = 1 : i64, tpu.core_type = #tpu.core_type<tc>, window_params = [{transform_indices = @transform_0, window_bounds = array<i64: 32, 128>}, {transform_indices = @transform_1, window_bounds = array<i64: 128, 128>}, {transform_indices = @transform_2, window_bounds = array<i64: 1, 128>}, {transform_indices = @transform_3, window_bounds = array<i64: 32, 128>}]} {
    %c0_i32 = arith.constant 0 : i32
    %0 = arith.cmpi eq, %arg2, %c0_i32 : i32
    %1 = arith.extui %0 : i1 to i32
    %c0_i32_0 = arith.constant 0 : i32
    %2 = arith.cmpi ne, %1, %c0_i32_0 : i32
    scf.if %2 {
      %cst_9 = arith.constant 0.000000e+00 : f32
      %12 = vector.broadcast %cst_9 : f32 to vector<32x128xf32>
      %c0_10 = arith.constant 0 : index
      %c0_11 = arith.constant 0 : index
      %13 = vector.load %arg7[%c0_10, %c0_11] : memref<32x128xf32, #tpu.memory_space<vmem>>, vector<32x128xf32>
      tpu.vector_store %arg7[%c0_10, %c0_11], %12 {strides = array<i32>} : memref<32x128xf32, #tpu.memory_space<vmem>>, vector<32x128xf32>,
    } else {
    }
    %c0 = arith.constant 0 : index
    %c0_1 = arith.constant 0 : index
    %3 = vector.load %arg7[%c0, %c0_1] : memref<32x128xf32, #tpu.memory_space<vmem>>, vector<32x128xf32>
    %c0_2 = arith.constant 0 : index
    %c0_3 = arith.constant 0 : index
    %4 = vector.load %arg3[%c0_2, %c0_3] : memref<32x128xbf16, #tpu.memory_space<vmem>>, vector<32x128xbf16>
    %c0_4 = arith.constant 0 : index
    %c0_5 = arith.constant 0 : index
    %5 = vector.load %arg4[%c0_4, %c0_5] : memref<128x128xbf16, #tpu.memory_space<vmem>>, vector<128x128xbf16>
    %cst = arith.constant dense<0.000000e+00> : vector<32x128xf32>
    %6 = tpu.matmul %4, %5, %cst {dimension_numbers = #tpu.dot_dimension_numbers<[1], [0], [0], [1], [0, 0, 1, 1], [], []>} : vector<32x128xbf16>, vector<128x128xbf16>, vector<32x128xf32> -> vector<32x128xf32>
    %7 = arith.addf %3, %6 : vector<32x128xf32>
    %c0_6 = arith.constant 0 : index
    %c0_7 = arith.constant 0 : index
    %8 = vector.load %arg7[%c0_6, %c0_7] : memref<32x128xf32, #tpu.memory_space<vmem>>, vector<32x128xf32>
    tpu.vector_store %arg7[%c0_6, %c0_7], %7 {strides = array<i32>} : memref<32x128xf32, #tpu.memory_space<vmem>>, vector<32x128xf32>,
    %c4_i32 = arith.constant 4 : i32
    %9 = arith.cmpi eq, %arg2, %c4_i32 : i32
    %10 = arith.extui %9 : i1 to i32
    %c0_i32_8 = arith.constant 0 : i32
    %11 = arith.cmpi ne, %10, %c0_i32_8 : i32
    scf.if %11 {
      %c0_9 = arith.constant 0 : index
      %c0_10 = arith.constant 0 : index
      %12 = vector.load %arg7[%c0_9, %c0_10] : memref<32x128xf32, #tpu.memory_space<vmem>>, vector<32x128xf32>
      %c0_11 = arith.constant 0 : index
      %c0_12 = arith.constant 0 : index
      %13 = vector.load %arg5[%c0_11, %c0_12] : memref<1x128xf32, #tpu.memory_space<vmem>>, vector<1x128xf32>
      %14 = vector.broadcast %13 : vector<1x128xf32> to vector<32x128xf32>
      %15 = arith.addf %12, %14 : vector<32x128xf32>
      %cst_13 = arith.constant 0.000000e+00 : f32
      %16 = vector.broadcast %cst_13 : f32 to vector<32x128xf32>
      %17 = arith.maximumf %15, %16 : vector<32x128xf32>
      %18 = arith.truncf %17 : vector<32x128xf32> to vector<32x128xbf16>
      %c0_14 = arith.constant 0 : index
      %c0_15 = arith.constant 0 : index
      %19 = vector.load %arg6[%c0_14, %c0_15] : memref<32x128xbf16, #tpu.memory_space<vmem>>, vector<32x128xbf16>
      tpu.vector_store %arg6[%c0_14, %c0_15], %18 {strides = array<i32>} : memref<32x128xbf16, #tpu.memory_space<vmem>>, vector<32x128xbf16>,
    } else {
    }
    return
  }
  func.func @transform_0(%arg0: i32, %arg1: i32, %arg2: i32) -> (i32, i32) {
    %c0_i32 = arith.constant 0 : i32
    return %arg0, %arg2 : i32, i32
  }
  func.func @transform_1(%arg0: i32, %arg1: i32, %arg2: i32) -> (i32, i32) {
    %c0_i32 = arith.constant 0 : i32
    return %arg2, %arg1 : i32, i32
  }
  func.func @transform_2(%arg0: i32, %arg1: i32, %arg2: i32) -> (i32, i32) {
    %c0_i32 = arith.constant 0 : i32
    %c0_i32_0 = arith.constant 0 : i32
    return %c0_i32, %arg1 : i32, i32
  }
  func.func @transform_3(%arg0: i32, %arg1: i32, %arg2: i32) -> (i32, i32) {
    %c0_i32 = arith.constant 0 : i32
    return %arg0, %arg1 : i32, i32
  }
}

module attributes {stable_mosaic.version = 11 : i64} {
  func.func @_fused_mm_kernel(%arg0: i32, %arg1: i32, %arg2: i32, %arg3: memref<32x128xbf16, #tpu.memory_space<vmem>>, %arg4: memref<128x128xbf16, #tpu.memory_space<vmem>>, %arg5: memref<1x128xf32, #tpu.memory_space<vmem>>, %arg6: memref<32x128xbf16, #tpu.memory_space<vmem>>, %arg7: memref<32x128xf32, #tpu.memory_space<vmem>>) attributes {dimension_semantics = [#tpu.dimension_semantics<parallel>, #tpu.dimension_semantics<parallel>, #tpu.dimension_semantics<arbitrary>], iteration_bounds = array<i64: 1, 1, 1>, scalar_prefetch = 0 : i64, scratch_operands = 1 : i64, tpu.core_type = #tpu.core_type<tc>, window_params = [{transform_indices = @transform_0, window_bounds = array<i64: 32, 128>}, {transform_indices = @transform_1, window_bounds = array<i64: 128, 128>}, {transform_indices = @transform_2, window_bounds = array<i64: 1, 128>}, {transform_indices = @transform_3, window_bounds = array<i64: 32, 128>}]} {
    %c0_i32 = arith.constant 0 : i32
    %0 = arith.cmpi eq, %arg2, %c0_i32 : i32
    %1 = arith.extui %0 : i1 to i32
    %c0_i32_0 = arith.constant 0 : i32
    %2 = arith.cmpi ne, %1, %c0_i32_0 : i32
    scf.if %2 {
      %cst_10 = arith.constant 0.000000e+00 : f32
      %12 = vector.broadcast %cst_10 : f32 to vector<32x128xf32>
      %c0_11 = arith.constant 0 : index
      %c0_12 = arith.constant 0 : index
      %13 = vector.load %arg7[%c0_11, %c0_12] : memref<32x128xf32, #tpu.memory_space<vmem>>, vector<32x128xf32>
      tpu.vector_store %arg7[%c0_11, %c0_12], %12 {strides = array<i32>} : memref<32x128xf32, #tpu.memory_space<vmem>>, vector<32x128xf32>,
    } else {
    }
    %c0 = arith.constant 0 : index
    %c0_1 = arith.constant 0 : index
    %3 = vector.load %arg7[%c0, %c0_1] : memref<32x128xf32, #tpu.memory_space<vmem>>, vector<32x128xf32>
    %c0_2 = arith.constant 0 : index
    %c0_3 = arith.constant 0 : index
    %4 = vector.load %arg3[%c0_2, %c0_3] : memref<32x128xbf16, #tpu.memory_space<vmem>>, vector<32x128xbf16>
    %c0_4 = arith.constant 0 : index
    %c0_5 = arith.constant 0 : index
    %5 = vector.load %arg4[%c0_4, %c0_5] : memref<128x128xbf16, #tpu.memory_space<vmem>>, vector<128x128xbf16>
    %cst = arith.constant dense<0.000000e+00> : vector<32x128xf32>
    %6 = tpu.matmul %4, %5, %cst {dimension_numbers = #tpu.dot_dimension_numbers<[1], [0], [0], [1], [0, 0, 1, 1], [], []>} : vector<32x128xbf16>, vector<128x128xbf16>, vector<32x128xf32> -> vector<32x128xf32>
    %7 = arith.addf %3, %6 : vector<32x128xf32>
    %c0_6 = arith.constant 0 : index
    %c0_7 = arith.constant 0 : index
    %8 = vector.load %arg7[%c0_6, %c0_7] : memref<32x128xf32, #tpu.memory_space<vmem>>, vector<32x128xf32>
    tpu.vector_store %arg7[%c0_6, %c0_7], %7 {strides = array<i32>} : memref<32x128xf32, #tpu.memory_space<vmem>>, vector<32x128xf32>,
    %c0_i32_8 = arith.constant 0 : i32
    %9 = arith.cmpi eq, %arg2, %c0_i32_8 : i32
    %10 = arith.extui %9 : i1 to i32
    %c0_i32_9 = arith.constant 0 : i32
    %11 = arith.cmpi ne, %10, %c0_i32_9 : i32
    scf.if %11 {
      %c0_10 = arith.constant 0 : index
      %c0_11 = arith.constant 0 : index
      %12 = vector.load %arg7[%c0_10, %c0_11] : memref<32x128xf32, #tpu.memory_space<vmem>>, vector<32x128xf32>
      %c0_12 = arith.constant 0 : index
      %c0_13 = arith.constant 0 : index
      %13 = vector.load %arg5[%c0_12, %c0_13] : memref<1x128xf32, #tpu.memory_space<vmem>>, vector<1x128xf32>
      %14 = vector.broadcast %13 : vector<1x128xf32> to vector<32x128xf32>
      %15 = arith.addf %12, %14 : vector<32x128xf32>
      %16 = arith.truncf %15 : vector<32x128xf32> to vector<32x128xbf16>
      %c0_14 = arith.constant 0 : index
      %c0_15 = arith.constant 0 : index
      %17 = vector.load %arg6[%c0_14, %c0_15] : memref<32x128xbf16, #tpu.memory_space<vmem>>, vector<32x128xbf16>
      tpu.vector_store %arg6[%c0_14, %c0_15], %16 {strides = array<i32>} : memref<32x128xbf16, #tpu.memory_space<vmem>>, vector<32x128xbf16>,
    } else {
    }
    return
  }
  func.func @transform_0(%arg0: i32, %arg1: i32, %arg2: i32) -> (i32, i32) {
    %c0_i32 = arith.constant 0 : i32
    return %arg0, %arg2 : i32, i32
  }
  func.func @transform_1(%arg0: i32, %arg1: i32, %arg2: i32) -> (i32, i32) {
    %c0_i32 = arith.constant 0 : i32
    return %arg2, %arg1 : i32, i32
  }
  func.func @transform_2(%arg0: i32, %arg1: i32, %arg2: i32) -> (i32, i32) {
    %c0_i32 = arith.constant 0 : i32
    %c0_i32_0 = arith.constant 0 : i32
    return %c0_i32, %arg1 : i32, i32
  }
  func.func @transform_3(%arg0: i32, %arg1: i32, %arg2: i32) -> (i32, i32) {
    %c0_i32 = arith.constant 0 : i32
    return %arg0, %arg1 : i32, i32
  }
}

module attributes {stable_mosaic.version = 11 : i64} {
  func.func @_fused_mm_kernel(%arg0: i32, %arg1: i32, %arg2: i32, %arg3: memref<32x384xbf16, #tpu.memory_space<vmem>>, %arg4: memref<384x128xbf16, #tpu.memory_space<vmem>>, %arg5: memref<1x128xf32, #tpu.memory_space<vmem>>, %arg6: memref<32x128xbf16, #tpu.memory_space<vmem>>, %arg7: memref<32x128xbf16, #tpu.memory_space<vmem>>, %arg8: memref<32x128xf32, #tpu.memory_space<vmem>>) attributes {dimension_semantics = [#tpu.dimension_semantics<parallel>, #tpu.dimension_semantics<parallel>, #tpu.dimension_semantics<arbitrary>], iteration_bounds = array<i64: 1, 1, 3>, scalar_prefetch = 0 : i64, scratch_operands = 1 : i64, tpu.core_type = #tpu.core_type<tc>, window_params = [{transform_indices = @transform_0, window_bounds = array<i64: 32, 384>}, {transform_indices = @transform_1, window_bounds = array<i64: 384, 128>}, {transform_indices = @transform_2, window_bounds = array<i64: 1, 128>}, {transform_indices = @transform_3, window_bounds = array<i64: 32, 128>}, {transform_indices = @transform_4, window_bounds = array<i64: 32, 128>}]} {
    %c0_i32 = arith.constant 0 : i32
    %0 = arith.cmpi eq, %arg2, %c0_i32 : i32
    %1 = arith.extui %0 : i1 to i32
    %c0_i32_0 = arith.constant 0 : i32
    %2 = arith.cmpi ne, %1, %c0_i32_0 : i32
    scf.if %2 {
      %cst_9 = arith.constant 0.000000e+00 : f32
      %12 = vector.broadcast %cst_9 : f32 to vector<32x128xf32>
      %c0_10 = arith.constant 0 : index
      %c0_11 = arith.constant 0 : index
      %13 = vector.load %arg8[%c0_10, %c0_11] : memref<32x128xf32, #tpu.memory_space<vmem>>, vector<32x128xf32>
      tpu.vector_store %arg8[%c0_10, %c0_11], %12 {strides = array<i32>} : memref<32x128xf32, #tpu.memory_space<vmem>>, vector<32x128xf32>,
    } else {
    }
    %c0 = arith.constant 0 : index
    %c0_1 = arith.constant 0 : index
    %3 = vector.load %arg8[%c0, %c0_1] : memref<32x128xf32, #tpu.memory_space<vmem>>, vector<32x128xf32>
    %c0_2 = arith.constant 0 : index
    %c0_3 = arith.constant 0 : index
    %4 = vector.load %arg3[%c0_2, %c0_3] : memref<32x384xbf16, #tpu.memory_space<vmem>>, vector<32x384xbf16>
    %c0_4 = arith.constant 0 : index
    %c0_5 = arith.constant 0 : index
    %5 = vector.load %arg4[%c0_4, %c0_5] : memref<384x128xbf16, #tpu.memory_space<vmem>>, vector<384x128xbf16>
    %cst = arith.constant dense<0.000000e+00> : vector<32x128xf32>
    %6 = tpu.matmul %4, %5, %cst {dimension_numbers = #tpu.dot_dimension_numbers<[1], [0], [0], [1], [0, 0, 1, 1], [], []>} : vector<32x384xbf16>, vector<384x128xbf16>, vector<32x128xf32> -> vector<32x128xf32>
    %7 = arith.addf %3, %6 : vector<32x128xf32>
    %c0_6 = arith.constant 0 : index
    %c0_7 = arith.constant 0 : index
    %8 = vector.load %arg8[%c0_6, %c0_7] : memref<32x128xf32, #tpu.memory_space<vmem>>, vector<32x128xf32>
    tpu.vector_store %arg8[%c0_6, %c0_7], %7 {strides = array<i32>} : memref<32x128xf32, #tpu.memory_space<vmem>>, vector<32x128xf32>,
    %c2_i32 = arith.constant 2 : i32
    %9 = arith.cmpi eq, %arg2, %c2_i32 : i32
    %10 = arith.extui %9 : i1 to i32
    %c0_i32_8 = arith.constant 0 : i32
    %11 = arith.cmpi ne, %10, %c0_i32_8 : i32
    scf.if %11 {
      %c0_9 = arith.constant 0 : index
      %c0_10 = arith.constant 0 : index
      %12 = vector.load %arg8[%c0_9, %c0_10] : memref<32x128xf32, #tpu.memory_space<vmem>>, vector<32x128xf32>
      %c0_11 = arith.constant 0 : index
      %c0_12 = arith.constant 0 : index
      %13 = vector.load %arg5[%c0_11, %c0_12] : memref<1x128xf32, #tpu.memory_space<vmem>>, vector<1x128xf32>
      %14 = vector.broadcast %13 : vector<1x128xf32> to vector<32x128xf32>
      %15 = arith.addf %12, %14 : vector<32x128xf32>
      %c0_13 = arith.constant 0 : index
      %c0_14 = arith.constant 0 : index
      %16 = vector.load %arg6[%c0_13, %c0_14] : memref<32x128xbf16, #tpu.memory_space<vmem>>, vector<32x128xbf16>
      %17 = arith.extf %16 : vector<32x128xbf16> to vector<32x128xf32>
      %18 = arith.addf %15, %17 : vector<32x128xf32>
      %cst_15 = arith.constant 0.000000e+00 : f32
      %19 = vector.broadcast %cst_15 : f32 to vector<32x128xf32>
      %20 = arith.maximumf %18, %19 : vector<32x128xf32>
      %21 = arith.truncf %20 : vector<32x128xf32> to vector<32x128xbf16>
      %c0_16 = arith.constant 0 : index
      %c0_17 = arith.constant 0 : index
      %22 = vector.load %arg7[%c0_16, %c0_17] : memref<32x128xbf16, #tpu.memory_space<vmem>>, vector<32x128xbf16>
      tpu.vector_store %arg7[%c0_16, %c0_17], %21 {strides = array<i32>} : memref<32x128xbf16, #tpu.memory_space<vmem>>, vector<32x128xbf16>,
    } else {
    }
    return
  }
  func.func @transform_0(%arg0: i32, %arg1: i32, %arg2: i32) -> (i32, i32) {
    %c0_i32 = arith.constant 0 : i32
    return %arg0, %arg2 : i32, i32
  }
  func.func @transform_1(%arg0: i32, %arg1: i32, %arg2: i32) -> (i32, i32) {
    %c0_i32 = arith.constant 0 : i32
    return %arg2, %arg1 : i32, i32
  }
  func.func @transform_2(%arg0: i32, %arg1: i32, %arg2: i32) -> (i32, i32) {
    %c0_i32 = arith.constant 0 : i32
    %c0_i32_0 = arith.constant 0 : i32
    return %c0_i32, %arg1 : i32, i32
  }
  func.func @transform_3(%arg0: i32, %arg1: i32, %arg2: i32) -> (i32, i32) {
    %c0_i32 = arith.constant 0 : i32
    return %arg0, %arg1 : i32, i32
  }
  func.func @transform_4(%arg0: i32, %arg1: i32, %arg2: i32) -> (i32, i32) {
    %c0_i32 = arith.constant 0 : i32
    return %arg0, %arg1 : i32, i32
  }
}

module attributes {stable_mosaic.version = 11 : i64} {
  func.func @_fused_mm_kernel(%arg0: i32, %arg1: i32, %arg2: i32, %arg3: memref<16x384xbf16, #tpu.memory_space<vmem>>, %arg4: memref<384x256xbf16, #tpu.memory_space<vmem>>, %arg5: memref<1x256xf32, #tpu.memory_space<vmem>>, %arg6: memref<16x256xbf16, #tpu.memory_space<vmem>>, %arg7: memref<16x256xf32, #tpu.memory_space<vmem>>) attributes {dimension_semantics = [#tpu.dimension_semantics<parallel>, #tpu.dimension_semantics<parallel>, #tpu.dimension_semantics<arbitrary>], iteration_bounds = array<i64: 1, 1, 3>, scalar_prefetch = 0 : i64, scratch_operands = 1 : i64, tpu.core_type = #tpu.core_type<tc>, window_params = [{transform_indices = @transform_0, window_bounds = array<i64: 16, 384>}, {transform_indices = @transform_1, window_bounds = array<i64: 384, 256>}, {transform_indices = @transform_2, window_bounds = array<i64: 1, 256>}, {transform_indices = @transform_3, window_bounds = array<i64: 16, 256>}]} {
    %c0_i32 = arith.constant 0 : i32
    %0 = arith.cmpi eq, %arg2, %c0_i32 : i32
    %1 = arith.extui %0 : i1 to i32
    %c0_i32_0 = arith.constant 0 : i32
    %2 = arith.cmpi ne, %1, %c0_i32_0 : i32
    scf.if %2 {
      %cst_9 = arith.constant 0.000000e+00 : f32
      %12 = vector.broadcast %cst_9 : f32 to vector<16x256xf32>
      %c0_10 = arith.constant 0 : index
      %c0_11 = arith.constant 0 : index
      %13 = vector.load %arg7[%c0_10, %c0_11] : memref<16x256xf32, #tpu.memory_space<vmem>>, vector<16x256xf32>
      tpu.vector_store %arg7[%c0_10, %c0_11], %12 {strides = array<i32>} : memref<16x256xf32, #tpu.memory_space<vmem>>, vector<16x256xf32>,
    } else {
    }
    %c0 = arith.constant 0 : index
    %c0_1 = arith.constant 0 : index
    %3 = vector.load %arg7[%c0, %c0_1] : memref<16x256xf32, #tpu.memory_space<vmem>>, vector<16x256xf32>
    %c0_2 = arith.constant 0 : index
    %c0_3 = arith.constant 0 : index
    %4 = vector.load %arg3[%c0_2, %c0_3] : memref<16x384xbf16, #tpu.memory_space<vmem>>, vector<16x384xbf16>
    %c0_4 = arith.constant 0 : index
    %c0_5 = arith.constant 0 : index
    %5 = vector.load %arg4[%c0_4, %c0_5] : memref<384x256xbf16, #tpu.memory_space<vmem>>, vector<384x256xbf16>
    %cst = arith.constant dense<0.000000e+00> : vector<16x256xf32>
    %6 = tpu.matmul %4, %5, %cst {dimension_numbers = #tpu.dot_dimension_numbers<[1], [0], [0], [1], [0, 0, 1, 1], [], []>} : vector<16x384xbf16>, vector<384x256xbf16>, vector<16x256xf32> -> vector<16x256xf32>
    %7 = arith.addf %3, %6 : vector<16x256xf32>
    %c0_6 = arith.constant 0 : index
    %c0_7 = arith.constant 0 : index
    %8 = vector.load %arg7[%c0_6, %c0_7] : memref<16x256xf32, #tpu.memory_space<vmem>>, vector<16x256xf32>
    tpu.vector_store %arg7[%c0_6, %c0_7], %7 {strides = array<i32>} : memref<16x256xf32, #tpu.memory_space<vmem>>, vector<16x256xf32>,
    %c2_i32 = arith.constant 2 : i32
    %9 = arith.cmpi eq, %arg2, %c2_i32 : i32
    %10 = arith.extui %9 : i1 to i32
    %c0_i32_8 = arith.constant 0 : i32
    %11 = arith.cmpi ne, %10, %c0_i32_8 : i32
    scf.if %11 {
      %c0_9 = arith.constant 0 : index
      %c0_10 = arith.constant 0 : index
      %12 = vector.load %arg7[%c0_9, %c0_10] : memref<16x256xf32, #tpu.memory_space<vmem>>, vector<16x256xf32>
      %c0_11 = arith.constant 0 : index
      %c0_12 = arith.constant 0 : index
      %13 = vector.load %arg5[%c0_11, %c0_12] : memref<1x256xf32, #tpu.memory_space<vmem>>, vector<1x256xf32>
      %14 = vector.broadcast %13 : vector<1x256xf32> to vector<16x256xf32>
      %15 = arith.addf %12, %14 : vector<16x256xf32>
      %cst_13 = arith.constant 0.000000e+00 : f32
      %16 = vector.broadcast %cst_13 : f32 to vector<16x256xf32>
      %17 = arith.maximumf %15, %16 : vector<16x256xf32>
      %18 = arith.truncf %17 : vector<16x256xf32> to vector<16x256xbf16>
      %c0_14 = arith.constant 0 : index
      %c0_15 = arith.constant 0 : index
      %19 = vector.load %arg6[%c0_14, %c0_15] : memref<16x256xbf16, #tpu.memory_space<vmem>>, vector<16x256xbf16>
      tpu.vector_store %arg6[%c0_14, %c0_15], %18 {strides = array<i32>} : memref<16x256xbf16, #tpu.memory_space<vmem>>, vector<16x256xbf16>,
    } else {
    }
    return
  }
  func.func @transform_0(%arg0: i32, %arg1: i32, %arg2: i32) -> (i32, i32) {
    %c0_i32 = arith.constant 0 : i32
    return %arg0, %arg2 : i32, i32
  }
  func.func @transform_1(%arg0: i32, %arg1: i32, %arg2: i32) -> (i32, i32) {
    %c0_i32 = arith.constant 0 : i32
    return %arg2, %arg1 : i32, i32
  }
  func.func @transform_2(%arg0: i32, %arg1: i32, %arg2: i32) -> (i32, i32) {
    %c0_i32 = arith.constant 0 : i32
    %c0_i32_0 = arith.constant 0 : i32
    return %c0_i32, %arg1 : i32, i32
  }
  func.func @transform_3(%arg0: i32, %arg1: i32, %arg2: i32) -> (i32, i32) {
    %c0_i32 = arith.constant 0 : i32
    return %arg0, %arg1 : i32, i32
  }
}

module attributes {stable_mosaic.version = 11 : i64} {
  func.func @_fused_mm_kernel(%arg0: i32, %arg1: i32, %arg2: i32, %arg3: memref<16x384xbf16, #tpu.memory_space<vmem>>, %arg4: memref<384x256xbf16, #tpu.memory_space<vmem>>, %arg5: memref<1x256xf32, #tpu.memory_space<vmem>>, %arg6: memref<16x256xbf16, #tpu.memory_space<vmem>>, %arg7: memref<16x256xbf16, #tpu.memory_space<vmem>>, %arg8: memref<16x256xf32, #tpu.memory_space<vmem>>) attributes {dimension_semantics = [#tpu.dimension_semantics<parallel>, #tpu.dimension_semantics<parallel>, #tpu.dimension_semantics<arbitrary>], iteration_bounds = array<i64: 1, 1, 6>, scalar_prefetch = 0 : i64, scratch_operands = 1 : i64, tpu.core_type = #tpu.core_type<tc>, window_params = [{transform_indices = @transform_0, window_bounds = array<i64: 16, 384>}, {transform_indices = @transform_1, window_bounds = array<i64: 384, 256>}, {transform_indices = @transform_2, window_bounds = array<i64: 1, 256>}, {transform_indices = @transform_3, window_bounds = array<i64: 16, 256>}, {transform_indices = @transform_4, window_bounds = array<i64: 16, 256>}]} {
    %c0_i32 = arith.constant 0 : i32
    %0 = arith.cmpi eq, %arg2, %c0_i32 : i32
    %1 = arith.extui %0 : i1 to i32
    %c0_i32_0 = arith.constant 0 : i32
    %2 = arith.cmpi ne, %1, %c0_i32_0 : i32
    scf.if %2 {
      %cst_9 = arith.constant 0.000000e+00 : f32
      %12 = vector.broadcast %cst_9 : f32 to vector<16x256xf32>
      %c0_10 = arith.constant 0 : index
      %c0_11 = arith.constant 0 : index
      %13 = vector.load %arg8[%c0_10, %c0_11] : memref<16x256xf32, #tpu.memory_space<vmem>>, vector<16x256xf32>
      tpu.vector_store %arg8[%c0_10, %c0_11], %12 {strides = array<i32>} : memref<16x256xf32, #tpu.memory_space<vmem>>, vector<16x256xf32>,
    } else {
    }
    %c0 = arith.constant 0 : index
    %c0_1 = arith.constant 0 : index
    %3 = vector.load %arg8[%c0, %c0_1] : memref<16x256xf32, #tpu.memory_space<vmem>>, vector<16x256xf32>
    %c0_2 = arith.constant 0 : index
    %c0_3 = arith.constant 0 : index
    %4 = vector.load %arg3[%c0_2, %c0_3] : memref<16x384xbf16, #tpu.memory_space<vmem>>, vector<16x384xbf16>
    %c0_4 = arith.constant 0 : index
    %c0_5 = arith.constant 0 : index
    %5 = vector.load %arg4[%c0_4, %c0_5] : memref<384x256xbf16, #tpu.memory_space<vmem>>, vector<384x256xbf16>
    %cst = arith.constant dense<0.000000e+00> : vector<16x256xf32>
    %6 = tpu.matmul %4, %5, %cst {dimension_numbers = #tpu.dot_dimension_numbers<[1], [0], [0], [1], [0, 0, 1, 1], [], []>} : vector<16x384xbf16>, vector<384x256xbf16>, vector<16x256xf32> -> vector<16x256xf32>
    %7 = arith.addf %3, %6 : vector<16x256xf32>
    %c0_6 = arith.constant 0 : index
    %c0_7 = arith.constant 0 : index
    %8 = vector.load %arg8[%c0_6, %c0_7] : memref<16x256xf32, #tpu.memory_space<vmem>>, vector<16x256xf32>
    tpu.vector_store %arg8[%c0_6, %c0_7], %7 {strides = array<i32>} : memref<16x256xf32, #tpu.memory_space<vmem>>, vector<16x256xf32>,
    %c5_i32 = arith.constant 5 : i32
    %9 = arith.cmpi eq, %arg2, %c5_i32 : i32
    %10 = arith.extui %9 : i1 to i32
    %c0_i32_8 = arith.constant 0 : i32
    %11 = arith.cmpi ne, %10, %c0_i32_8 : i32
    scf.if %11 {
      %c0_9 = arith.constant 0 : index
      %c0_10 = arith.constant 0 : index
      %12 = vector.load %arg8[%c0_9, %c0_10] : memref<16x256xf32, #tpu.memory_space<vmem>>, vector<16x256xf32>
      %c0_11 = arith.constant 0 : index
      %c0_12 = arith.constant 0 : index
      %13 = vector.load %arg5[%c0_11, %c0_12] : memref<1x256xf32, #tpu.memory_space<vmem>>, vector<1x256xf32>
      %14 = vector.broadcast %13 : vector<1x256xf32> to vector<16x256xf32>
      %15 = arith.addf %12, %14 : vector<16x256xf32>
      %c0_13 = arith.constant 0 : index
      %c0_14 = arith.constant 0 : index
      %16 = vector.load %arg6[%c0_13, %c0_14] : memref<16x256xbf16, #tpu.memory_space<vmem>>, vector<16x256xbf16>
      %17 = arith.extf %16 : vector<16x256xbf16> to vector<16x256xf32>
      %18 = arith.addf %15, %17 : vector<16x256xf32>
      %cst_15 = arith.constant 0.000000e+00 : f32
      %19 = vector.broadcast %cst_15 : f32 to vector<16x256xf32>
      %20 = arith.maximumf %18, %19 : vector<16x256xf32>
      %21 = arith.truncf %20 : vector<16x256xf32> to vector<16x256xbf16>
      %c0_16 = arith.constant 0 : index
      %c0_17 = arith.constant 0 : index
      %22 = vector.load %arg7[%c0_16, %c0_17] : memref<16x256xbf16, #tpu.memory_space<vmem>>, vector<16x256xbf16>
      tpu.vector_store %arg7[%c0_16, %c0_17], %21 {strides = array<i32>} : memref<16x256xbf16, #tpu.memory_space<vmem>>, vector<16x256xbf16>,
    } else {
    }
    return
  }
  func.func @transform_0(%arg0: i32, %arg1: i32, %arg2: i32) -> (i32, i32) {
    %c0_i32 = arith.constant 0 : i32
    return %arg0, %arg2 : i32, i32
  }
  func.func @transform_1(%arg0: i32, %arg1: i32, %arg2: i32) -> (i32, i32) {
    %c0_i32 = arith.constant 0 : i32
    return %arg2, %arg1 : i32, i32
  }
  func.func @transform_2(%arg0: i32, %arg1: i32, %arg2: i32) -> (i32, i32) {
    %c0_i32 = arith.constant 0 : i32
    %c0_i32_0 = arith.constant 0 : i32
    return %c0_i32, %arg1 : i32, i32
  }
  func.func @transform_3(%arg0: i32, %arg1: i32, %arg2: i32) -> (i32, i32) {
    %c0_i32 = arith.constant 0 : i32
    return %arg0, %arg1 : i32, i32
  }
  func.func @transform_4(%arg0: i32, %arg1: i32, %arg2: i32) -> (i32, i32) {
    %c0_i32 = arith.constant 0 : i32
    return %arg0, %arg1 : i32, i32
  }
}

module attributes {stable_mosaic.version = 11 : i64} {
  func.func @_fused_mm_kernel(%arg0: i32, %arg1: i32, %arg2: i32, %arg3: memref<16x128xbf16, #tpu.memory_space<vmem>>, %arg4: memref<128x256xbf16, #tpu.memory_space<vmem>>, %arg5: memref<1x256xf32, #tpu.memory_space<vmem>>, %arg6: memref<16x256xbf16, #tpu.memory_space<vmem>>, %arg7: memref<16x256xf32, #tpu.memory_space<vmem>>) attributes {dimension_semantics = [#tpu.dimension_semantics<parallel>, #tpu.dimension_semantics<parallel>, #tpu.dimension_semantics<arbitrary>], iteration_bounds = array<i64: 1, 1, 1>, scalar_prefetch = 0 : i64, scratch_operands = 1 : i64, tpu.core_type = #tpu.core_type<tc>, window_params = [{transform_indices = @transform_0, window_bounds = array<i64: 16, 128>}, {transform_indices = @transform_1, window_bounds = array<i64: 128, 256>}, {transform_indices = @transform_2, window_bounds = array<i64: 1, 256>}, {transform_indices = @transform_3, window_bounds = array<i64: 16, 256>}]} {
    %c0_i32 = arith.constant 0 : i32
    %0 = arith.cmpi eq, %arg2, %c0_i32 : i32
    %1 = arith.extui %0 : i1 to i32
    %c0_i32_0 = arith.constant 0 : i32
    %2 = arith.cmpi ne, %1, %c0_i32_0 : i32
    scf.if %2 {
      %cst_10 = arith.constant 0.000000e+00 : f32
      %12 = vector.broadcast %cst_10 : f32 to vector<16x256xf32>
      %c0_11 = arith.constant 0 : index
      %c0_12 = arith.constant 0 : index
      %13 = vector.load %arg7[%c0_11, %c0_12] : memref<16x256xf32, #tpu.memory_space<vmem>>, vector<16x256xf32>
      tpu.vector_store %arg7[%c0_11, %c0_12], %12 {strides = array<i32>} : memref<16x256xf32, #tpu.memory_space<vmem>>, vector<16x256xf32>,
    } else {
    }
    %c0 = arith.constant 0 : index
    %c0_1 = arith.constant 0 : index
    %3 = vector.load %arg7[%c0, %c0_1] : memref<16x256xf32, #tpu.memory_space<vmem>>, vector<16x256xf32>
    %c0_2 = arith.constant 0 : index
    %c0_3 = arith.constant 0 : index
    %4 = vector.load %arg3[%c0_2, %c0_3] : memref<16x128xbf16, #tpu.memory_space<vmem>>, vector<16x128xbf16>
    %c0_4 = arith.constant 0 : index
    %c0_5 = arith.constant 0 : index
    %5 = vector.load %arg4[%c0_4, %c0_5] : memref<128x256xbf16, #tpu.memory_space<vmem>>, vector<128x256xbf16>
    %cst = arith.constant dense<0.000000e+00> : vector<16x256xf32>
    %6 = tpu.matmul %4, %5, %cst {dimension_numbers = #tpu.dot_dimension_numbers<[1], [0], [0], [1], [0, 0, 1, 1], [], []>} : vector<16x128xbf16>, vector<128x256xbf16>, vector<16x256xf32> -> vector<16x256xf32>
    %7 = arith.addf %3, %6 : vector<16x256xf32>
    %c0_6 = arith.constant 0 : index
    %c0_7 = arith.constant 0 : index
    %8 = vector.load %arg7[%c0_6, %c0_7] : memref<16x256xf32, #tpu.memory_space<vmem>>, vector<16x256xf32>
    tpu.vector_store %arg7[%c0_6, %c0_7], %7 {strides = array<i32>} : memref<16x256xf32, #tpu.memory_space<vmem>>, vector<16x256xf32>,
    %c0_i32_8 = arith.constant 0 : i32
    %9 = arith.cmpi eq, %arg2, %c0_i32_8 : i32
    %10 = arith.extui %9 : i1 to i32
    %c0_i32_9 = arith.constant 0 : i32
    %11 = arith.cmpi ne, %10, %c0_i32_9 : i32
    scf.if %11 {
      %c0_10 = arith.constant 0 : index
      %c0_11 = arith.constant 0 : index
      %12 = vector.load %arg7[%c0_10, %c0_11] : memref<16x256xf32, #tpu.memory_space<vmem>>, vector<16x256xf32>
      %c0_12 = arith.constant 0 : index
      %c0_13 = arith.constant 0 : index
      %13 = vector.load %arg5[%c0_12, %c0_13] : memref<1x256xf32, #tpu.memory_space<vmem>>, vector<1x256xf32>
      %14 = vector.broadcast %13 : vector<1x256xf32> to vector<16x256xf32>
      %15 = arith.addf %12, %14 : vector<16x256xf32>
      %16 = arith.truncf %15 : vector<16x256xf32> to vector<16x256xbf16>
      %c0_14 = arith.constant 0 : index
      %c0_15 = arith.constant 0 : index
      %17 = vector.load %arg6[%c0_14, %c0_15] : memref<16x256xbf16, #tpu.memory_space<vmem>>, vector<16x256xbf16>
      tpu.vector_store %arg6[%c0_14, %c0_15], %16 {strides = array<i32>} : memref<16x256xbf16, #tpu.memory_space<vmem>>, vector<16x256xbf16>,
    } else {
    }
    return
  }
  func.func @transform_0(%arg0: i32, %arg1: i32, %arg2: i32) -> (i32, i32) {
    %c0_i32 = arith.constant 0 : i32
    return %arg0, %arg2 : i32, i32
  }
  func.func @transform_1(%arg0: i32, %arg1: i32, %arg2: i32) -> (i32, i32) {
    %c0_i32 = arith.constant 0 : i32
    return %arg2, %arg1 : i32, i32
  }
  func.func @transform_2(%arg0: i32, %arg1: i32, %arg2: i32) -> (i32, i32) {
    %c0_i32 = arith.constant 0 : i32
    %c0_i32_0 = arith.constant 0 : i32
    return %c0_i32, %arg1 : i32, i32
  }
  func.func @transform_3(%arg0: i32, %arg1: i32, %arg2: i32) -> (i32, i32) {
    %c0_i32 = arith.constant 0 : i32
    return %arg0, %arg1 : i32, i32
  }
}

module attributes {stable_mosaic.version = 11 : i64} {
  func.func @_fused_mm_kernel(%arg0: i32, %arg1: i32, %arg2: i32, %arg3: memref<16x384xbf16, #tpu.memory_space<vmem>>, %arg4: memref<384x256xbf16, #tpu.memory_space<vmem>>, %arg5: memref<1x256xf32, #tpu.memory_space<vmem>>, %arg6: memref<16x256xbf16, #tpu.memory_space<vmem>>, %arg7: memref<16x256xf32, #tpu.memory_space<vmem>>) attributes {dimension_semantics = [#tpu.dimension_semantics<parallel>, #tpu.dimension_semantics<parallel>, #tpu.dimension_semantics<arbitrary>], iteration_bounds = array<i64: 1, 2, 6>, scalar_prefetch = 0 : i64, scratch_operands = 1 : i64, tpu.core_type = #tpu.core_type<tc>, window_params = [{transform_indices = @transform_0, window_bounds = array<i64: 16, 384>}, {transform_indices = @transform_1, window_bounds = array<i64: 384, 256>}, {transform_indices = @transform_2, window_bounds = array<i64: 1, 256>}, {transform_indices = @transform_3, window_bounds = array<i64: 16, 256>}]} {
    %c0_i32 = arith.constant 0 : i32
    %0 = arith.cmpi eq, %arg2, %c0_i32 : i32
    %1 = arith.extui %0 : i1 to i32
    %c0_i32_0 = arith.constant 0 : i32
    %2 = arith.cmpi ne, %1, %c0_i32_0 : i32
    scf.if %2 {
      %cst_9 = arith.constant 0.000000e+00 : f32
      %12 = vector.broadcast %cst_9 : f32 to vector<16x256xf32>
      %c0_10 = arith.constant 0 : index
      %c0_11 = arith.constant 0 : index
      %13 = vector.load %arg7[%c0_10, %c0_11] : memref<16x256xf32, #tpu.memory_space<vmem>>, vector<16x256xf32>
      tpu.vector_store %arg7[%c0_10, %c0_11], %12 {strides = array<i32>} : memref<16x256xf32, #tpu.memory_space<vmem>>, vector<16x256xf32>,
    } else {
    }
    %c0 = arith.constant 0 : index
    %c0_1 = arith.constant 0 : index
    %3 = vector.load %arg7[%c0, %c0_1] : memref<16x256xf32, #tpu.memory_space<vmem>>, vector<16x256xf32>
    %c0_2 = arith.constant 0 : index
    %c0_3 = arith.constant 0 : index
    %4 = vector.load %arg3[%c0_2, %c0_3] : memref<16x384xbf16, #tpu.memory_space<vmem>>, vector<16x384xbf16>
    %c0_4 = arith.constant 0 : index
    %c0_5 = arith.constant 0 : index
    %5 = vector.load %arg4[%c0_4, %c0_5] : memref<384x256xbf16, #tpu.memory_space<vmem>>, vector<384x256xbf16>
    %cst = arith.constant dense<0.000000e+00> : vector<16x256xf32>
    %6 = tpu.matmul %4, %5, %cst {dimension_numbers = #tpu.dot_dimension_numbers<[1], [0], [0], [1], [0, 0, 1, 1], [], []>} : vector<16x384xbf16>, vector<384x256xbf16>, vector<16x256xf32> -> vector<16x256xf32>
    %7 = arith.addf %3, %6 : vector<16x256xf32>
    %c0_6 = arith.constant 0 : index
    %c0_7 = arith.constant 0 : index
    %8 = vector.load %arg7[%c0_6, %c0_7] : memref<16x256xf32, #tpu.memory_space<vmem>>, vector<16x256xf32>
    tpu.vector_store %arg7[%c0_6, %c0_7], %7 {strides = array<i32>} : memref<16x256xf32, #tpu.memory_space<vmem>>, vector<16x256xf32>,
    %c5_i32 = arith.constant 5 : i32
    %9 = arith.cmpi eq, %arg2, %c5_i32 : i32
    %10 = arith.extui %9 : i1 to i32
    %c0_i32_8 = arith.constant 0 : i32
    %11 = arith.cmpi ne, %10, %c0_i32_8 : i32
    scf.if %11 {
      %c0_9 = arith.constant 0 : index
      %c0_10 = arith.constant 0 : index
      %12 = vector.load %arg7[%c0_9, %c0_10] : memref<16x256xf32, #tpu.memory_space<vmem>>, vector<16x256xf32>
      %c0_11 = arith.constant 0 : index
      %c0_12 = arith.constant 0 : index
      %13 = vector.load %arg5[%c0_11, %c0_12] : memref<1x256xf32, #tpu.memory_space<vmem>>, vector<1x256xf32>
      %14 = vector.broadcast %13 : vector<1x256xf32> to vector<16x256xf32>
      %15 = arith.addf %12, %14 : vector<16x256xf32>
      %cst_13 = arith.constant 0.000000e+00 : f32
      %16 = vector.broadcast %cst_13 : f32 to vector<16x256xf32>
      %17 = arith.maximumf %15, %16 : vector<16x256xf32>
      %18 = arith.truncf %17 : vector<16x256xf32> to vector<16x256xbf16>
      %c0_14 = arith.constant 0 : index
      %c0_15 = arith.constant 0 : index
      %19 = vector.load %arg6[%c0_14, %c0_15] : memref<16x256xbf16, #tpu.memory_space<vmem>>, vector<16x256xbf16>
      tpu.vector_store %arg6[%c0_14, %c0_15], %18 {strides = array<i32>} : memref<16x256xbf16, #tpu.memory_space<vmem>>, vector<16x256xbf16>,
    } else {
    }
    return
  }
  func.func @transform_0(%arg0: i32, %arg1: i32, %arg2: i32) -> (i32, i32) {
    %c0_i32 = arith.constant 0 : i32
    return %arg0, %arg2 : i32, i32
  }
  func.func @transform_1(%arg0: i32, %arg1: i32, %arg2: i32) -> (i32, i32) {
    %c0_i32 = arith.constant 0 : i32
    return %arg2, %arg1 : i32, i32
  }
  func.func @transform_2(%arg0: i32, %arg1: i32, %arg2: i32) -> (i32, i32) {
    %c0_i32 = arith.constant 0 : i32
    %c0_i32_0 = arith.constant 0 : i32
    return %c0_i32, %arg1 : i32, i32
  }
  func.func @transform_3(%arg0: i32, %arg1: i32, %arg2: i32) -> (i32, i32) {
    %c0_i32 = arith.constant 0 : i32
    return %arg0, %arg1 : i32, i32
  }
}

module attributes {stable_mosaic.version = 11 : i64} {
  func.func @_fused_mm_kernel(%arg0: i32, %arg1: i32, %arg2: i32, %arg3: memref<16x256xbf16, #tpu.memory_space<vmem>>, %arg4: memref<256x256xbf16, #tpu.memory_space<vmem>>, %arg5: memref<1x256xf32, #tpu.memory_space<vmem>>, %arg6: memref<16x256xbf16, #tpu.memory_space<vmem>>, %arg7: memref<16x256xf32, #tpu.memory_space<vmem>>) attributes {dimension_semantics = [#tpu.dimension_semantics<parallel>, #tpu.dimension_semantics<parallel>, #tpu.dimension_semantics<arbitrary>], iteration_bounds = array<i64: 1, 2, 1>, scalar_prefetch = 0 : i64, scratch_operands = 1 : i64, tpu.core_type = #tpu.core_type<tc>, window_params = [{transform_indices = @transform_0, window_bounds = array<i64: 16, 256>}, {transform_indices = @transform_1, window_bounds = array<i64: 256, 256>}, {transform_indices = @transform_2, window_bounds = array<i64: 1, 256>}, {transform_indices = @transform_3, window_bounds = array<i64: 16, 256>}]} {
    %c0_i32 = arith.constant 0 : i32
    %0 = arith.cmpi eq, %arg2, %c0_i32 : i32
    %1 = arith.extui %0 : i1 to i32
    %c0_i32_0 = arith.constant 0 : i32
    %2 = arith.cmpi ne, %1, %c0_i32_0 : i32
    scf.if %2 {
      %cst_10 = arith.constant 0.000000e+00 : f32
      %12 = vector.broadcast %cst_10 : f32 to vector<16x256xf32>
      %c0_11 = arith.constant 0 : index
      %c0_12 = arith.constant 0 : index
      %13 = vector.load %arg7[%c0_11, %c0_12] : memref<16x256xf32, #tpu.memory_space<vmem>>, vector<16x256xf32>
      tpu.vector_store %arg7[%c0_11, %c0_12], %12 {strides = array<i32>} : memref<16x256xf32, #tpu.memory_space<vmem>>, vector<16x256xf32>,
    } else {
    }
    %c0 = arith.constant 0 : index
    %c0_1 = arith.constant 0 : index
    %3 = vector.load %arg7[%c0, %c0_1] : memref<16x256xf32, #tpu.memory_space<vmem>>, vector<16x256xf32>
    %c0_2 = arith.constant 0 : index
    %c0_3 = arith.constant 0 : index
    %4 = vector.load %arg3[%c0_2, %c0_3] : memref<16x256xbf16, #tpu.memory_space<vmem>>, vector<16x256xbf16>
    %c0_4 = arith.constant 0 : index
    %c0_5 = arith.constant 0 : index
    %5 = vector.load %arg4[%c0_4, %c0_5] : memref<256x256xbf16, #tpu.memory_space<vmem>>, vector<256x256xbf16>
    %cst = arith.constant dense<0.000000e+00> : vector<16x256xf32>
    %6 = tpu.matmul %4, %5, %cst {dimension_numbers = #tpu.dot_dimension_numbers<[1], [0], [0], [1], [0, 0, 1, 1], [], []>} : vector<16x256xbf16>, vector<256x256xbf16>, vector<16x256xf32> -> vector<16x256xf32>
    %7 = arith.addf %3, %6 : vector<16x256xf32>
    %c0_6 = arith.constant 0 : index
    %c0_7 = arith.constant 0 : index
    %8 = vector.load %arg7[%c0_6, %c0_7] : memref<16x256xf32, #tpu.memory_space<vmem>>, vector<16x256xf32>
    tpu.vector_store %arg7[%c0_6, %c0_7], %7 {strides = array<i32>} : memref<16x256xf32, #tpu.memory_space<vmem>>, vector<16x256xf32>,
    %c0_i32_8 = arith.constant 0 : i32
    %9 = arith.cmpi eq, %arg2, %c0_i32_8 : i32
    %10 = arith.extui %9 : i1 to i32
    %c0_i32_9 = arith.constant 0 : i32
    %11 = arith.cmpi ne, %10, %c0_i32_9 : i32
    scf.if %11 {
      %c0_10 = arith.constant 0 : index
      %c0_11 = arith.constant 0 : index
      %12 = vector.load %arg7[%c0_10, %c0_11] : memref<16x256xf32, #tpu.memory_space<vmem>>, vector<16x256xf32>
      %c0_12 = arith.constant 0 : index
      %c0_13 = arith.constant 0 : index
      %13 = vector.load %arg5[%c0_12, %c0_13] : memref<1x256xf32, #tpu.memory_space<vmem>>, vector<1x256xf32>
      %14 = vector.broadcast %13 : vector<1x256xf32> to vector<16x256xf32>
      %15 = arith.addf %12, %14 : vector<16x256xf32>
      %16 = arith.truncf %15 : vector<16x256xf32> to vector<16x256xbf16>
      %c0_14 = arith.constant 0 : index
      %c0_15 = arith.constant 0 : index
      %17 = vector.load %arg6[%c0_14, %c0_15] : memref<16x256xbf16, #tpu.memory_space<vmem>>, vector<16x256xbf16>
      tpu.vector_store %arg6[%c0_14, %c0_15], %16 {strides = array<i32>} : memref<16x256xbf16, #tpu.memory_space<vmem>>, vector<16x256xbf16>,
    } else {
    }
    return
  }
  func.func @transform_0(%arg0: i32, %arg1: i32, %arg2: i32) -> (i32, i32) {
    %c0_i32 = arith.constant 0 : i32
    return %arg0, %arg2 : i32, i32
  }
  func.func @transform_1(%arg0: i32, %arg1: i32, %arg2: i32) -> (i32, i32) {
    %c0_i32 = arith.constant 0 : i32
    return %arg2, %arg1 : i32, i32
  }
  func.func @transform_2(%arg0: i32, %arg1: i32, %arg2: i32) -> (i32, i32) {
    %c0_i32 = arith.constant 0 : i32
    %c0_i32_0 = arith.constant 0 : i32
    return %c0_i32, %arg1 : i32, i32
  }
  func.func @transform_3(%arg0: i32, %arg1: i32, %arg2: i32) -> (i32, i32) {
    %c0_i32 = arith.constant 0 : i32
    return %arg0, %arg1 : i32, i32
  }
}

module attributes {stable_mosaic.version = 11 : i64} {
  func.func @_fused_mm_kernel(%arg0: i32, %arg1: i32, %arg2: i32, %arg3: memref<16x512xbf16, #tpu.memory_space<vmem>>, %arg4: memref<512x256xbf16, #tpu.memory_space<vmem>>, %arg5: memref<1x256xf32, #tpu.memory_space<vmem>>, %arg6: memref<16x256xbf16, #tpu.memory_space<vmem>>, %arg7: memref<16x256xbf16, #tpu.memory_space<vmem>>, %arg8: memref<16x256xf32, #tpu.memory_space<vmem>>) attributes {dimension_semantics = [#tpu.dimension_semantics<parallel>, #tpu.dimension_semantics<parallel>, #tpu.dimension_semantics<arbitrary>], iteration_bounds = array<i64: 1, 2, 9>, scalar_prefetch = 0 : i64, scratch_operands = 1 : i64, tpu.core_type = #tpu.core_type<tc>, window_params = [{transform_indices = @transform_0, window_bounds = array<i64: 16, 512>}, {transform_indices = @transform_1, window_bounds = array<i64: 512, 256>}, {transform_indices = @transform_2, window_bounds = array<i64: 1, 256>}, {transform_indices = @transform_3, window_bounds = array<i64: 16, 256>}, {transform_indices = @transform_4, window_bounds = array<i64: 16, 256>}]} {
    %c0_i32 = arith.constant 0 : i32
    %0 = arith.cmpi eq, %arg2, %c0_i32 : i32
    %1 = arith.extui %0 : i1 to i32
    %c0_i32_0 = arith.constant 0 : i32
    %2 = arith.cmpi ne, %1, %c0_i32_0 : i32
    scf.if %2 {
      %cst_9 = arith.constant 0.000000e+00 : f32
      %12 = vector.broadcast %cst_9 : f32 to vector<16x256xf32>
      %c0_10 = arith.constant 0 : index
      %c0_11 = arith.constant 0 : index
      %13 = vector.load %arg8[%c0_10, %c0_11] : memref<16x256xf32, #tpu.memory_space<vmem>>, vector<16x256xf32>
      tpu.vector_store %arg8[%c0_10, %c0_11], %12 {strides = array<i32>} : memref<16x256xf32, #tpu.memory_space<vmem>>, vector<16x256xf32>,
    } else {
    }
    %c0 = arith.constant 0 : index
    %c0_1 = arith.constant 0 : index
    %3 = vector.load %arg8[%c0, %c0_1] : memref<16x256xf32, #tpu.memory_space<vmem>>, vector<16x256xf32>
    %c0_2 = arith.constant 0 : index
    %c0_3 = arith.constant 0 : index
    %4 = vector.load %arg3[%c0_2, %c0_3] : memref<16x512xbf16, #tpu.memory_space<vmem>>, vector<16x512xbf16>
    %c0_4 = arith.constant 0 : index
    %c0_5 = arith.constant 0 : index
    %5 = vector.load %arg4[%c0_4, %c0_5] : memref<512x256xbf16, #tpu.memory_space<vmem>>, vector<512x256xbf16>
    %cst = arith.constant dense<0.000000e+00> : vector<16x256xf32>
    %6 = tpu.matmul %4, %5, %cst {dimension_numbers = #tpu.dot_dimension_numbers<[1], [0], [0], [1], [0, 0, 1, 1], [], []>} : vector<16x512xbf16>, vector<512x256xbf16>, vector<16x256xf32> -> vector<16x256xf32>
    %7 = arith.addf %3, %6 : vector<16x256xf32>
    %c0_6 = arith.constant 0 : index
    %c0_7 = arith.constant 0 : index
    %8 = vector.load %arg8[%c0_6, %c0_7] : memref<16x256xf32, #tpu.memory_space<vmem>>, vector<16x256xf32>
    tpu.vector_store %arg8[%c0_6, %c0_7], %7 {strides = array<i32>} : memref<16x256xf32, #tpu.memory_space<vmem>>, vector<16x256xf32>,
    %c8_i32 = arith.constant 8 : i32
    %9 = arith.cmpi eq, %arg2, %c8_i32 : i32
    %10 = arith.extui %9 : i1 to i32
    %c0_i32_8 = arith.constant 0 : i32
    %11 = arith.cmpi ne, %10, %c0_i32_8 : i32
    scf.if %11 {
      %c0_9 = arith.constant 0 : index
      %c0_10 = arith.constant 0 : index
      %12 = vector.load %arg8[%c0_9, %c0_10] : memref<16x256xf32, #tpu.memory_space<vmem>>, vector<16x256xf32>
      %c0_11 = arith.constant 0 : index
      %c0_12 = arith.constant 0 : index
      %13 = vector.load %arg5[%c0_11, %c0_12] : memref<1x256xf32, #tpu.memory_space<vmem>>, vector<1x256xf32>
      %14 = vector.broadcast %13 : vector<1x256xf32> to vector<16x256xf32>
      %15 = arith.addf %12, %14 : vector<16x256xf32>
      %c0_13 = arith.constant 0 : index
      %c0_14 = arith.constant 0 : index
      %16 = vector.load %arg6[%c0_13, %c0_14] : memref<16x256xbf16, #tpu.memory_space<vmem>>, vector<16x256xbf16>
      %17 = arith.extf %16 : vector<16x256xbf16> to vector<16x256xf32>
      %18 = arith.addf %15, %17 : vector<16x256xf32>
      %cst_15 = arith.constant 0.000000e+00 : f32
      %19 = vector.broadcast %cst_15 : f32 to vector<16x256xf32>
      %20 = arith.maximumf %18, %19 : vector<16x256xf32>
      %21 = arith.truncf %20 : vector<16x256xf32> to vector<16x256xbf16>
      %c0_16 = arith.constant 0 : index
      %c0_17 = arith.constant 0 : index
      %22 = vector.load %arg7[%c0_16, %c0_17] : memref<16x256xbf16, #tpu.memory_space<vmem>>, vector<16x256xbf16>
      tpu.vector_store %arg7[%c0_16, %c0_17], %21 {strides = array<i32>} : memref<16x256xbf16, #tpu.memory_space<vmem>>, vector<16x256xbf16>,
    } else {
    }
    return
  }
  func.func @transform_0(%arg0: i32, %arg1: i32, %arg2: i32) -> (i32, i32) {
    %c0_i32 = arith.constant 0 : i32
    return %arg0, %arg2 : i32, i32
  }
  func.func @transform_1(%arg0: i32, %arg1: i32, %arg2: i32) -> (i32, i32) {
    %c0_i32 = arith.constant 0 : i32
    return %arg2, %arg1 : i32, i32
  }
  func.func @transform_2(%arg0: i32, %arg1: i32, %arg2: i32) -> (i32, i32) {
    %c0_i32 = arith.constant 0 : i32
    %c0_i32_0 = arith.constant 0 : i32
    return %c0_i32, %arg1 : i32, i32
  }
  func.func @transform_3(%arg0: i32, %arg1: i32, %arg2: i32) -> (i32, i32) {
    %c0_i32 = arith.constant 0 : i32
    return %arg0, %arg1 : i32, i32
  }
  func.func @transform_4(%arg0: i32, %arg1: i32, %arg2: i32) -> (i32, i32) {
    %c0_i32 = arith.constant 0 : i32
    return %arg0, %arg1 : i32, i32
  }
}

module attributes {stable_mosaic.version = 11 : i64} {
  func.func @_fused_mm_kernel(%arg0: i32, %arg1: i32, %arg2: i32, %arg3: memref<256x256xbf16, #tpu.memory_space<vmem>>, %arg4: memref<256x128xbf16, #tpu.memory_space<vmem>>, %arg5: memref<1x128xf32, #tpu.memory_space<vmem>>, %arg6: memref<256x128xbf16, #tpu.memory_space<vmem>>, %arg7: memref<256x128xf32, #tpu.memory_space<vmem>>) attributes {dimension_semantics = [#tpu.dimension_semantics<parallel>, #tpu.dimension_semantics<parallel>, #tpu.dimension_semantics<arbitrary>], iteration_bounds = array<i64: 4, 1, 1>, scalar_prefetch = 0 : i64, scratch_operands = 1 : i64, tpu.core_type = #tpu.core_type<tc>, window_params = [{transform_indices = @transform_0, window_bounds = array<i64: 256, 256>}, {transform_indices = @transform_1, window_bounds = array<i64: 256, 128>}, {transform_indices = @transform_2, window_bounds = array<i64: 1, 128>}, {transform_indices = @transform_3, window_bounds = array<i64: 256, 128>}]} {
    %c0_i32 = arith.constant 0 : i32
    %0 = arith.cmpi eq, %arg2, %c0_i32 : i32
    %1 = arith.extui %0 : i1 to i32
    %c0_i32_0 = arith.constant 0 : i32
    %2 = arith.cmpi ne, %1, %c0_i32_0 : i32
    scf.if %2 {
      %cst_10 = arith.constant 0.000000e+00 : f32
      %12 = vector.broadcast %cst_10 : f32 to vector<256x128xf32>
      %c0_11 = arith.constant 0 : index
      %c0_12 = arith.constant 0 : index
      %13 = vector.load %arg7[%c0_11, %c0_12] : memref<256x128xf32, #tpu.memory_space<vmem>>, vector<256x128xf32>
      tpu.vector_store %arg7[%c0_11, %c0_12], %12 {strides = array<i32>} : memref<256x128xf32, #tpu.memory_space<vmem>>, vector<256x128xf32>,
    } else {
    }
    %c0 = arith.constant 0 : index
    %c0_1 = arith.constant 0 : index
    %3 = vector.load %arg7[%c0, %c0_1] : memref<256x128xf32, #tpu.memory_space<vmem>>, vector<256x128xf32>
    %c0_2 = arith.constant 0 : index
    %c0_3 = arith.constant 0 : index
    %4 = vector.load %arg3[%c0_2, %c0_3] : memref<256x256xbf16, #tpu.memory_space<vmem>>, vector<256x256xbf16>
    %c0_4 = arith.constant 0 : index
    %c0_5 = arith.constant 0 : index
    %5 = vector.load %arg4[%c0_4, %c0_5] : memref<256x128xbf16, #tpu.memory_space<vmem>>, vector<256x128xbf16>
    %cst = arith.constant dense<0.000000e+00> : vector<256x128xf32>
    %6 = tpu.matmul %4, %5, %cst {dimension_numbers = #tpu.dot_dimension_numbers<[1], [0], [0], [1], [0, 0, 1, 1], [], []>} : vector<256x256xbf16>, vector<256x128xbf16>, vector<256x128xf32> -> vector<256x128xf32>
    %7 = arith.addf %3, %6 : vector<256x128xf32>
    %c0_6 = arith.constant 0 : index
    %c0_7 = arith.constant 0 : index
    %8 = vector.load %arg7[%c0_6, %c0_7] : memref<256x128xf32, #tpu.memory_space<vmem>>, vector<256x128xf32>
    tpu.vector_store %arg7[%c0_6, %c0_7], %7 {strides = array<i32>} : memref<256x128xf32, #tpu.memory_space<vmem>>, vector<256x128xf32>,
    %c0_i32_8 = arith.constant 0 : i32
    %9 = arith.cmpi eq, %arg2, %c0_i32_8 : i32
    %10 = arith.extui %9 : i1 to i32
    %c0_i32_9 = arith.constant 0 : i32
    %11 = arith.cmpi ne, %10, %c0_i32_9 : i32
    scf.if %11 {
      %c0_10 = arith.constant 0 : index
      %c0_11 = arith.constant 0 : index
      %12 = vector.load %arg7[%c0_10, %c0_11] : memref<256x128xf32, #tpu.memory_space<vmem>>, vector<256x128xf32>
      %c0_12 = arith.constant 0 : index
      %c0_13 = arith.constant 0 : index
      %13 = vector.load %arg5[%c0_12, %c0_13] : memref<1x128xf32, #tpu.memory_space<vmem>>, vector<1x128xf32>
      %14 = vector.broadcast %13 : vector<1x128xf32> to vector<256x128xf32>
      %15 = arith.addf %12, %14 : vector<256x128xf32>
      %cst_14 = arith.constant 0.000000e+00 : f32
      %16 = vector.broadcast %cst_14 : f32 to vector<256x128xf32>
      %17 = arith.maximumf %15, %16 : vector<256x128xf32>
      %18 = arith.truncf %17 : vector<256x128xf32> to vector<256x128xbf16>
      %c0_15 = arith.constant 0 : index
      %c0_16 = arith.constant 0 : index
      %19 = vector.load %arg6[%c0_15, %c0_16] : memref<256x128xbf16, #tpu.memory_space<vmem>>, vector<256x128xbf16>
      tpu.vector_store %arg6[%c0_15, %c0_16], %18 {strides = array<i32>} : memref<256x128xbf16, #tpu.memory_space<vmem>>, vector<256x128xbf16>,
    } else {
    }
    return
  }
  func.func @transform_0(%arg0: i32, %arg1: i32, %arg2: i32) -> (i32, i32) {
    %c0_i32 = arith.constant 0 : i32
    return %arg0, %arg2 : i32, i32
  }
  func.func @transform_1(%arg0: i32, %arg1: i32, %arg2: i32) -> (i32, i32) {
    %c0_i32 = arith.constant 0 : i32
    return %arg2, %arg1 : i32, i32
  }
  func.func @transform_2(%arg0: i32, %arg1: i32, %arg2: i32) -> (i32, i32) {
    %c0_i32 = arith.constant 0 : i32
    %c0_i32_0 = arith.constant 0 : i32
    return %c0_i32, %arg1 : i32, i32
  }
  func.func @transform_3(%arg0: i32, %arg1: i32, %arg2: i32) -> (i32, i32) {
    %c0_i32 = arith.constant 0 : i32
    return %arg0, %arg1 : i32, i32
  }
}

module attributes {stable_mosaic.version = 11 : i64} {
  func.func @_fused_mm_kernel(%arg0: i32, %arg1: i32, %arg2: i32, %arg3: memref<256x128xbf16, #tpu.memory_space<vmem>>, %arg4: memref<128x128xbf16, #tpu.memory_space<vmem>>, %arg5: memref<1x128xf32, #tpu.memory_space<vmem>>, %arg6: memref<256x128xbf16, #tpu.memory_space<vmem>>, %arg7: memref<256x128xf32, #tpu.memory_space<vmem>>) attributes {dimension_semantics = [#tpu.dimension_semantics<parallel>, #tpu.dimension_semantics<parallel>, #tpu.dimension_semantics<arbitrary>], iteration_bounds = array<i64: 1, 1, 5>, scalar_prefetch = 0 : i64, scratch_operands = 1 : i64, tpu.core_type = #tpu.core_type<tc>, window_params = [{transform_indices = @transform_0, window_bounds = array<i64: 256, 128>}, {transform_indices = @transform_1, window_bounds = array<i64: 128, 128>}, {transform_indices = @transform_2, window_bounds = array<i64: 1, 128>}, {transform_indices = @transform_3, window_bounds = array<i64: 256, 128>}]} {
    %c0_i32 = arith.constant 0 : i32
    %0 = arith.cmpi eq, %arg2, %c0_i32 : i32
    %1 = arith.extui %0 : i1 to i32
    %c0_i32_0 = arith.constant 0 : i32
    %2 = arith.cmpi ne, %1, %c0_i32_0 : i32
    scf.if %2 {
      %cst_9 = arith.constant 0.000000e+00 : f32
      %12 = vector.broadcast %cst_9 : f32 to vector<256x128xf32>
      %c0_10 = arith.constant 0 : index
      %c0_11 = arith.constant 0 : index
      %13 = vector.load %arg7[%c0_10, %c0_11] : memref<256x128xf32, #tpu.memory_space<vmem>>, vector<256x128xf32>
      tpu.vector_store %arg7[%c0_10, %c0_11], %12 {strides = array<i32>} : memref<256x128xf32, #tpu.memory_space<vmem>>, vector<256x128xf32>,
    } else {
    }
    %c0 = arith.constant 0 : index
    %c0_1 = arith.constant 0 : index
    %3 = vector.load %arg7[%c0, %c0_1] : memref<256x128xf32, #tpu.memory_space<vmem>>, vector<256x128xf32>
    %c0_2 = arith.constant 0 : index
    %c0_3 = arith.constant 0 : index
    %4 = vector.load %arg3[%c0_2, %c0_3] : memref<256x128xbf16, #tpu.memory_space<vmem>>, vector<256x128xbf16>
    %c0_4 = arith.constant 0 : index
    %c0_5 = arith.constant 0 : index
    %5 = vector.load %arg4[%c0_4, %c0_5] : memref<128x128xbf16, #tpu.memory_space<vmem>>, vector<128x128xbf16>
    %cst = arith.constant dense<0.000000e+00> : vector<256x128xf32>
    %6 = tpu.matmul %4, %5, %cst {dimension_numbers = #tpu.dot_dimension_numbers<[1], [0], [0], [1], [0, 0, 1, 1], [], []>} : vector<256x128xbf16>, vector<128x128xbf16>, vector<256x128xf32> -> vector<256x128xf32>
    %7 = arith.addf %3, %6 : vector<256x128xf32>
    %c0_6 = arith.constant 0 : index
    %c0_7 = arith.constant 0 : index
    %8 = vector.load %arg7[%c0_6, %c0_7] : memref<256x128xf32, #tpu.memory_space<vmem>>, vector<256x128xf32>
    tpu.vector_store %arg7[%c0_6, %c0_7], %7 {strides = array<i32>} : memref<256x128xf32, #tpu.memory_space<vmem>>, vector<256x128xf32>,
    %c4_i32 = arith.constant 4 : i32
    %9 = arith.cmpi eq, %arg2, %c4_i32 : i32
    %10 = arith.extui %9 : i1 to i32
    %c0_i32_8 = arith.constant 0 : i32
    %11 = arith.cmpi ne, %10, %c0_i32_8 : i32
    scf.if %11 {
      %c0_9 = arith.constant 0 : index
      %c0_10 = arith.constant 0 : index
      %12 = vector.load %arg7[%c0_9, %c0_10] : memref<256x128xf32, #tpu.memory_space<vmem>>, vector<256x128xf32>
      %c0_11 = arith.constant 0 : index
      %c0_12 = arith.constant 0 : index
      %13 = vector.load %arg5[%c0_11, %c0_12] : memref<1x128xf32, #tpu.memory_space<vmem>>, vector<1x128xf32>
      %14 = vector.broadcast %13 : vector<1x128xf32> to vector<256x128xf32>
      %15 = arith.addf %12, %14 : vector<256x128xf32>
      %cst_13 = arith.constant 0.000000e+00 : f32
      %16 = vector.broadcast %cst_13 : f32 to vector<256x128xf32>
      %17 = arith.maximumf %15, %16 : vector<256x128xf32>
      %18 = arith.truncf %17 : vector<256x128xf32> to vector<256x128xbf16>
      %c0_14 = arith.constant 0 : index
      %c0_15 = arith.constant 0 : index
      %19 = vector.load %arg6[%c0_14, %c0_15] : memref<256x128xbf16, #tpu.memory_space<vmem>>, vector<256x128xbf16>
      tpu.vector_store %arg6[%c0_14, %c0_15], %18 {strides = array<i32>} : memref<256x128xbf16, #tpu.memory_space<vmem>>, vector<256x128xbf16>,
    } else {
    }
    return
  }
  func.func @transform_0(%arg0: i32, %arg1: i32, %arg2: i32) -> (i32, i32) {
    %c0_i32 = arith.constant 0 : i32
    return %arg0, %arg2 : i32, i32
  }
  func.func @transform_1(%arg0: i32, %arg1: i32, %arg2: i32) -> (i32, i32) {
    %c0_i32 = arith.constant 0 : i32
    return %arg2, %arg1 : i32, i32
  }
  func.func @transform_2(%arg0: i32, %arg1: i32, %arg2: i32) -> (i32, i32) {
    %c0_i32 = arith.constant 0 : i32
    %c0_i32_0 = arith.constant 0 : i32
    return %c0_i32, %arg1 : i32, i32
  }
  func.func @transform_3(%arg0: i32, %arg1: i32, %arg2: i32) -> (i32, i32) {
    %c0_i32 = arith.constant 0 : i32
    return %arg0, %arg1 : i32, i32
  }
}

module attributes {stable_mosaic.version = 11 : i64} {
  func.func @_fused_mm_kernel(%arg0: i32, %arg1: i32, %arg2: i32, %arg3: memref<256x128xbf16, #tpu.memory_space<vmem>>, %arg4: memref<128x128xbf16, #tpu.memory_space<vmem>>, %arg5: memref<1x128xf32, #tpu.memory_space<vmem>>, %arg6: memref<256x128xbf16, #tpu.memory_space<vmem>>, %arg7: memref<256x128xbf16, #tpu.memory_space<vmem>>, %arg8: memref<256x128xf32, #tpu.memory_space<vmem>>) attributes {dimension_semantics = [#tpu.dimension_semantics<parallel>, #tpu.dimension_semantics<parallel>, #tpu.dimension_semantics<arbitrary>], iteration_bounds = array<i64: 1, 1, 5>, scalar_prefetch = 0 : i64, scratch_operands = 1 : i64, tpu.core_type = #tpu.core_type<tc>, window_params = [{transform_indices = @transform_0, window_bounds = array<i64: 256, 128>}, {transform_indices = @transform_1, window_bounds = array<i64: 128, 128>}, {transform_indices = @transform_2, window_bounds = array<i64: 1, 128>}, {transform_indices = @transform_3, window_bounds = array<i64: 256, 128>}, {transform_indices = @transform_4, window_bounds = array<i64: 256, 128>}]} {
    %c0_i32 = arith.constant 0 : i32
    %0 = arith.cmpi eq, %arg2, %c0_i32 : i32
    %1 = arith.extui %0 : i1 to i32
    %c0_i32_0 = arith.constant 0 : i32
    %2 = arith.cmpi ne, %1, %c0_i32_0 : i32
    scf.if %2 {
      %cst_9 = arith.constant 0.000000e+00 : f32
      %12 = vector.broadcast %cst_9 : f32 to vector<256x128xf32>
      %c0_10 = arith.constant 0 : index
      %c0_11 = arith.constant 0 : index
      %13 = vector.load %arg8[%c0_10, %c0_11] : memref<256x128xf32, #tpu.memory_space<vmem>>, vector<256x128xf32>
      tpu.vector_store %arg8[%c0_10, %c0_11], %12 {strides = array<i32>} : memref<256x128xf32, #tpu.memory_space<vmem>>, vector<256x128xf32>,
    } else {
    }
    %c0 = arith.constant 0 : index
    %c0_1 = arith.constant 0 : index
    %3 = vector.load %arg8[%c0, %c0_1] : memref<256x128xf32, #tpu.memory_space<vmem>>, vector<256x128xf32>
    %c0_2 = arith.constant 0 : index
    %c0_3 = arith.constant 0 : index
    %4 = vector.load %arg3[%c0_2, %c0_3] : memref<256x128xbf16, #tpu.memory_space<vmem>>, vector<256x128xbf16>
    %c0_4 = arith.constant 0 : index
    %c0_5 = arith.constant 0 : index
    %5 = vector.load %arg4[%c0_4, %c0_5] : memref<128x128xbf16, #tpu.memory_space<vmem>>, vector<128x128xbf16>
    %cst = arith.constant dense<0.000000e+00> : vector<256x128xf32>
    %6 = tpu.matmul %4, %5, %cst {dimension_numbers = #tpu.dot_dimension_numbers<[1], [0], [0], [1], [0, 0, 1, 1], [], []>} : vector<256x128xbf16>, vector<128x128xbf16>, vector<256x128xf32> -> vector<256x128xf32>
    %7 = arith.addf %3, %6 : vector<256x128xf32>
    %c0_6 = arith.constant 0 : index
    %c0_7 = arith.constant 0 : index
    %8 = vector.load %arg8[%c0_6, %c0_7] : memref<256x128xf32, #tpu.memory_space<vmem>>, vector<256x128xf32>
    tpu.vector_store %arg8[%c0_6, %c0_7], %7 {strides = array<i32>} : memref<256x128xf32, #tpu.memory_space<vmem>>, vector<256x128xf32>,
    %c4_i32 = arith.constant 4 : i32
    %9 = arith.cmpi eq, %arg2, %c4_i32 : i32
    %10 = arith.extui %9 : i1 to i32
    %c0_i32_8 = arith.constant 0 : i32
    %11 = arith.cmpi ne, %10, %c0_i32_8 : i32
    scf.if %11 {
      %c0_9 = arith.constant 0 : index
      %c0_10 = arith.constant 0 : index
      %12 = vector.load %arg8[%c0_9, %c0_10] : memref<256x128xf32, #tpu.memory_space<vmem>>, vector<256x128xf32>
      %c0_11 = arith.constant 0 : index
      %c0_12 = arith.constant 0 : index
      %13 = vector.load %arg5[%c0_11, %c0_12] : memref<1x128xf32, #tpu.memory_space<vmem>>, vector<1x128xf32>
      %14 = vector.broadcast %13 : vector<1x128xf32> to vector<256x128xf32>
      %15 = arith.addf %12, %14 : vector<256x128xf32>
      %c0_13 = arith.constant 0 : index
      %c0_14 = arith.constant 0 : index
      %16 = vector.load %arg6[%c0_13, %c0_14] : memref<256x128xbf16, #tpu.memory_space<vmem>>, vector<256x128xbf16>
      %17 = arith.extf %16 : vector<256x128xbf16> to vector<256x128xf32>
      %18 = arith.addf %15, %17 : vector<256x128xf32>
      %cst_15 = arith.constant 0.000000e+00 : f32
      %19 = vector.broadcast %cst_15 : f32 to vector<256x128xf32>
      %20 = arith.maximumf %18, %19 : vector<256x128xf32>
      %21 = arith.truncf %20 : vector<256x128xf32> to vector<256x128xbf16>
      %c0_16 = arith.constant 0 : index
      %c0_17 = arith.constant 0 : index
      %22 = vector.load %arg7[%c0_16, %c0_17] : memref<256x128xbf16, #tpu.memory_space<vmem>>, vector<256x128xbf16>
      tpu.vector_store %arg7[%c0_16, %c0_17], %21 {strides = array<i32>} : memref<256x128xbf16, #tpu.memory_space<vmem>>, vector<256x128xbf16>,
    } else {
    }
    return
  }
  func.func @transform_0(%arg0: i32, %arg1: i32, %arg2: i32) -> (i32, i32) {
    %c0_i32 = arith.constant 0 : i32
    return %arg0, %arg2 : i32, i32
  }
  func.func @transform_1(%arg0: i32, %arg1: i32, %arg2: i32) -> (i32, i32) {
    %c0_i32 = arith.constant 0 : i32
    return %arg2, %arg1 : i32, i32
  }
  func.func @transform_2(%arg0: i32, %arg1: i32, %arg2: i32) -> (i32, i32) {
    %c0_i32 = arith.constant 0 : i32
    %c0_i32_0 = arith.constant 0 : i32
    return %c0_i32, %arg1 : i32, i32
  }
  func.func @transform_3(%arg0: i32, %arg1: i32, %arg2: i32) -> (i32, i32) {
    %c0_i32 = arith.constant 0 : i32
    return %arg0, %arg1 : i32, i32
  }
  func.func @transform_4(%arg0: i32, %arg1: i32, %arg2: i32) -> (i32, i32) {
    %c0_i32 = arith.constant 0 : i32
    return %arg0, %arg1 : i32, i32
  }
}

module attributes {stable_mosaic.version = 11 : i64} {
  func.func @_fused_mm_kernel(%arg0: i32, %arg1: i32, %arg2: i32, %arg3: memref<64x128xbf16, #tpu.memory_space<vmem>>, %arg4: memref<128x128xbf16, #tpu.memory_space<vmem>>, %arg5: memref<1x128xf32, #tpu.memory_space<vmem>>, %arg6: memref<64x128xbf16, #tpu.memory_space<vmem>>, %arg7: memref<64x128xf32, #tpu.memory_space<vmem>>) attributes {dimension_semantics = [#tpu.dimension_semantics<parallel>, #tpu.dimension_semantics<parallel>, #tpu.dimension_semantics<arbitrary>], iteration_bounds = array<i64: 1, 1, 5>, scalar_prefetch = 0 : i64, scratch_operands = 1 : i64, tpu.core_type = #tpu.core_type<tc>, window_params = [{transform_indices = @transform_0, window_bounds = array<i64: 64, 128>}, {transform_indices = @transform_1, window_bounds = array<i64: 128, 128>}, {transform_indices = @transform_2, window_bounds = array<i64: 1, 128>}, {transform_indices = @transform_3, window_bounds = array<i64: 64, 128>}]} {
    %c0_i32 = arith.constant 0 : i32
    %0 = arith.cmpi eq, %arg2, %c0_i32 : i32
    %1 = arith.extui %0 : i1 to i32
    %c0_i32_0 = arith.constant 0 : i32
    %2 = arith.cmpi ne, %1, %c0_i32_0 : i32
    scf.if %2 {
      %cst_9 = arith.constant 0.000000e+00 : f32
      %12 = vector.broadcast %cst_9 : f32 to vector<64x128xf32>
      %c0_10 = arith.constant 0 : index
      %c0_11 = arith.constant 0 : index
      %13 = vector.load %arg7[%c0_10, %c0_11] : memref<64x128xf32, #tpu.memory_space<vmem>>, vector<64x128xf32>
      tpu.vector_store %arg7[%c0_10, %c0_11], %12 {strides = array<i32>} : memref<64x128xf32, #tpu.memory_space<vmem>>, vector<64x128xf32>,
    } else {
    }
    %c0 = arith.constant 0 : index
    %c0_1 = arith.constant 0 : index
    %3 = vector.load %arg7[%c0, %c0_1] : memref<64x128xf32, #tpu.memory_space<vmem>>, vector<64x128xf32>
    %c0_2 = arith.constant 0 : index
    %c0_3 = arith.constant 0 : index
    %4 = vector.load %arg3[%c0_2, %c0_3] : memref<64x128xbf16, #tpu.memory_space<vmem>>, vector<64x128xbf16>
    %c0_4 = arith.constant 0 : index
    %c0_5 = arith.constant 0 : index
    %5 = vector.load %arg4[%c0_4, %c0_5] : memref<128x128xbf16, #tpu.memory_space<vmem>>, vector<128x128xbf16>
    %cst = arith.constant dense<0.000000e+00> : vector<64x128xf32>
    %6 = tpu.matmul %4, %5, %cst {dimension_numbers = #tpu.dot_dimension_numbers<[1], [0], [0], [1], [0, 0, 1, 1], [], []>} : vector<64x128xbf16>, vector<128x128xbf16>, vector<64x128xf32> -> vector<64x128xf32>
    %7 = arith.addf %3, %6 : vector<64x128xf32>
    %c0_6 = arith.constant 0 : index
    %c0_7 = arith.constant 0 : index
    %8 = vector.load %arg7[%c0_6, %c0_7] : memref<64x128xf32, #tpu.memory_space<vmem>>, vector<64x128xf32>
    tpu.vector_store %arg7[%c0_6, %c0_7], %7 {strides = array<i32>} : memref<64x128xf32, #tpu.memory_space<vmem>>, vector<64x128xf32>,
    %c4_i32 = arith.constant 4 : i32
    %9 = arith.cmpi eq, %arg2, %c4_i32 : i32
    %10 = arith.extui %9 : i1 to i32
    %c0_i32_8 = arith.constant 0 : i32
    %11 = arith.cmpi ne, %10, %c0_i32_8 : i32
    scf.if %11 {
      %c0_9 = arith.constant 0 : index
      %c0_10 = arith.constant 0 : index
      %12 = vector.load %arg7[%c0_9, %c0_10] : memref<64x128xf32, #tpu.memory_space<vmem>>, vector<64x128xf32>
      %c0_11 = arith.constant 0 : index
      %c0_12 = arith.constant 0 : index
      %13 = vector.load %arg5[%c0_11, %c0_12] : memref<1x128xf32, #tpu.memory_space<vmem>>, vector<1x128xf32>
      %14 = vector.broadcast %13 : vector<1x128xf32> to vector<64x128xf32>
      %15 = arith.addf %12, %14 : vector<64x128xf32>
      %cst_13 = arith.constant 0.000000e+00 : f32
      %16 = vector.broadcast %cst_13 : f32 to vector<64x128xf32>
      %17 = arith.maximumf %15, %16 : vector<64x128xf32>
      %18 = arith.truncf %17 : vector<64x128xf32> to vector<64x128xbf16>
      %c0_14 = arith.constant 0 : index
      %c0_15 = arith.constant 0 : index
      %19 = vector.load %arg6[%c0_14, %c0_15] : memref<64x128xbf16, #tpu.memory_space<vmem>>, vector<64x128xbf16>
      tpu.vector_store %arg6[%c0_14, %c0_15], %18 {strides = array<i32>} : memref<64x128xbf16, #tpu.memory_space<vmem>>, vector<64x128xbf16>,
    } else {
    }
    return
  }
  func.func @transform_0(%arg0: i32, %arg1: i32, %arg2: i32) -> (i32, i32) {
    %c0_i32 = arith.constant 0 : i32
    return %arg0, %arg2 : i32, i32
  }
  func.func @transform_1(%arg0: i32, %arg1: i32, %arg2: i32) -> (i32, i32) {
    %c0_i32 = arith.constant 0 : i32
    return %arg2, %arg1 : i32, i32
  }
  func.func @transform_2(%arg0: i32, %arg1: i32, %arg2: i32) -> (i32, i32) {
    %c0_i32 = arith.constant 0 : i32
    %c0_i32_0 = arith.constant 0 : i32
    return %c0_i32, %arg1 : i32, i32
  }
  func.func @transform_3(%arg0: i32, %arg1: i32, %arg2: i32) -> (i32, i32) {
    %c0_i32 = arith.constant 0 : i32
    return %arg0, %arg1 : i32, i32
  }
}

module attributes {stable_mosaic.version = 11 : i64} {
  func.func @_fused_mm_kernel(%arg0: i32, %arg1: i32, %arg2: i32, %arg3: memref<64x384xbf16, #tpu.memory_space<vmem>>, %arg4: memref<384x128xbf16, #tpu.memory_space<vmem>>, %arg5: memref<1x128xf32, #tpu.memory_space<vmem>>, %arg6: memref<64x128xbf16, #tpu.memory_space<vmem>>, %arg7: memref<64x128xbf16, #tpu.memory_space<vmem>>, %arg8: memref<64x128xf32, #tpu.memory_space<vmem>>) attributes {dimension_semantics = [#tpu.dimension_semantics<parallel>, #tpu.dimension_semantics<parallel>, #tpu.dimension_semantics<arbitrary>], iteration_bounds = array<i64: 1, 1, 3>, scalar_prefetch = 0 : i64, scratch_operands = 1 : i64, tpu.core_type = #tpu.core_type<tc>, window_params = [{transform_indices = @transform_0, window_bounds = array<i64: 64, 384>}, {transform_indices = @transform_1, window_bounds = array<i64: 384, 128>}, {transform_indices = @transform_2, window_bounds = array<i64: 1, 128>}, {transform_indices = @transform_3, window_bounds = array<i64: 64, 128>}, {transform_indices = @transform_4, window_bounds = array<i64: 64, 128>}]} {
    %c0_i32 = arith.constant 0 : i32
    %0 = arith.cmpi eq, %arg2, %c0_i32 : i32
    %1 = arith.extui %0 : i1 to i32
    %c0_i32_0 = arith.constant 0 : i32
    %2 = arith.cmpi ne, %1, %c0_i32_0 : i32
    scf.if %2 {
      %cst_9 = arith.constant 0.000000e+00 : f32
      %12 = vector.broadcast %cst_9 : f32 to vector<64x128xf32>
      %c0_10 = arith.constant 0 : index
      %c0_11 = arith.constant 0 : index
      %13 = vector.load %arg8[%c0_10, %c0_11] : memref<64x128xf32, #tpu.memory_space<vmem>>, vector<64x128xf32>
      tpu.vector_store %arg8[%c0_10, %c0_11], %12 {strides = array<i32>} : memref<64x128xf32, #tpu.memory_space<vmem>>, vector<64x128xf32>,
    } else {
    }
    %c0 = arith.constant 0 : index
    %c0_1 = arith.constant 0 : index
    %3 = vector.load %arg8[%c0, %c0_1] : memref<64x128xf32, #tpu.memory_space<vmem>>, vector<64x128xf32>
    %c0_2 = arith.constant 0 : index
    %c0_3 = arith.constant 0 : index
    %4 = vector.load %arg3[%c0_2, %c0_3] : memref<64x384xbf16, #tpu.memory_space<vmem>>, vector<64x384xbf16>
    %c0_4 = arith.constant 0 : index
    %c0_5 = arith.constant 0 : index
    %5 = vector.load %arg4[%c0_4, %c0_5] : memref<384x128xbf16, #tpu.memory_space<vmem>>, vector<384x128xbf16>
    %cst = arith.constant dense<0.000000e+00> : vector<64x128xf32>
    %6 = tpu.matmul %4, %5, %cst {dimension_numbers = #tpu.dot_dimension_numbers<[1], [0], [0], [1], [0, 0, 1, 1], [], []>} : vector<64x384xbf16>, vector<384x128xbf16>, vector<64x128xf32> -> vector<64x128xf32>
    %7 = arith.addf %3, %6 : vector<64x128xf32>
    %c0_6 = arith.constant 0 : index
    %c0_7 = arith.constant 0 : index
    %8 = vector.load %arg8[%c0_6, %c0_7] : memref<64x128xf32, #tpu.memory_space<vmem>>, vector<64x128xf32>
    tpu.vector_store %arg8[%c0_6, %c0_7], %7 {strides = array<i32>} : memref<64x128xf32, #tpu.memory_space<vmem>>, vector<64x128xf32>,
    %c2_i32 = arith.constant 2 : i32
    %9 = arith.cmpi eq, %arg2, %c2_i32 : i32
    %10 = arith.extui %9 : i1 to i32
    %c0_i32_8 = arith.constant 0 : i32
    %11 = arith.cmpi ne, %10, %c0_i32_8 : i32
    scf.if %11 {
      %c0_9 = arith.constant 0 : index
      %c0_10 = arith.constant 0 : index
      %12 = vector.load %arg8[%c0_9, %c0_10] : memref<64x128xf32, #tpu.memory_space<vmem>>, vector<64x128xf32>
      %c0_11 = arith.constant 0 : index
      %c0_12 = arith.constant 0 : index
      %13 = vector.load %arg5[%c0_11, %c0_12] : memref<1x128xf32, #tpu.memory_space<vmem>>, vector<1x128xf32>
      %14 = vector.broadcast %13 : vector<1x128xf32> to vector<64x128xf32>
      %15 = arith.addf %12, %14 : vector<64x128xf32>
      %c0_13 = arith.constant 0 : index
      %c0_14 = arith.constant 0 : index
      %16 = vector.load %arg6[%c0_13, %c0_14] : memref<64x128xbf16, #tpu.memory_space<vmem>>, vector<64x128xbf16>
      %17 = arith.extf %16 : vector<64x128xbf16> to vector<64x128xf32>
      %18 = arith.addf %15, %17 : vector<64x128xf32>
      %cst_15 = arith.constant 0.000000e+00 : f32
      %19 = vector.broadcast %cst_15 : f32 to vector<64x128xf32>
      %20 = arith.maximumf %18, %19 : vector<64x128xf32>
      %21 = arith.truncf %20 : vector<64x128xf32> to vector<64x128xbf16>
      %c0_16 = arith.constant 0 : index
      %c0_17 = arith.constant 0 : index
      %22 = vector.load %arg7[%c0_16, %c0_17] : memref<64x128xbf16, #tpu.memory_space<vmem>>, vector<64x128xbf16>
      tpu.vector_store %arg7[%c0_16, %c0_17], %21 {strides = array<i32>} : memref<64x128xbf16, #tpu.memory_space<vmem>>, vector<64x128xbf16>,
    } else {
    }
    return
  }
  func.func @transform_0(%arg0: i32, %arg1: i32, %arg2: i32) -> (i32, i32) {
    %c0_i32 = arith.constant 0 : i32
    return %arg0, %arg2 : i32, i32
  }
  func.func @transform_1(%arg0: i32, %arg1: i32, %arg2: i32) -> (i32, i32) {
    %c0_i32 = arith.constant 0 : i32
    return %arg2, %arg1 : i32, i32
  }
  func.func @transform_2(%arg0: i32, %arg1: i32, %arg2: i32) -> (i32, i32) {
    %c0_i32 = arith.constant 0 : i32
    %c0_i32_0 = arith.constant 0 : i32
    return %c0_i32, %arg1 : i32, i32
  }
  func.func @transform_3(%arg0: i32, %arg1: i32, %arg2: i32) -> (i32, i32) {
    %c0_i32 = arith.constant 0 : i32
    return %arg0, %arg1 : i32, i32
  }
  func.func @transform_4(%arg0: i32, %arg1: i32, %arg2: i32) -> (i32, i32) {
    %c0_i32 = arith.constant 0 : i32
    return %arg0, %arg1 : i32, i32
  }
}

module attributes {stable_mosaic.version = 11 : i64} {
  func.func @_fused_mm_kernel(%arg0: i32, %arg1: i32, %arg2: i32, %arg3: memref<64x128xbf16, #tpu.memory_space<vmem>>, %arg4: memref<128x128xbf16, #tpu.memory_space<vmem>>, %arg5: memref<1x128xf32, #tpu.memory_space<vmem>>, %arg6: memref<64x128xbf16, #tpu.memory_space<vmem>>, %arg7: memref<64x128xf32, #tpu.memory_space<vmem>>) attributes {dimension_semantics = [#tpu.dimension_semantics<parallel>, #tpu.dimension_semantics<parallel>, #tpu.dimension_semantics<arbitrary>], iteration_bounds = array<i64: 1, 1, 1>, scalar_prefetch = 0 : i64, scratch_operands = 1 : i64, tpu.core_type = #tpu.core_type<tc>, window_params = [{transform_indices = @transform_0, window_bounds = array<i64: 64, 128>}, {transform_indices = @transform_1, window_bounds = array<i64: 128, 128>}, {transform_indices = @transform_2, window_bounds = array<i64: 1, 128>}, {transform_indices = @transform_3, window_bounds = array<i64: 64, 128>}]} {
    %c0_i32 = arith.constant 0 : i32
    %0 = arith.cmpi eq, %arg2, %c0_i32 : i32
    %1 = arith.extui %0 : i1 to i32
    %c0_i32_0 = arith.constant 0 : i32
    %2 = arith.cmpi ne, %1, %c0_i32_0 : i32
    scf.if %2 {
      %cst_10 = arith.constant 0.000000e+00 : f32
      %12 = vector.broadcast %cst_10 : f32 to vector<64x128xf32>
      %c0_11 = arith.constant 0 : index
      %c0_12 = arith.constant 0 : index
      %13 = vector.load %arg7[%c0_11, %c0_12] : memref<64x128xf32, #tpu.memory_space<vmem>>, vector<64x128xf32>
      tpu.vector_store %arg7[%c0_11, %c0_12], %12 {strides = array<i32>} : memref<64x128xf32, #tpu.memory_space<vmem>>, vector<64x128xf32>,
    } else {
    }
    %c0 = arith.constant 0 : index
    %c0_1 = arith.constant 0 : index
    %3 = vector.load %arg7[%c0, %c0_1] : memref<64x128xf32, #tpu.memory_space<vmem>>, vector<64x128xf32>
    %c0_2 = arith.constant 0 : index
    %c0_3 = arith.constant 0 : index
    %4 = vector.load %arg3[%c0_2, %c0_3] : memref<64x128xbf16, #tpu.memory_space<vmem>>, vector<64x128xbf16>
    %c0_4 = arith.constant 0 : index
    %c0_5 = arith.constant 0 : index
    %5 = vector.load %arg4[%c0_4, %c0_5] : memref<128x128xbf16, #tpu.memory_space<vmem>>, vector<128x128xbf16>
    %cst = arith.constant dense<0.000000e+00> : vector<64x128xf32>
    %6 = tpu.matmul %4, %5, %cst {dimension_numbers = #tpu.dot_dimension_numbers<[1], [0], [0], [1], [0, 0, 1, 1], [], []>} : vector<64x128xbf16>, vector<128x128xbf16>, vector<64x128xf32> -> vector<64x128xf32>
    %7 = arith.addf %3, %6 : vector<64x128xf32>
    %c0_6 = arith.constant 0 : index
    %c0_7 = arith.constant 0 : index
    %8 = vector.load %arg7[%c0_6, %c0_7] : memref<64x128xf32, #tpu.memory_space<vmem>>, vector<64x128xf32>
    tpu.vector_store %arg7[%c0_6, %c0_7], %7 {strides = array<i32>} : memref<64x128xf32, #tpu.memory_space<vmem>>, vector<64x128xf32>,
    %c0_i32_8 = arith.constant 0 : i32
    %9 = arith.cmpi eq, %arg2, %c0_i32_8 : i32
    %10 = arith.extui %9 : i1 to i32
    %c0_i32_9 = arith.constant 0 : i32
    %11 = arith.cmpi ne, %10, %c0_i32_9 : i32
    scf.if %11 {
      %c0_10 = arith.constant 0 : index
      %c0_11 = arith.constant 0 : index
      %12 = vector.load %arg7[%c0_10, %c0_11] : memref<64x128xf32, #tpu.memory_space<vmem>>, vector<64x128xf32>
      %c0_12 = arith.constant 0 : index
      %c0_13 = arith.constant 0 : index
      %13 = vector.load %arg5[%c0_12, %c0_13] : memref<1x128xf32, #tpu.memory_space<vmem>>, vector<1x128xf32>
      %14 = vector.broadcast %13 : vector<1x128xf32> to vector<64x128xf32>
      %15 = arith.addf %12, %14 : vector<64x128xf32>
      %16 = arith.truncf %15 : vector<64x128xf32> to vector<64x128xbf16>
      %c0_14 = arith.constant 0 : index
      %c0_15 = arith.constant 0 : index
      %17 = vector.load %arg6[%c0_14, %c0_15] : memref<64x128xbf16, #tpu.memory_space<vmem>>, vector<64x128xbf16>
      tpu.vector_store %arg6[%c0_14, %c0_15], %16 {strides = array<i32>} : memref<64x128xbf16, #tpu.memory_space<vmem>>, vector<64x128xbf16>,
    } else {
    }
    return
  }
  func.func @transform_0(%arg0: i32, %arg1: i32, %arg2: i32) -> (i32, i32) {
    %c0_i32 = arith.constant 0 : i32
    return %arg0, %arg2 : i32, i32
  }
  func.func @transform_1(%arg0: i32, %arg1: i32, %arg2: i32) -> (i32, i32) {
    %c0_i32 = arith.constant 0 : i32
    return %arg2, %arg1 : i32, i32
  }
  func.func @transform_2(%arg0: i32, %arg1: i32, %arg2: i32) -> (i32, i32) {
    %c0_i32 = arith.constant 0 : i32
    %c0_i32_0 = arith.constant 0 : i32
    return %c0_i32, %arg1 : i32, i32
  }
  func.func @transform_3(%arg0: i32, %arg1: i32, %arg2: i32) -> (i32, i32) {
    %c0_i32 = arith.constant 0 : i32
    return %arg0, %arg1 : i32, i32
  }
}

module attributes {stable_mosaic.version = 11 : i64} {
  func.func @_fused_mm_kernel(%arg0: i32, %arg1: i32, %arg2: i32, %arg3: memref<16x512xbf16, #tpu.memory_space<vmem>>, %arg4: memref<512x128xbf16, #tpu.memory_space<vmem>>, %arg5: memref<1x128xf32, #tpu.memory_space<vmem>>, %arg6: memref<16x128xf32, #tpu.memory_space<vmem>>, %arg7: memref<16x128xf32, #tpu.memory_space<vmem>>) attributes {dimension_semantics = [#tpu.dimension_semantics<parallel>, #tpu.dimension_semantics<parallel>, #tpu.dimension_semantics<arbitrary>], iteration_bounds = array<i64: 1, 1, 3>, scalar_prefetch = 0 : i64, scratch_operands = 1 : i64, tpu.core_type = #tpu.core_type<tc>, window_params = [{transform_indices = @transform_0, window_bounds = array<i64: 16, 512>}, {transform_indices = @transform_1, window_bounds = array<i64: 512, 128>}, {transform_indices = @transform_2, window_bounds = array<i64: 1, 128>}, {transform_indices = @transform_3, window_bounds = array<i64: 16, 128>}]} {
    %c0_i32 = arith.constant 0 : i32
    %0 = arith.cmpi eq, %arg2, %c0_i32 : i32
    %1 = arith.extui %0 : i1 to i32
    %c0_i32_0 = arith.constant 0 : i32
    %2 = arith.cmpi ne, %1, %c0_i32_0 : i32
    scf.if %2 {
      %cst_9 = arith.constant 0.000000e+00 : f32
      %12 = vector.broadcast %cst_9 : f32 to vector<16x128xf32>
      %c0_10 = arith.constant 0 : index
      %c0_11 = arith.constant 0 : index
      %13 = vector.load %arg7[%c0_10, %c0_11] : memref<16x128xf32, #tpu.memory_space<vmem>>, vector<16x128xf32>
      tpu.vector_store %arg7[%c0_10, %c0_11], %12 {strides = array<i32>} : memref<16x128xf32, #tpu.memory_space<vmem>>, vector<16x128xf32>,
    } else {
    }
    %c0 = arith.constant 0 : index
    %c0_1 = arith.constant 0 : index
    %3 = vector.load %arg7[%c0, %c0_1] : memref<16x128xf32, #tpu.memory_space<vmem>>, vector<16x128xf32>
    %c0_2 = arith.constant 0 : index
    %c0_3 = arith.constant 0 : index
    %4 = vector.load %arg3[%c0_2, %c0_3] : memref<16x512xbf16, #tpu.memory_space<vmem>>, vector<16x512xbf16>
    %c0_4 = arith.constant 0 : index
    %c0_5 = arith.constant 0 : index
    %5 = vector.load %arg4[%c0_4, %c0_5] : memref<512x128xbf16, #tpu.memory_space<vmem>>, vector<512x128xbf16>
    %cst = arith.constant dense<0.000000e+00> : vector<16x128xf32>
    %6 = tpu.matmul %4, %5, %cst {dimension_numbers = #tpu.dot_dimension_numbers<[1], [0], [0], [1], [0, 0, 1, 1], [], []>} : vector<16x512xbf16>, vector<512x128xbf16>, vector<16x128xf32> -> vector<16x128xf32>
    %7 = arith.addf %3, %6 : vector<16x128xf32>
    %c0_6 = arith.constant 0 : index
    %c0_7 = arith.constant 0 : index
    %8 = vector.load %arg7[%c0_6, %c0_7] : memref<16x128xf32, #tpu.memory_space<vmem>>, vector<16x128xf32>
    tpu.vector_store %arg7[%c0_6, %c0_7], %7 {strides = array<i32>} : memref<16x128xf32, #tpu.memory_space<vmem>>, vector<16x128xf32>,
    %c2_i32 = arith.constant 2 : i32
    %9 = arith.cmpi eq, %arg2, %c2_i32 : i32
    %10 = arith.extui %9 : i1 to i32
    %c0_i32_8 = arith.constant 0 : i32
    %11 = arith.cmpi ne, %10, %c0_i32_8 : i32
    scf.if %11 {
      %c0_9 = arith.constant 0 : index
      %c0_10 = arith.constant 0 : index
      %12 = vector.load %arg7[%c0_9, %c0_10] : memref<16x128xf32, #tpu.memory_space<vmem>>, vector<16x128xf32>
      %c0_11 = arith.constant 0 : index
      %c0_12 = arith.constant 0 : index
      %13 = vector.load %arg5[%c0_11, %c0_12] : memref<1x128xf32, #tpu.memory_space<vmem>>, vector<1x128xf32>
      %14 = vector.broadcast %13 : vector<1x128xf32> to vector<16x128xf32>
      %15 = arith.addf %12, %14 : vector<16x128xf32>
      %c0_13 = arith.constant 0 : index
      %c0_14 = arith.constant 0 : index
      %16 = vector.load %arg6[%c0_13, %c0_14] : memref<16x128xf32, #tpu.memory_space<vmem>>, vector<16x128xf32>
      tpu.vector_store %arg6[%c0_13, %c0_14], %15 {strides = array<i32>} : memref<16x128xf32, #tpu.memory_space<vmem>>, vector<16x128xf32>,
    } else {
    }
    return
  }
  func.func @transform_0(%arg0: i32, %arg1: i32, %arg2: i32) -> (i32, i32) {
    %c0_i32 = arith.constant 0 : i32
    return %arg0, %arg2 : i32, i32
  }
  func.func @transform_1(%arg0: i32, %arg1: i32, %arg2: i32) -> (i32, i32) {
    %c0_i32 = arith.constant 0 : i32
    return %arg2, %arg1 : i32, i32
  }
  func.func @transform_2(%arg0: i32, %arg1: i32, %arg2: i32) -> (i32, i32) {
    %c0_i32 = arith.constant 0 : i32
    %c0_i32_0 = arith.constant 0 : i32
    return %c0_i32, %arg1 : i32, i32
  }
  func.func @transform_3(%arg0: i32, %arg1: i32, %arg2: i32) -> (i32, i32) {
    %c0_i32 = arith.constant 0 : i32
    return %arg0, %arg1 : i32, i32
  }
}

</mosaic_0001>

<bundles_post_ra>
// kernel: gaze3inputs_forward.25
= control target key start
LH: loop header
LB: loop body
LE: loop exit
PB: predicated region body
PF: predicated region fallthrough
CT: control target
= control target key end

     0   :  { %s1744_s12 = smov 0   ;;  %s1746_s13 = smov 0   ;;  %s1918_s0 = inlined_call_operand.vmem [shape: bf16[512,256], index: 0, kind: input, shape index: {}]   ;;  %s1919_s1 = inlined_call_operand.vmem [shape: bf16[256,128], index: 1, kind: input, shape index: {}]   ;;  %s1920_s2 = inlined_call_operand.vmem [shape: f32[1,128], index: 2, kind: input, shape index: {}]   ;;  %s1921_s3 = inlined_call_operand.vmem [shape: bf16[512,128], index: 3, kind: output, shape index: {}]  }
   0x1   :  { %s1748_s14 = smov 0  }
   0x2 LB: > { %s32_s15 = sadd.s32 1, %s1718_s13  ;;  %p1267_p0 = scmp.ge.s32.totalorder %s1722_s14, 1  ;;  %s1722_s14 = sphi %s1748_s14, %s13_s14   ;;  %s1718_s13 = sphi %s1746_s13, %s1923_s13   ;;  %s1714_s12 = sphi %s1744_s12, %s1922_s12  }
   0x3   : > { %p34_p1 = scmp.ge.s32.totalorder %s32_s15, 2  ;;  %p191_p2 = scmp.lt.s32.totalorder %s1722_s14, 3 }
   0x5   : > { %s1925_s15 = smov (%p34_p1, %s32_s15), 0  ;;  %p192_p3 = pnand %p1267_p0, %p191_p2 }
   0x6   : > { %v1636_v0 = vld [vmem:[%s1919_s1 + $0x40] sm:$0xff] (!%p192_p3)   ;;  %s1268_s18 = sshll.u32 (!%p192_p3), %s1714_s12, 5  ;;  %v1638_v2 = vld [vmem:[%s1919_s1 + $0x48] sm:$0xff] (!%p192_p3)   ;;  %v1640_v4 = vld [vmem:[%s1919_s1 + $0x50] sm:$0xff] (!%p192_p3)  }
   0x7   : > { %195 = sbr.rel (%p192_p3) target bundleno = 320 (0x140), region = 32  ;;  %v1637_v1 = vld [vmem:[%s1919_s1] sm:$0xff] (!%p192_p3)   ;;  %1484 = vmatprep.subr.bf16.mxu0 (!%p192_p3), %v1636_v0  ;;  %1596 = vmatprep.subr.bf16.mxu1 (!%p192_p3), %v1636_v0  ;;  %v1639_v3 = vld [vmem:[%s1919_s1 + $0x8] sm:$0xff] (!%p192_p3)   ;;  %p236_p4 = scmp.lt.s32.totalorder (!%p192_p3), %s1268_s18, 63  ;;  %v1641_v5 = vld [vmem:[%s1919_s1 + $0x10] sm:$0xff] (!%p192_p3)  }
   0x8   : > { %1485 = vmatpush3.bf16.msra.mxu0 (!%p192_p3), %v1637_v1  ;;  %1604 = vmatpush3.bf16.msra.mxu1 (!%p192_p3), %v1637_v1  ;;  %v1642_v6 = vld [vmem:[%s1919_s1 + $0x58] sm:$0xff] (!%p192_p3)   ;;  %v1644_v8 = vld [vmem:[%s1919_s1 + $0x60] sm:$0xff] (!%p192_p3)   ;;  %v1646_v10 = vld [vmem:[%s1919_s1 + $0x68] sm:$0xff] (!%p192_p3)  }
   0x9   : > { %1486 = vmatprep.subr.bf16.mxu0 (!%p192_p3), %v1638_v2  ;;  %1597 = vmatprep.subr.bf16.mxu1 (!%p192_p3), %v1638_v2  ;;  %v1643_v7 = vld [vmem:[%s1919_s1 + $0x18] sm:$0xff] (!%p192_p3)   ;;  %v1645_v9 = vld [vmem:[%s1919_s1 + $0x20] sm:$0xff] (!%p192_p3)   ;;  %v1647_v13 = vld [vmem:[%s1919_s1 + $0x28] sm:$0xff] (!%p192_p3)  }
   0xa   : > { %v1648_v14 = vld [vmem:[%s1919_s1 + $0x70] sm:$0xff] (!%p192_p3)   ;;  %v1650_v16 = vld [vmem:[%s1919_s1 + $0x78] sm:$0xff] (!%p192_p3)   ;;  %v1853_v51 = vld [vmem:[%s1920_s2] ss:$0 sm:$0xff] (!%p192_p3) }
   0xb   : > { %v1649_v15 = vld [vmem:[%s1919_s1 + $0x30] sm:$0xff] (!%p192_p3)   ;;  %v1651_v17 = vld [vmem:[%s1919_s1 + $0x38] sm:$0xff] (!%p192_p3)  }
   0xc   : > { %1487 = vmatpush3.bf16.msra.mxu0 (!%p192_p3), %v1639_v3  ;;  %1605 = vmatpush3.bf16.msra.mxu1 (!%p192_p3), %v1639_v3 }
   0xd   : > { %1488 = vmatprep.subr.bf16.mxu0 (!%p192_p3), %v1640_v4  ;;  %1598 = vmatprep.subr.bf16.mxu1 (!%p192_p3), %v1640_v4 }
   0xe   : > { %s1927_s18 = smov (!%p236_p4, %s1268_s18), 63 }
   0xf   : > { %s1356_s6 = sshll.u32 %s1927_s18, 3  ;;  %s1272_s5 = sshll.u32 %s1927_s18, 2 }
  0x10   : > { %1489 = vmatpush3.bf16.msra.mxu0 %v1641_v5  ;;  %1606 = vmatpush3.bf16.msra.mxu1 %v1641_v5  ;;  %s1795_s11 = scalar_lea.vmem %s1918_s0, %s1356_s6  ;;  %s1863_s8 = scalar_lea.vmem %s1921_s3, %s1272_s5 }
  0x11   : > { %1490 = vmatprep.subr.bf16.mxu0 %v1642_v6  ;;  %1599 = vmatprep.subr.bf16.mxu1 %v1642_v6  ;;  %v1654_v11 = vld [vmem:[%s1795_s11 + $0x4] ss:$8 sps:$4 sm:$0xff]   ;;  %v1652_v18 = vld [vmem:[%s1795_s11] ss:$8 sps:$4 sm:$0xff]   ;;  %v1658_v20 = vld [vmem:[%s1795_s11 + $0x14] ss:$8 sps:$4 sm:$0xff]  }
  0x12   : > { %v1657_v12 = vld [vmem:[%s1795_s11 + $0x84] ss:$8 sps:$4 sm:$0xff]   ;;  %688 = vmatprep.mubr.bf16.mxu0 %v1654_v11  ;;  %v1655_v19 = vld [vmem:[%s1795_s11 + $0x80] ss:$8 sps:$4 sm:$0xff]   ;;  %v1660_v21 = vld [vmem:[%s1795_s11 + $0x94] ss:$8 sps:$4 sm:$0xff]  }
  0x13   : > { %752 = vmatprep.mubr.bf16.mxu1 %v1657_v12  ;;  %v1662_v22 = vld [vmem:[%s1795_s11 + $0x10] ss:$8 sps:$4 sm:$0xff]   ;;  %v1664_v24 = vld [vmem:[%s1795_s11 + $0x24] ss:$8 sps:$4 sm:$0xff]   ;;  %v1668_v26 = vld [vmem:[%s1795_s11 + $0x20] ss:$8 sps:$4 sm:$0xff]  }
  0x14   : > { %1491 = vmatpush3.bf16.msra.mxu0 %v1643_v7  ;;  %1607 = vmatpush3.bf16.msra.mxu1 %v1643_v7  ;;  %v1663_v23 = vld [vmem:[%s1795_s11 + $0x90] ss:$8 sps:$4 sm:$0xff]   ;;  %v1666_v25 = vld [vmem:[%s1795_s11 + $0xa4] ss:$8 sps:$4 sm:$0xff]   ;;  %v1669_v27 = vld [vmem:[%s1795_s11 + $0xa0] ss:$8 sps:$4 sm:$0xff]  }
  0x15   : > { %1492 = vmatprep.subr.bf16.mxu0 %v1644_v8  ;;  %1600 = vmatprep.subr.bf16.mxu1 %v1644_v8  ;;  %v1670_v28 = vld [vmem:[%s1795_s11 + $0x34] ss:$8 sps:$4 sm:$0xff]   ;;  %v1674_v30 = vld [vmem:[%s1795_s11 + $0x30] ss:$8 sps:$4 sm:$0xff]   ;;  %v1676_v32 = vld [vmem:[%s1795_s11 + $0x44] ss:$8 sps:$4 sm:$0xff]  }
  0x16   : > { %v1672_v29 = vld [vmem:[%s1795_s11 + $0xb4] ss:$8 sps:$4 sm:$0xff]   ;;  %v1675_v31 = vld [vmem:[%s1795_s11 + $0xb0] ss:$8 sps:$4 sm:$0xff]   ;;  %v1678_v33 = vld [vmem:[%s1795_s11 + $0xc4] ss:$8 sps:$4 sm:$0xff]  }
  0x17   : > { %v1680_v34 = vld [vmem:[%s1795_s11 + $0x40] ss:$8 sps:$4 sm:$0xff]   ;;  %v1682_v36 = vld [vmem:[%s1795_s11 + $0x54] ss:$8 sps:$4 sm:$0xff]   ;;  %v1686_v38 = vld [vmem:[%s1795_s11 + $0x50] ss:$8 sps:$4 sm:$0xff]  }
  0x18   : > { %1493 = vmatpush3.bf16.msra.mxu0 %v1645_v9  ;;  %1608 = vmatpush3.bf16.msra.mxu1 %v1645_v9  ;;  %v1681_v35 = vld [vmem:[%s1795_s11 + $0xc0] ss:$8 sps:$4 sm:$0xff]   ;;  %v1684_v37 = vld [vmem:[%s1795_s11 + $0xd4] ss:$8 sps:$4 sm:$0xff]   ;;  %v1687_v39 = vld [vmem:[%s1795_s11 + $0xd0] ss:$8 sps:$4 sm:$0xff]  }
  0x19   : > { %1494 = vmatprep.subr.bf16.mxu0 %v1646_v10  ;;  %1601 = vmatprep.subr.bf16.mxu1 %v1646_v10  ;;  %v1688_v40 = vld [vmem:[%s1795_s11 + $0x64] ss:$8 sps:$4 sm:$0xff]   ;;  %v1692_v42 = vld [vmem:[%s1795_s11 + $0x60] ss:$8 sps:$4 sm:$0xff]   ;;  %v1694_v44 = vld [vmem:[%s1795_s11 + $0x74] ss:$8 sps:$4 sm:$0xff]  }
  0x1a   : > { %v1690_v41 = vld [vmem:[%s1795_s11 + $0xe4] ss:$8 sps:$4 sm:$0xff]   ;;  %v1693_v43 = vld [vmem:[%s1795_s11 + $0xe0] ss:$8 sps:$4 sm:$0xff]   ;;  %v1696_v45 = vld [vmem:[%s1795_s11 + $0xf4] ss:$8 sps:$4 sm:$0xff]  }
  0x1b   : > { %v1698_v46 = vld [vmem:[%s1795_s11 + $0x70] ss:$8 sps:$4 sm:$0xff]  }
  0x1c   : > { %1495 = vmatpush3.bf16.msra.mxu0 %v1647_v13  ;;  %1609 = vmatpush3.bf16.msra.mxu1 %v1647_v13  ;;  %v1699_v47 = vld [vmem:[%s1795_s11 + $0xf0] ss:$8 sps:$4 sm:$0xff]  }
  0x1d   : > { %1496 = vmatprep.subr.bf16.mxu0 %v1648_v14  ;;  %1602 = vmatprep.subr.bf16.mxu1 %v1648_v14 }
  0x20   : > { %1497 = vmatpush3.bf16.msra.mxu0 %v1649_v15  ;;  %1610 = vmatpush3.bf16.msra.mxu1 %v1649_v15 }
  0x21   : > { %1498 = vmatprep.subr.bf16.mxu0 %v1650_v16  ;;  %1603 = vmatprep.subr.bf16.mxu1 %v1650_v16 }
  0x24   : > { %1499 = vmatpush3.bf16.msra.mxu0 %v1651_v17  ;;  %1611 = vmatpush3.bf16.msra.mxu1 %v1651_v17 }
  0x27   : > { %689 = vmatmul.mubr.bf16.vlgmr.msra.gmra.mrb[0].mxu0 %v1652_v18  ;;  %753 = vmatmul.mubr.bf16.vlgmr.msra.gmra.mrb[0].mxu1 %v1655_v19 }
  0x28   : > { %696 = vmatprep.mubr.bf16.mxu0 %v1658_v20  ;;  %760 = vmatprep.mubr.bf16.mxu1 %v1660_v21 }
  0x2f   : > { %697 = vmatmul.mubr.bf16.gmra.mrb[4].mxu0 %v1662_v22  ;;  %761 = vmatmul.mubr.bf16.gmra.mrb[4].mxu1 %v1663_v23 }
  0x30   : > { %704 = vmatprep.mubr.bf16.mxu0 %v1664_v24  ;;  %768 = vmatprep.mubr.bf16.mxu1 %v1666_v25 }
  0x37   : > { %705 = vmatmul.mubr.bf16.gmra.mrb[8].mxu0 %v1668_v26  ;;  %769 = vmatmul.mubr.bf16.gmra.mrb[8].mxu1 %v1669_v27 }
  0x38   : > { %712 = vmatprep.mubr.bf16.mxu0 %v1670_v28  ;;  %776 = vmatprep.mubr.bf16.mxu1 %v1672_v29 }
  0x3f   : > { %713 = vmatmul.mubr.bf16.gmra.mrb[12].mxu0 %v1674_v30  ;;  %777 = vmatmul.mubr.bf16.gmra.mrb[12].mxu1 %v1675_v31 }
  0x40   : > { %720 = vmatprep.mubr.bf16.mxu0 %v1676_v32  ;;  %784 = vmatprep.mubr.bf16.mxu1 %v1678_v33 }
  0x47   : > { %721 = vmatmul.mubr.bf16.gmra.mrb[16].mxu0 %v1680_v34  ;;  %785 = vmatmul.mubr.bf16.gmra.mrb[16].mxu1 %v1681_v35 }
  0x48   : > { %728 = vmatprep.mubr.bf16.mxu0 %v1682_v36  ;;  %792 = vmatprep.mubr.bf16.mxu1 %v1684_v37 }
  0x4f   : > { %729 = vmatmul.mubr.bf16.gmra.mrb[20].mxu0 %v1686_v38  ;;  %793 = vmatmul.mubr.bf16.gmra.mrb[20].mxu1 %v1687_v39 }
  0x50   : > { %736 = vmatprep.mubr.bf16.mxu0 %v1688_v40  ;;  %800 = vmatprep.mubr.bf16.mxu1 %v1690_v41 }
  0x57   : > { %737 = vmatmul.mubr.bf16.gmra.mrb[24].mxu0 %v1692_v42  ;;  %801 = vmatmul.mubr.bf16.gmra.mrb[24].mxu1 %v1693_v43 }
  0x58   : > { %744 = vmatprep.mubr.bf16.mxu0 %v1694_v44  ;;  %808 = vmatprep.mubr.bf16.mxu1 %v1696_v45 }
  0x5f   : > { %745 = vmatmul.mubr.bf16.gmra.mrb[28].mxu0 %v1698_v46  ;;  %809 = vmatmul.mubr.bf16.gmra.mrb[28].mxu1 %v1699_v47 }
  0xfa   : > { %v1500_v48 = vpop.f32.mrb[0].mxu0  ;;  %v1548_v49 = vpop.f32.mrb[0].mxu1 }
  0xfb   : > { %v1501_v50 = vpop.f32.mrb[1].mxu0  ;;  %v1549_v52 = vpop.f32.mrb[1].mxu1 }
  0xfc   : > { %v1502_v53 = vadd.f32 %v1501_v50, %v1500_v48  ;;  %v1550_v54 = vadd.f32 %v1549_v52, %v1548_v49  ;;  %v1503_v55 = vpop.f32.mrb[2].mxu0  ;;  %v1551_v56 = vpop.f32.mrb[2].mxu1 }
  0xfd   : > { %v1504_v57 = vpop.f32.mrb[3].mxu0  ;;  %v1552_v58 = vpop.f32.mrb[3].mxu1 }
  0xfe   : > { %v923_v59 = vadd.f32 %v1502_v53, %v1853_v51  ;;  %v939_v60 = vadd.f32 %v1550_v54, %v1853_v51  ;;  %v1505_v61 = vadd.f32 %v1504_v57, %v1503_v55  ;;  %v1553_v62 = vadd.f32 %v1552_v58, %v1551_v56 }
 0x100   : > { %v924_v63 = vadd.f32 %v1505_v61, %v1853_v51  ;;  %v940_v0 = vadd.f32 %v1553_v62, %v1853_v51  ;;  %v955_v1 = vmax.f32 %v923_v59, 0.0  ;;  %v971_v2 = vmax.f32 %v939_v60, 0.0 }
 0x102   : > { %v956_v3 = vmax.f32 %v924_v63, 0.0  ;;  %v972_v4 = vmax.f32 %v940_v0, 0.0  ;;  %v1506_v5 = vpop.f32.mrb[4].mxu0  ;;  %v1554_v6 = vpop.f32.mrb[4].mxu1 }
 0x103   : > { %v1507_v7 = vpop.f32.mrb[5].mxu0  ;;  %v1555_v8 = vpop.f32.mrb[5].mxu1 }
 0x104   : > { %v1392_v9 = vpack.c.bf16 %v956_v3, %v955_v1  ;;  %v1432_v10 = vpack.c.bf16 %v972_v4, %v971_v2  ;;  %v1508_v11 = vadd.f32 %v1507_v7, %v1506_v5  ;;  %v1556_v12 = vadd.f32 %v1555_v8, %v1554_v6  ;;  %v1509_v13 = vpop.f32.mrb[6].mxu0  ;;  %v1557_v14 = vpop.f32.mrb[6].mxu1 }
 0x105   : > { %v1510_v15 = vpop.f32.mrb[7].mxu0  ;;  %v1558_v16 = vpop.f32.mrb[7].mxu1 }
 0x106   : > { %1393 = vst [vmem:[%s1863_s8] sm:$0xff] %v1392_v9   ;;  %1476 = vst [vmem:[%s1863_s8 + $0x40] sm:$0xff] %v1432_v10   ;;  %v925_v17 = vadd.f32 %v1508_v11, %v1853_v51  ;;  %v941_v18 = vadd.f32 %v1556_v12, %v1853_v51  ;;  %v1511_v19 = vadd.f32 %v1510_v15, %v1509_v13 }
 0x107   : > { %v1559_v20 = vadd.f32 %v1558_v16, %v1557_v14 }
 0x108   : > { %v926_v21 = vadd.f32 %v1511_v19, %v1853_v51  ;;  %v957_v23 = vmax.f32 %v925_v17, 0.0  ;;  %v973_v24 = vmax.f32 %v941_v18, 0.0 }
 0x109   : > { %v942_v22 = vadd.f32 %v1559_v20, %v1853_v51 }
 0x10a   : > { %v958_v25 = vmax.f32 %v926_v21, 0.0  ;;  %v1512_v27 = vpop.f32.mrb[8].mxu0  ;;  %v1560_v28 = vpop.f32.mrb[8].mxu1 }
 0x10b   : > { %v974_v26 = vmax.f32 %v942_v22, 0.0  ;;  %v1513_v29 = vpop.f32.mrb[9].mxu0  ;;  %v1561_v30 = vpop.f32.mrb[9].mxu1 }
 0x10c   : > { %v1397_v31 = vpack.c.bf16 %v958_v25, %v957_v23  ;;  %v1514_v33 = vadd.f32 %v1513_v29, %v1512_v27  ;;  %v1562_v34 = vadd.f32 %v1561_v30, %v1560_v28  ;;  %v1515_v35 = vpop.f32.mrb[10].mxu0  ;;  %v1563_v36 = vpop.f32.mrb[10].mxu1 }
 0x10d   : > { %v1437_v32 = vpack.c.bf16 %v974_v26, %v973_v24  ;;  %v1516_v37 = vpop.f32.mrb[11].mxu0  ;;  %v1564_v38 = vpop.f32.mrb[11].mxu1 }
 0x10e   : > { %1469 = vst [vmem:[%s1863_s8 + $0x8] sm:$0xff] %v1397_v31   ;;  %v927_v39 = vadd.f32 %v1514_v33, %v1853_v51  ;;  %v943_v40 = vadd.f32 %v1562_v34, %v1853_v51  ;;  %v1517_v41 = vadd.f32 %v1516_v37, %v1515_v35  ;;  %v1565_v42 = vadd.f32 %v1564_v38, %v1563_v36 }
 0x10f   : > { %1477 = vst [vmem:[%s1863_s8 + $0x48] sm:$0xff] %v1437_v32  }
 0x110   : > { %v928_v43 = vadd.f32 %v1517_v41, %v1853_v51  ;;  %v944_v44 = vadd.f32 %v1565_v42, %v1853_v51  ;;  %v959_v45 = vmax.f32 %v927_v39, 0.0  ;;  %v975_v46 = vmax.f32 %v943_v40, 0.0 }
 0x112   : > { %v960_v47 = vmax.f32 %v928_v43, 0.0  ;;  %v976_v48 = vmax.f32 %v944_v44, 0.0  ;;  %v1518_v49 = vpop.f32.mrb[12].mxu0  ;;  %v1566_v50 = vpop.f32.mrb[12].mxu1 }
 0x113   : > { %v1519_v52 = vpop.f32.mrb[13].mxu0  ;;  %v1567_v53 = vpop.f32.mrb[13].mxu1 }
 0x114   : > { %v1402_v54 = vpack.c.bf16 %v960_v47, %v959_v45  ;;  %v1442_v55 = vpack.c.bf16 %v976_v48, %v975_v46  ;;  %v1520_v56 = vadd.f32 %v1519_v52, %v1518_v49  ;;  %v1568_v57 = vadd.f32 %v1567_v53, %v1566_v50  ;;  %v1521_v58 = vpop.f32.mrb[14].mxu0  ;;  %v1569_v59 = vpop.f32.mrb[14].mxu1 }
 0x115   : > { %v1522_v60 = vpop.f32.mrb[15].mxu0  ;;  %v1570_v61 = vpop.f32.mrb[15].mxu1 }
 0x116   : > { %1470 = vst [vmem:[%s1863_s8 + $0x10] sm:$0xff] %v1402_v54   ;;  %1478 = vst [vmem:[%s1863_s8 + $0x50] sm:$0xff] %v1442_v55   ;;  %v929_v62 = vadd.f32 %v1520_v56, %v1853_v51  ;;  %v945_v63 = vadd.f32 %v1568_v57, %v1853_v51  ;;  %v1523_v0 = vadd.f32 %v1522_v60, %v1521_v58 }
 0x117   : > { %v1571_v1 = vadd.f32 %v1570_v61, %v1569_v59 }
 0x118   : > { %v930_v2 = vadd.f32 %v1523_v0, %v1853_v51  ;;  %v961_v4 = vmax.f32 %v929_v62, 0.0  ;;  %v977_v5 = vmax.f32 %v945_v63, 0.0 }
 0x119   : > { %v946_v3 = vadd.f32 %v1571_v1, %v1853_v51 }
 0x11a   : > { %v962_v6 = vmax.f32 %v930_v2, 0.0  ;;  %v1524_v8 = vpop.f32.mrb[16].mxu0  ;;  %v1572_v9 = vpop.f32.mrb[16].mxu1 }
 0x11b   : > { %v978_v7 = vmax.f32 %v946_v3, 0.0  ;;  %v1525_v10 = vpop.f32.mrb[17].mxu0  ;;  %v1573_v11 = vpop.f32.mrb[17].mxu1 }
 0x11c   : > { %v1407_v12 = vpack.c.bf16 %v962_v6, %v961_v4  ;;  %v1526_v14 = vadd.f32 %v1525_v10, %v1524_v8  ;;  %v1574_v15 = vadd.f32 %v1573_v11, %v1572_v9  ;;  %v1527_v16 = vpop.f32.mrb[18].mxu0  ;;  %v1575_v17 = vpop.f32.mrb[18].mxu1 }
 0x11d   : > { %v1447_v13 = vpack.c.bf16 %v978_v7, %v977_v5  ;;  %v1528_v18 = vpop.f32.mrb[19].mxu0  ;;  %v1576_v19 = vpop.f32.mrb[19].mxu1 }
 0x11e   : > { %1471 = vst [vmem:[%s1863_s8 + $0x18] sm:$0xff] %v1407_v12   ;;  %v931_v20 = vadd.f32 %v1526_v14, %v1853_v51  ;;  %v947_v21 = vadd.f32 %v1574_v15, %v1853_v51  ;;  %v1529_v22 = vadd.f32 %v1528_v18, %v1527_v16  ;;  %v1577_v23 = vadd.f32 %v1576_v19, %v1575_v17 }
 0x11f   : > { %1479 = vst [vmem:[%s1863_s8 + $0x58] sm:$0xff] %v1447_v13  }
 0x120   : > { %v932_v24 = vadd.f32 %v1529_v22, %v1853_v51  ;;  %v948_v25 = vadd.f32 %v1577_v23, %v1853_v51  ;;  %v963_v26 = vmax.f32 %v931_v20, 0.0  ;;  %v979_v27 = vmax.f32 %v947_v21, 0.0 }
 0x122   : > { %v964_v28 = vmax.f32 %v932_v24, 0.0  ;;  %v980_v29 = vmax.f32 %v948_v25, 0.0  ;;  %v1530_v30 = vpop.f32.mrb[20].mxu0  ;;  %v1578_v31 = vpop.f32.mrb[20].mxu1 }
 0x123   : > { %v1531_v32 = vpop.f32.mrb[21].mxu0  ;;  %v1579_v33 = vpop.f32.mrb[21].mxu1 }
 0x124   : > { %v1412_v34 = vpack.c.bf16 %v964_v28, %v963_v26  ;;  %v1452_v35 = vpack.c.bf16 %v980_v29, %v979_v27  ;;  %v1532_v36 = vadd.f32 %v1531_v32, %v1530_v30  ;;  %v1580_v37 = vadd.f32 %v1579_v33, %v1578_v31  ;;  %v1533_v38 = vpop.f32.mrb[22].mxu0  ;;  %v1581_v39 = vpop.f32.mrb[22].mxu1 }
 0x125   : > { %v1534_v40 = vpop.f32.mrb[23].mxu0  ;;  %v1582_v41 = vpop.f32.mrb[23].mxu1 }
 0x126   : > { %1472 = vst [vmem:[%s1863_s8 + $0x20] sm:$0xff] %v1412_v34   ;;  %1480 = vst [vmem:[%s1863_s8 + $0x60] sm:$0xff] %v1452_v35   ;;  %v933_v42 = vadd.f32 %v1532_v36, %v1853_v51  ;;  %v949_v43 = vadd.f32 %v1580_v37, %v1853_v51  ;;  %v1535_v44 = vadd.f32 %v1534_v40, %v1533_v38 }
 0x127   : > { %v1583_v45 = vadd.f32 %v1582_v41, %v1581_v39 }
 0x128   : > { %v934_v46 = vadd.f32 %v1535_v44, %v1853_v51  ;;  %v965_v48 = vmax.f32 %v933_v42, 0.0  ;;  %v981_v49 = vmax.f32 %v949_v43, 0.0 }
 0x129   : > { %v950_v47 = vadd.f32 %v1583_v45, %v1853_v51 }
 0x12a   : > { %v966_v50 = vmax.f32 %v934_v46, 0.0  ;;  %v1536_v53 = vpop.f32.mrb[24].mxu0  ;;  %v1584_v54 = vpop.f32.mrb[24].mxu1 }
 0x12b   : > { %v982_v52 = vmax.f32 %v950_v47, 0.0  ;;  %v1537_v55 = vpop.f32.mrb[25].mxu0  ;;  %v1585_v56 = vpop.f32.mrb[25].mxu1 }
 0x12c   : > { %v1417_v57 = vpack.c.bf16 %v966_v50, %v965_v48  ;;  %v1538_v59 = vadd.f32 %v1537_v55, %v1536_v53  ;;  %v1586_v60 = vadd.f32 %v1585_v56, %v1584_v54  ;;  %v1539_v61 = vpop.f32.mrb[26].mxu0  ;;  %v1587_v62 = vpop.f32.mrb[26].mxu1 }
 0x12d   : > { %v1457_v58 = vpack.c.bf16 %v982_v52, %v981_v49  ;;  %v1540_v63 = vpop.f32.mrb[27].mxu0  ;;  %v1588_v0 = vpop.f32.mrb[27].mxu1 }
 0x12e   : > { %1473 = vst [vmem:[%s1863_s8 + $0x28] sm:$0xff] %v1417_v57   ;;  %v935_v1 = vadd.f32 %v1538_v59, %v1853_v51  ;;  %v951_v2 = vadd.f32 %v1586_v60, %v1853_v51  ;;  %v1541_v3 = vadd.f32 %v1540_v63, %v1539_v61  ;;  %v1589_v4 = vadd.f32 %v1588_v0, %v1587_v62 }
 0x12f   : > { %1481 = vst [vmem:[%s1863_s8 + $0x68] sm:$0xff] %v1457_v58  }
 0x130   : > { %v936_v5 = vadd.f32 %v1541_v3, %v1853_v51  ;;  %v952_v6 = vadd.f32 %v1589_v4, %v1853_v51  ;;  %v967_v7 = vmax.f32 %v935_v1, 0.0  ;;  %v983_v8 = vmax.f32 %v951_v2, 0.0 }
 0x132   : > { %v968_v9 = vmax.f32 %v936_v5, 0.0  ;;  %v984_v10 = vmax.f32 %v952_v6, 0.0  ;;  %v1542_v11 = vpop.f32.mrb[28].mxu0  ;;  %v1590_v12 = vpop.f32.mrb[28].mxu1 }
 0x133   : > { %v1543_v13 = vpop.f32.mrb[29].mxu0  ;;  %v1591_v14 = vpop.f32.mrb[29].mxu1 }
 0x134   : > { %v1422_v15 = vpack.c.bf16 %v968_v9, %v967_v7  ;;  %v1462_v16 = vpack.c.bf16 %v984_v10, %v983_v8  ;;  %v1544_v17 = vadd.f32 %v1543_v13, %v1542_v11  ;;  %v1592_v18 = vadd.f32 %v1591_v14, %v1590_v12  ;;  %v1545_v19 = vpop.f32.mrb[30].mxu0  ;;  %v1593_v20 = vpop.f32.mrb[30].mxu1 }
 0x135   : > { %v1546_v21 = vpop.f32.mrb[31].mxu0  ;;  %v1594_v22 = vpop.f32.mrb[31].mxu1 }
 0x136   : > { %1474 = vst [vmem:[%s1863_s8 + $0x30] sm:$0xff] %v1422_v15   ;;  %1482 = vst [vmem:[%s1863_s8 + $0x70] sm:$0xff] %v1462_v16   ;;  %v937_v23 = vadd.f32 %v1544_v17, %v1853_v51  ;;  %v953_v24 = vadd.f32 %v1592_v18, %v1853_v51  ;;  %v1547_v25 = vadd.f32 %v1546_v21, %v1545_v19 }
 0x137   : > { %v1595_v26 = vadd.f32 %v1594_v22, %v1593_v20 }
 0x138   : > { %v938_v27 = vadd.f32 %v1547_v25, %v1853_v51  ;;  %v969_v29 = vmax.f32 %v937_v23, 0.0  ;;  %v985_v30 = vmax.f32 %v953_v24, 0.0 }
 0x139   : > { %v954_v28 = vadd.f32 %v1595_v26, %v1853_v51 }
 0x13a   : > { %v970_v31 = vmax.f32 %v938_v27, 0.0 }
 0x13b   : > { %v986_v32 = vmax.f32 %v954_v28, 0.0 }
 0x13c   : > { %v1427_v33 = vpack.c.bf16 %v970_v31, %v969_v29 }
 0x13d   : > { %v1467_v34 = vpack.c.bf16 %v986_v32, %v985_v30 }
 0x13e   : > { %1475 = vst [vmem:[%s1863_s8 + $0x38] sm:$0xff] %v1427_v33  }
 0x13f   : > { %1483 = vst [vmem:[%s1863_s8 + $0x78] sm:$0xff] %v1467_v34  }
 0x140 PF: > { %s13_s14 = sadd.s32 1, %s1722_s14   ;;  %s1922_s12 = smov %s1718_s13 }
 0x141   : > { %p10_p5 = scmp.ge.s32.totalorder %s13_s14, 4   ;;  %s1923_s13 = smov %s1925_s15 }
 0x143   :  { %12 = sbr.rel (!%p10_p5) target bundleno = 2 (0x2), region = 76 }

// kernel: gaze3inputs_forward.27
= control target key start
LH: loop header
LB: loop body
LE: loop exit
PB: predicated region body
PF: predicated region fallthrough
CT: control target
= control target key end

     0   :  { %s1361_s15 = smov 0   ;;  %s1363_s16 = smov 0   ;;  %s1535_s0 = inlined_call_operand.vmem [shape: bf16[128,640], index: 0, kind: input, shape index: {}]   ;;  %s1536_s1 = inlined_call_operand.vmem [shape: bf16[640,128], index: 1, kind: input, shape index: {}]   ;;  %s1537_s2 = inlined_call_operand.vmem [shape: f32[1,128], index: 2, kind: input, shape index: {}]   ;;  %s1538_s3 = inlined_call_operand.vmem [shape: bf16[128,128], index: 3, kind: input, shape index: {}]   ;;  %s1539_s4 = inlined_call_operand.vmem [shape: bf16[128,128], index: 4, kind: output, shape index: {}]  }
   0x1   :  { %s1365_s17 = smov 0   ;;  %s1367_s18 = smov 0  }
   0x2   :  { %s1369_s19 = smov 0  }
   0x3 LB: > { %s26_s20 = sadd.s32 1, %s1329_s18  ;;  %p49_p1 = scmp.ne.s32.totalorder %s1321_s16, %s1317_s15  ;;  %s1333_s19 = sphi %s1369_s19, %s14_s19   ;;  %s1329_s18 = sphi %s1367_s18, %s1543_s18   ;;  %s1325_s17 = sphi %s1365_s17, %s1542_s17   ;;  %s1321_s16 = sphi %s1363_s16, %s1541_s16   ;;  %s1317_s15 = sphi %s1361_s15, %s1540_s15  }
   0x4   : > { %p27_p0 = scmp.ge.s32.totalorder %s26_s20, 5  ;;  %p50_p2 = scmp.eq.s32.totalorder %s1333_s19, 0 }
   0x5   : > { %s42_s22 = sadd.s32 1, %s1321_s16  ;;  %p1026_p5 = scmp.ge.s32.totalorder %s1333_s19, 5 }
   0x6   : > { %s1545_s20 = smov (%p27_p0, %s26_s20), 0  ;;  %p51_p3 = por %p50_p2, %p49_p1 }
   0x7   : > { %s38_s21 = ssub.s32 %s1329_s18, %s1545_s20  ;;  %203 = sbr.rel (%p1026_p5) target bundleno = 28 (0x1c), region = 24 }
   0x8   : > { %p40_p4 = scmp.eq.s32.totalorder %s38_s21, 0 }
   0xa   : > { %s1396_s23 = scalar_select %p40_p4, %s1321_s16, %s42_s22  }
   0xe   : > { %206 = sbr.rel (!%p51_p3) target bundleno = 28 (0x1c), region = 28  ;;  %s208_s24 = sand.u32 (%p51_p3), 1, %s1321_s16  }
   0xf   : > { %s1028_s25 = sshll.u32 (%p51_p3), %s1329_s18, 2  ;;  %s1027_s26 = sshll.u32 (%p51_p3), %s208_s24, 6 }
  0x10   : > { %s1404_s29 = scalar_lea.vmem (%p51_p3), %s1535_s0, %s1028_s25  ;;  %s210_s30 = scalar_lea.vmem (%p51_p3), [#allocation3], %s1027_s26 }
  0x11   : > { %v231_v0 = vld [vmem:[%s1404_s29] sm:$0xf] (%p51_p3)  ;;  %v233_v1 = vld [vmem:[%s1404_s29 + $0x14] sm:$0xf] (%p51_p3)  ;;  %v235_v2 = vld [vmem:[%s1404_s29 + $0x28] sm:$0xf] (%p51_p3) }
  0x12   : > { %232 = vst [vmem:[%s210_s30] sm:$0xf] (%p51_p3), %v231_v0  ;;  %234 = vst [vmem:[%s210_s30 + $0x4] sm:$0xf] (%p51_p3), %v233_v1  ;;  %v237_v3 = vld [vmem:[%s1404_s29 + $0x3c] sm:$0xf] (%p51_p3) }
  0x13   : > { %v239_v4 = vld [vmem:[%s1404_s29 + $0x50] sm:$0xf] (%p51_p3)  ;;  %236 = vst [vmem:[%s210_s30 + $0x8] sm:$0xf] (%p51_p3), %v235_v2  ;;  %238 = vst [vmem:[%s210_s30 + $0xc] sm:$0xf] (%p51_p3), %v237_v3 }
  0x14   : > { %240 = vst [vmem:[%s210_s30 + $0x10] sm:$0xf] (%p51_p3), %v239_v4  ;;  %v241_v5 = vld [vmem:[%s1404_s29 + $0x64] sm:$0xf] (%p51_p3)  ;;  %v243_v6 = vld [vmem:[%s1404_s29 + $0x78] sm:$0xf] (%p51_p3) }
  0x15   : > { %v245_v7 = vld [vmem:[%s1404_s29 + $0x8c] sm:$0xf]  ;;  %242 = vst [vmem:[%s210_s30 + $0x14] sm:$0xf] %v241_v5  ;;  %244 = vst [vmem:[%s210_s30 + $0x18] sm:$0xf] %v243_v6 }
  0x16   : > { %246 = vst [vmem:[%s210_s30 + $0x1c] sm:$0xf] %v245_v7  ;;  %v247_v8 = vld [vmem:[%s1404_s29 + $0xa0] sm:$0xf]  ;;  %v249_v9 = vld [vmem:[%s1404_s29 + $0xb4] sm:$0xf] }
  0x17   : > { %v251_v10 = vld [vmem:[%s1404_s29 + $0xc8] sm:$0xf]  ;;  %248 = vst [vmem:[%s210_s30 + $0x20] sm:$0xf] %v247_v8  ;;  %250 = vst [vmem:[%s210_s30 + $0x24] sm:$0xf] %v249_v9 }
  0x18   : > { %252 = vst [vmem:[%s210_s30 + $0x28] sm:$0xf] %v251_v10  ;;  %v253_v11 = vld [vmem:[%s1404_s29 + $0xdc] sm:$0xf]  ;;  %v255_v12 = vld [vmem:[%s1404_s29 + $0xf0] sm:$0xf] }
  0x19   : > { %v257_v13 = vld [vmem:[%s1404_s29 + $0x104] sm:$0xf]  ;;  %254 = vst [vmem:[%s210_s30 + $0x2c] sm:$0xf] %v253_v11  ;;  %256 = vst [vmem:[%s210_s30 + $0x30] sm:$0xf] %v255_v12 }
  0x1a   : > { %258 = vst [vmem:[%s210_s30 + $0x34] sm:$0xf] %v257_v13  ;;  %v259_v14 = vld [vmem:[%s1404_s29 + $0x118] sm:$0xf]  ;;  %v261_v15 = vld [vmem:[%s1404_s29 + $0x12c] sm:$0xf] }
  0x1b   : > { %260 = vst [vmem:[%s210_s30 + $0x38] sm:$0xf] %v259_v14  ;;  %262 = vst [vmem:[%s210_s30 + $0x3c] sm:$0xf] %v261_v15 }
  0x1c PF: > { %p1029_p6 = scmp.ge.s32.totalorder %s1333_s19, 1  ;;  %p328_p7 = scmp.lt.s32.totalorder %s1333_s19, 6 }
  0x1e   : > { %p329_p8 = pnand %p1029_p6, %p328_p7 }
  0x1f   : > { %s335_s5 = sand.u32 (!%p329_p8), 1, %s1317_s15   ;;  %s1031_s6 = sshll.u32 (!%p329_p8), %s1325_s17, 4 }
  0x20   : > { %332 = sbr.rel (%p329_p8) target bundleno = 328 (0x148), region = 73  ;;  %s1030_s7 = sshll.u32 (!%p329_p8), %s335_s5, 6 }
  0x21   : > { %p384_p9 = scmp.lt.s32.totalorder (!%p329_p8), %s1031_s6, 79  ;;  %s1431_s12 = scalar_lea.vmem (!%p329_p8), [#allocation3], %s1030_s7 }
  0x22   : > { %p1033_p10 = scmp.ne.s32.totalorder (!%p329_p8), %s1325_s17, 0 }
  0x27   : > { %s1547_s6 = smov (!%p384_p9, %s1031_s6), 79  ;;  %417 = sbr.rel (%p1033_p10) target bundleno = 49 (0x31), region = 81 }
  0x28   : > { %s1032_s8 = sshll.u32 %s1547_s6, 2  ;;  %v1335_v16 = vmov (!%p1033_p10), 0.0  }
  0x29   : > { %s1429_s11 = scalar_lea.vmem %s1536_s1, %s1032_s8  ;;  %418 = vst [vmem:[#allocation2] sm:$0xff] (!%p1033_p10), %v1335_v16  ;;  %419 = vst [vmem:[#allocation2 + $0x8] sm:$0xff] (!%p1033_p10), %v1335_v16 }
  0x2a   : > { %420 = vst [vmem:[#allocation2 + $0x10] sm:$0xff] (!%p1033_p10), %v1335_v16  ;;  %421 = vst [vmem:[#allocation2 + $0x18] sm:$0xff] (!%p1033_p10), %v1335_v16 }
  0x2b   : > { %422 = vst [vmem:[#allocation2 + $0x20] sm:$0xff] (!%p1033_p10), %v1335_v16  ;;  %423 = vst [vmem:[#allocation2 + $0x28] sm:$0xff] (!%p1033_p10), %v1335_v16 }
  0x2c   : > { %424 = vst [vmem:[#allocation2 + $0x30] sm:$0xff] (!%p1033_p10), %v1335_v16  ;;  %425 = vst [vmem:[#allocation2 + $0x38] sm:$0xff] (!%p1033_p10), %v1335_v16 }
  0x2d   : > { %426 = vst [vmem:[#allocation2 + $0x40] sm:$0xff] (!%p1033_p10), %v1335_v16  ;;  %427 = vst [vmem:[#allocation2 + $0x48] sm:$0xff] (!%p1033_p10), %v1335_v16 }
  0x2e   : > { %428 = vst [vmem:[#allocation2 + $0x50] sm:$0xff] %v1335_v16  ;;  %429 = vst [vmem:[#allocation2 + $0x58] sm:$0xff] %v1335_v16 }
  0x2f   : > { %430 = vst [vmem:[#allocation2 + $0x60] sm:$0xff] %v1335_v16  ;;  %431 = vst [vmem:[#allocation2 + $0x68] sm:$0xff] %v1335_v16 }
  0x30   : > { %432 = vst [vmem:[#allocation2 + $0x70] sm:$0xff] %v1335_v16  ;;  %433 = vst [vmem:[#allocation2 + $0x78] sm:$0xff] %v1335_v16 }
  0x31 PF: > { %v1279_v17 = vld [vmem:[%s1429_s11] sm:$0xff]   ;;  %v1280_v18 = vld [vmem:[%s1429_s11 + $0x8] sm:$0xff]   ;;  %v1281_v19 = vld [vmem:[%s1429_s11 + $0x10] sm:$0xff]   ;;  %p1050_p11 = scmp.ne.s32.totalorder %s1325_s17, 4 }
  0x32   : > { %1190 = vmatprep.subr.bf16.mxu0 %v1279_v17  ;;  %1222 = vmatprep.subr.bf16.mxu1 %v1279_v17  ;;  %v1282_v20 = vld [vmem:[%s1429_s11 + $0x18] sm:$0xff]   ;;  %v1287_v21 = vld [vmem:[%s1431_s12] sm:$0xff]   ;;  %v1284_v24 = vld [vmem:[%s1429_s11 + $0x28] sm:$0xff]  }
  0x33   : > { %1191 = vmatpush3.bf16.msra.mxu0 %v1279_v17  ;;  %1230 = vmatpush3.bf16.msra.mxu1 %v1279_v17  ;;  %v1288_v22 = vld [vmem:[%s1431_s12 + $0x20] sm:$0xff]   ;;  %v1285_v25 = vld [vmem:[%s1429_s11 + $0x30] sm:$0xff]   ;;  %v1286_v26 = vld [vmem:[%s1429_s11 + $0x38] sm:$0xff]  }
  0x34   : > { %1192 = vmatprep.subr.bf16.mxu0 %v1280_v18  ;;  %1223 = vmatprep.subr.bf16.mxu1 %v1280_v18  ;;  %v1283_v23 = vld [vmem:[%s1429_s11 + $0x20] sm:$0xff]   ;;  %v1289_v27 = vld [vmem:[%s1431_s12 + $0x8] sm:$0xff]   ;;  %v1291_v29 = vld [vmem:[%s1431_s12 + $0x10] sm:$0xff]  }
  0x35   : > { %1206 = vmatprep.mubr.bf16.mxu0 %v1287_v21  ;;  %1214 = vmatprep.mubr.bf16.mxu1 %v1288_v22  ;;  %v1290_v28 = vld [vmem:[%s1431_s12 + $0x28] sm:$0xff]   ;;  %v1292_v30 = vld [vmem:[%s1431_s12 + $0x30] sm:$0xff]   ;;  %v1293_v31 = vld [vmem:[%s1431_s12 + $0x18] sm:$0xff]  }
  0x36   : > { %v1294_v32 = vld [vmem:[%s1431_s12 + $0x38] sm:$0xff]   ;;  %v436_v33 = vld [vmem:[#allocation2 + $0x10] sm:$0xff]  ;;  %v434_v35 = vld [vmem:[#allocation2] sm:$0xff] }
  0x37   : > { %1193 = vmatpush3.bf16.msra.mxu0 %v1280_v18  ;;  %1231 = vmatpush3.bf16.msra.mxu1 %v1280_v18  ;;  %v444_v34 = vld [vmem:[#allocation2 + $0x50] sm:$0xff]  ;;  %v442_v36 = vld [vmem:[#allocation2 + $0x40] sm:$0xff]  ;;  %v437_v39 = vld [vmem:[#allocation2 + $0x18] sm:$0xff] }
  0x38   : > { %1194 = vmatprep.subr.bf16.mxu0 %v1281_v19  ;;  %1224 = vmatprep.subr.bf16.mxu1 %v1281_v19  ;;  %v445_v40 = vld [vmem:[#allocation2 + $0x58] sm:$0xff]  ;;  %v435_v45 = vld [vmem:[#allocation2 + $0x8] sm:$0xff]  ;;  %v440_v57 = vld [vmem:[#allocation2 + $0x30] sm:$0xff] }
  0x39   : > { %v443_v46 = vld [vmem:[#allocation2 + $0x48] sm:$0xff]  ;;  %v448_v58 = vld [vmem:[#allocation2 + $0x70] sm:$0xff]  ;;  %v438_v59 = vld [vmem:[#allocation2 + $0x20] sm:$0xff] }
  0x3a   : > { %v446_v60 = vld [vmem:[#allocation2 + $0x60] sm:$0xff]  ;;  %v441_v63 = vld [vmem:[#allocation2 + $0x38] sm:$0xff]  ;;  %v439_v5 = vld [vmem:[#allocation2 + $0x28] sm:$0xff] }
  0x3b   : > { %1195 = vmatpush3.bf16.msra.mxu0 %v1281_v19  ;;  %1232 = vmatpush3.bf16.msra.mxu1 %v1281_v19  ;;  %v449_v0 = vld [vmem:[#allocation2 + $0x78] sm:$0xff]  ;;  %v447_v6 = vld [vmem:[#allocation2 + $0x68] sm:$0xff]  ;;  %v1454_v19 = vld [vmem:[%s1537_s2] ss:$0 sm:$0xff] (!%p1050_p11) }
  0x3c   : > { %1196 = vmatprep.subr.bf16.mxu0 %v1282_v20  ;;  %1225 = vmatprep.subr.bf16.mxu1 %v1282_v20  ;;  %v1089_v22 = vld [vmem:[%s1538_s3] sm:$0xff] (!%p1050_p11)  }
  0x3f   : > { %1197 = vmatpush3.bf16.msra.mxu0 %v1282_v20  ;;  %1233 = vmatpush3.bf16.msra.mxu1 %v1282_v20 }
  0x40   : > { %1198 = vmatprep.subr.bf16.mxu0 %v1283_v23  ;;  %1226 = vmatprep.subr.bf16.mxu1 %v1283_v23 }
  0x43   : > { %1199 = vmatpush3.bf16.msra.mxu0 %v1283_v23  ;;  %1234 = vmatpush3.bf16.msra.mxu1 %v1283_v23 }
  0x44   : > { %1200 = vmatprep.subr.bf16.mxu0 %v1284_v24  ;;  %1227 = vmatprep.subr.bf16.mxu1 %v1284_v24 }
  0x47   : > { %1201 = vmatpush3.bf16.msra.mxu0 %v1284_v24  ;;  %1235 = vmatpush3.bf16.msra.mxu1 %v1284_v24 }
  0x48   : > { %1202 = vmatprep.subr.bf16.mxu0 %v1285_v25  ;;  %1228 = vmatprep.subr.bf16.mxu1 %v1285_v25 }
  0x4b   : > { %1203 = vmatpush3.bf16.msra.mxu0 %v1285_v25  ;;  %1236 = vmatpush3.bf16.msra.mxu1 %v1285_v25  ;;  %v1090_v25 = vunpack.c.l.bf16 (!%p1050_p11), %v1089_v22 }
  0x4c   : > { %1204 = vmatprep.subr.bf16.mxu0 %v1286_v26  ;;  %1229 = vmatprep.subr.bf16.mxu1 %v1286_v26 }
  0x4f   : > { %1205 = vmatpush3.bf16.msra.mxu0 %v1286_v26  ;;  %1237 = vmatpush3.bf16.msra.mxu1 %v1286_v26  ;;  %v1091_v26 = vunpack.c.h.bf16 (!%p1050_p11), %v1089_v22 }
  0x52   : > { %1207 = vmatmul.mubr.bf16.vlgmr.msra.gmra.mrb[0].mxu0 %v1289_v27  ;;  %1215 = vmatmul.mubr.bf16.vlgmr.msra.gmra.mrb[0].mxu1 %v1290_v28 }
  0x53   : > { %1210 = vmatprep.mubr.bf16.mxu0 %v1291_v29  ;;  %1218 = vmatprep.mubr.bf16.mxu1 %v1292_v30  ;;  %v1160_v29 = vld [vmem:[%s1538_s3 + $0x8] sm:$0xff] (!%p1050_p11)  }
  0x5a   : > { %1211 = vmatmul.mubr.bf16.gmra.mrb[4].mxu0 %v1293_v31  ;;  %1219 = vmatmul.mubr.bf16.gmra.mrb[4].mxu1 %v1294_v32  ;;  %v1094_v32 = vunpack.c.l.bf16 (!%p1050_p11), %v1160_v29 }
 0x125   : > { %v1208_v37 = vpop.f32.mrb[0].mxu0  ;;  %v1216_v38 = vpop.f32.mrb[0].mxu1 }
 0x126   : > { %v677_v41 = vadd.f32 %v1208_v37, %v436_v33  ;;  %v685_v42 = vadd.f32 %v1216_v38, %v444_v34  ;;  %v612_v43 = vpop.f32.mrb[1].mxu0  ;;  %v644_v44 = vpop.f32.mrb[1].mxu1  ;;  %v1095_v33 = vunpack.c.h.bf16 (!%p1050_p11), %v1160_v29 }
 0x127   : > { %v675_v47 = vadd.f32 %v612_v43, %v434_v35  ;;  %v683_v48 = vadd.f32 %v644_v44, %v442_v36  ;;  %v1209_v49 = vpop.f32.mrb[2].mxu0  ;;  %v1217_v50 = vpop.f32.mrb[2].mxu1  ;;  %v1161_v36 = vld [vmem:[%s1538_s3 + $0x10] sm:$0xff] (!%p1050_p11)   ;;  %v1162_v43 = vld [vmem:[%s1538_s3 + $0x18] sm:$0xff] (!%p1050_p11)  }
 0x128   : > { %693 = vst [vmem:[#allocation2 + $0x10] sm:$0xff] %v677_v41  ;;  %701 = vst [vmem:[#allocation2 + $0x50] sm:$0xff] %v685_v42  ;;  %v678_v51 = vadd.f32 %v1209_v49, %v437_v39  ;;  %v686_v52 = vadd.f32 %v1217_v50, %v445_v40  ;;  %v615_v53 = vpop.f32.mrb[3].mxu0  ;;  %v647_v54 = vpop.f32.mrb[3].mxu1  ;;  %v1098_v41 = vunpack.c.l.bf16 (!%p1050_p11), %v1161_v36  ;;  %v1099_v42 = vunpack.c.h.bf16 (!%p1050_p11), %v1161_v36 }
 0x129   : > { %691 = vst [vmem:[#allocation2] sm:$0xff] %v675_v47  ;;  %699 = vst [vmem:[#allocation2 + $0x40] sm:$0xff] %v683_v48  ;;  %v676_v55 = vadd.f32 %v615_v53, %v435_v45  ;;  %v684_v56 = vadd.f32 %v647_v54, %v443_v46 }
 0x12a   : > { %694 = vst [vmem:[#allocation2 + $0x18] sm:$0xff] %v678_v51  ;;  %702 = vst [vmem:[#allocation2 + $0x58] sm:$0xff] %v686_v52 }
 0x12b   : > { %692 = vst [vmem:[#allocation2 + $0x8] sm:$0xff] %v676_v55  ;;  %700 = vst [vmem:[#allocation2 + $0x48] sm:$0xff] %v684_v56  ;;  %v1102_v56 = vunpack.c.l.bf16 (!%p1050_p11), %v1162_v43 }
 0x12d   : > { %v1212_v61 = vpop.f32.mrb[4].mxu0  ;;  %v1220_v62 = vpop.f32.mrb[4].mxu1  ;;  %710 = sbr.rel (%p1050_p11) target bundleno = 328 (0x148), region = 85 }
 0x12e   : > { %v681_v1 = vadd.f32 %v1212_v61, %v440_v57  ;;  %v689_v2 = vadd.f32 %v1220_v62, %v448_v58  ;;  %v628_v3 = vpop.f32.mrb[5].mxu0  ;;  %v660_v4 = vpop.f32.mrb[5].mxu1  ;;  %v1103_v57 = vunpack.c.h.bf16 (!%p1050_p11), %v1162_v43  ;;  %v1163_v58 = vld [vmem:[%s1538_s3 + $0x20] sm:$0xff] (!%p1050_p11)  }
 0x12f   : > { %v679_v7 = vadd.f32 %v628_v3, %v438_v59  ;;  %v687_v8 = vadd.f32 %v660_v4, %v446_v60  ;;  %v1213_v9 = vpop.f32.mrb[6].mxu0  ;;  %v1221_v10 = vpop.f32.mrb[6].mxu1  ;;  %v713_v23 = vld [vmem:[#allocation2 + $0x10] sm:$0xff] (!%p1050_p11) }
 0x130   : > { %697 = vst [vmem:[#allocation2 + $0x30] sm:$0xff] %v681_v1  ;;  %705 = vst [vmem:[#allocation2 + $0x70] sm:$0xff] %v689_v2  ;;  %v682_v11 = vadd.f32 %v1213_v9, %v441_v63  ;;  %v690_v12 = vadd.f32 %v1221_v10, %v449_v0  ;;  %v631_v13 = vpop.f32.mrb[7].mxu0  ;;  %v663_v14 = vpop.f32.mrb[7].mxu1  ;;  %v711_v17 = vld [vmem:[#allocation2] sm:$0xff] (!%p1050_p11)  ;;  %v736_v27 = vadd.f32 (!%p1050_p11), %v1454_v19, %v713_v23  ;;  %v721_v59 = vld [vmem:[#allocation2 + $0x50] sm:$0xff] (!%p1050_p11)  ;;  %v1107_v9 = vunpack.c.h.bf16 (!%p1050_p11), %v1163_v58 }
 0x131   : > { %695 = vst [vmem:[#allocation2 + $0x20] sm:$0xff] %v679_v7  ;;  %703 = vst [vmem:[#allocation2 + $0x60] sm:$0xff] %v687_v8  ;;  %v680_v15 = vadd.f32 %v631_v13, %v439_v5  ;;  %v688_v16 = vadd.f32 %v663_v14, %v447_v6  ;;  %v734_v20 = vadd.f32 (!%p1050_p11), %v1454_v19, %v711_v17  ;;  %v714_v24 = vld [vmem:[#allocation2 + $0x18] sm:$0xff] (!%p1050_p11)  ;;  %v719_v48 = vld [vmem:[#allocation2 + $0x40] sm:$0xff] (!%p1050_p11)  ;;  %v1106_v8 = vunpack.c.l.bf16 (!%p1050_p11), %v1163_v58 }
 0x132   : > { %698 = vst [vmem:[#allocation2 + $0x38] sm:$0xff] %v682_v11  ;;  %706 = vst [vmem:[#allocation2 + $0x78] sm:$0xff] %v690_v12  ;;  %v712_v18 = vld [vmem:[#allocation2 + $0x8] sm:$0xff] (!%p1050_p11)  ;;  %v737_v28 = vadd.f32 (!%p1050_p11), %v1454_v19, %v714_v24  ;;  %v784_v44 = vadd.f32 (!%p1050_p11), %v1094_v32, %v736_v27  ;;  %v742_v63 = vadd.f32 (!%p1050_p11), %v1454_v19, %v719_v48  ;;  %v722_v0 = vld [vmem:[#allocation2 + $0x58] sm:$0xff] (!%p1050_p11) }
 0x133   : > { %696 = vst [vmem:[#allocation2 + $0x28] sm:$0xff] %v680_v15  ;;  %704 = vst [vmem:[#allocation2 + $0x68] sm:$0xff] %v688_v16  ;;  %v735_v21 = vadd.f32 (!%p1050_p11), %v1454_v19, %v712_v18  ;;  %v782_v39 = vadd.f32 (!%p1050_p11), %v1090_v25, %v734_v20  ;;  %v720_v53 = vld [vmem:[#allocation2 + $0x48] sm:$0xff] (!%p1050_p11)  ;;  %v744_v10 = vadd.f32 (!%p1050_p11), %v1454_v19, %v721_v59  ;;  %v1165_v12 = vld [vmem:[%s1538_s3 + $0x30] sm:$0xff] (!%p1050_p11)  }
 0x134   : > { %v785_v45 = vadd.f32 %v1095_v33, %v737_v28  ;;  %v800_v54 = vmax.f32 %v784_v44, 0.0  ;;  %v1164_v1 = vld [vmem:[%s1538_s3 + $0x28] sm:$0xff]   ;;  %v743_v5 = vadd.f32 %v1454_v19, %v720_v53  ;;  %v745_v15 = vadd.f32 %v1454_v19, %v722_v0  ;;  %v1166_v28 = vld [vmem:[%s1538_s3 + $0x38] sm:$0xff]  }
 0x135   : > { %v783_v40 = vadd.f32 %v1091_v26, %v735_v21  ;;  %v798_v49 = vmax.f32 %v782_v39, 0.0  ;;  %v1110_v16 = vunpack.c.l.bf16 %v1164_v1  ;;  %v790_v17 = vadd.f32 %v1106_v8, %v742_v63 }
 0x136   : > { %v801_v55 = vmax.f32 %v785_v45, 0.0  ;;  %v791_v18 = vadd.f32 %v1107_v9, %v743_v5  ;;  %v1111_v20 = vunpack.c.h.bf16 %v1164_v1  ;;  %v1114_v27 = vunpack.c.l.bf16 %v1165_v12 }
 0x137   : > { %v717_v37 = vld [vmem:[#allocation2 + $0x30] sm:$0xff]  ;;  %v799_v50 = vmax.f32 %v783_v40, 0.0  ;;  %v792_v25 = vadd.f32 %v1110_v16, %v744_v10  ;;  %v806_v29 = vmax.f32 %v790_v17, 0.0  ;;  %v1115_v32 = vunpack.c.h.bf16 %v1165_v12 }
 0x138   : > { %v715_v30 = vld [vmem:[#allocation2 + $0x20] sm:$0xff]  ;;  %v740_v46 = vadd.f32 %v1454_v19, %v717_v37  ;;  %v1128_v2 = vpack.c.bf16 %v801_v55, %v800_v54  ;;  %v725_v22 = vld [vmem:[#allocation2 + $0x70] sm:$0xff]  ;;  %v1118_v40 = vunpack.c.l.bf16 %v1166_v28 }
 0x139   : > { %v738_v34 = vadd.f32 %v1454_v19, %v715_v30  ;;  %v718_v38 = vld [vmem:[#allocation2 + $0x38] sm:$0xff]  ;;  %v1123_v60 = vpack.c.bf16 %v799_v50, %v798_v49  ;;  %v723_v6 = vld [vmem:[#allocation2 + $0x60] sm:$0xff]  ;;  %v807_v30 = vmax.f32 %v791_v18, 0.0  ;;  %v808_v33 = vmax.f32 %v792_v25, 0.0 }
 0x13a   : > { %v716_v31 = vld [vmem:[#allocation2 + $0x28] sm:$0xff]  ;;  %v741_v47 = vadd.f32 %v1454_v19, %v718_v38  ;;  %v788_v3 = vadd.f32 %v1102_v56, %v740_v46  ;;  %1167 = vst [vmem:[%s1539_s4 + $0x8] sm:$0xff] %v1128_v2   ;;  %v746_v21 = vadd.f32 %v1454_v19, %v723_v6  ;;  %v726_v23 = vld [vmem:[#allocation2 + $0x78] sm:$0xff] }
 0x13b   : > { %v739_v35 = vadd.f32 %v1454_v19, %v716_v31  ;;  %v786_v51 = vadd.f32 %v1098_v41, %v738_v34  ;;  %1124 = vst [vmem:[%s1539_s4] sm:$0xff] %v1123_v60   ;;  %v724_v11 = vld [vmem:[#allocation2 + $0x68] sm:$0xff]  ;;  %v793_v31 = vadd.f32 %v1111_v20, %v745_v15  ;;  %v749_v36 = vadd.f32 %v1454_v19, %v726_v23 }
 0x13c   : > { %v789_v4 = vadd.f32 %v1103_v57, %v741_v47  ;;  %v804_v13 = vmax.f32 %v788_v3, 0.0  ;;  %v747_v26 = vadd.f32 %v1454_v19, %v724_v11  ;;  %v794_v34 = vadd.f32 %v1114_v27, %v746_v21 }
 0x13d   : > { %v787_v52 = vadd.f32 %v1099_v42, %v739_v35  ;;  %v802_v61 = vmax.f32 %v786_v51, 0.0  ;;  %v748_v35 = vadd.f32 %v1454_v19, %v725_v22  ;;  %v1143_v37 = vpack.c.bf16 %v807_v30, %v806_v29 }
 0x13e   : > { %v805_v14 = vmax.f32 %v789_v4, 0.0  ;;  %v809_v38 = vmax.f32 %v793_v31, 0.0  ;;  %v795_v39 = vadd.f32 %v1115_v32, %v747_v26  ;;  %v810_v41 = vmax.f32 %v794_v34, 0.0 }
 0x13f   : > { %v803_v62 = vmax.f32 %v787_v52, 0.0  ;;  %v1119_v42 = vunpack.c.h.bf16 %v1166_v28  ;;  %1170 = vst [vmem:[%s1539_s4 + $0x20] sm:$0xff] %v1143_v37   ;;  %v796_v45 = vadd.f32 %v1118_v40, %v748_v35 }
 0x140   : > { %v1138_v24 = vpack.c.bf16 %v805_v14, %v804_v13  ;;  %v1148_v43 = vpack.c.bf16 %v809_v38, %v808_v33  ;;  %v811_v44 = vmax.f32 %v795_v39, 0.0 }
 0x141   : > { %v1133_v7 = vpack.c.bf16 %v803_v62, %v802_v61  ;;  %v797_v46 = vadd.f32 %v1119_v42, %v749_v36  ;;  %v812_v19 = vmax.f32 %v796_v45, 0.0 }
 0x142   : > { %1169 = vst [vmem:[%s1539_s4 + $0x18] sm:$0xff] %v1138_v24   ;;  %1171 = vst [vmem:[%s1539_s4 + $0x28] sm:$0xff] %v1148_v43   ;;  %v1153_v47 = vpack.c.bf16 %v811_v44, %v810_v41 }
 0x143   : > { %1168 = vst [vmem:[%s1539_s4 + $0x10] sm:$0xff] %v1133_v7   ;;  %v813_v48 = vmax.f32 %v797_v46, 0.0 }
 0x144   : > { %1172 = vst [vmem:[%s1539_s4 + $0x30] sm:$0xff] %v1153_v47  }
 0x145   : > { %v1158_v49 = vpack.c.bf16 %v813_v48, %v812_v19 }
 0x147   : > { %1173 = vst [vmem:[%s1539_s4 + $0x38] sm:$0xff] %v1158_v49  }
 0x148 PF: > { %s14_s19 = sadd.s32 1, %s1333_s19   ;;  %s1540_s15 = smov %s1321_s16 }
 0x149   : > { %p11_p12 = scmp.ge.s32.totalorder %s14_s19, 7   ;;  %s1541_s16 = smov %s1396_s23 }
 0x14a   : > { %s1542_s17 = smov %s1329_s18  ;;  %s1543_s18 = smov %s1545_s20 }
 0x14b   :  { %13 = sbr.rel (!%p11_p12) target bundleno = 3 (0x3), region = 129 }

// kernel: gaze3inputs_forward.26
= control target key start
LH: loop header
LB: loop body
LE: loop exit
PB: predicated region body
PF: predicated region fallthrough
CT: control target
= control target key end

     0   :  { %s1190_s12 = smov 0   ;;  %s1192_s13 = smov 0   ;;  %s1322_s0 = inlined_call_operand.vmem [shape: bf16[128,640], index: 0, kind: input, shape index: {}]   ;;  %s1323_s1 = inlined_call_operand.vmem [shape: bf16[640,128], index: 1, kind: input, shape index: {}]   ;;  %s1324_s2 = inlined_call_operand.vmem [shape: f32[1,128], index: 2, kind: input, shape index: {}]   ;;  %s1325_s3 = inlined_call_operand.vmem [shape: bf16[128,128], index: 3, kind: output, shape index: {}]  }
   0x1   :  { %s1194_s14 = smov 0   ;;  %s1196_s15 = smov 0  }
   0x2   :  { %s1198_s16 = smov 0  }
   0x3 LB: > { %s25_s17 = sadd.s32 1, %s1163_s15  ;;  %p48_p1 = scmp.ne.s32.totalorder %s1155_s13, %s1151_s12  ;;  %s1167_s16 = sphi %s1198_s16, %s13_s16   ;;  %s1163_s15 = sphi %s1196_s15, %s1329_s15   ;;  %s1159_s14 = sphi %s1194_s14, %s1328_s14   ;;  %s1155_s13 = sphi %s1192_s13, %s1327_s13   ;;  %s1151_s12 = sphi %s1190_s12, %s1326_s12  }
   0x4   : > { %p26_p0 = scmp.ge.s32.totalorder %s25_s17, 5  ;;  %p49_p2 = scmp.eq.s32.totalorder %s1167_s16, 0 }
   0x5   : > { %s41_s19 = sadd.s32 1, %s1155_s13  ;;  %p899_p5 = scmp.ge.s32.totalorder %s1167_s16, 5 }
   0x6   : > { %s1331_s17 = smov (%p26_p0, %s25_s17), 0  ;;  %p50_p3 = por %p49_p2, %p48_p1 }
   0x7   : > { %s37_s18 = ssub.s32 %s1163_s15, %s1331_s17  ;;  %162 = sbr.rel (%p899_p5) target bundleno = 28 (0x1c), region = 20 }
   0x8   : > { %p39_p4 = scmp.eq.s32.totalorder %s37_s18, 0 }
   0xa   : > { %s1225_s20 = scalar_select %p39_p4, %s1155_s13, %s41_s19  }
   0xe   : > { %165 = sbr.rel (!%p50_p3) target bundleno = 28 (0x1c), region = 24  ;;  %s167_s21 = sand.u32 (%p50_p3), 1, %s1155_s13  }
   0xf   : > { %s901_s22 = sshll.u32 (%p50_p3), %s1163_s15, 2  ;;  %s900_s23 = sshll.u32 (%p50_p3), %s167_s21, 6 }
  0x10   : > { %s1233_s26 = scalar_lea.vmem (%p50_p3), %s1322_s0, %s901_s22  ;;  %s169_s27 = scalar_lea.vmem (%p50_p3), [#allocation3], %s900_s23 }
  0x11   : > { %v190_v0 = vld [vmem:[%s1233_s26] sm:$0xf] (%p50_p3)  ;;  %v192_v1 = vld [vmem:[%s1233_s26 + $0x14] sm:$0xf] (%p50_p3)  ;;  %v194_v2 = vld [vmem:[%s1233_s26 + $0x28] sm:$0xf] (%p50_p3) }
  0x12   : > { %191 = vst [vmem:[%s169_s27] sm:$0xf] (%p50_p3), %v190_v0  ;;  %193 = vst [vmem:[%s169_s27 + $0x4] sm:$0xf] (%p50_p3), %v192_v1  ;;  %v196_v3 = vld [vmem:[%s1233_s26 + $0x3c] sm:$0xf] (%p50_p3) }
  0x13   : > { %v198_v4 = vld [vmem:[%s1233_s26 + $0x50] sm:$0xf] (%p50_p3)  ;;  %195 = vst [vmem:[%s169_s27 + $0x8] sm:$0xf] (%p50_p3), %v194_v2  ;;  %197 = vst [vmem:[%s169_s27 + $0xc] sm:$0xf] (%p50_p3), %v196_v3 }
  0x14   : > { %199 = vst [vmem:[%s169_s27 + $0x10] sm:$0xf] (%p50_p3), %v198_v4  ;;  %v200_v5 = vld [vmem:[%s1233_s26 + $0x64] sm:$0xf] (%p50_p3)  ;;  %v202_v6 = vld [vmem:[%s1233_s26 + $0x78] sm:$0xf] (%p50_p3) }
  0x15   : > { %v204_v7 = vld [vmem:[%s1233_s26 + $0x8c] sm:$0xf]  ;;  %201 = vst [vmem:[%s169_s27 + $0x14] sm:$0xf] %v200_v5  ;;  %203 = vst [vmem:[%s169_s27 + $0x18] sm:$0xf] %v202_v6 }
  0x16   : > { %205 = vst [vmem:[%s169_s27 + $0x1c] sm:$0xf] %v204_v7  ;;  %v206_v8 = vld [vmem:[%s1233_s26 + $0xa0] sm:$0xf]  ;;  %v208_v9 = vld [vmem:[%s1233_s26 + $0xb4] sm:$0xf] }
  0x17   : > { %v210_v10 = vld [vmem:[%s1233_s26 + $0xc8] sm:$0xf]  ;;  %207 = vst [vmem:[%s169_s27 + $0x20] sm:$0xf] %v206_v8  ;;  %209 = vst [vmem:[%s169_s27 + $0x24] sm:$0xf] %v208_v9 }
  0x18   : > { %211 = vst [vmem:[%s169_s27 + $0x28] sm:$0xf] %v210_v10  ;;  %v212_v11 = vld [vmem:[%s1233_s26 + $0xdc] sm:$0xf]  ;;  %v214_v12 = vld [vmem:[%s1233_s26 + $0xf0] sm:$0xf] }
  0x19   : > { %v216_v13 = vld [vmem:[%s1233_s26 + $0x104] sm:$0xf]  ;;  %213 = vst [vmem:[%s169_s27 + $0x2c] sm:$0xf] %v212_v11  ;;  %215 = vst [vmem:[%s169_s27 + $0x30] sm:$0xf] %v214_v12 }
  0x1a   : > { %217 = vst [vmem:[%s169_s27 + $0x34] sm:$0xf] %v216_v13  ;;  %v218_v14 = vld [vmem:[%s1233_s26 + $0x118] sm:$0xf]  ;;  %v220_v15 = vld [vmem:[%s1233_s26 + $0x12c] sm:$0xf] }
  0x1b   : > { %219 = vst [vmem:[%s169_s27 + $0x38] sm:$0xf] %v218_v14  ;;  %221 = vst [vmem:[%s169_s27 + $0x3c] sm:$0xf] %v220_v15 }
  0x1c PF: > { %p902_p6 = scmp.ge.s32.totalorder %s1167_s16, 1  ;;  %p287_p7 = scmp.lt.s32.totalorder %s1167_s16, 6 }
  0x1e   : > { %p288_p8 = pnand %p902_p6, %p287_p7 }
  0x1f   : > { %s294_s28 = sand.u32 (!%p288_p8), 1, %s1151_s12   ;;  %s904_s29 = sshll.u32 (!%p288_p8), %s1159_s14, 4 }
  0x20   : > { %291 = sbr.rel (%p288_p8) target bundleno = 323 (0x143), region = 69  ;;  %s903_s30 = sshll.u32 (!%p288_p8), %s294_s28, 6 }
  0x21   : > { %p333_p9 = scmp.lt.s32.totalorder (!%p288_p8), %s904_s29, 79  ;;  %s1260_s8 = scalar_lea.vmem (!%p288_p8), [#allocation3], %s903_s30 }
  0x22   : > { %p906_p10 = scmp.ne.s32.totalorder (!%p288_p8), %s1159_s14, 0 }
  0x27   : > { %s1333_s29 = smov (!%p333_p9, %s904_s29), 79  ;;  %357 = sbr.rel (%p906_p10) target bundleno = 49 (0x31), region = 77 }
  0x28   : > { %s905_s4 = sshll.u32 %s1333_s29, 2  ;;  %v1169_v16 = vmov (!%p906_p10), 0.0  }
  0x29   : > { %s1258_s7 = scalar_lea.vmem %s1323_s1, %s905_s4  ;;  %358 = vst [vmem:[#allocation2] sm:$0xff] (!%p906_p10), %v1169_v16  ;;  %359 = vst [vmem:[#allocation2 + $0x8] sm:$0xff] (!%p906_p10), %v1169_v16 }
  0x2a   : > { %360 = vst [vmem:[#allocation2 + $0x10] sm:$0xff] (!%p906_p10), %v1169_v16  ;;  %361 = vst [vmem:[#allocation2 + $0x18] sm:$0xff] (!%p906_p10), %v1169_v16 }
  0x2b   : > { %362 = vst [vmem:[#allocation2 + $0x20] sm:$0xff] (!%p906_p10), %v1169_v16  ;;  %363 = vst [vmem:[#allocation2 + $0x28] sm:$0xff] (!%p906_p10), %v1169_v16 }
  0x2c   : > { %364 = vst [vmem:[#allocation2 + $0x30] sm:$0xff] (!%p906_p10), %v1169_v16  ;;  %365 = vst [vmem:[#allocation2 + $0x38] sm:$0xff] (!%p906_p10), %v1169_v16 }
  0x2d   : > { %366 = vst [vmem:[#allocation2 + $0x40] sm:$0xff] (!%p906_p10), %v1169_v16  ;;  %367 = vst [vmem:[#allocation2 + $0x48] sm:$0xff] (!%p906_p10), %v1169_v16 }
  0x2e   : > { %368 = vst [vmem:[#allocation2 + $0x50] sm:$0xff] %v1169_v16  ;;  %369 = vst [vmem:[#allocation2 + $0x58] sm:$0xff] %v1169_v16 }
  0x2f   : > { %370 = vst [vmem:[#allocation2 + $0x60] sm:$0xff] %v1169_v16  ;;  %371 = vst [vmem:[#allocation2 + $0x68] sm:$0xff] %v1169_v16 }
  0x30   : > { %372 = vst [vmem:[#allocation2 + $0x70] sm:$0xff] %v1169_v16  ;;  %373 = vst [vmem:[#allocation2 + $0x78] sm:$0xff] %v1169_v16 }
  0x31 PF: > { %v1113_v17 = vld [vmem:[%s1258_s7] sm:$0xff]   ;;  %v1114_v18 = vld [vmem:[%s1258_s7 + $0x8] sm:$0xff]   ;;  %v1115_v19 = vld [vmem:[%s1258_s7 + $0x10] sm:$0xff]   ;;  %p923_p11 = scmp.ne.s32.totalorder %s1159_s14, 4 }
  0x32   : > { %1024 = vmatprep.subr.bf16.mxu0 %v1113_v17  ;;  %1056 = vmatprep.subr.bf16.mxu1 %v1113_v17  ;;  %v1116_v20 = vld [vmem:[%s1258_s7 + $0x18] sm:$0xff]   ;;  %v1121_v21 = vld [vmem:[%s1260_s8] sm:$0xff]   ;;  %v1118_v24 = vld [vmem:[%s1258_s7 + $0x28] sm:$0xff]  }
  0x33   : > { %1025 = vmatpush3.bf16.msra.mxu0 %v1113_v17  ;;  %1064 = vmatpush3.bf16.msra.mxu1 %v1113_v17  ;;  %v1122_v22 = vld [vmem:[%s1260_s8 + $0x20] sm:$0xff]   ;;  %v1119_v25 = vld [vmem:[%s1258_s7 + $0x30] sm:$0xff]   ;;  %v1120_v26 = vld [vmem:[%s1258_s7 + $0x38] sm:$0xff]  }
  0x34   : > { %1026 = vmatprep.subr.bf16.mxu0 %v1114_v18  ;;  %1057 = vmatprep.subr.bf16.mxu1 %v1114_v18  ;;  %v1117_v23 = vld [vmem:[%s1258_s7 + $0x20] sm:$0xff]   ;;  %v1123_v27 = vld [vmem:[%s1260_s8 + $0x8] sm:$0xff]   ;;  %v1125_v29 = vld [vmem:[%s1260_s8 + $0x10] sm:$0xff]  }
  0x35   : > { %1040 = vmatprep.mubr.bf16.mxu0 %v1121_v21  ;;  %1048 = vmatprep.mubr.bf16.mxu1 %v1122_v22  ;;  %v1124_v28 = vld [vmem:[%s1260_s8 + $0x28] sm:$0xff]   ;;  %v1126_v30 = vld [vmem:[%s1260_s8 + $0x30] sm:$0xff]   ;;  %v1127_v31 = vld [vmem:[%s1260_s8 + $0x18] sm:$0xff]  }
  0x36   : > { %v1128_v32 = vld [vmem:[%s1260_s8 + $0x38] sm:$0xff]   ;;  %v376_v33 = vld [vmem:[#allocation2 + $0x10] sm:$0xff]  ;;  %v374_v35 = vld [vmem:[#allocation2] sm:$0xff] }
  0x37   : > { %1027 = vmatpush3.bf16.msra.mxu0 %v1114_v18  ;;  %1065 = vmatpush3.bf16.msra.mxu1 %v1114_v18  ;;  %v384_v34 = vld [vmem:[#allocation2 + $0x50] sm:$0xff]  ;;  %v382_v36 = vld [vmem:[#allocation2 + $0x40] sm:$0xff]  ;;  %v377_v39 = vld [vmem:[#allocation2 + $0x18] sm:$0xff] }
  0x38   : > { %1028 = vmatprep.subr.bf16.mxu0 %v1115_v19  ;;  %1058 = vmatprep.subr.bf16.mxu1 %v1115_v19  ;;  %v385_v40 = vld [vmem:[#allocation2 + $0x58] sm:$0xff]  ;;  %v375_v45 = vld [vmem:[#allocation2 + $0x8] sm:$0xff]  ;;  %v380_v57 = vld [vmem:[#allocation2 + $0x30] sm:$0xff] }
  0x39   : > { %v383_v46 = vld [vmem:[#allocation2 + $0x48] sm:$0xff]  ;;  %v388_v58 = vld [vmem:[#allocation2 + $0x70] sm:$0xff]  ;;  %v378_v59 = vld [vmem:[#allocation2 + $0x20] sm:$0xff] }
  0x3a   : > { %v386_v60 = vld [vmem:[#allocation2 + $0x60] sm:$0xff]  ;;  %v381_v63 = vld [vmem:[#allocation2 + $0x38] sm:$0xff]  ;;  %v379_v5 = vld [vmem:[#allocation2 + $0x28] sm:$0xff] }
  0x3b   : > { %1029 = vmatpush3.bf16.msra.mxu0 %v1115_v19  ;;  %1066 = vmatpush3.bf16.msra.mxu1 %v1115_v19  ;;  %v389_v0 = vld [vmem:[#allocation2 + $0x78] sm:$0xff]  ;;  %v387_v6 = vld [vmem:[#allocation2 + $0x68] sm:$0xff]  ;;  %v924_v19 = vld [vmem:[%s1324_s2] ss:$0 sm:$0xff] (!%p923_p11) }
  0x3c   : > { %1030 = vmatprep.subr.bf16.mxu0 %v1116_v20  ;;  %1059 = vmatprep.subr.bf16.mxu1 %v1116_v20 }
  0x3f   : > { %1031 = vmatpush3.bf16.msra.mxu0 %v1116_v20  ;;  %1067 = vmatpush3.bf16.msra.mxu1 %v1116_v20 }
  0x40   : > { %1032 = vmatprep.subr.bf16.mxu0 %v1117_v23  ;;  %1060 = vmatprep.subr.bf16.mxu1 %v1117_v23 }
  0x43   : > { %1033 = vmatpush3.bf16.msra.mxu0 %v1117_v23  ;;  %1068 = vmatpush3.bf16.msra.mxu1 %v1117_v23 }
  0x44   : > { %1034 = vmatprep.subr.bf16.mxu0 %v1118_v24  ;;  %1061 = vmatprep.subr.bf16.mxu1 %v1118_v24 }
  0x47   : > { %1035 = vmatpush3.bf16.msra.mxu0 %v1118_v24  ;;  %1069 = vmatpush3.bf16.msra.mxu1 %v1118_v24 }
  0x48   : > { %1036 = vmatprep.subr.bf16.mxu0 %v1119_v25  ;;  %1062 = vmatprep.subr.bf16.mxu1 %v1119_v25 }
  0x4b   : > { %1037 = vmatpush3.bf16.msra.mxu0 %v1119_v25  ;;  %1070 = vmatpush3.bf16.msra.mxu1 %v1119_v25 }
  0x4c   : > { %1038 = vmatprep.subr.bf16.mxu0 %v1120_v26  ;;  %1063 = vmatprep.subr.bf16.mxu1 %v1120_v26 }
  0x4f   : > { %1039 = vmatpush3.bf16.msra.mxu0 %v1120_v26  ;;  %1071 = vmatpush3.bf16.msra.mxu1 %v1120_v26 }
  0x52   : > { %1041 = vmatmul.mubr.bf16.vlgmr.msra.gmra.mrb[0].mxu0 %v1123_v27  ;;  %1049 = vmatmul.mubr.bf16.vlgmr.msra.gmra.mrb[0].mxu1 %v1124_v28 }
  0x53   : > { %1044 = vmatprep.mubr.bf16.mxu0 %v1125_v29  ;;  %1052 = vmatprep.mubr.bf16.mxu1 %v1126_v30 }
  0x5a   : > { %1045 = vmatmul.mubr.bf16.gmra.mrb[4].mxu0 %v1127_v31  ;;  %1053 = vmatmul.mubr.bf16.gmra.mrb[4].mxu1 %v1128_v32 }
 0x125   : > { %v1042_v37 = vpop.f32.mrb[0].mxu0  ;;  %v1050_v38 = vpop.f32.mrb[0].mxu1 }
 0x126   : > { %v617_v41 = vadd.f32 %v1042_v37, %v376_v33  ;;  %v625_v42 = vadd.f32 %v1050_v38, %v384_v34  ;;  %v552_v43 = vpop.f32.mrb[1].mxu0  ;;  %v584_v44 = vpop.f32.mrb[1].mxu1 }
 0x127   : > { %v615_v47 = vadd.f32 %v552_v43, %v374_v35  ;;  %v623_v48 = vadd.f32 %v584_v44, %v382_v36  ;;  %v1043_v49 = vpop.f32.mrb[2].mxu0  ;;  %v1051_v50 = vpop.f32.mrb[2].mxu1 }
 0x128   : > { %633 = vst [vmem:[#allocation2 + $0x10] sm:$0xff] %v617_v41  ;;  %641 = vst [vmem:[#allocation2 + $0x50] sm:$0xff] %v625_v42  ;;  %v618_v51 = vadd.f32 %v1043_v49, %v377_v39  ;;  %v626_v52 = vadd.f32 %v1051_v50, %v385_v40  ;;  %v555_v53 = vpop.f32.mrb[3].mxu0  ;;  %v587_v54 = vpop.f32.mrb[3].mxu1 }
 0x129   : > { %631 = vst [vmem:[#allocation2] sm:$0xff] %v615_v47  ;;  %639 = vst [vmem:[#allocation2 + $0x40] sm:$0xff] %v623_v48  ;;  %v616_v55 = vadd.f32 %v555_v53, %v375_v45  ;;  %v624_v56 = vadd.f32 %v587_v54, %v383_v46 }
 0x12a   : > { %634 = vst [vmem:[#allocation2 + $0x18] sm:$0xff] %v618_v51  ;;  %642 = vst [vmem:[#allocation2 + $0x58] sm:$0xff] %v626_v52 }
 0x12b   : > { %632 = vst [vmem:[#allocation2 + $0x8] sm:$0xff] %v616_v55  ;;  %640 = vst [vmem:[#allocation2 + $0x48] sm:$0xff] %v624_v56 }
 0x12d   : > { %v1046_v61 = vpop.f32.mrb[4].mxu0  ;;  %v1054_v62 = vpop.f32.mrb[4].mxu1  ;;  %650 = sbr.rel (%p923_p11) target bundleno = 323 (0x143), region = 81 }
 0x12e   : > { %v621_v1 = vadd.f32 %v1046_v61, %v380_v57  ;;  %v629_v2 = vadd.f32 %v1054_v62, %v388_v58  ;;  %v568_v3 = vpop.f32.mrb[5].mxu0  ;;  %v600_v4 = vpop.f32.mrb[5].mxu1 }
 0x12f   : > { %v619_v7 = vadd.f32 %v568_v3, %v378_v59  ;;  %v627_v8 = vadd.f32 %v600_v4, %v386_v60  ;;  %v1047_v9 = vpop.f32.mrb[6].mxu0  ;;  %v1055_v10 = vpop.f32.mrb[6].mxu1  ;;  %v653_v22 = vld [vmem:[#allocation2 + $0x10] sm:$0xff] (!%p923_p11) }
 0x130   : > { %637 = vst [vmem:[#allocation2 + $0x30] sm:$0xff] %v621_v1  ;;  %645 = vst [vmem:[#allocation2 + $0x70] sm:$0xff] %v629_v2  ;;  %v622_v11 = vadd.f32 %v1047_v9, %v381_v63  ;;  %v630_v12 = vadd.f32 %v1055_v10, %v389_v0  ;;  %v571_v13 = vpop.f32.mrb[7].mxu0  ;;  %v603_v14 = vpop.f32.mrb[7].mxu1  ;;  %v651_v17 = vld [vmem:[#allocation2] sm:$0xff] (!%p923_p11)  ;;  %v676_v25 = vadd.f32 (!%p923_p11), %v924_v19, %v653_v22  ;;  %v661_v37 = vld [vmem:[#allocation2 + $0x50] sm:$0xff] (!%p923_p11) }
 0x131   : > { %635 = vst [vmem:[#allocation2 + $0x20] sm:$0xff] %v619_v7  ;;  %643 = vst [vmem:[#allocation2 + $0x60] sm:$0xff] %v627_v8  ;;  %v620_v15 = vadd.f32 %v571_v13, %v379_v5  ;;  %v628_v16 = vadd.f32 %v603_v14, %v387_v6  ;;  %v674_v20 = vadd.f32 (!%p923_p11), %v924_v19, %v651_v17  ;;  %v654_v23 = vld [vmem:[#allocation2 + $0x18] sm:$0xff] (!%p923_p11)  ;;  %v659_v35 = vld [vmem:[#allocation2 + $0x40] sm:$0xff] (!%p923_p11) }
 0x132   : > { %638 = vst [vmem:[#allocation2 + $0x38] sm:$0xff] %v622_v11  ;;  %646 = vst [vmem:[#allocation2 + $0x78] sm:$0xff] %v630_v12  ;;  %v652_v18 = vld [vmem:[#allocation2 + $0x8] sm:$0xff] (!%p923_p11)  ;;  %v677_v26 = vadd.f32 (!%p923_p11), %v924_v19, %v654_v23  ;;  %v692_v38 = vmax.f32 (!%p923_p11), %v676_v25, 0.0  ;;  %v662_v42 = vld [vmem:[#allocation2 + $0x58] sm:$0xff] (!%p923_p11)  ;;  %v682_v47 = vadd.f32 (!%p923_p11), %v924_v19, %v659_v35  ;;  %v684_v52 = vadd.f32 (!%p923_p11), %v924_v19, %v661_v37 }
 0x133   : > { %636 = vst [vmem:[#allocation2 + $0x28] sm:$0xff] %v620_v15  ;;  %644 = vst [vmem:[#allocation2 + $0x68] sm:$0xff] %v628_v16  ;;  %v675_v21 = vadd.f32 (!%p923_p11), %v924_v19, %v652_v18  ;;  %v690_v31 = vmax.f32 (!%p923_p11), %v674_v20, 0.0  ;;  %v660_v36 = vld [vmem:[#allocation2 + $0x48] sm:$0xff] (!%p923_p11)  ;;  %v685_v57 = vadd.f32 (!%p923_p11), %v924_v19, %v662_v42 }
 0x134   : > { %v693_v39 = vmax.f32 %v677_v26, 0.0  ;;  %v683_v51 = vadd.f32 %v924_v19, %v660_v36  ;;  %v698_v56 = vmax.f32 %v682_v47, 0.0  ;;  %v700_v61 = vmax.f32 %v684_v52, 0.0 }
 0x135   : > { %v691_v32 = vmax.f32 %v675_v21, 0.0  ;;  %v701_v63 = vmax.f32 %v685_v57, 0.0 }
 0x136   : > { %v969_v49 = vpack.c.bf16 %v693_v39, %v692_v38  ;;  %v699_v60 = vmax.f32 %v683_v51, 0.0 }
 0x137   : > { %v657_v29 = vld [vmem:[#allocation2 + $0x30] sm:$0xff]  ;;  %v964_v44 = vpack.c.bf16 %v691_v32, %v690_v31  ;;  %v989_v5 = vpack.c.bf16 %v701_v63, %v700_v61 }
 0x138   : > { %v655_v24 = vld [vmem:[#allocation2 + $0x20] sm:$0xff]  ;;  %v680_v34 = vadd.f32 %v924_v19, %v657_v29  ;;  %v665_v53 = vld [vmem:[#allocation2 + $0x70] sm:$0xff]  ;;  %1001 = vst [vmem:[%s1325_s3 + $0x8] sm:$0xff] %v969_v49   ;;  %v984_v3 = vpack.c.bf16 %v699_v60, %v698_v56 }
 0x139   : > { %v678_v28 = vadd.f32 %v924_v19, %v655_v24  ;;  %v658_v30 = vld [vmem:[#allocation2 + $0x38] sm:$0xff]  ;;  %v663_v43 = vld [vmem:[#allocation2 + $0x60] sm:$0xff]  ;;  %965 = vst [vmem:[%s1325_s3] sm:$0xff] %v964_v44   ;;  %v688_v1 = vadd.f32 %v924_v19, %v665_v53  ;;  %1005 = vst [vmem:[%s1325_s3 + $0x28] sm:$0xff] %v989_v5  }
 0x13a   : > { %v656_v27 = vld [vmem:[#allocation2 + $0x28] sm:$0xff]  ;;  %v681_v41 = vadd.f32 %v924_v19, %v658_v30  ;;  %v696_v46 = vmax.f32 %v680_v34, 0.0  ;;  %v666_v54 = vld [vmem:[#allocation2 + $0x78] sm:$0xff]  ;;  %v686_v58 = vadd.f32 %v924_v19, %v663_v43  ;;  %1004 = vst [vmem:[%s1325_s3 + $0x20] sm:$0xff] %v984_v3  }
 0x13b   : > { %v679_v33 = vadd.f32 %v924_v19, %v656_v27  ;;  %v694_v40 = vmax.f32 %v678_v28, 0.0  ;;  %v664_v48 = vld [vmem:[#allocation2 + $0x68] sm:$0xff]  ;;  %v689_v2 = vadd.f32 %v924_v19, %v666_v54  ;;  %v704_v6 = vmax.f32 %v688_v1, 0.0 }
 0x13c   : > { %v697_v50 = vmax.f32 %v681_v41, 0.0  ;;  %v687_v62 = vadd.f32 %v924_v19, %v664_v48  ;;  %v702_v0 = vmax.f32 %v686_v58, 0.0 }
 0x13d   : > { %v695_v45 = vmax.f32 %v679_v33, 0.0  ;;  %v705_v7 = vmax.f32 %v689_v2, 0.0 }
 0x13e   : > { %v979_v59 = vpack.c.bf16 %v697_v50, %v696_v46  ;;  %v703_v4 = vmax.f32 %v687_v62, 0.0 }
 0x13f   : > { %v974_v55 = vpack.c.bf16 %v695_v45, %v694_v40  ;;  %v999_v9 = vpack.c.bf16 %v705_v7, %v704_v6 }
 0x140   : > { %1003 = vst [vmem:[%s1325_s3 + $0x18] sm:$0xff] %v979_v59   ;;  %v994_v8 = vpack.c.bf16 %v703_v4, %v702_v0 }
 0x141   : > { %1002 = vst [vmem:[%s1325_s3 + $0x10] sm:$0xff] %v974_v55   ;;  %1007 = vst [vmem:[%s1325_s3 + $0x38] sm:$0xff] %v999_v9  }
 0x142   : > { %1006 = vst [vmem:[%s1325_s3 + $0x30] sm:$0xff] %v994_v8  }
 0x143 PF: > { %s13_s16 = sadd.s32 1, %s1167_s16   ;;  %s1326_s12 = smov %s1155_s13 }
 0x144   : > { %p10_p12 = scmp.ge.s32.totalorder %s13_s16, 7   ;;  %s1327_s13 = smov %s1225_s20 }
 0x145   : > { %s1328_s14 = smov %s1163_s15  ;;  %s1329_s15 = smov %s1331_s17 }
 0x146   :  { %12 = sbr.rel (!%p10_p12) target bundleno = 3 (0x3), region = 122 }

// kernel: gaze3inputs_forward.29
= control target key start
LH: loop header
LB: loop body
LE: loop exit
PB: predicated region body
PF: predicated region fallthrough
CT: control target
= control target key end

     0   :  { %s796_s12 = smov 0   ;;  %s798_s13 = smov 0   ;;  %s889_s0 = inlined_call_operand.vmem [shape: bf16[32,640], index: 0, kind: input, shape index: {}]   ;;  %s890_s1 = inlined_call_operand.vmem [shape: bf16[640,128], index: 1, kind: input, shape index: {}]   ;;  %s891_s2 = inlined_call_operand.vmem [shape: f32[1,128], index: 2, kind: input, shape index: {}]   ;;  %s892_s3 = inlined_call_operand.vmem [shape: bf16[32,128], index: 3, kind: output, shape index: {}]  }
   0x1   :  { %s800_s14 = smov 0   ;;  %s802_s15 = smov 0  }
   0x2   :  { %s804_s16 = smov 0  }
   0x3 LB: > { %s25_s17 = sadd.s32 1, %s769_s15  ;;  %p48_p1 = scmp.ne.s32.totalorder %s761_s13, %s757_s12  ;;  %s773_s16 = sphi %s804_s16, %s13_s16   ;;  %s769_s15 = sphi %s802_s15, %s896_s15   ;;  %s765_s14 = sphi %s800_s14, %s895_s14   ;;  %s761_s13 = sphi %s798_s13, %s894_s13   ;;  %s757_s12 = sphi %s796_s12, %s893_s12  }
   0x4   : > { %p26_p0 = scmp.ge.s32.totalorder %s25_s17, 5  ;;  %p49_p2 = scmp.eq.s32.totalorder %s773_s16, 0 }
   0x5   : > { %s41_s19 = sadd.s32 1, %s761_s13  ;;  %p611_p5 = scmp.ge.s32.totalorder %s773_s16, 5 }
   0x6   : > { %s898_s17 = smov (%p26_p0, %s25_s17), 0  ;;  %p50_p3 = por %p49_p2, %p48_p1 }
   0x7   : > { %s37_s18 = ssub.s32 %s769_s15, %s898_s17  ;;  %162 = sbr.rel (%p611_p5) target bundleno = 21 (0x15), region = 20 }
   0x8   : > { %p39_p4 = scmp.eq.s32.totalorder %s37_s18, 0 }
   0xa   : > { %s831_s20 = scalar_select %p39_p4, %s761_s13, %s41_s19  }
   0xe   : > { %165 = sbr.rel (!%p50_p3) target bundleno = 21 (0x15), region = 24  ;;  %s167_s21 = sand.u32 (%p50_p3), 1, %s761_s13  }
   0xf   : > { %s613_s22 = sshll.u32 (%p50_p3), %s769_s15, 2  ;;  %s612_s23 = sshll.u32 (%p50_p3), %s167_s21, 4 }
  0x10   : > { %s174_s26 = scalar_lea.vmem (%p50_p3), %s889_s0, %s613_s22  ;;  %s169_s27 = scalar_lea.vmem (%p50_p3), [#allocation3], %s612_s23 }
  0x11   : > { %v190_v0 = vld [vmem:[%s174_s26] sm:$0xf] (%p50_p3)  ;;  %v192_v1 = vld [vmem:[%s174_s26 + $0x14] sm:$0xf] (%p50_p3)  ;;  %v194_v2 = vld [vmem:[%s174_s26 + $0x28] sm:$0xf] (%p50_p3) }
  0x12   : > { %191 = vst [vmem:[%s169_s27] sm:$0xf] (%p50_p3), %v190_v0  ;;  %193 = vst [vmem:[%s169_s27 + $0x4] sm:$0xf] (%p50_p3), %v192_v1  ;;  %v196_v3 = vld [vmem:[%s174_s26 + $0x3c] sm:$0xf] (%p50_p3) }
  0x13   : > { %195 = vst [vmem:[%s169_s27 + $0x8] sm:$0xf] (%p50_p3), %v194_v2  ;;  %197 = vst [vmem:[%s169_s27 + $0xc] sm:$0xf] (%p50_p3), %v196_v3 }
  0x15 PF: > { %p614_p6 = scmp.ge.s32.totalorder %s773_s16, 1  ;;  %p239_p7 = scmp.lt.s32.totalorder %s773_s16, 6 }
  0x17   : > { %p240_p8 = pnand %p614_p6, %p239_p7 }
  0x18   : > { %s246_s28 = sand.u32 (!%p240_p8), 1, %s757_s12   ;;  %s616_s29 = sshll.u32 (!%p240_p8), %s765_s14, 4 }
  0x19   : > { %243 = sbr.rel (%p240_p8) target bundleno = 304 (0x130), region = 69  ;;  %s843_s30 = sshll.u32 (!%p240_p8), %s246_s28, 4 }
  0x1a   : > { %p285_p9 = scmp.lt.s32.totalorder (!%p240_p8), %s616_s29, 79  ;;  %s248_s8 = scalar_lea.vmem (!%p240_p8), [#allocation3], %s843_s30 }
  0x1b   : > { %p618_p10 = scmp.ne.s32.totalorder (!%p240_p8), %s765_s14, 0 }
  0x20   : > { %s900_s29 = smov (!%p285_p9, %s616_s29), 79  ;;  %309 = sbr.rel (%p618_p10) target bundleno = 39 (0x27), region = 77 }
  0x21   : > { %s617_s4 = sshll.u32 %s900_s29, 2  ;;  %v775_v4 = vmov (!%p618_p10), 0.0  }
  0x22   : > { %s848_s7 = scalar_lea.vmem %s890_s1, %s617_s4  ;;  %310 = vst [vmem:[#allocation2] sm:$0xff] (!%p618_p10), %v775_v4  ;;  %311 = vst [vmem:[#allocation2 + $0x8] sm:$0xff] (!%p618_p10), %v775_v4 }
  0x23   : > { %312 = vst [vmem:[#allocation2 + $0x10] sm:$0xff] (!%p618_p10), %v775_v4  ;;  %313 = vst [vmem:[#allocation2 + $0x18] sm:$0xff] (!%p618_p10), %v775_v4 }
  0x27 PF: > { %v725_v5 = vld [vmem:[%s848_s7] sm:$0xff]   ;;  %v726_v6 = vld [vmem:[%s848_s7 + $0x8] sm:$0xff]   ;;  %v727_v7 = vld [vmem:[%s848_s7 + $0x10] sm:$0xff]   ;;  %p629_p11 = scmp.ne.s32.totalorder %s765_s14, 4 }
  0x28   : > { %664 = vmatprep.subr.bf16.mxu0 %v725_v5  ;;  %v728_v8 = vld [vmem:[%s848_s7 + $0x18] sm:$0xff]   ;;  %v733_v9 = vld [vmem:[%s248_s8] sm:$0xff]   ;;  %v730_v11 = vld [vmem:[%s848_s7 + $0x28] sm:$0xff]  }
  0x29   : > { %665 = vmatpush3.bf16.msra.mxu0 %v725_v5  ;;  %680 = vmatprep.mubr.bf16.mxu0 %v733_v9  ;;  %v729_v10 = vld [vmem:[%s848_s7 + $0x20] sm:$0xff]   ;;  %v731_v12 = vld [vmem:[%s848_s7 + $0x30] sm:$0xff]   ;;  %v732_v13 = vld [vmem:[%s848_s7 + $0x38] sm:$0xff]  }
  0x2a   : > { %666 = vmatprep.subr.bf16.mxu0 %v726_v6  ;;  %v734_v14 = vld [vmem:[%s248_s8 + $0x8] sm:$0xff]   ;;  %v316_v15 = vld [vmem:[#allocation2 + $0x10] sm:$0xff]  ;;  %v314_v16 = vld [vmem:[#allocation2] sm:$0xff] }
  0x2b   : > { %v317_v18 = vld [vmem:[#allocation2 + $0x18] sm:$0xff]  ;;  %v315_v21 = vld [vmem:[#allocation2 + $0x8] sm:$0xff]  ;;  %v630_v29 = vld [vmem:[%s891_s2] ss:$0 sm:$0xff] (!%p629_p11) }
  0x2d   : > { %667 = vmatpush3.bf16.msra.mxu0 %v726_v6 }
  0x2e   : > { %668 = vmatprep.subr.bf16.mxu0 %v727_v7 }
  0x31   : > { %669 = vmatpush3.bf16.msra.mxu0 %v727_v7 }
  0x32   : > { %670 = vmatprep.subr.bf16.mxu0 %v728_v8 }
  0x35   : > { %671 = vmatpush3.bf16.msra.mxu0 %v728_v8 }
  0x36   : > { %672 = vmatprep.subr.bf16.mxu0 %v729_v10 }
  0x39   : > { %673 = vmatpush3.bf16.msra.mxu0 %v729_v10 }
  0x3a   : > { %674 = vmatprep.subr.bf16.mxu0 %v730_v11 }
  0x3d   : > { %675 = vmatpush3.bf16.msra.mxu0 %v730_v11 }
  0x3e   : > { %676 = vmatprep.subr.bf16.mxu0 %v731_v12 }
  0x41   : > { %677 = vmatpush3.bf16.msra.mxu0 %v731_v12 }
  0x42   : > { %678 = vmatprep.subr.bf16.mxu0 %v732_v13 }
  0x45   : > { %679 = vmatpush3.bf16.msra.mxu0 %v732_v13 }
  0x48   : > { %681 = vmatmul.mubr.bf16.vlgmr.msra.gmra.mrb[0].mxu0 %v734_v14 }
 0x11b   : > { %v682_v17 = vpop.f32.mrb[0].mxu0  ;;  %458 = sbr.rel (%p629_p11) target bundleno = 304 (0x130), region = 81 }
 0x11c   : > { %v449_v19 = vadd.f32 %v682_v17, %v316_v15  ;;  %v432_v20 = vpop.f32.mrb[1].mxu0 }
 0x11d   : > { %v447_v22 = vadd.f32 %v432_v20, %v314_v16  ;;  %v683_v23 = vpop.f32.mrb[2].mxu0 }
 0x11e   : > { %453 = vst [vmem:[#allocation2 + $0x10] sm:$0xff] %v449_v19  ;;  %v450_v24 = vadd.f32 %v683_v23, %v317_v18  ;;  %v435_v25 = vpop.f32.mrb[3].mxu0 }
 0x11f   : > { %451 = vst [vmem:[#allocation2] sm:$0xff] %v447_v22  ;;  %v448_v26 = vadd.f32 %v435_v25, %v315_v21 }
 0x120   : > { %454 = vst [vmem:[#allocation2 + $0x18] sm:$0xff] %v450_v24 }
 0x121   : > { %452 = vst [vmem:[#allocation2 + $0x8] sm:$0xff] %v448_v26 }
 0x125   : > { %v461_v32 = vld [vmem:[#allocation2 + $0x10] sm:$0xff] }
 0x126   : > { %v459_v27 = vld [vmem:[#allocation2] sm:$0xff]  ;;  %v472_v34 = vadd.f32 %v630_v29, %v461_v32 }
 0x127   : > { %v470_v30 = vadd.f32 %v630_v29, %v459_v27  ;;  %v462_v33 = vld [vmem:[#allocation2 + $0x18] sm:$0xff] }
 0x128   : > { %v460_v28 = vld [vmem:[#allocation2 + $0x8] sm:$0xff]  ;;  %v473_v35 = vadd.f32 %v630_v29, %v462_v33  ;;  %v476_v38 = vmax.f32 %v472_v34, 0.0 }
 0x129   : > { %v471_v31 = vadd.f32 %v630_v29, %v460_v28  ;;  %v474_v36 = vmax.f32 %v470_v30, 0.0 }
 0x12a   : > { %v477_v39 = vmax.f32 %v473_v35, 0.0 }
 0x12b   : > { %v475_v37 = vmax.f32 %v471_v31, 0.0 }
 0x12c   : > { %v651_v41 = vpack.c.bf16 %v477_v39, %v476_v38 }
 0x12d   : > { %v646_v40 = vpack.c.bf16 %v475_v37, %v474_v36 }
 0x12e   : > { %653 = vst [vmem:[%s892_s3 + $0x8] sm:$0xff] %v651_v41  }
 0x12f   : > { %647 = vst [vmem:[%s892_s3] sm:$0xff] %v646_v40  }
 0x130 PF: > { %s13_s16 = sadd.s32 1, %s773_s16   ;;  %s893_s12 = smov %s761_s13 }
 0x131   : > { %p10_p12 = scmp.ge.s32.totalorder %s13_s16, 7   ;;  %s894_s13 = smov %s831_s20 }
 0x132   : > { %s895_s14 = smov %s769_s15  ;;  %s896_s15 = smov %s898_s17 }
 0x133   :  { %12 = sbr.rel (!%p10_p12) target bundleno = 3 (0x3), region = 122 }

// kernel: gaze3inputs_forward.28
= control target key start
LH: loop header
LB: loop body
LE: loop exit
PB: predicated region body
PF: predicated region fallthrough
CT: control target
= control target key end

     0   :  { %s335_s1 = inlined_call_operand.vmem [shape: bf16[128,128], index: 1, kind: input, shape index: {}]   ;;  %s336_s0 = inlined_call_operand.vmem [shape: bf16[32,128], index: 0, kind: input, shape index: {}]   ;;  %s337_s2 = inlined_call_operand.vmem [shape: f32[1,128], index: 2, kind: input, shape index: {}]   ;;  %s338_s3 = inlined_call_operand.vmem [shape: bf16[32,128], index: 3, kind: output, shape index: {}]  }
   0x1   :  { %v266_v0 = vld [vmem:[%s335_s1] sm:$0xff]   ;;  %v267_v1 = vld [vmem:[%s335_s1 + $0x8] sm:$0xff]   ;;  %v268_v2 = vld [vmem:[%s335_s1 + $0x10] sm:$0xff]  }
   0x2   :  { %246 = vmatprep.subr.bf16.mxu0 %v266_v0  ;;  %v269_v3 = vld [vmem:[%s335_s1 + $0x18] sm:$0xff]   ;;  %v274_v4 = vld [vmem:[%s336_s0] sm:$0xff]   ;;  %v271_v6 = vld [vmem:[%s335_s1 + $0x28] sm:$0xff]  }
   0x3   :  { %247 = vmatpush3.bf16.msra.mxu0 %v266_v0  ;;  %262 = vmatprep.mubr.bf16.mxu0 %v274_v4  ;;  %v270_v5 = vld [vmem:[%s335_s1 + $0x20] sm:$0xff]   ;;  %v272_v7 = vld [vmem:[%s335_s1 + $0x30] sm:$0xff]   ;;  %v273_v8 = vld [vmem:[%s335_s1 + $0x38] sm:$0xff]  }
   0x4   :  { %248 = vmatprep.subr.bf16.mxu0 %v267_v1  ;;  %v275_v9 = vld [vmem:[%s336_s0 + $0x8] sm:$0xff]   ;;  %v216_v11 = vld [vmem:[%s337_s2] ss:$0 sm:$0xff] }
   0x7   :  { %249 = vmatpush3.bf16.msra.mxu0 %v267_v1 }
   0x8   :  { %250 = vmatprep.subr.bf16.mxu0 %v268_v2 }
   0xb   :  { %251 = vmatpush3.bf16.msra.mxu0 %v268_v2 }
   0xc   :  { %252 = vmatprep.subr.bf16.mxu0 %v269_v3 }
   0xf   :  { %253 = vmatpush3.bf16.msra.mxu0 %v269_v3 }
  0x10   :  { %254 = vmatprep.subr.bf16.mxu0 %v270_v5 }
  0x13   :  { %255 = vmatpush3.bf16.msra.mxu0 %v270_v5 }
  0x14   :  { %256 = vmatprep.subr.bf16.mxu0 %v271_v6 }
  0x17   :  { %257 = vmatpush3.bf16.msra.mxu0 %v271_v6 }
  0x18   :  { %258 = vmatprep.subr.bf16.mxu0 %v272_v7 }
  0x1b   :  { %259 = vmatpush3.bf16.msra.mxu0 %v272_v7 }
  0x1c   :  { %260 = vmatprep.subr.bf16.mxu0 %v273_v8 }
  0x1f   :  { %261 = vmatpush3.bf16.msra.mxu0 %v273_v8 }
  0x22   :  { %263 = vmatmul.mubr.bf16.vlgmr.msra.gmra.mrb[0].mxu0 %v275_v9 }
  0xf5   :  { %v264_v10 = vpop.f32.mrb[0].mxu0 }
  0xf6   :  { %v141_v12 = vpop.f32.mrb[1].mxu0  ;;  %v180_v14 = vadd.f32 %v264_v10, %v216_v11 }
  0xf7   :  { %v265_v13 = vpop.f32.mrb[2].mxu0  ;;  %v178_v17 = vadd.f32 %v216_v11, %v141_v12 }
  0xf8   :  { %v181_v15 = vadd.f32 %v265_v13, %v216_v11  ;;  %v144_v16 = vpop.f32.mrb[3].mxu0 }
  0xf9   :  { %v179_v18 = vadd.f32 %v216_v11, %v144_v16 }
  0xfa   :  { %v233_v19 = vpack.c.bf16 %v181_v15, %v180_v14 }
  0xfb   :  { %v228_v20 = vpack.c.bf16 %v179_v18, %v178_v17 }
  0xfc   :  { %235 = vst [vmem:[%s338_s3 + $0x8] sm:$0xff] %v233_v19  }
  0xfd   :  { %229 = vst [vmem:[%s338_s3] sm:$0xff] %v228_v20  }

// kernel: gaze3inputs_forward.30
= control target key start
LH: loop header
LB: loop body
LE: loop exit
PB: predicated region body
PF: predicated region fallthrough
CT: control target
= control target key end

     0   :  { %s1176_s15 = smov 0   ;;  %s1178_s16 = smov 0   ;;  %s1292_s0 = inlined_call_operand.vmem [shape: bf16[32,1152], index: 0, kind: input, shape index: {}]   ;;  %s1293_s1 = inlined_call_operand.vmem [shape: bf16[1152,128], index: 1, kind: input, shape index: {}]   ;;  %s1294_s2 = inlined_call_operand.vmem [shape: f32[1,128], index: 2, kind: input, shape index: {}]   ;;  %s1295_s3 = inlined_call_operand.vmem [shape: bf16[32,128], index: 3, kind: input, shape index: {}]   ;;  %s1296_s4 = inlined_call_operand.vmem [shape: bf16[32,128], index: 4, kind: output, shape index: {}]  }
   0x1   :  { %s1180_s17 = smov 0   ;;  %s1182_s18 = smov 0  }
   0x2   :  { %s1184_s19 = smov 0  }
   0x3 LB: > { %s26_s20 = sadd.s32 1, %s1144_s18  ;;  %p49_p1 = scmp.ne.s32.totalorder %s1136_s16, %s1132_s15  ;;  %s1148_s19 = sphi %s1184_s19, %s14_s19   ;;  %s1144_s18 = sphi %s1182_s18, %s1300_s18   ;;  %s1140_s17 = sphi %s1180_s17, %s1299_s17   ;;  %s1136_s16 = sphi %s1178_s16, %s1298_s16   ;;  %s1132_s15 = sphi %s1176_s15, %s1297_s15  }
   0x4   : > { %p27_p0 = scmp.ge.s32.totalorder %s26_s20, 3  ;;  %p50_p2 = scmp.eq.s32.totalorder %s1148_s19, 0 }
   0x5   : > { %s42_s22 = sadd.s32 1, %s1136_s16  ;;  %p899_p5 = scmp.ge.s32.totalorder %s1148_s19, 3 }
   0x6   : > { %s1302_s20 = smov (%p27_p0, %s26_s20), 0  ;;  %p51_p3 = por %p50_p2, %p49_p1 }
   0x7   : > { %s38_s21 = ssub.s32 %s1144_s18, %s1302_s20  ;;  %203 = sbr.rel (%p899_p5) target bundleno = 23 (0x17), region = 24 }
   0x8   : > { %p40_p4 = scmp.eq.s32.totalorder %s38_s21, 0 }
   0xa   : > { %s1211_s23 = scalar_select %p40_p4, %s1136_s16, %s42_s22  }
   0xe   : > { %206 = sbr.rel (!%p51_p3) target bundleno = 23 (0x17), region = 28  ;;  %s208_s24 = sand.u32 (%p51_p3), 1, %s1136_s16  }
   0xf   : > { %s952_s25 = smul.u32 (%p51_p3), 12, %s1144_s18 }
  0x10   : > { %s1035_s26 = smul.u32 (%p51_p3), 48, %s208_s24 }
  0x11   : > { %s216_s29 = scalar_lea.vmem (%p51_p3), %s1292_s0, %s952_s25 }
  0x12   : > { %v231_v0 = vld [vmem:[%s216_s29] sm:$0xff] (%p51_p3)  ;;  %v235_v2 = vld [vmem:[%s216_s29 + $0x48] sm:$0xff] (%p51_p3)  ;;  %s210_s30 = scalar_lea.vmem (%p51_p3), [#allocation3], %s1035_s26  ;;  %v905_v6 = vld [vmem:[%s216_s29 + $0x50] sm:$0xf] (%p51_p3) }
  0x13   : > { %v233_v1 = vld [vmem:[%s216_s29 + $0x24] sm:$0xff] (%p51_p3)  ;;  %232 = vst [vmem:[%s210_s30] sm:$0xff] (%p51_p3), %v231_v0  ;;  %236 = vst [vmem:[%s210_s30 + $0x18] sm:$0xff] (%p51_p3), %v235_v2  ;;  %v237_v3 = vld [vmem:[%s216_s29 + $0x6c] sm:$0xff] (%p51_p3) }
  0x14   : > { %234 = vst [vmem:[%s210_s30 + $0xc] sm:$0xff] (%p51_p3), %v233_v1  ;;  %v901_v4 = vld [vmem:[%s216_s29 + $0x8] sm:$0xf] (%p51_p3)  ;;  %v903_v5 = vld [vmem:[%s216_s29 + $0x2c] sm:$0xf] (%p51_p3)  ;;  %238 = vst [vmem:[%s210_s30 + $0x24] sm:$0xff] (%p51_p3), %v237_v3 }
  0x15   : > { %902 = vst [vmem:[%s210_s30 + $0x8] sm:$0xf] %v901_v4  ;;  %904 = vst [vmem:[%s210_s30 + $0x14] sm:$0xf] %v903_v5  ;;  %v907_v7 = vld [vmem:[%s216_s29 + $0x74] sm:$0xf] }
  0x16   : > { %906 = vst [vmem:[%s210_s30 + $0x20] sm:$0xf] %v905_v6  ;;  %908 = vst [vmem:[%s210_s30 + $0x2c] sm:$0xf] %v907_v7 }
  0x17 PF: > { %p909_p6 = scmp.ge.s32.totalorder %s1148_s19, 1  ;;  %p270_p7 = scmp.lt.s32.totalorder %s1148_s19, 4 }
  0x19   : > { %p271_p8 = pnand %p909_p6, %p270_p7 }
  0x1a   : > { %s277_s5 = sand.u32 (!%p271_p8), 1, %s1132_s15   ;;  %s326_s6 = smul.u32 (!%p271_p8), 48, %s1140_s17 }
  0x1b   : > { %274 = sbr.rel (%p271_p8) target bundleno = 320 (0x140), region = 58  ;;  %p911_p10 = scmp.ne.s32.totalorder (!%p271_p8), %s1140_s17, 0 }
  0x1c   : > { %s1036_s7 = smul.u32 (!%p271_p8), 48, %s277_s5  ;;  %p327_p9 = scmp.lt.s32.totalorder (!%p271_p8), %s326_s6, 143 }
  0x1e   : > { %s1228_s12 = scalar_lea.vmem (!%p271_p8), [#allocation3], %s1036_s7 }
  0x22   : > { %s1304_s6 = smov (!%p327_p9, %s326_s6), 143  ;;  %360 = sbr.rel (%p911_p10) target bundleno = 41 (0x29), region = 66 }
  0x23   : > { %s910_s8 = sshll.u32 %s1304_s6, 2  ;;  %v1150_v8 = vmov (!%p911_p10), 0.0  }
  0x24   : > { %s1226_s11 = scalar_lea.vmem %s1293_s1, %s910_s8  ;;  %361 = vst [vmem:[#allocation2] sm:$0xff] (!%p911_p10), %v1150_v8  ;;  %362 = vst [vmem:[#allocation2 + $0x8] sm:$0xff] (!%p911_p10), %v1150_v8 }
  0x25   : > { %363 = vst [vmem:[#allocation2 + $0x10] sm:$0xff] (!%p911_p10), %v1150_v8  ;;  %364 = vst [vmem:[#allocation2 + $0x18] sm:$0xff] (!%p911_p10), %v1150_v8 }
  0x29 PF: > { %v1078_v9 = vld [vmem:[%s1226_s11 + $0x40] sm:$0xff]   ;;  %v1081_v12 = vld [vmem:[%s1226_s11 + $0x48] sm:$0xff]   ;;  %v1084_v15 = vld [vmem:[%s1226_s11 + $0x50] sm:$0xff]   ;;  %p942_p11 = scmp.ne.s32.totalorder %s1140_s17, 2 }
  0x2a   : > { %v1079_v10 = vld [vmem:[%s1226_s11] sm:$0xff]   ;;  %977 = vmatprep.subr.bf16.mxu0 %v1078_v9  ;;  %v1082_v13 = vld [vmem:[%s1226_s11 + $0x8] sm:$0xff]   ;;  %v1085_v16 = vld [vmem:[%s1226_s11 + $0x10] sm:$0xff]  }
  0x2b   : > { %v1080_v11 = vld [vmem:[%s1226_s11 + $0x80] sm:$0xff]   ;;  %978 = vmatpush3.bf16.msra.mxu0 %v1079_v10  ;;  %v1083_v14 = vld [vmem:[%s1226_s11 + $0x88] sm:$0xff]   ;;  %v1086_v17 = vld [vmem:[%s1226_s11 + $0x90] sm:$0xff]  }
  0x2c   : > { %1015 = vmatprep.subr.bf16.mxu1 %v1080_v11  ;;  %979 = vmatprep.subr.bf16.mxu0 %v1081_v12  ;;  %v1087_v18 = vld [vmem:[%s1226_s11 + $0x58] sm:$0xff]   ;;  %v1090_v21 = vld [vmem:[%s1226_s11 + $0x60] sm:$0xff]   ;;  %v1093_v24 = vld [vmem:[%s1226_s11 + $0x68] sm:$0xff]  }
  0x2d   : > { %1016 = vmatpush3.bf16.msra.mxu1 %v1080_v11  ;;  %v1088_v19 = vld [vmem:[%s1226_s11 + $0x18] sm:$0xff]   ;;  %v1092_v22 = vld [vmem:[%s1226_s11 + $0xa0] sm:$0xff]   ;;  %v1095_v25 = vld [vmem:[%s1226_s11 + $0xa8] sm:$0xff]  }
  0x2e   : > { %1017 = vmatprep.subr.bf16.mxu1 %v1083_v14  ;;  %v1089_v20 = vld [vmem:[%s1226_s11 + $0x98] sm:$0xff]   ;;  %v1091_v23 = vld [vmem:[%s1226_s11 + $0x20] sm:$0xff]   ;;  %v1094_v26 = vld [vmem:[%s1226_s11 + $0x28] sm:$0xff]  }
  0x2f   : > { %980 = vmatpush3.bf16.msra.mxu0 %v1082_v13  ;;  %v1096_v27 = vld [vmem:[%s1226_s11 + $0x70] sm:$0xff]   ;;  %v1099_v30 = vld [vmem:[%s1226_s11 + $0x78] sm:$0xff]   ;;  %v365_v45 = vld [vmem:[#allocation2] sm:$0xff] }
  0x30   : > { %981 = vmatprep.subr.bf16.mxu0 %v1084_v15  ;;  %v1097_v28 = vld [vmem:[%s1226_s11 + $0x30] sm:$0xff]   ;;  %v1101_v31 = vld [vmem:[%s1226_s11 + $0xb8] sm:$0xff]   ;;  %v366_v50 = vld [vmem:[#allocation2 + $0x8] sm:$0xff] }
  0x31   : > { %1018 = vmatpush3.bf16.msra.mxu1 %v1083_v14  ;;  %v1098_v29 = vld [vmem:[%s1226_s11 + $0xb0] sm:$0xff]   ;;  %v1100_v34 = vld [vmem:[%s1226_s11 + $0x38] sm:$0xff]   ;;  %v943_v5 = vld [vmem:[%s1294_s2] ss:$0 sm:$0xff] (!%p942_p11) }
  0x32   : > { %1019 = vmatprep.subr.bf16.mxu1 %v1086_v17  ;;  %v1104_v32 = vld [vmem:[%s1228_s12 + $0x4] ss:$12 sps:$4 sm:$0xff]   ;;  %v1105_v33 = vld [vmem:[%s1228_s12 + $0x8] ss:$12 sps:$4 sm:$0xff]   ;;  %v1102_v35 = vld [vmem:[%s1228_s12] ss:$12 sps:$4 sm:$0xff]  }
  0x33   : > { %982 = vmatpush3.bf16.msra.mxu0 %v1085_v16  ;;  %633 = vmatprep.mubr.bf16.mxu0 %v1104_v32  ;;  %v1107_v36 = vld [vmem:[%s1228_s12 + $0x1c] ss:$12 sps:$4 sm:$0xff]   ;;  %v1106_v37 = vld [vmem:[%s1228_s12 + $0x20] ss:$12 sps:$4 sm:$0xff]   ;;  %v1109_v38 = vld [vmem:[%s1228_s12 + $0x18] ss:$12 sps:$4 sm:$0xff]  }
  0x34   : > { %983 = vmatprep.subr.bf16.mxu0 %v1087_v18  ;;  %1031 = vmatprep.mubr.bf16.mxu1 %v1105_v33  ;;  %v367_v59 = vld [vmem:[#allocation2 + $0x10] sm:$0xff]  ;;  %v368_v63 = vld [vmem:[#allocation2 + $0x18] sm:$0xff]  ;;  %v958_v8 = vld [vmem:[%s1295_s3] sm:$0xff] (!%p942_p11)  }
  0x35   : > { %1020 = vmatpush3.bf16.msra.mxu1 %v1086_v17  ;;  %v959_v11 = vunpack.c.l.bf16 (!%p942_p11), %v958_v8  ;;  %v960_v12 = vunpack.c.h.bf16 (!%p942_p11), %v958_v8  ;;  %v975_v15 = vld [vmem:[%s1295_s3 + $0x8] sm:$0xff] (!%p942_p11)  }
  0x36   : > { %1021 = vmatprep.subr.bf16.mxu1 %v1089_v20  ;;  %v963_v16 = vunpack.c.l.bf16 (!%p942_p11), %v975_v15  ;;  %v964_v17 = vunpack.c.h.bf16 (!%p942_p11), %v975_v15 }
  0x37   : > { %984 = vmatpush3.bf16.msra.mxu0 %v1088_v19 }
  0x38   : > { %985 = vmatprep.subr.bf16.mxu0 %v1090_v21 }
  0x39   : > { %1022 = vmatpush3.bf16.msra.mxu1 %v1089_v20 }
  0x3a   : > { %1023 = vmatprep.subr.bf16.mxu1 %v1092_v22 }
  0x3b   : > { %986 = vmatpush3.bf16.msra.mxu0 %v1091_v23 }
  0x3c   : > { %987 = vmatprep.subr.bf16.mxu0 %v1093_v24 }
  0x3d   : > { %1024 = vmatpush3.bf16.msra.mxu1 %v1092_v22 }
  0x3e   : > { %1025 = vmatprep.subr.bf16.mxu1 %v1095_v25 }
  0x3f   : > { %988 = vmatpush3.bf16.msra.mxu0 %v1094_v26 }
  0x40   : > { %989 = vmatprep.subr.bf16.mxu0 %v1096_v27 }
  0x41   : > { %1026 = vmatpush3.bf16.msra.mxu1 %v1095_v25 }
  0x42   : > { %1027 = vmatprep.subr.bf16.mxu1 %v1098_v29 }
  0x43   : > { %990 = vmatpush3.bf16.msra.mxu0 %v1097_v28 }
  0x44   : > { %991 = vmatprep.subr.bf16.mxu0 %v1099_v30 }
  0x45   : > { %1028 = vmatpush3.bf16.msra.mxu1 %v1098_v29 }
  0x46   : > { %1029 = vmatprep.subr.bf16.mxu1 %v1101_v31 }
  0x47   : > { %992 = vmatpush3.bf16.msra.mxu0 %v1100_v34 }
  0x49   : > { %1030 = vmatpush3.bf16.msra.mxu1 %v1101_v31 }
  0x4a   : > { %634 = vmatmul.mubr.bf16.vlgmr.msra.gmra.mrb[0].mxu0 %v1102_v35 }
  0x4b   : > { %641 = vmatprep.mubr.bf16.mxu0 %v1107_v36 }
  0x4c   : > { %1032 = vmatmul.mubr.bf16.vlgmr.msra.gmra.mrb[0].mxu1 %v1106_v37 }
  0x52   : > { %642 = vmatmul.mubr.bf16.gmra.mrb[4].mxu0 %v1109_v38 }
 0x11d   : > { %v993_v39 = vpop.f32.mrb[0].mxu0 }
 0x11e   : > { %v994_v40 = vpop.f32.mrb[1].mxu0 }
 0x11f   : > { %v995_v41 = vadd.f32 %v994_v40, %v993_v39  ;;  %v996_v42 = vpop.f32.mrb[2].mxu0  ;;  %v1033_v43 = vpop.f32.mrb[0].mxu1 }
 0x120   : > { %v997_v44 = vpop.f32.mrb[3].mxu0  ;;  %v684_v46 = vpop.f32.mrb[1].mxu1 }
 0x121   : > { %v998_v47 = vadd.f32 %v997_v44, %v996_v42  ;;  %v685_v48 = vadd.f32 %v995_v41, %v684_v46  ;;  %v1034_v49 = vpop.f32.mrb[2].mxu1 }
 0x122   : > { %v687_v51 = vpop.f32.mrb[3].mxu1 }
 0x123   : > { %v699_v52 = vadd.f32 %v685_v48, %v365_v45  ;;  %v688_v53 = vadd.f32 %v998_v47, %v687_v51 }
 0x125   : > { %703 = vst [vmem:[#allocation2] sm:$0xff] %v699_v52  ;;  %v700_v54 = vadd.f32 %v688_v53, %v366_v50  ;;  %v999_v55 = vpop.f32.mrb[4].mxu0 }
 0x126   : > { %v1000_v56 = vpop.f32.mrb[5].mxu0 }
 0x127   : > { %704 = vst [vmem:[#allocation2 + $0x8] sm:$0xff] %v700_v54  ;;  %v1001_v57 = vadd.f32 %v1000_v56, %v999_v55  ;;  %v1002_v58 = vpop.f32.mrb[6].mxu0 }
 0x128   : > { %v1003_v60 = vpop.f32.mrb[7].mxu0 }
 0x129   : > { %v693_v61 = vadd.f32 %v1033_v43, %v1001_v57  ;;  %v1004_v62 = vadd.f32 %v1003_v60, %v1002_v58  ;;  %710 = sbr.rel (%p942_p11) target bundleno = 320 (0x140), region = 70 }
 0x12b   : > { %v701_v0 = vadd.f32 %v693_v61, %v367_v59  ;;  %v696_v1 = vadd.f32 %v1034_v49, %v1004_v62 }
 0x12c   : > { %v711_v3 = vld [vmem:[#allocation2] sm:$0xff] (!%p942_p11) }
 0x12d   : > { %705 = vst [vmem:[#allocation2 + $0x10] sm:$0xff] %v701_v0  ;;  %v702_v2 = vadd.f32 %v696_v1, %v368_v63  ;;  %v722_v6 = vadd.f32 (!%p942_p11), %v943_v5, %v711_v3 }
 0x12e   : > { %v712_v4 = vld [vmem:[#allocation2 + $0x8] sm:$0xff] (!%p942_p11) }
 0x12f   : > { %706 = vst [vmem:[#allocation2 + $0x18] sm:$0xff] %v702_v2  ;;  %v723_v7 = vadd.f32 (!%p942_p11), %v943_v5, %v712_v4  ;;  %v734_v18 = vadd.f32 (!%p942_p11), %v959_v11, %v722_v6 }
 0x131   : > { %v735_v19 = vadd.f32 %v960_v12, %v723_v7  ;;  %v738_v22 = vmax.f32 %v734_v18, 0.0 }
 0x133   : > { %v739_v23 = vmax.f32 %v735_v19, 0.0 }
 0x134   : > { %v713_v9 = vld [vmem:[#allocation2 + $0x10] sm:$0xff] }
 0x135   : > { %v724_v13 = vadd.f32 %v943_v5, %v713_v9  ;;  %v968_v26 = vpack.c.bf16 %v739_v23, %v738_v22 }
 0x136   : > { %v714_v10 = vld [vmem:[#allocation2 + $0x18] sm:$0xff] }
 0x137   : > { %v725_v14 = vadd.f32 %v943_v5, %v714_v10  ;;  %v736_v20 = vadd.f32 %v963_v16, %v724_v13  ;;  %969 = vst [vmem:[%s1296_s4] sm:$0xff] %v968_v26  }
 0x139   : > { %v737_v21 = vadd.f32 %v964_v17, %v725_v14  ;;  %v740_v24 = vmax.f32 %v736_v20, 0.0 }
 0x13b   : > { %v741_v25 = vmax.f32 %v737_v21, 0.0 }
 0x13d   : > { %v973_v27 = vpack.c.bf16 %v741_v25, %v740_v24 }
 0x13f   : > { %976 = vst [vmem:[%s1296_s4 + $0x8] sm:$0xff] %v973_v27  }
 0x140 PF: > { %s14_s19 = sadd.s32 1, %s1148_s19   ;;  %s1297_s15 = smov %s1136_s16 }
 0x141   : > { %p11_p12 = scmp.ge.s32.totalorder %s14_s19, 5   ;;  %s1298_s16 = smov %s1211_s23 }
 0x142   : > { %s1299_s17 = smov %s1144_s18  ;;  %s1300_s18 = smov %s1302_s20 }
 0x143   :  { %13 = sbr.rel (!%p11_p12) target bundleno = 3 (0x3), region = 120 }

// kernel: gaze3inputs_forward.32
= control target key start
LH: loop header
LB: loop body
LE: loop exit
PB: predicated region body
PF: predicated region fallthrough
CT: control target
= control target key end

     0   :  { %s1151_s12 = smov 0   ;;  %s1153_s13 = smov 0   ;;  %s1282_s0 = inlined_call_operand.vmem [shape: bf16[16,1152], index: 0, kind: input, shape index: {}]   ;;  %s1283_s1 = inlined_call_operand.vmem [shape: bf16[1152,256], index: 1, kind: input, shape index: {}]   ;;  %s1284_s2 = inlined_call_operand.vmem [shape: f32[1,256], index: 2, kind: input, shape index: {}]   ;;  %s1285_s3 = inlined_call_operand.vmem [shape: bf16[16,256], index: 3, kind: output, shape index: {}]  }
   0x1   :  { %s1155_s14 = smov 0   ;;  %s1157_s15 = smov 0  }
   0x2   :  { %s1159_s16 = smov 0  }
   0x3 LB: > { %s25_s17 = sadd.s32 1, %s1123_s15  ;;  %p48_p1 = scmp.ne.s32.totalorder %s1115_s13, %s1111_s12  ;;  %s1127_s16 = sphi %s1159_s16, %s13_s16   ;;  %s1123_s15 = sphi %s1157_s15, %s1289_s15   ;;  %s1119_s14 = sphi %s1155_s14, %s1288_s14   ;;  %s1115_s13 = sphi %s1153_s13, %s1287_s13   ;;  %s1111_s12 = sphi %s1151_s12, %s1286_s12  }
   0x4   : > { %p26_p0 = scmp.ge.s32.totalorder %s25_s17, 3  ;;  %p49_p2 = scmp.eq.s32.totalorder %s1127_s16, 0 }
   0x5   : > { %s41_s19 = sadd.s32 1, %s1115_s13  ;;  %p893_p5 = scmp.ge.s32.totalorder %s1127_s16, 3 }
   0x6   : > { %s1291_s17 = smov (%p26_p0, %s25_s17), 0  ;;  %p50_p3 = por %p49_p2, %p48_p1 }
   0x7   : > { %s37_s18 = ssub.s32 %s1123_s15, %s1291_s17  ;;  %164 = sbr.rel (%p893_p5) target bundleno = 21 (0x15), region = 20 }
   0x8   : > { %p39_p4 = scmp.eq.s32.totalorder %s37_s18, 0 }
   0xa   : > { %s1186_s20 = scalar_select %p39_p4, %s1115_s13, %s41_s19  }
   0xe   : > { %167 = sbr.rel (!%p50_p3) target bundleno = 21 (0x15), region = 24  ;;  %s169_s21 = sand.u32 (%p50_p3), 1, %s1115_s13  }
   0xf   : > { %s961_s22 = smul.u32 (%p50_p3), 12, %s1123_s15 }
  0x10   : > { %s969_s23 = smul.u32 (%p50_p3), 24, %s169_s21 }
  0x11   : > { %s177_s26 = scalar_lea.vmem (%p50_p3), %s1282_s0, %s961_s22 }
  0x12   : > { %v192_v0 = vld [vmem:[%s177_s26] sm:$0xff] (%p50_p3)  ;;  %v895_v2 = vld [vmem:[%s177_s26 + $0x8] sm:$0xf] (%p50_p3)  ;;  %s171_s27 = scalar_lea.vmem (%p50_p3), [#allocation3], %s969_s23  ;;  %v897_v3 = vld [vmem:[%s177_s26 + $0x2c] sm:$0xf] (%p50_p3) }
  0x13   : > { %v194_v1 = vld [vmem:[%s177_s26 + $0x24] sm:$0xff] (%p50_p3)  ;;  %193 = vst [vmem:[%s171_s27] sm:$0xff] (%p50_p3), %v192_v0  ;;  %896 = vst [vmem:[%s171_s27 + $0x8] sm:$0xf] (%p50_p3), %v895_v2 }
  0x14   : > { %195 = vst [vmem:[%s171_s27 + $0xc] sm:$0xff] (%p50_p3), %v194_v1  ;;  %898 = vst [vmem:[%s171_s27 + $0x14] sm:$0xf] (%p50_p3), %v897_v3 }
  0x15 PF: > { %p899_p6 = scmp.ge.s32.totalorder %s1127_s16, 1  ;;  %p226_p7 = scmp.lt.s32.totalorder %s1127_s16, 4 }
  0x17   : > { %p227_p8 = pnand %p899_p6, %p226_p7 }
  0x18   : > { %s233_s28 = sand.u32 (!%p227_p8), 1, %s1111_s12   ;;  %s277_s29 = smul.u32 (!%p227_p8), 48, %s1119_s14 }
  0x19   : > { %230 = sbr.rel (%p227_p8) target bundleno = 338 (0x152), region = 54  ;;  %p902_p10 = scmp.ne.s32.totalorder (!%p227_p8), %s1119_s14, 0 }
  0x1a   : > { %s970_s30 = smul.u32 (!%p227_p8), 24, %s233_s28  ;;  %p279_p9 = scmp.lt.s32.totalorder (!%p227_p8), %s277_s29, 143 }
  0x1c   : > { %s1203_s8 = scalar_lea.vmem (!%p227_p8), [#allocation3], %s970_s30 }
  0x20   : > { %s1293_s29 = smov (!%p279_p9, %s277_s29), 143  ;;  %310 = sbr.rel (%p902_p10) target bundleno = 39 (0x27), region = 62 }
  0x21   : > { %s962_s4 = sshll.u32 %s1293_s29, 3  ;;  %v1129_v4 = vmov (!%p902_p10), 0.0  }
  0x22   : > { %s1201_s7 = scalar_lea.vmem %s1283_s1, %s962_s4  ;;  %311 = vst [vmem:[#allocation2] sm:$0xff] (!%p902_p10), %v1129_v4  ;;  %312 = vst [vmem:[#allocation2 + $0x8] sm:$0xff] (!%p902_p10), %v1129_v4 }
  0x23   : > { %313 = vst [vmem:[#allocation2 + $0x10] sm:$0xff] (!%p902_p10), %v1129_v4  ;;  %314 = vst [vmem:[#allocation2 + $0x18] sm:$0xff] (!%p902_p10), %v1129_v4 }
  0x27 PF: > { %v1013_v5 = vld [vmem:[%s1201_s7 + $0x4] ss:$8 sps:$4 sm:$0xff]   ;;  %v1015_v6 = vld [vmem:[%s1201_s7] ss:$8 sps:$4 sm:$0xff]   ;;  %v1130_v7 = vmov 0   ;;  %p954_p11 = scmp.ne.s32.totalorder %s1119_s14, 2 }
  0x28   : > { %702 = vmatprep.mubr.bf16.mxu0 %v1130_v7  ;;  %627 = vmatprep.subr.bf16.mxu1 %v1013_v5  ;;  %v1016_v8 = vld [vmem:[%s1201_s7 + $0x14] ss:$8 sps:$4 sm:$0xff]   ;;  %v1018_v9 = vld [vmem:[%s1201_s7 + $0x10] ss:$8 sps:$4 sm:$0xff]   ;;  %v1019_v10 = vld [vmem:[%s1201_s7 + $0x24] ss:$8 sps:$4 sm:$0xff]  }
  0x29   : > { %628 = vmatpush1.bf16.msra.mxu1 %v1015_v6  ;;  %v1021_v11 = vld [vmem:[%s1201_s7 + $0x20] ss:$8 sps:$4 sm:$0xff]   ;;  %v1022_v12 = vld [vmem:[%s1201_s7 + $0x34] ss:$8 sps:$4 sm:$0xff]   ;;  %v1024_v13 = vld [vmem:[%s1201_s7 + $0x30] ss:$8 sps:$4 sm:$0xff]  }
  0x2a   : > { %629 = vmatprep.subr.bf16.mxu1 %v1016_v8  ;;  %v1037_v14 = vld [vmem:[%s1201_s7 + $0x104] ss:$8 sps:$4 sm:$0xff]   ;;  %v1039_v15 = vld [vmem:[%s1201_s7 + $0x100] ss:$8 sps:$4 sm:$0xff]   ;;  %v1043_v17 = vld [vmem:[%s1201_s7 + $0x114] ss:$8 sps:$4 sm:$0xff]  }
  0x2b   : > { %v1025_v16 = vld [vmem:[%s1201_s7 + $0x44] ss:$8 sps:$4 sm:$0xff]   ;;  %670 = vmatprep.subr.bf16.mxu0 %v1037_v14  ;;  %v1045_v18 = vld [vmem:[%s1201_s7 + $0x110] ss:$8 sps:$4 sm:$0xff]   ;;  %v1027_v19 = vld [vmem:[%s1201_s7 + $0x40] ss:$8 sps:$4 sm:$0xff]  }
  0x2c   : > { %671 = vmatpush1.bf16.msra.mxu0 %v1039_v15  ;;  %v1028_v20 = vld [vmem:[%s1201_s7 + $0x54] ss:$8 sps:$4 sm:$0xff]   ;;  %v1049_v21 = vld [vmem:[%s1201_s7 + $0x124] ss:$8 sps:$4 sm:$0xff]   ;;  %v1051_v22 = vld [vmem:[%s1201_s7 + $0x120] ss:$8 sps:$4 sm:$0xff]  }
  0x2d   : > { %630 = vmatpush1.bf16.msra.mxu1 %v1018_v9  ;;  %672 = vmatprep.subr.bf16.mxu0 %v1043_v17  ;;  %v1030_v23 = vld [vmem:[%s1201_s7 + $0x50] ss:$8 sps:$4 sm:$0xff]   ;;  %v1055_v24 = vld [vmem:[%s1201_s7 + $0x134] ss:$8 sps:$4 sm:$0xff]   ;;  %v1031_v25 = vld [vmem:[%s1201_s7 + $0x64] ss:$8 sps:$4 sm:$0xff]  }
  0x2e   : > { %631 = vmatprep.subr.bf16.mxu1 %v1019_v10  ;;  %v1057_v26 = vld [vmem:[%s1201_s7 + $0x130] ss:$8 sps:$4 sm:$0xff]   ;;  %v1033_v27 = vld [vmem:[%s1201_s7 + $0x60] ss:$8 sps:$4 sm:$0xff]   ;;  %v1061_v28 = vld [vmem:[%s1201_s7 + $0x144] ss:$8 sps:$4 sm:$0xff]  }
  0x2f   : > { %v1034_v29 = vld [vmem:[%s1201_s7 + $0x74] ss:$8 sps:$4 sm:$0xff]   ;;  %v1063_v30 = vld [vmem:[%s1201_s7 + $0x140] ss:$8 sps:$4 sm:$0xff]   ;;  %v1036_v31 = vld [vmem:[%s1201_s7 + $0x70] ss:$8 sps:$4 sm:$0xff]  }
  0x30   : > { %673 = vmatpush1.bf16.msra.mxu0 %v1045_v18  ;;  %v1067_v32 = vld [vmem:[%s1201_s7 + $0x154] ss:$8 sps:$4 sm:$0xff]   ;;  %v1040_v33 = vld [vmem:[%s1201_s7 + $0x84] ss:$8 sps:$4 sm:$0xff]   ;;  %v1069_v34 = vld [vmem:[%s1201_s7 + $0x150] ss:$8 sps:$4 sm:$0xff]  }
  0x31   : > { %632 = vmatpush1.bf16.msra.mxu1 %v1021_v11  ;;  %674 = vmatprep.subr.bf16.mxu0 %v1049_v21  ;;  %v1042_v35 = vld [vmem:[%s1201_s7 + $0x80] ss:$8 sps:$4 sm:$0xff]   ;;  %v1073_v36 = vld [vmem:[%s1201_s7 + $0x164] ss:$8 sps:$4 sm:$0xff]   ;;  %v1046_v37 = vld [vmem:[%s1201_s7 + $0x94] ss:$8 sps:$4 sm:$0xff]  }
  0x32   : > { %633 = vmatprep.subr.bf16.mxu1 %v1022_v12  ;;  %v1075_v38 = vld [vmem:[%s1201_s7 + $0x160] ss:$8 sps:$4 sm:$0xff]   ;;  %v1048_v40 = vld [vmem:[%s1201_s7 + $0x90] ss:$8 sps:$4 sm:$0xff]   ;;  %v1079_v41 = vld [vmem:[%s1201_s7 + $0x174] ss:$8 sps:$4 sm:$0xff]  }
  0x33   : > { %v1088_v39 = vld [vmem:[%s1203_s8 + $0x4] ss:$12 sps:$4 sm:$0xff]   ;;  %v1085_v46 = vld [vmem:[%s1203_s8 + $0x8] ss:$12 sps:$4 sm:$0xff]   ;;  %v1086_v56 = vld [vmem:[%s1203_s8] ss:$12 sps:$4 sm:$0xff]  }
  0x34   : > { %675 = vmatpush1.bf16.msra.mxu0 %v1051_v22  ;;  %v1052_v42 = vld [vmem:[%s1201_s7 + $0xa4] ss:$8 sps:$4 sm:$0xff]   ;;  %659 = vmatprep.mubr.bf16.mxu1 %v1088_v39  ;;  %v1081_v43 = vld [vmem:[%s1201_s7 + $0x170] ss:$8 sps:$4 sm:$0xff]   ;;  %v1054_v44 = vld [vmem:[%s1201_s7 + $0xa0] ss:$8 sps:$4 sm:$0xff]  }
  0x35   : > { %634 = vmatpush1.bf16.msra.mxu1 %v1024_v13  ;;  %676 = vmatprep.subr.bf16.mxu0 %v1055_v24  ;;  %v1058_v45 = vld [vmem:[%s1201_s7 + $0xb4] ss:$8 sps:$4 sm:$0xff]   ;;  %v1060_v47 = vld [vmem:[%s1201_s7 + $0xb0] ss:$8 sps:$4 sm:$0xff]   ;;  %v1064_v48 = vld [vmem:[%s1201_s7 + $0xc4] ss:$8 sps:$4 sm:$0xff]   ;;  %v731_v13 = vlaneseq (!%p954_p11) }
  0x36   : > { %635 = vmatprep.subr.bf16.mxu1 %v1025_v16  ;;  %v1066_v49 = vld [vmem:[%s1201_s7 + $0xc0] ss:$8 sps:$4 sm:$0xff]   ;;  %v1070_v50 = vld [vmem:[%s1201_s7 + $0xd4] ss:$8 sps:$4 sm:$0xff]   ;;  %v1072_v51 = vld [vmem:[%s1201_s7 + $0xd0] ss:$8 sps:$4 sm:$0xff]  }
  0x37   : > { %v1076_v52 = vld [vmem:[%s1201_s7 + $0xe4] ss:$8 sps:$4 sm:$0xff]   ;;  %v1078_v53 = vld [vmem:[%s1201_s7 + $0xe0] ss:$8 sps:$4 sm:$0xff]   ;;  %v1082_v54 = vld [vmem:[%s1201_s7 + $0xf4] ss:$8 sps:$4 sm:$0xff]  }
  0x38   : > { %677 = vmatpush1.bf16.msra.mxu0 %v1057_v26  ;;  %v1084_v55 = vld [vmem:[%s1201_s7 + $0xf0] ss:$8 sps:$4 sm:$0xff]   ;;  %v315_v61 = vld [vmem:[#allocation2] sm:$0xff]  ;;  %v316_v0 = vld [vmem:[#allocation2 + $0x8] sm:$0xff]  ;;  %v732_v14 = vshrl.u32 (!%p954_p11), %v731_v13, 7 }
  0x39   : > { %636 = vmatpush1.bf16.msra.mxu1 %v1027_v19  ;;  %678 = vmatprep.subr.bf16.mxu0 %v1061_v28  ;;  %v317_v3 = vld [vmem:[#allocation2 + $0x10] sm:$0xff]  ;;  %v318_v7 = vld [vmem:[#allocation2 + $0x18] sm:$0xff]  ;;  %v729_v15 = vld [vmem:[%s1284_s2] sm:$0x3] (!%p954_p11) }
  0x3a   : > { %637 = vmatprep.subr.bf16.mxu1 %v1028_v20  ;;  %v733_v17 = vsub.s32 (!%p954_p11), 0, %v732_v14  ;;  %v737_v18 = vsub.s32 (!%p954_p11), 1, %v732_v14 }
  0x3c   : > { %679 = vmatpush1.bf16.msra.mxu0 %v1063_v30  ;;  %v734_v22 = vrot.slane (!%p954_p11), %v729_v15, %v733_v17 }
  0x3d   : > { %638 = vmatpush1.bf16.msra.mxu1 %v1030_v23  ;;  %680 = vmatprep.subr.bf16.mxu0 %v1067_v32  ;;  %v738_v23 = vrot.slane (!%p954_p11), %v729_v15, %v737_v18 }
  0x3e   : > { %639 = vmatprep.subr.bf16.mxu1 %v1031_v25 }
  0x40   : > { %681 = vmatpush1.bf16.msra.mxu0 %v1069_v34 }
  0x41   : > { %640 = vmatpush1.bf16.msra.mxu1 %v1033_v27  ;;  %682 = vmatprep.subr.bf16.mxu0 %v1073_v36 }
  0x42   : > { %641 = vmatprep.subr.bf16.mxu1 %v1034_v29 }
  0x44   : > { %683 = vmatpush1.bf16.msra.mxu0 %v1075_v38 }
  0x45   : > { %642 = vmatpush1.bf16.msra.mxu1 %v1036_v31  ;;  %684 = vmatprep.subr.bf16.mxu0 %v1079_v41 }
  0x46   : > { %643 = vmatprep.subr.bf16.mxu1 %v1040_v33 }
  0x48   : > { %685 = vmatpush1.bf16.msra.mxu0 %v1081_v43 }
  0x49   : > { %644 = vmatpush1.bf16.msra.mxu1 %v1042_v35 }
  0x4a   : > { %645 = vmatprep.subr.bf16.mxu1 %v1046_v37 }
  0x4b   : > { %703 = vmatmul.mubr.bf16.vlgmr.msra.gmra.mrb[0].mxu0 %v1085_v46 }
  0x4d   : > { %646 = vmatpush1.bf16.msra.mxu1 %v1048_v40 }
  0x4e   : > { %647 = vmatprep.subr.bf16.mxu1 %v1052_v42 }
  0x51   : > { %648 = vmatpush1.bf16.msra.mxu1 %v1054_v44 }
  0x52   : > { %649 = vmatprep.subr.bf16.mxu1 %v1058_v45 }
  0x55   : > { %650 = vmatpush1.bf16.msra.mxu1 %v1060_v47 }
  0x56   : > { %651 = vmatprep.subr.bf16.mxu1 %v1064_v48 }
  0x59   : > { %652 = vmatpush1.bf16.msra.mxu1 %v1066_v49 }
  0x5a   : > { %653 = vmatprep.subr.bf16.mxu1 %v1070_v50 }
  0x5d   : > { %654 = vmatpush1.bf16.msra.mxu1 %v1072_v51 }
  0x5e   : > { %655 = vmatprep.subr.bf16.mxu1 %v1076_v52 }
  0x61   : > { %656 = vmatpush1.bf16.msra.mxu1 %v1078_v53 }
  0x62   : > { %657 = vmatprep.subr.bf16.mxu1 %v1082_v54 }
  0x65   : > { %658 = vmatpush1.bf16.msra.mxu1 %v1084_v55 }
  0x68   : > { %660 = vmatmul.mubr.bf16.vlgmr.msra.gmra.mrb[0].mxu1 %v1086_v56 }
 0x11e   : > { %v704_v57 = vpop.f32.mrb[0].mxu0 }
 0x11f   : > { %v706_v58 = vpop.f32.mrb[1].mxu0 }
 0x120   : > { %v708_v59 = vpop.f32.mrb[2].mxu0 }
 0x121   : > { %v710_v60 = vpop.f32.mrb[3].mxu0 }
 0x13b   : > { %v661_v62 = vpop.f32.mrb[0].mxu1 }
 0x13c   : > { %v705_v63 = vadd.f32 %v704_v57, %v661_v62  ;;  %v663_v1 = vpop.f32.mrb[1].mxu1 }
 0x13d   : > { %v707_v2 = vadd.f32 %v706_v58, %v663_v1  ;;  %v665_v4 = vpop.f32.mrb[2].mxu1  ;;  %724 = sbr.rel (%p954_p11) target bundleno = 338 (0x152), region = 66 }
 0x13e   : > { %v713_v5 = vadd.f32 %v705_v63, %v315_v61  ;;  %v709_v6 = vadd.f32 %v708_v59, %v665_v4  ;;  %v667_v8 = vpop.f32.mrb[3].mxu1 }
 0x13f   : > { %v714_v9 = vadd.f32 %v707_v2, %v316_v0  ;;  %v711_v10 = vadd.f32 %v710_v60, %v667_v8 }
 0x140   : > { %717 = vst [vmem:[#allocation2] sm:$0xff] %v713_v5  ;;  %v715_v11 = vadd.f32 %v709_v6, %v317_v3 }
 0x141   : > { %718 = vst [vmem:[#allocation2 + $0x8] sm:$0xff] %v714_v9  ;;  %v716_v12 = vadd.f32 %v711_v10, %v318_v7 }
 0x142   : > { %719 = vst [vmem:[#allocation2 + $0x10] sm:$0xff] %v715_v11 }
 0x143   : > { %720 = vst [vmem:[#allocation2 + $0x18] sm:$0xff] %v716_v12 }
 0x147   : > { %v725_v16 = vld [vmem:[#allocation2] sm:$0xff] }
 0x148   : > { %v726_v19 = vld [vmem:[#allocation2 + $0x8] sm:$0xff]  ;;  %v741_v24 = vadd.f32 %v734_v22, %v725_v16 }
 0x149   : > { %v727_v20 = vld [vmem:[#allocation2 + $0x10] sm:$0xff]  ;;  %v742_v25 = vadd.f32 %v738_v23, %v726_v19 }
 0x14a   : > { %v728_v21 = vld [vmem:[#allocation2 + $0x18] sm:$0xff]  ;;  %v743_v26 = vadd.f32 %v734_v22, %v727_v20  ;;  %v745_v28 = vmax.f32 %v741_v24, 0.0 }
 0x14b   : > { %v744_v27 = vadd.f32 %v738_v23, %v728_v21  ;;  %v746_v29 = vmax.f32 %v742_v25, 0.0 }
 0x14c   : > { %v747_v30 = vmax.f32 %v743_v26, 0.0 }
 0x14d   : > { %v748_v31 = vmax.f32 %v744_v27, 0.0  ;;  %v963_v32 = vpack.c.bf16 %v746_v29, %v745_v28 }
 0x14f   : > { %v964_v33 = vpack.c.bf16 %v748_v31, %v747_v30  ;;  %761 = vst [vmem:[%s1285_s3] sm:$0xff] %v963_v32 }
 0x151   : > { %762 = vst [vmem:[%s1285_s3 + $0x8] sm:$0xff] %v964_v33 }
 0x152 PF: > { %s13_s16 = sadd.s32 1, %s1127_s16   ;;  %s1286_s12 = smov %s1115_s13 }
 0x153   : > { %p10_p12 = scmp.ge.s32.totalorder %s13_s16, 5   ;;  %s1287_s13 = smov %s1186_s20 }
 0x154   : > { %s1288_s14 = smov %s1123_s15  ;;  %s1289_s15 = smov %s1291_s17 }
 0x155   :  { %12 = sbr.rel (!%p10_p12) target bundleno = 3 (0x3), region = 113 }

// kernel: gaze3inputs_forward.33
= control target key start
LH: loop header
LB: loop body
LE: loop exit
PB: predicated region body
PF: predicated region fallthrough
CT: control target
= control target key end

     0   :  { %s1256_s15 = smov 0   ;;  %s1258_s16 = smov 0   ;;  %s1393_s0 = inlined_call_operand.vmem [shape: bf16[16,2304], index: 0, kind: input, shape index: {}]   ;;  %s1394_s1 = inlined_call_operand.vmem [shape: bf16[2304,256], index: 1, kind: input, shape index: {}]   ;;  %s1395_s2 = inlined_call_operand.vmem [shape: f32[1,256], index: 2, kind: input, shape index: {}]   ;;  %s1396_s3 = inlined_call_operand.vmem [shape: bf16[16,256], index: 3, kind: input, shape index: {}]   ;;  %s1397_s4 = inlined_call_operand.vmem [shape: bf16[16,256], index: 4, kind: output, shape index: {}]  }
   0x1   :  { %s1260_s17 = smov 0   ;;  %s1262_s18 = smov 0  }
   0x2   :  { %s1264_s19 = smov 0  }
   0x3 LB: > { %s26_s20 = sadd.s32 1, %s1223_s18  ;;  %p49_p1 = scmp.ne.s32.totalorder %s1215_s16, %s1211_s15  ;;  %s1227_s19 = sphi %s1264_s19, %s14_s19   ;;  %s1223_s18 = sphi %s1262_s18, %s1401_s18   ;;  %s1219_s17 = sphi %s1260_s17, %s1400_s17   ;;  %s1215_s16 = sphi %s1258_s16, %s1399_s16   ;;  %s1211_s15 = sphi %s1256_s15, %s1398_s15  }
   0x4   : > { %p27_p0 = scmp.ge.s32.totalorder %s26_s20, 6  ;;  %p50_p2 = scmp.eq.s32.totalorder %s1227_s19, 0 }
   0x5   : > { %s42_s22 = sadd.s32 1, %s1215_s16  ;;  %p993_p5 = scmp.ge.s32.totalorder %s1227_s19, 6 }
   0x6   : > { %s1403_s20 = smov (%p27_p0, %s26_s20), 0  ;;  %p51_p3 = por %p50_p2, %p49_p1 }
   0x7   : > { %s38_s21 = ssub.s32 %s1223_s18, %s1403_s20  ;;  %208 = sbr.rel (%p993_p5) target bundleno = 21 (0x15), region = 24 }
   0x8   : > { %p40_p4 = scmp.eq.s32.totalorder %s38_s21, 0 }
   0xa   : > { %s1291_s23 = scalar_select %p40_p4, %s1215_s16, %s42_s22  }
   0xe   : > { %211 = sbr.rel (!%p51_p3) target bundleno = 21 (0x15), region = 28  ;;  %s213_s24 = sand.u32 (%p51_p3), 1, %s1215_s16  }
   0xf   : > { %s1061_s25 = smul.u32 (%p51_p3), 12, %s1223_s18 }
  0x10   : > { %s1069_s26 = smul.u32 (%p51_p3), 24, %s213_s24 }
  0x11   : > { %s221_s29 = scalar_lea.vmem (%p51_p3), %s1393_s0, %s1061_s25 }
  0x12   : > { %v236_v0 = vld [vmem:[%s221_s29] sm:$0xff] (%p51_p3)  ;;  %v238_v1 = vld [vmem:[%s221_s29 + $0x48] sm:$0xff] (%p51_p3)  ;;  %s215_s30 = scalar_lea.vmem (%p51_p3), [#allocation3], %s1069_s26  ;;  %v997_v3 = vld [vmem:[%s221_s29 + $0x50] sm:$0xf] (%p51_p3) }
  0x13   : > { %v995_v2 = vld [vmem:[%s221_s29 + $0x8] sm:$0xf] (%p51_p3)  ;;  %237 = vst [vmem:[%s215_s30] sm:$0xff] (%p51_p3), %v236_v0  ;;  %239 = vst [vmem:[%s215_s30 + $0xc] sm:$0xff] (%p51_p3), %v238_v1 }
  0x14   : > { %996 = vst [vmem:[%s215_s30 + $0x8] sm:$0xf] (%p51_p3), %v995_v2  ;;  %998 = vst [vmem:[%s215_s30 + $0x14] sm:$0xf] (%p51_p3), %v997_v3 }
  0x15 PF: > { %p999_p6 = scmp.ge.s32.totalorder %s1227_s19, 1  ;;  %p270_p7 = scmp.lt.s32.totalorder %s1227_s19, 7 }
  0x17   : > { %p271_p8 = pnand %p999_p6, %p270_p7 }
  0x18   : > { %s277_s5 = sand.u32 (!%p271_p8), 1, %s1211_s15   ;;  %s333_s6 = smul.u32 (!%p271_p8), 48, %s1219_s17 }
  0x19   : > { %274 = sbr.rel (%p271_p8) target bundleno = 340 (0x154), region = 58  ;;  %p1002_p10 = scmp.ne.s32.totalorder (!%p271_p8), %s1219_s17, 0 }
  0x1a   : > { %s1070_s7 = smul.u32 (!%p271_p8), 24, %s277_s5  ;;  %p335_p9 = scmp.lt.s32.totalorder (!%p271_p8), %s333_s6, 287 }
  0x1c   : > { %s1308_s12 = scalar_lea.vmem (!%p271_p8), [#allocation3], %s1070_s7 }
  0x20   : > { %s1405_s6 = smov (!%p335_p9, %s333_s6), 287  ;;  %378 = sbr.rel (%p1002_p10) target bundleno = 39 (0x27), region = 66 }
  0x21   : > { %s1062_s8 = sshll.u32 %s1405_s6, 3  ;;  %v1229_v4 = vmov (!%p1002_p10), 0.0  }
  0x22   : > { %s1306_s11 = scalar_lea.vmem %s1394_s1, %s1062_s8  ;;  %379 = vst [vmem:[#allocation2] sm:$0xff] (!%p1002_p10), %v1229_v4  ;;  %380 = vst [vmem:[#allocation2 + $0x8] sm:$0xff] (!%p1002_p10), %v1229_v4 }
  0x23   : > { %381 = vst [vmem:[#allocation2 + $0x10] sm:$0xff] (!%p1002_p10), %v1229_v4  ;;  %382 = vst [vmem:[#allocation2 + $0x18] sm:$0xff] (!%p1002_p10), %v1229_v4 }
  0x27 PF: > { %v1113_v5 = vld [vmem:[%s1306_s11 + $0x4] ss:$8 sps:$4 sm:$0xff]   ;;  %v1115_v6 = vld [vmem:[%s1306_s11] ss:$8 sps:$4 sm:$0xff]   ;;  %v1230_v7 = vmov 0   ;;  %p1054_p11 = scmp.ne.s32.totalorder %s1219_s17, 5 }
  0x28   : > { %770 = vmatprep.mubr.bf16.mxu0 %v1230_v7  ;;  %695 = vmatprep.subr.bf16.mxu1 %v1113_v5  ;;  %v1116_v8 = vld [vmem:[%s1306_s11 + $0x14] ss:$8 sps:$4 sm:$0xff]   ;;  %v1118_v9 = vld [vmem:[%s1306_s11 + $0x10] ss:$8 sps:$4 sm:$0xff]   ;;  %v1119_v10 = vld [vmem:[%s1306_s11 + $0x24] ss:$8 sps:$4 sm:$0xff]  }
  0x29   : > { %696 = vmatpush1.bf16.msra.mxu1 %v1115_v6  ;;  %v1121_v11 = vld [vmem:[%s1306_s11 + $0x20] ss:$8 sps:$4 sm:$0xff]   ;;  %v1122_v12 = vld [vmem:[%s1306_s11 + $0x34] ss:$8 sps:$4 sm:$0xff]   ;;  %v1124_v13 = vld [vmem:[%s1306_s11 + $0x30] ss:$8 sps:$4 sm:$0xff]  }
  0x2a   : > { %697 = vmatprep.subr.bf16.mxu1 %v1116_v8  ;;  %v1137_v14 = vld [vmem:[%s1306_s11 + $0x104] ss:$8 sps:$4 sm:$0xff]   ;;  %v1139_v15 = vld [vmem:[%s1306_s11 + $0x100] ss:$8 sps:$4 sm:$0xff]   ;;  %v1143_v17 = vld [vmem:[%s1306_s11 + $0x114] ss:$8 sps:$4 sm:$0xff]  }
  0x2b   : > { %v1125_v16 = vld [vmem:[%s1306_s11 + $0x44] ss:$8 sps:$4 sm:$0xff]   ;;  %738 = vmatprep.subr.bf16.mxu0 %v1137_v14  ;;  %v1145_v18 = vld [vmem:[%s1306_s11 + $0x110] ss:$8 sps:$4 sm:$0xff]   ;;  %v1127_v19 = vld [vmem:[%s1306_s11 + $0x40] ss:$8 sps:$4 sm:$0xff]  }
  0x2c   : > { %739 = vmatpush1.bf16.msra.mxu0 %v1139_v15  ;;  %v1128_v20 = vld [vmem:[%s1306_s11 + $0x54] ss:$8 sps:$4 sm:$0xff]   ;;  %v1149_v21 = vld [vmem:[%s1306_s11 + $0x124] ss:$8 sps:$4 sm:$0xff]   ;;  %v1151_v22 = vld [vmem:[%s1306_s11 + $0x120] ss:$8 sps:$4 sm:$0xff]  }
  0x2d   : > { %698 = vmatpush1.bf16.msra.mxu1 %v1118_v9  ;;  %740 = vmatprep.subr.bf16.mxu0 %v1143_v17  ;;  %v1130_v23 = vld [vmem:[%s1306_s11 + $0x50] ss:$8 sps:$4 sm:$0xff]   ;;  %v1155_v24 = vld [vmem:[%s1306_s11 + $0x134] ss:$8 sps:$4 sm:$0xff]   ;;  %v1131_v25 = vld [vmem:[%s1306_s11 + $0x64] ss:$8 sps:$4 sm:$0xff]  }
  0x2e   : > { %699 = vmatprep.subr.bf16.mxu1 %v1119_v10  ;;  %v1157_v26 = vld [vmem:[%s1306_s11 + $0x130] ss:$8 sps:$4 sm:$0xff]   ;;  %v1133_v27 = vld [vmem:[%s1306_s11 + $0x60] ss:$8 sps:$4 sm:$0xff]   ;;  %v1161_v28 = vld [vmem:[%s1306_s11 + $0x144] ss:$8 sps:$4 sm:$0xff]  }
  0x2f   : > { %v1134_v29 = vld [vmem:[%s1306_s11 + $0x74] ss:$8 sps:$4 sm:$0xff]   ;;  %v1163_v30 = vld [vmem:[%s1306_s11 + $0x140] ss:$8 sps:$4 sm:$0xff]   ;;  %v1136_v31 = vld [vmem:[%s1306_s11 + $0x70] ss:$8 sps:$4 sm:$0xff]  }
  0x30   : > { %741 = vmatpush1.bf16.msra.mxu0 %v1145_v18  ;;  %v1167_v32 = vld [vmem:[%s1306_s11 + $0x154] ss:$8 sps:$4 sm:$0xff]   ;;  %v1140_v33 = vld [vmem:[%s1306_s11 + $0x84] ss:$8 sps:$4 sm:$0xff]   ;;  %v1169_v34 = vld [vmem:[%s1306_s11 + $0x150] ss:$8 sps:$4 sm:$0xff]  }
  0x31   : > { %700 = vmatpush1.bf16.msra.mxu1 %v1121_v11  ;;  %742 = vmatprep.subr.bf16.mxu0 %v1149_v21  ;;  %v1142_v35 = vld [vmem:[%s1306_s11 + $0x80] ss:$8 sps:$4 sm:$0xff]   ;;  %v1173_v36 = vld [vmem:[%s1306_s11 + $0x164] ss:$8 sps:$4 sm:$0xff]   ;;  %v1146_v37 = vld [vmem:[%s1306_s11 + $0x94] ss:$8 sps:$4 sm:$0xff]  }
  0x32   : > { %701 = vmatprep.subr.bf16.mxu1 %v1122_v12  ;;  %v1175_v38 = vld [vmem:[%s1306_s11 + $0x160] ss:$8 sps:$4 sm:$0xff]   ;;  %v1148_v40 = vld [vmem:[%s1306_s11 + $0x90] ss:$8 sps:$4 sm:$0xff]   ;;  %v1179_v41 = vld [vmem:[%s1306_s11 + $0x174] ss:$8 sps:$4 sm:$0xff]  }
  0x33   : > { %v1188_v39 = vld [vmem:[%s1308_s12 + $0x4] ss:$12 sps:$4 sm:$0xff]   ;;  %v1185_v46 = vld [vmem:[%s1308_s12 + $0x8] ss:$12 sps:$4 sm:$0xff]   ;;  %v1186_v56 = vld [vmem:[%s1308_s12] ss:$12 sps:$4 sm:$0xff]  }
  0x34   : > { %743 = vmatpush1.bf16.msra.mxu0 %v1151_v22  ;;  %v1152_v42 = vld [vmem:[%s1306_s11 + $0xa4] ss:$8 sps:$4 sm:$0xff]   ;;  %727 = vmatprep.mubr.bf16.mxu1 %v1188_v39  ;;  %v1181_v43 = vld [vmem:[%s1306_s11 + $0x170] ss:$8 sps:$4 sm:$0xff]   ;;  %v1154_v44 = vld [vmem:[%s1306_s11 + $0xa0] ss:$8 sps:$4 sm:$0xff]  }
  0x35   : > { %702 = vmatpush1.bf16.msra.mxu1 %v1124_v13  ;;  %744 = vmatprep.subr.bf16.mxu0 %v1155_v24  ;;  %v1158_v45 = vld [vmem:[%s1306_s11 + $0xb4] ss:$8 sps:$4 sm:$0xff]   ;;  %v1160_v47 = vld [vmem:[%s1306_s11 + $0xb0] ss:$8 sps:$4 sm:$0xff]   ;;  %v1164_v48 = vld [vmem:[%s1306_s11 + $0xc4] ss:$8 sps:$4 sm:$0xff]   ;;  %v799_v13 = vlaneseq (!%p1054_p11) }
  0x36   : > { %703 = vmatprep.subr.bf16.mxu1 %v1125_v16  ;;  %v1166_v49 = vld [vmem:[%s1306_s11 + $0xc0] ss:$8 sps:$4 sm:$0xff]   ;;  %v1170_v50 = vld [vmem:[%s1306_s11 + $0xd4] ss:$8 sps:$4 sm:$0xff]   ;;  %v1172_v51 = vld [vmem:[%s1306_s11 + $0xd0] ss:$8 sps:$4 sm:$0xff]  }
  0x37   : > { %v1176_v52 = vld [vmem:[%s1306_s11 + $0xe4] ss:$8 sps:$4 sm:$0xff]   ;;  %v1178_v53 = vld [vmem:[%s1306_s11 + $0xe0] ss:$8 sps:$4 sm:$0xff]   ;;  %v1182_v54 = vld [vmem:[%s1306_s11 + $0xf4] ss:$8 sps:$4 sm:$0xff]  }
  0x38   : > { %745 = vmatpush1.bf16.msra.mxu0 %v1157_v26  ;;  %v1184_v55 = vld [vmem:[%s1306_s11 + $0xf0] ss:$8 sps:$4 sm:$0xff]   ;;  %v383_v61 = vld [vmem:[#allocation2] sm:$0xff]  ;;  %v384_v0 = vld [vmem:[#allocation2 + $0x8] sm:$0xff]  ;;  %v800_v14 = vshrl.u32 (!%p1054_p11), %v799_v13, 7 }
  0x39   : > { %704 = vmatpush1.bf16.msra.mxu1 %v1127_v19  ;;  %746 = vmatprep.subr.bf16.mxu0 %v1161_v28  ;;  %v385_v3 = vld [vmem:[#allocation2 + $0x10] sm:$0xff]  ;;  %v386_v7 = vld [vmem:[#allocation2 + $0x18] sm:$0xff]  ;;  %v813_v15 = vld [vmem:[%s1396_s3] sm:$0xff] (!%p1054_p11) }
  0x3a   : > { %705 = vmatprep.subr.bf16.mxu1 %v1128_v20  ;;  %v797_v16 = vld [vmem:[%s1395_s2] sm:$0x3] (!%p1054_p11)  ;;  %v814_v17 = vld [vmem:[%s1396_s3 + $0x8] sm:$0xff] (!%p1054_p11)  ;;  %v801_v19 = vsub.s32 (!%p1054_p11), 0, %v800_v14  ;;  %v805_v20 = vsub.s32 (!%p1054_p11), 1, %v800_v14  ;;  %v815_v22 = vunpack.c.l.bf16 (!%p1054_p11), %v813_v15 }
  0x3b   : > { %v817_v28 = vunpack.c.l.bf16 (!%p1054_p11), %v814_v17 }
  0x3c   : > { %747 = vmatpush1.bf16.msra.mxu0 %v1163_v30  ;;  %v802_v26 = vrot.slane (!%p1054_p11), %v797_v16, %v801_v19 }
  0x3d   : > { %706 = vmatpush1.bf16.msra.mxu1 %v1130_v23  ;;  %748 = vmatprep.subr.bf16.mxu0 %v1167_v32  ;;  %v816_v23 = vunpack.c.h.bf16 (!%p1054_p11), %v813_v15 }
  0x3e   : > { %707 = vmatprep.subr.bf16.mxu1 %v1131_v25 }
  0x40   : > { %749 = vmatpush1.bf16.msra.mxu0 %v1169_v34 }
  0x41   : > { %708 = vmatpush1.bf16.msra.mxu1 %v1133_v27  ;;  %750 = vmatprep.subr.bf16.mxu0 %v1173_v36  ;;  %v806_v27 = vrot.slane (!%p1054_p11), %v797_v16, %v805_v20 }
  0x42   : > { %709 = vmatprep.subr.bf16.mxu1 %v1134_v29  ;;  %v818_v29 = vunpack.c.h.bf16 (!%p1054_p11), %v814_v17 }
  0x44   : > { %751 = vmatpush1.bf16.msra.mxu0 %v1175_v38 }
  0x45   : > { %710 = vmatpush1.bf16.msra.mxu1 %v1136_v31  ;;  %752 = vmatprep.subr.bf16.mxu0 %v1179_v41 }
  0x46   : > { %711 = vmatprep.subr.bf16.mxu1 %v1140_v33 }
  0x48   : > { %753 = vmatpush1.bf16.msra.mxu0 %v1181_v43 }
  0x49   : > { %712 = vmatpush1.bf16.msra.mxu1 %v1142_v35 }
  0x4a   : > { %713 = vmatprep.subr.bf16.mxu1 %v1146_v37 }
  0x4b   : > { %771 = vmatmul.mubr.bf16.vlgmr.msra.gmra.mrb[0].mxu0 %v1185_v46 }
  0x4d   : > { %714 = vmatpush1.bf16.msra.mxu1 %v1148_v40 }
  0x4e   : > { %715 = vmatprep.subr.bf16.mxu1 %v1152_v42 }
  0x51   : > { %716 = vmatpush1.bf16.msra.mxu1 %v1154_v44 }
  0x52   : > { %717 = vmatprep.subr.bf16.mxu1 %v1158_v45 }
  0x55   : > { %718 = vmatpush1.bf16.msra.mxu1 %v1160_v47 }
  0x56   : > { %719 = vmatprep.subr.bf16.mxu1 %v1164_v48 }
  0x59   : > { %720 = vmatpush1.bf16.msra.mxu1 %v1166_v49 }
  0x5a   : > { %721 = vmatprep.subr.bf16.mxu1 %v1170_v50 }
  0x5d   : > { %722 = vmatpush1.bf16.msra.mxu1 %v1172_v51 }
  0x5e   : > { %723 = vmatprep.subr.bf16.mxu1 %v1176_v52 }
  0x61   : > { %724 = vmatpush1.bf16.msra.mxu1 %v1178_v53 }
  0x62   : > { %725 = vmatprep.subr.bf16.mxu1 %v1182_v54 }
  0x65   : > { %726 = vmatpush1.bf16.msra.mxu1 %v1184_v55 }
  0x68   : > { %728 = vmatmul.mubr.bf16.vlgmr.msra.gmra.mrb[0].mxu1 %v1186_v56 }
 0x11e   : > { %v772_v57 = vpop.f32.mrb[0].mxu0 }
 0x11f   : > { %v774_v58 = vpop.f32.mrb[1].mxu0 }
 0x120   : > { %v776_v59 = vpop.f32.mrb[2].mxu0 }
 0x121   : > { %v778_v60 = vpop.f32.mrb[3].mxu0 }
 0x13b   : > { %v729_v62 = vpop.f32.mrb[0].mxu1 }
 0x13c   : > { %v773_v63 = vadd.f32 %v772_v57, %v729_v62  ;;  %v731_v1 = vpop.f32.mrb[1].mxu1 }
 0x13d   : > { %v775_v2 = vadd.f32 %v774_v58, %v731_v1  ;;  %v733_v4 = vpop.f32.mrb[2].mxu1  ;;  %792 = sbr.rel (%p1054_p11) target bundleno = 340 (0x154), region = 70 }
 0x13e   : > { %v781_v5 = vadd.f32 %v773_v63, %v383_v61  ;;  %v777_v6 = vadd.f32 %v776_v59, %v733_v4  ;;  %v735_v8 = vpop.f32.mrb[3].mxu1 }
 0x13f   : > { %v782_v9 = vadd.f32 %v775_v2, %v384_v0  ;;  %v779_v10 = vadd.f32 %v778_v60, %v735_v8 }
 0x140   : > { %785 = vst [vmem:[#allocation2] sm:$0xff] %v781_v5  ;;  %v783_v11 = vadd.f32 %v777_v6, %v385_v3 }
 0x141   : > { %786 = vst [vmem:[#allocation2 + $0x8] sm:$0xff] %v782_v9  ;;  %v784_v12 = vadd.f32 %v779_v10, %v386_v7 }
 0x142   : > { %787 = vst [vmem:[#allocation2 + $0x10] sm:$0xff] %v783_v11 }
 0x143   : > { %788 = vst [vmem:[#allocation2 + $0x18] sm:$0xff] %v784_v12 }
 0x147   : > { %v793_v18 = vld [vmem:[#allocation2] sm:$0xff] }
 0x148   : > { %v794_v21 = vld [vmem:[#allocation2 + $0x8] sm:$0xff]  ;;  %v809_v30 = vadd.f32 %v802_v26, %v793_v18 }
 0x149   : > { %v795_v24 = vld [vmem:[#allocation2 + $0x10] sm:$0xff]  ;;  %v810_v31 = vadd.f32 %v806_v27, %v794_v21 }
 0x14a   : > { %v796_v25 = vld [vmem:[#allocation2 + $0x18] sm:$0xff]  ;;  %v811_v32 = vadd.f32 %v802_v26, %v795_v24  ;;  %v819_v34 = vadd.f32 %v815_v22, %v809_v30 }
 0x14b   : > { %v812_v33 = vadd.f32 %v806_v27, %v796_v25  ;;  %v820_v35 = vadd.f32 %v816_v23, %v810_v31 }
 0x14c   : > { %v821_v36 = vadd.f32 %v817_v28, %v811_v32  ;;  %v823_v38 = vmax.f32 %v819_v34, 0.0 }
 0x14d   : > { %v822_v37 = vadd.f32 %v818_v29, %v812_v33  ;;  %v824_v39 = vmax.f32 %v820_v35, 0.0 }
 0x14e   : > { %v825_v40 = vmax.f32 %v821_v36, 0.0 }
 0x14f   : > { %v826_v41 = vmax.f32 %v822_v37, 0.0  ;;  %v1063_v42 = vpack.c.bf16 %v824_v39, %v823_v38 }
 0x151   : > { %v1064_v43 = vpack.c.bf16 %v826_v41, %v825_v40  ;;  %839 = vst [vmem:[%s1397_s4] sm:$0xff] %v1063_v42 }
 0x153   : > { %840 = vst [vmem:[%s1397_s4 + $0x8] sm:$0xff] %v1064_v43 }
 0x154 PF: > { %s14_s19 = sadd.s32 1, %s1227_s19   ;;  %s1398_s15 = smov %s1215_s16 }
 0x155   : > { %p11_p12 = scmp.ge.s32.totalorder %s14_s19, 8   ;;  %s1399_s16 = smov %s1291_s23 }
 0x156   : > { %s1400_s17 = smov %s1223_s18  ;;  %s1401_s18 = smov %s1403_s20 }
 0x157   :  { %13 = sbr.rel (!%p11_p12) target bundleno = 3 (0x3), region = 120 }

// kernel: gaze3inputs_forward.31
= control target key start
LH: loop header
LB: loop body
LE: loop exit
PB: predicated region body
PF: predicated region fallthrough
CT: control target
= control target key end

     0   :  { %v270_v1 = vmov 0   ;;  %v191_v18 = vlaneseq  ;;  %s351_s1 = inlined_call_operand.vmem [shape: bf16[128,256], index: 1, kind: input, shape index: {}]   ;;  %s352_s0 = inlined_call_operand.vmem [shape: bf16[16,128], index: 0, kind: input, shape index: {}]   ;;  %s353_s2 = inlined_call_operand.vmem [shape: f32[1,256], index: 2, kind: input, shape index: {}]   ;;  %s354_s3 = inlined_call_operand.vmem [shape: bf16[16,256], index: 3, kind: output, shape index: {}]  }
   0x1   :  { %v245_v0 = vld [vmem:[%s351_s1 + $0x4] ss:$8 sps:$4 sm:$0xff]   ;;  %163 = vmatprep.mubr.bf16.mxu0 %v270_v1  ;;  %v247_v2 = vld [vmem:[%s351_s1] ss:$8 sps:$4 sm:$0xff]   ;;  %v248_v3 = vld [vmem:[%s351_s1 + $0x14] ss:$8 sps:$4 sm:$0xff]  }
   0x2   :  { %131 = vmatprep.subr.bf16.mxu0 %v245_v0  ;;  %v250_v4 = vld [vmem:[%s351_s1 + $0x10] ss:$8 sps:$4 sm:$0xff]   ;;  %v251_v5 = vld [vmem:[%s351_s1 + $0x24] ss:$8 sps:$4 sm:$0xff]   ;;  %v253_v6 = vld [vmem:[%s351_s1 + $0x20] ss:$8 sps:$4 sm:$0xff]  }
   0x3   :  { %132 = vmatpush1.bf16.msra.mxu0 %v247_v2  ;;  %v254_v7 = vld [vmem:[%s351_s1 + $0x34] ss:$8 sps:$4 sm:$0xff]   ;;  %v256_v8 = vld [vmem:[%s351_s1 + $0x30] ss:$8 sps:$4 sm:$0xff]   ;;  %v257_v9 = vld [vmem:[%s351_s1 + $0x44] ss:$8 sps:$4 sm:$0xff]  }
   0x4   :  { %133 = vmatprep.subr.bf16.mxu0 %v248_v3  ;;  %v259_v10 = vld [vmem:[%s351_s1 + $0x40] ss:$8 sps:$4 sm:$0xff]   ;;  %v260_v11 = vld [vmem:[%s351_s1 + $0x54] ss:$8 sps:$4 sm:$0xff]   ;;  %v262_v12 = vld [vmem:[%s351_s1 + $0x50] ss:$8 sps:$4 sm:$0xff]  }
   0x5   :  { %v263_v13 = vld [vmem:[%s351_s1 + $0x64] ss:$8 sps:$4 sm:$0xff]   ;;  %v265_v14 = vld [vmem:[%s351_s1 + $0x60] ss:$8 sps:$4 sm:$0xff]   ;;  %v266_v15 = vld [vmem:[%s351_s1 + $0x74] ss:$8 sps:$4 sm:$0xff]  }
   0x6   :  { %v268_v16 = vld [vmem:[%s351_s1 + $0x70] ss:$8 sps:$4 sm:$0xff]   ;;  %v269_v17 = vld [vmem:[%s352_s0] sm:$0xff]   ;;  %v192_v19 = vshrl.u32 %v191_v18, 7 }
   0x7   :  { %134 = vmatpush1.bf16.msra.mxu0 %v250_v4  ;;  %v189_v21 = vld [vmem:[%s353_s2] sm:$0x3] }
   0x8   :  { %135 = vmatprep.subr.bf16.mxu0 %v251_v5  ;;  %v193_v20 = vsub.s32 0, %v192_v19  ;;  %v197_v22 = vsub.s32 1, %v192_v19 }
   0xa   :  { %v194_v23 = vrot.slane %v189_v21, %v193_v20  ;;  %v198_v24 = vrot.slane %v189_v21, %v197_v22 }
   0xb   :  { %136 = vmatpush1.bf16.msra.mxu0 %v253_v6 }
   0xc   :  { %137 = vmatprep.subr.bf16.mxu0 %v254_v7 }
   0xf   :  { %138 = vmatpush1.bf16.msra.mxu0 %v256_v8 }
  0x10   :  { %139 = vmatprep.subr.bf16.mxu0 %v257_v9 }
  0x13   :  { %140 = vmatpush1.bf16.msra.mxu0 %v259_v10 }
  0x14   :  { %141 = vmatprep.subr.bf16.mxu0 %v260_v11 }
  0x17   :  { %142 = vmatpush1.bf16.msra.mxu0 %v262_v12 }
  0x18   :  { %143 = vmatprep.subr.bf16.mxu0 %v263_v13 }
  0x1b   :  { %144 = vmatpush1.bf16.msra.mxu0 %v265_v14 }
  0x1c   :  { %145 = vmatprep.subr.bf16.mxu0 %v266_v15 }
  0x1f   :  { %146 = vmatpush1.bf16.msra.mxu0 %v268_v16 }
  0x22   :  { %164 = vmatmul.mubr.bf16.vlgmr.msra.gmra.mrb[0].mxu0 %v269_v17 }
  0xf5   :  { %v165_v25 = vpop.f32.mrb[0].mxu0 }
  0xf6   :  { %v201_v26 = vadd.f32 %v194_v23, %v165_v25  ;;  %v167_v27 = vpop.f32.mrb[1].mxu0 }
  0xf7   :  { %v202_v28 = vadd.f32 %v198_v24, %v167_v27  ;;  %v169_v29 = vpop.f32.mrb[2].mxu0 }
  0xf8   :  { %v203_v30 = vadd.f32 %v194_v23, %v169_v29  ;;  %v171_v31 = vpop.f32.mrb[3].mxu0 }
  0xf9   :  { %v242_v32 = vpack.c.bf16 %v202_v28, %v201_v26  ;;  %v204_v33 = vadd.f32 %v198_v24, %v171_v31 }
  0xfb   :  { %217 = vst [vmem:[%s354_s3] sm:$0xff] %v242_v32  ;;  %v243_v34 = vpack.c.bf16 %v204_v33, %v203_v30 }
  0xfd   :  { %218 = vst [vmem:[%s354_s3 + $0x8] sm:$0xff] %v243_v34 }

// kernel: gaze3inputs_forward.34
= control target key start
LH: loop header
LB: loop body
LE: loop exit
PB: predicated region body
PF: predicated region fallthrough
CT: control target
= control target key end

     0   :  { %s1079_s12 = smov 0   ;;  %s1081_s13 = smov 0   ;;  %s1267_s0 = inlined_call_operand.vmem [shape: bf16[16,256], index: 0, kind: input, shape index: {}]   ;;  %s1268_s1 = inlined_call_operand.vmem [shape: bf16[256,512], index: 1, kind: input, shape index: {}]   ;;  %s1269_s2 = inlined_call_operand.vmem [shape: f32[1,512], index: 2, kind: input, shape index: {}]   ;;  %s1270_s3 = inlined_call_operand.vmem [shape: bf16[16,512], index: 3, kind: output, shape index: {}]  }
   0x1   :  { %s1083_s14 = smov 0   ;;  %s1085_s15 = smov 0  }
   0x2   :  { %s1087_s16 = smov 0  }
   0x3 LB: > { %s28_s17 = sadd.s32 1, %s1053_s15  ;;  %s871_s18 = sadd.s32 4294967295, %s1057_s16   ;;  %s1057_s16 = sphi %s1087_s16, %s13_s16   ;;  %s1053_s15 = sphi %s1085_s15, %s1275_s15   ;;  %s1049_s14 = sphi %s1083_s14, %s1274_s14   ;;  %s1045_s13 = sphi %s1081_s13, %s1273_s13   ;;  %s1041_s12 = sphi %s1079_s12, %s1272_s12  }
   0x4   : > { %p30_p0 = scmp.ge.s32.totalorder %s28_s17, 2  ;;  %p76_p1 = scmp.ne.s32.totalorder %s1045_s13, %s1041_s12 }
   0x5   : > { %p77_p2 = scmp.eq.s32.totalorder %s1057_s16, 0  ;;  %p134_p4 = scmp.eq.s32.totalorder %s871_s18, 1 }
   0x6   : > { %s1277_s17 = smov (%p30_p0, %s28_s17), 0  ;;  %s69_s20 = sadd.s32 1, %s1045_s13 }
   0x7   : > { %p78_p3 = por %p77_p2, %p76_p1  ;;  %s65_s19 = ssub.s32 %s1053_s15, %s1277_s17 }
   0x8   : > { %p67_p5 = scmp.eq.s32.totalorder %s65_s19, 0  ;;  %p1114_p6 = por %p134_p4, %p76_p1 }
   0x9   : > { %p875_p7 = scmp.ge.s32.totalorder %s1057_s16, 2 }
   0xa   : > { %s1119_s22 = scalar_select %p67_p5, %s1045_s13, %s69_s20  }
   0xb   : > { %171 = sbr.rel (%p875_p7) target bundleno = 38 (0x26), region = 20 }
  0x12   : > { %174 = sbr.rel (!%p78_p3) target bundleno = 38 (0x26), region = 24  ;;  %s176_s23 = sand.u32 (%p78_p3), 1, %s1045_s13  }
  0x13   : > { %s924_s24 = sshll.u32 (%p78_p3), %s1053_s15, 3  ;;  %s876_s25 = sshll.u32 (%p78_p3), %s176_s23, 8 }
  0x14   : > { %s1127_s28 = scalar_lea.vmem (%p78_p3), %s1268_s1, %s924_s24  ;;  %s1132_s29 = scalar_lea.vmem (%p78_p3), [#allocation3], %s876_s25 }
  0x15   : > { %v274_v0 = vld [vmem:[%s1127_s28] sm:$0xff] (%p78_p3)  ;;  %v276_v1 = vld [vmem:[%s1127_s28 + $0x10] sm:$0xff] (%p78_p3) }
  0x16   : > { %v278_v2 = vld [vmem:[%s1127_s28 + $0x20] sm:$0xff] (%p78_p3)  ;;  %275 = vst [vmem:[%s1132_s29] sm:$0xff] (%p78_p3), %v274_v0  ;;  %277 = vst [vmem:[%s1132_s29 + $0x8] sm:$0xff] (%p78_p3), %v276_v1  ;;  %v280_v3 = vld [vmem:[%s1127_s28 + $0x30] sm:$0xff] (%p78_p3) }
  0x17   : > { %279 = vst [vmem:[%s1132_s29 + $0x10] sm:$0xff] (%p78_p3), %v278_v2  ;;  %v282_v4 = vld [vmem:[%s1127_s28 + $0x40] sm:$0xff] (%p78_p3)  ;;  %v284_v5 = vld [vmem:[%s1127_s28 + $0x50] sm:$0xff] (%p78_p3)  ;;  %281 = vst [vmem:[%s1132_s29 + $0x18] sm:$0xff] (%p78_p3), %v280_v3 }
  0x18   : > { %283 = vst [vmem:[%s1132_s29 + $0x20] sm:$0xff] (%p78_p3), %v282_v4  ;;  %285 = vst [vmem:[%s1132_s29 + $0x28] sm:$0xff] (%p78_p3), %v284_v5  ;;  %v286_v6 = vld [vmem:[%s1127_s28 + $0x60] sm:$0xff] (%p78_p3)  ;;  %v288_v7 = vld [vmem:[%s1127_s28 + $0x70] sm:$0xff] (%p78_p3) }
  0x19   : > { %v290_v8 = vld [vmem:[%s1127_s28 + $0x80] sm:$0xff]  ;;  %287 = vst [vmem:[%s1132_s29 + $0x30] sm:$0xff] %v286_v6  ;;  %289 = vst [vmem:[%s1132_s29 + $0x38] sm:$0xff] %v288_v7  ;;  %v292_v9 = vld [vmem:[%s1127_s28 + $0x90] sm:$0xff] }
  0x1a   : > { %291 = vst [vmem:[%s1132_s29 + $0x40] sm:$0xff] %v290_v8  ;;  %v294_v10 = vld [vmem:[%s1127_s28 + $0xa0] sm:$0xff]  ;;  %v296_v11 = vld [vmem:[%s1127_s28 + $0xb0] sm:$0xff]  ;;  %293 = vst [vmem:[%s1132_s29 + $0x48] sm:$0xff] %v292_v9 }
  0x1b   : > { %295 = vst [vmem:[%s1132_s29 + $0x50] sm:$0xff] %v294_v10  ;;  %297 = vst [vmem:[%s1132_s29 + $0x58] sm:$0xff] %v296_v11  ;;  %v298_v12 = vld [vmem:[%s1127_s28 + $0xc0] sm:$0xff]  ;;  %v300_v13 = vld [vmem:[%s1127_s28 + $0xd0] sm:$0xff] }
  0x1c   : > { %v302_v14 = vld [vmem:[%s1127_s28 + $0xe0] sm:$0xff]  ;;  %299 = vst [vmem:[%s1132_s29 + $0x60] sm:$0xff] %v298_v12  ;;  %301 = vst [vmem:[%s1132_s29 + $0x68] sm:$0xff] %v300_v13  ;;  %v304_v15 = vld [vmem:[%s1127_s28 + $0xf0] sm:$0xff] }
  0x1d   : > { %303 = vst [vmem:[%s1132_s29 + $0x70] sm:$0xff] %v302_v14  ;;  %v306_v16 = vld [vmem:[%s1127_s28 + $0x100] sm:$0xff]  ;;  %v308_v17 = vld [vmem:[%s1127_s28 + $0x110] sm:$0xff]  ;;  %305 = vst [vmem:[%s1132_s29 + $0x78] sm:$0xff] %v304_v15 }
  0x1e   : > { %307 = vst [vmem:[%s1132_s29 + $0x80] sm:$0xff] %v306_v16  ;;  %309 = vst [vmem:[%s1132_s29 + $0x88] sm:$0xff] %v308_v17  ;;  %v310_v18 = vld [vmem:[%s1127_s28 + $0x120] sm:$0xff]  ;;  %v312_v19 = vld [vmem:[%s1127_s28 + $0x130] sm:$0xff] }
  0x1f   : > { %v314_v20 = vld [vmem:[%s1127_s28 + $0x140] sm:$0xff]  ;;  %311 = vst [vmem:[%s1132_s29 + $0x90] sm:$0xff] %v310_v18  ;;  %313 = vst [vmem:[%s1132_s29 + $0x98] sm:$0xff] %v312_v19  ;;  %v316_v21 = vld [vmem:[%s1127_s28 + $0x150] sm:$0xff] }
  0x20   : > { %315 = vst [vmem:[%s1132_s29 + $0xa0] sm:$0xff] %v314_v20  ;;  %v318_v22 = vld [vmem:[%s1127_s28 + $0x160] sm:$0xff]  ;;  %v320_v23 = vld [vmem:[%s1127_s28 + $0x170] sm:$0xff]  ;;  %317 = vst [vmem:[%s1132_s29 + $0xa8] sm:$0xff] %v316_v21 }
  0x21   : > { %319 = vst [vmem:[%s1132_s29 + $0xb0] sm:$0xff] %v318_v22  ;;  %321 = vst [vmem:[%s1132_s29 + $0xb8] sm:$0xff] %v320_v23  ;;  %v322_v24 = vld [vmem:[%s1127_s28 + $0x180] sm:$0xff]  ;;  %v324_v25 = vld [vmem:[%s1127_s28 + $0x190] sm:$0xff] }
  0x22   : > { %v326_v26 = vld [vmem:[%s1127_s28 + $0x1a0] sm:$0xff]  ;;  %323 = vst [vmem:[%s1132_s29 + $0xc0] sm:$0xff] %v322_v24  ;;  %325 = vst [vmem:[%s1132_s29 + $0xc8] sm:$0xff] %v324_v25  ;;  %v328_v27 = vld [vmem:[%s1127_s28 + $0x1b0] sm:$0xff] }
  0x23   : > { %327 = vst [vmem:[%s1132_s29 + $0xd0] sm:$0xff] %v326_v26  ;;  %v330_v28 = vld [vmem:[%s1127_s28 + $0x1c0] sm:$0xff]  ;;  %v332_v29 = vld [vmem:[%s1127_s28 + $0x1d0] sm:$0xff]  ;;  %329 = vst [vmem:[%s1132_s29 + $0xd8] sm:$0xff] %v328_v27 }
  0x24   : > { %331 = vst [vmem:[%s1132_s29 + $0xe0] sm:$0xff] %v330_v28  ;;  %333 = vst [vmem:[%s1132_s29 + $0xe8] sm:$0xff] %v332_v29  ;;  %v334_v30 = vld [vmem:[%s1127_s28 + $0x1e0] sm:$0xff]  ;;  %v336_v31 = vld [vmem:[%s1127_s28 + $0x1f0] sm:$0xff] }
  0x25   : > { %335 = vst [vmem:[%s1132_s29 + $0xf0] sm:$0xff] %v334_v30  ;;  %337 = vst [vmem:[%s1132_s29 + $0xf8] sm:$0xff] %v336_v31 }
  0x26 PF: > { %p879_p8 = scmp.ge.s32.totalorder %s1057_s16, 1  ;;  %p350_p9 = scmp.lt.s32.totalorder %s1057_s16, 3 }
  0x28   : > { %p351_p10 = pnand %p879_p8, %p350_p9 }
  0x29   : > { %s357_s30 = sand.u32 (!%p351_p10), 1, %s1041_s12   ;;  %v1018_v32 = vld [vmem:[%s1267_s0 + $0x4] ss:$8 sps:$4 sm:$0xff] (!%p351_p10)   ;;  %v1016_v1 = vld [vmem:[%s1267_s0] ss:$8 sps:$4 sm:$0xff] (!%p351_p10)   ;;  %s882_s10 = sshll.u32 (!%p351_p10), %s1049_s14, 1  ;;  %v690_v2 = vlaneseq (!%p351_p10) }
  0x2a   : > { %354 = sbr.rel (%p351_p10) target bundleno = 337 (0x151), region = 66  ;;  %s880_s4 = sshll.u32 (!%p351_p10), %s357_s30, 8  ;;  %662 = vmatprep.mubr.bf16.mxu0 (!%p351_p10), %v1018_v32 }
  0x2b   : > { %s1203_s7 = scalar_lea.vmem (!%p351_p10), [#allocation3], %s880_s4  ;;  %p408_p11 = scmp.lt.s32.totalorder (!%p351_p10), %s882_s10, 3  ;;  %v691_v3 = vshrl.u32 (!%p351_p10), %v690_v2, 7 }
  0x2c   : > { %v968_v33 = vld [vmem:[%s1203_s7 + $0x4] ss:$8 sps:$4 sm:$0xff] (!%p351_p10)   ;;  %v970_v34 = vld [vmem:[%s1203_s7] ss:$8 sps:$4 sm:$0xff] (!%p351_p10)   ;;  %v971_v35 = vld [vmem:[%s1203_s7 + $0x14] ss:$8 sps:$4 sm:$0xff] (!%p351_p10)  }
  0x2d   : > { %630 = vmatprep.subr.bf16.mxu0 (!%p351_p10), %v968_v33  ;;  %v973_v36 = vld [vmem:[%s1203_s7 + $0x10] ss:$8 sps:$4 sm:$0xff] (!%p351_p10)   ;;  %v974_v37 = vld [vmem:[%s1203_s7 + $0x24] ss:$8 sps:$4 sm:$0xff] (!%p351_p10)   ;;  %v976_v38 = vld [vmem:[%s1203_s7 + $0x20] ss:$8 sps:$4 sm:$0xff] (!%p351_p10)  }
  0x2e   : > { %631 = vmatpush1.bf16.msra.mxu0 (!%p351_p10), %v970_v34  ;;  %v977_v39 = vld [vmem:[%s1203_s7 + $0x34] ss:$8 sps:$4 sm:$0xff] (!%p351_p10)   ;;  %v979_v40 = vld [vmem:[%s1203_s7 + $0x30] ss:$8 sps:$4 sm:$0xff] (!%p351_p10)   ;;  %v980_v41 = vld [vmem:[%s1203_s7 + $0x44] ss:$8 sps:$4 sm:$0xff] (!%p351_p10)  }
  0x2f   : > { %632 = vmatprep.subr.bf16.mxu0 (!%p351_p10), %v971_v35  ;;  %v982_v42 = vld [vmem:[%s1203_s7 + $0x40] ss:$8 sps:$4 sm:$0xff] (!%p351_p10)   ;;  %v983_v43 = vld [vmem:[%s1203_s7 + $0x54] ss:$8 sps:$4 sm:$0xff] (!%p351_p10)   ;;  %v985_v44 = vld [vmem:[%s1203_s7 + $0x50] ss:$8 sps:$4 sm:$0xff] (!%p351_p10)  }
  0x30   : > { %v986_v45 = vld [vmem:[%s1203_s7 + $0x64] ss:$8 sps:$4 sm:$0xff] (!%p351_p10)   ;;  %v988_v46 = vld [vmem:[%s1203_s7 + $0x60] ss:$8 sps:$4 sm:$0xff] (!%p351_p10)   ;;  %v989_v47 = vld [vmem:[%s1203_s7 + $0x74] ss:$8 sps:$4 sm:$0xff] (!%p351_p10)  }
  0x31   : > { %v991_v48 = vld [vmem:[%s1203_s7 + $0x70] ss:$8 sps:$4 sm:$0xff]   ;;  %v992_v49 = vld [vmem:[%s1203_s7 + $0x84] ss:$8 sps:$4 sm:$0xff]   ;;  %v994_v50 = vld [vmem:[%s1203_s7 + $0x80] ss:$8 sps:$4 sm:$0xff]  }
  0x32   : > { %633 = vmatpush1.bf16.msra.mxu0 %v973_v36  ;;  %v995_v51 = vld [vmem:[%s1203_s7 + $0x94] ss:$8 sps:$4 sm:$0xff]   ;;  %v997_v52 = vld [vmem:[%s1203_s7 + $0x90] ss:$8 sps:$4 sm:$0xff]   ;;  %v998_v53 = vld [vmem:[%s1203_s7 + $0xa4] ss:$8 sps:$4 sm:$0xff]  }
  0x33   : > { %634 = vmatprep.subr.bf16.mxu0 %v974_v37  ;;  %v1000_v54 = vld [vmem:[%s1203_s7 + $0xa0] ss:$8 sps:$4 sm:$0xff]   ;;  %v1001_v55 = vld [vmem:[%s1203_s7 + $0xb4] ss:$8 sps:$4 sm:$0xff]   ;;  %v1003_v56 = vld [vmem:[%s1203_s7 + $0xb0] ss:$8 sps:$4 sm:$0xff]  }
  0x34   : > { %v1004_v57 = vld [vmem:[%s1203_s7 + $0xc4] ss:$8 sps:$4 sm:$0xff]   ;;  %v1006_v58 = vld [vmem:[%s1203_s7 + $0xc0] ss:$8 sps:$4 sm:$0xff]   ;;  %v1007_v59 = vld [vmem:[%s1203_s7 + $0xd4] ss:$8 sps:$4 sm:$0xff]  }
  0x35   : > { %v1009_v60 = vld [vmem:[%s1203_s7 + $0xd0] ss:$8 sps:$4 sm:$0xff]   ;;  %v1010_v61 = vld [vmem:[%s1203_s7 + $0xe4] ss:$8 sps:$4 sm:$0xff]   ;;  %v1012_v62 = vld [vmem:[%s1203_s7 + $0xe0] ss:$8 sps:$4 sm:$0xff]  }
  0x36   : > { %635 = vmatpush1.bf16.msra.mxu0 %v976_v38  ;;  %v1013_v63 = vld [vmem:[%s1203_s7 + $0xf4] ss:$8 sps:$4 sm:$0xff]   ;;  %v1015_v0 = vld [vmem:[%s1203_s7 + $0xf0] ss:$8 sps:$4 sm:$0xff]   ;;  %s1279_s10 = smov (!%p408_p11, %s882_s10), 3  ;;  %v692_v4 = vsub.s32 0, %v691_v3 }
  0x37   : > { %636 = vmatprep.subr.bf16.mxu0 %v977_v39  ;;  %s410_s19 = scalar_lea.vmem %s1269_s2, %s1279_s10  ;;  %v696_v6 = vsub.s32 1, %v691_v3  ;;  %s881_s20 = sshll.u32 %s357_s30, 4 }
  0x38   : > { %v688_v5 = vld [vmem:[%s410_s19] sm:$0x3]  ;;  %s392_s23 = scalar_lea.vmem [#allocation4], %s881_s20  ;;  %s927_s24 = sshll.u32 (%p1114_p6), %s1049_s14, 3 }
  0x39   : > { %v693_v7 = vrot.slane %v688_v5, %v692_v4  ;;  %v697_v8 = vrot.slane %v688_v5, %v696_v6  ;;  %s730_s26 = scalar_lea.vmem (%p1114_p6), %s1270_s3, %s927_s24 }
  0x3a   : > { %637 = vmatpush1.bf16.msra.mxu0 %v979_v40 }
  0x3b   : > { %638 = vmatprep.subr.bf16.mxu0 %v980_v41 }
  0x3e   : > { %639 = vmatpush1.bf16.msra.mxu0 %v982_v42 }
  0x3f   : > { %640 = vmatprep.subr.bf16.mxu0 %v983_v43 }
  0x42   : > { %641 = vmatpush1.bf16.msra.mxu0 %v985_v44 }
  0x43   : > { %642 = vmatprep.subr.bf16.mxu0 %v986_v45 }
  0x46   : > { %643 = vmatpush1.bf16.msra.mxu0 %v988_v46 }
  0x47   : > { %644 = vmatprep.subr.bf16.mxu0 %v989_v47 }
  0x4a   : > { %645 = vmatpush1.bf16.msra.mxu0 %v991_v48 }
  0x4b   : > { %646 = vmatprep.subr.bf16.mxu0 %v992_v49 }
  0x4e   : > { %647 = vmatpush1.bf16.msra.mxu0 %v994_v50 }
  0x4f   : > { %648 = vmatprep.subr.bf16.mxu0 %v995_v51 }
  0x52   : > { %649 = vmatpush1.bf16.msra.mxu0 %v997_v52 }
  0x53   : > { %650 = vmatprep.subr.bf16.mxu0 %v998_v53 }
  0x56   : > { %651 = vmatpush1.bf16.msra.mxu0 %v1000_v54 }
  0x57   : > { %652 = vmatprep.subr.bf16.mxu0 %v1001_v55 }
  0x5a   : > { %653 = vmatpush1.bf16.msra.mxu0 %v1003_v56 }
  0x5b   : > { %654 = vmatprep.subr.bf16.mxu0 %v1004_v57 }
  0x5e   : > { %655 = vmatpush1.bf16.msra.mxu0 %v1006_v58 }
  0x5f   : > { %656 = vmatprep.subr.bf16.mxu0 %v1007_v59 }
  0x62   : > { %657 = vmatpush1.bf16.msra.mxu0 %v1009_v60 }
  0x63   : > { %658 = vmatprep.subr.bf16.mxu0 %v1010_v61 }
  0x66   : > { %659 = vmatpush1.bf16.msra.mxu0 %v1012_v62 }
  0x67   : > { %660 = vmatprep.subr.bf16.mxu0 %v1013_v63 }
  0x6a   : > { %661 = vmatpush1.bf16.msra.mxu0 %v1015_v0 }
  0x6d   : > { %663 = vmatmul.mubr.bf16.vlgmr.msra.gmra.mrb[0].mxu0 %v1016_v1 }
 0x140   : > { %v664_v9 = vpop.f32.mrb[0].mxu0 }
 0x141   : > { %v700_v10 = vadd.f32 %v693_v7, %v664_v9  ;;  %v666_v11 = vpop.f32.mrb[1].mxu0 }
 0x142   : > { %v701_v12 = vadd.f32 %v697_v8, %v666_v11  ;;  %v668_v13 = vpop.f32.mrb[2].mxu0  ;;  %724 = sbr.rel (!%p1114_p6) target bundleno = 337 (0x151), region = 82 }
 0x143   : > { %v702_v14 = vadd.f32 %v693_v7, %v668_v13  ;;  %v670_v15 = vpop.f32.mrb[3].mxu0 }
 0x144   : > { %v925_v16 = vpack.c.bf16 %v701_v12, %v700_v10  ;;  %v703_v17 = vadd.f32 %v697_v8, %v670_v15 }
 0x146   : > { %716 = vst [vmem:[%s392_s23] sm:$0xff] %v925_v16  ;;  %v926_v18 = vpack.c.bf16 %v703_v17, %v702_v14 }
 0x148   : > { %717 = vst [vmem:[%s392_s23 + $0x8] sm:$0xff] %v926_v18 }
 0x14d   : > { %v760_v19 = vld [vmem:[%s392_s23] sm:$0xff] }
 0x14e   : > { %761 = vst [vmem:[%s730_s26] sm:$0xff] %v760_v19 }
 0x14f   : > { %v762_v20 = vld [vmem:[%s392_s23 + $0x8] sm:$0xff] }
 0x150   : > { %763 = vst [vmem:[%s730_s26 + $0x10] sm:$0xff] %v762_v20 }
 0x151 PF: > { %s13_s16 = sadd.s32 1, %s1057_s16   ;;  %s1272_s12 = smov %s1045_s13 }
 0x152   : > { %p10_p12 = scmp.ge.s32.totalorder %s13_s16, 4   ;;  %s1273_s13 = smov %s1119_s22 }
 0x153   : > { %s1274_s14 = smov %s1053_s15  ;;  %s1275_s15 = smov %s1277_s17 }
 0x154   :  { %12 = sbr.rel (!%p10_p12) target bundleno = 3 (0x3), region = 157 }

// kernel: gaze3inputs_forward.35
= control target key start
LH: loop header
LB: loop body
LE: loop exit
PB: predicated region body
PF: predicated region fallthrough
CT: control target
= control target key end

     0   :  { %s1813_s0 = inlined_call_operand.vmem [shape: bf16[16,2304], index: 0, kind: input, shape index: {}]   ;;  %s1814_s1 = inlined_call_operand.vmem [shape: bf16[2304,512], index: 1, kind: input, shape index: {}]   ;;  %s1815_s2 = inlined_call_operand.vmem [shape: f32[1,512], index: 2, kind: input, shape index: {}]   ;;  %s1816_s3 = inlined_call_operand.vmem [shape: bf16[16,512], index: 3, kind: output, shape index: {}]  }
   0x1   :  { %1818 = sst [smem:[#allocation7_spill]] %s1813_s0 }
   0x2   :  { %1819 = sst [smem:[#allocation8_spill]] %s1814_s1 }
   0x3   :  { %s1480_s12 = smov 0   ;;  %s1482_s13 = smov 0  }
   0x4   :  { %s1484_s14 = smov 0   ;;  %s1486_s15 = smov 0  }
   0x5   :  { %s1488_s16 = smov 0   ;;  %s1490_s17 = smov 0  }
   0x6   :  { %s1492_s18 = smov 0   ;;  %s1494_s19 = smov 0  }
   0x7   :  { %s1496_s20 = smov 0   ;;  %s1498_s21 = smov 0  }
   0x8   :  { %s1500_s22 = smov 0  }
   0x9 LB: > { %s1116_s23 = sadd.s32 4294967295, %s1456_s22   ;;  %s25_s24 = sadd.s32 1, %s1448_s20  ;;  %s1456_s22 = sphi %s1500_s22, %s13_s22   ;;  %s1452_s21 = sphi %s1498_s21, %s1836_s21   ;;  %s1448_s20 = sphi %s1496_s20, %s1835_s20   ;;  %s1444_s19 = sphi %s1494_s19, %s1834_s19   ;;  %s1440_s18 = sphi %s1492_s18, %s1833_s18   ;;  %s1436_s17 = sphi %s1490_s17, %s1832_s17   ;;  %s1432_s16 = sphi %s1488_s16, %s1831_s16   ;;  %s1428_s15 = sphi %s1486_s15, %s1830_s15   ;;  %s1424_s14 = sphi %s1484_s14, %s1829_s14   ;;  %s1420_s13 = sphi %s1482_s13, %s1828_s13   ;;  %s1416_s12 = sphi %s1480_s12, %s1827_s12  }
   0xa   : > { %p26_p0 = scmp.ge.s32.totalorder %s25_s24, 6  ;;  %s28_s25 = sadd.s32 1, %s1452_s21 }
   0xb   : > { %s41_s26 = sadd.s32 1, %s1436_s17  ;;  %p48_p1 = scmp.ne.s32.totalorder %s1436_s17, %s1432_s16 }
   0xc   : > { %s1838_s24 = smov (%p26_p0, %s25_s24), 0  ;;  %s1840_s25 = smov (!%p26_p0, %s28_s25), %s1452_s21 }
   0xd   : > { %s37_s27 = ssub.s32 %s1448_s20, %s1838_s24  ;;  %p49_p2 = scmp.eq.s32.totalorder %s1456_s22, 0 }
   0xe   : > { %p30_p3 = scmp.ge.s32.totalorder %s1840_s25, 2  ;;  %p39_p4 = scmp.eq.s32.totalorder %s37_s27, 0 }
   0xf   : > { %p1547_p5 = por %p49_p2, %p48_p1  ;;  %s69_s29 = sadd.s32 1, %s1428_s15 }
  0x10   : > { %s1842_s25 = smov (%p30_p3, %s1840_s25), 0  ;;  %p76_p6 = scmp.ne.s32.totalorder %s1428_s15, %s1424_s14 }
  0x11   : > { %1821 = sst [smem:[#allocation6_spill]] %s1842_s25  ;;  %s65_s4 = ssub.s32 %s1452_s21, %s1842_s25 }
  0x12   : > { %s1555_s30 = scalar_select %p39_p4, %s1436_s17, %s41_s26  }
  0x13   : > { %s66_s5 = sor.u32 %s65_s4, %s37_s27  ;;  %p121_p7 = scmp.eq.s32.totalorder %s65_s4, 0 }
  0x14   : > { %p67_p8 = scmp.eq.s32.totalorder %s66_s5, 0  ;;  %p1561_p9 = por %p76_p6, %p49_p2 }
  0x15   : > { %s123_s7 = sadd.s32 1, %s1420_s13  ;;  %p133_p10 = scmp.ne.s32.totalorder %s1420_s13, %s1416_s12 }
  0x16   : > { %s1569_s8 = scalar_select %p67_p8, %s1428_s15, %s69_s29  }
  0x17   : > { %s1572_s9 = scalar_select %p121_p7, %s1420_s13, %s123_s7  }
  0x18   : > { %p134_p11 = scmp.eq.s32.totalorder %s1116_s23, 11  ;;  %p1119_p13 = scmp.ge.s32.totalorder %s1456_s22, 12 }
  0x1a   : > { %p1574_p12 = por %p134_p11, %p133_p10  ;;  %156 = sbr.rel (%p1119_p13) target bundleno = 78 (0x4e), region = 16 }
  0x21   : > { %159 = sbr.rel (!%p1547_p5) target bundleno = 44 (0x2c), region = 20  ;;  %s161_s11 = sand.u32 (%p1547_p5), 1, %s1436_s17  }
  0x22   : > { %s1191_s26 = smul.u32 (%p1547_p5), 12, %s1448_s20  ;;  %s1824_s0 = sld [smem:[#allocation7_spill]] (%p1547_p5) }
  0x23   : > { %s1200_s27 = smul.u32 (%p1547_p5), 24, %s161_s11 }
  0x25   : > { %s163_s23 = scalar_lea.vmem (%p1547_p5), [#allocation3], %s1200_s27 }
  0x28   : > { %s169_s5 = scalar_lea.vmem %s1824_s0, %s1191_s26 }
  0x29   : > { %v184_v0 = vld [vmem:[%s169_s5] sm:$0xff]  ;;  %v186_v1 = vld [vmem:[%s169_s5 + $0x48] sm:$0xff]  ;;  %v1123_v3 = vld [vmem:[%s169_s5 + $0x50] sm:$0xf] }
  0x2a   : > { %v1121_v2 = vld [vmem:[%s169_s5 + $0x8] sm:$0xf]  ;;  %185 = vst [vmem:[%s163_s23] sm:$0xff] %v184_v0  ;;  %187 = vst [vmem:[%s163_s23 + $0xc] sm:$0xff] %v186_v1 }
  0x2b   : > { %1122 = vst [vmem:[%s163_s23 + $0x8] sm:$0xf] %v1121_v2  ;;  %1124 = vst [vmem:[%s163_s23 + $0x14] sm:$0xf] %v1123_v3 }
  0x2c PF: > { %204 = sbr.rel (!%p1561_p9) target bundleno = 78 (0x4e), region = 46  ;;  %s206_s28 = sand.u32 (%p1561_p9), 1, %s1428_s15  }
  0x2d   : > { %s1201_s7 = smul.u32 (%p1561_p9), 384, %s206_s28  ;;  %s1125_s11 = sshll.u32 (%p1561_p9), %s1452_s21, 1 }
  0x2e   : > { %s1192_s26 = smul.u32 (%p1561_p9), 192, %s1448_s20  ;;  %s1825_s1 = sld [smem:[#allocation8_spill]] (%p1561_p9) }
  0x2f   : > { %s1599_s6 = scalar_lea.vmem (%p1561_p9), [#allocation4], %s1201_s7 }
  0x30   : > { %s212_s29 = sadd.s32 (%p1561_p9), %s1192_s26, %s1125_s11 }
  0x31   : > { %s1127_s4 = sshll.u32 (%p1561_p9), %s212_s29, 2 }
  0x34   : > { %s1594_s25 = scalar_lea.vmem %s1825_s1, %s1127_s4 }
  0x35   : > { %v336_v4 = vld [vmem:[%s1594_s25] sm:$0xff]  ;;  %v338_v5 = vld [vmem:[%s1594_s25 + $0x10] sm:$0xff] }
  0x36   : > { %v340_v6 = vld [vmem:[%s1594_s25 + $0x20] sm:$0xff]  ;;  %337 = vst [vmem:[%s1599_s6] sm:$0xff] %v336_v4  ;;  %339 = vst [vmem:[%s1599_s6 + $0x8] sm:$0xff] %v338_v5  ;;  %v342_v7 = vld [vmem:[%s1594_s25 + $0x30] sm:$0xff] }
  0x37   : > { %341 = vst [vmem:[%s1599_s6 + $0x10] sm:$0xff] %v340_v6  ;;  %v344_v8 = vld [vmem:[%s1594_s25 + $0x40] sm:$0xff]  ;;  %v346_v9 = vld [vmem:[%s1594_s25 + $0x50] sm:$0xff]  ;;  %343 = vst [vmem:[%s1599_s6 + $0x18] sm:$0xff] %v342_v7 }
  0x38   : > { %345 = vst [vmem:[%s1599_s6 + $0x20] sm:$0xff] %v344_v8  ;;  %347 = vst [vmem:[%s1599_s6 + $0x28] sm:$0xff] %v346_v9  ;;  %v348_v10 = vld [vmem:[%s1594_s25 + $0x60] sm:$0xff]  ;;  %v350_v11 = vld [vmem:[%s1594_s25 + $0x70] sm:$0xff] }
  0x39   : > { %v352_v12 = vld [vmem:[%s1594_s25 + $0x80] sm:$0xff]  ;;  %349 = vst [vmem:[%s1599_s6 + $0x30] sm:$0xff] %v348_v10  ;;  %351 = vst [vmem:[%s1599_s6 + $0x38] sm:$0xff] %v350_v11  ;;  %v354_v13 = vld [vmem:[%s1594_s25 + $0x90] sm:$0xff] }
  0x3a   : > { %353 = vst [vmem:[%s1599_s6 + $0x40] sm:$0xff] %v352_v12  ;;  %v356_v14 = vld [vmem:[%s1594_s25 + $0xa0] sm:$0xff]  ;;  %v358_v15 = vld [vmem:[%s1594_s25 + $0xb0] sm:$0xff]  ;;  %355 = vst [vmem:[%s1599_s6 + $0x48] sm:$0xff] %v354_v13 }
  0x3b   : > { %357 = vst [vmem:[%s1599_s6 + $0x50] sm:$0xff] %v356_v14  ;;  %359 = vst [vmem:[%s1599_s6 + $0x58] sm:$0xff] %v358_v15  ;;  %v360_v16 = vld [vmem:[%s1594_s25 + $0xc0] sm:$0xff]  ;;  %v362_v17 = vld [vmem:[%s1594_s25 + $0xd0] sm:$0xff] }
  0x3c   : > { %v364_v18 = vld [vmem:[%s1594_s25 + $0xe0] sm:$0xff]  ;;  %361 = vst [vmem:[%s1599_s6 + $0x60] sm:$0xff] %v360_v16  ;;  %363 = vst [vmem:[%s1599_s6 + $0x68] sm:$0xff] %v362_v17  ;;  %v366_v19 = vld [vmem:[%s1594_s25 + $0xf0] sm:$0xff] }
  0x3d   : > { %365 = vst [vmem:[%s1599_s6 + $0x70] sm:$0xff] %v364_v18  ;;  %v368_v20 = vld [vmem:[%s1594_s25 + $0x100] sm:$0xff]  ;;  %v370_v21 = vld [vmem:[%s1594_s25 + $0x110] sm:$0xff]  ;;  %367 = vst [vmem:[%s1599_s6 + $0x78] sm:$0xff] %v366_v19 }
  0x3e   : > { %369 = vst [vmem:[%s1599_s6 + $0x80] sm:$0xff] %v368_v20  ;;  %371 = vst [vmem:[%s1599_s6 + $0x88] sm:$0xff] %v370_v21  ;;  %v372_v22 = vld [vmem:[%s1594_s25 + $0x120] sm:$0xff]  ;;  %v374_v23 = vld [vmem:[%s1594_s25 + $0x130] sm:$0xff] }
  0x3f   : > { %v376_v24 = vld [vmem:[%s1594_s25 + $0x140] sm:$0xff]  ;;  %373 = vst [vmem:[%s1599_s6 + $0x90] sm:$0xff] %v372_v22  ;;  %375 = vst [vmem:[%s1599_s6 + $0x98] sm:$0xff] %v374_v23  ;;  %v378_v25 = vld [vmem:[%s1594_s25 + $0x150] sm:$0xff] }
  0x40   : > { %377 = vst [vmem:[%s1599_s6 + $0xa0] sm:$0xff] %v376_v24  ;;  %v380_v26 = vld [vmem:[%s1594_s25 + $0x160] sm:$0xff]  ;;  %v382_v27 = vld [vmem:[%s1594_s25 + $0x170] sm:$0xff]  ;;  %379 = vst [vmem:[%s1599_s6 + $0xa8] sm:$0xff] %v378_v25 }
  0x41   : > { %381 = vst [vmem:[%s1599_s6 + $0xb0] sm:$0xff] %v380_v26  ;;  %383 = vst [vmem:[%s1599_s6 + $0xb8] sm:$0xff] %v382_v27  ;;  %v384_v28 = vld [vmem:[%s1594_s25 + $0x180] sm:$0xff]  ;;  %v386_v29 = vld [vmem:[%s1594_s25 + $0x190] sm:$0xff] }
  0x42   : > { %v388_v30 = vld [vmem:[%s1594_s25 + $0x1a0] sm:$0xff]  ;;  %385 = vst [vmem:[%s1599_s6 + $0xc0] sm:$0xff] %v384_v28  ;;  %387 = vst [vmem:[%s1599_s6 + $0xc8] sm:$0xff] %v386_v29  ;;  %v390_v31 = vld [vmem:[%s1594_s25 + $0x1b0] sm:$0xff] }
  0x43   : > { %389 = vst [vmem:[%s1599_s6 + $0xd0] sm:$0xff] %v388_v30  ;;  %v392_v32 = vld [vmem:[%s1594_s25 + $0x1c0] sm:$0xff]  ;;  %v394_v33 = vld [vmem:[%s1594_s25 + $0x1d0] sm:$0xff]  ;;  %391 = vst [vmem:[%s1599_s6 + $0xd8] sm:$0xff] %v390_v31 }
  0x44   : > { %393 = vst [vmem:[%s1599_s6 + $0xe0] sm:$0xff] %v392_v32  ;;  %395 = vst [vmem:[%s1599_s6 + $0xe8] sm:$0xff] %v394_v33  ;;  %v396_v34 = vld [vmem:[%s1594_s25 + $0x1e0] sm:$0xff]  ;;  %v398_v35 = vld [vmem:[%s1594_s25 + $0x1f0] sm:$0xff] }
  0x45   : > { %v400_v36 = vld [vmem:[%s1594_s25 + $0x200] sm:$0xff]  ;;  %397 = vst [vmem:[%s1599_s6 + $0xf0] sm:$0xff] %v396_v34  ;;  %399 = vst [vmem:[%s1599_s6 + $0xf8] sm:$0xff] %v398_v35  ;;  %v402_v37 = vld [vmem:[%s1594_s25 + $0x210] sm:$0xff] }
  0x46   : > { %401 = vst [vmem:[%s1599_s6 + $0x100] sm:$0xff] %v400_v36  ;;  %v404_v38 = vld [vmem:[%s1594_s25 + $0x220] sm:$0xff]  ;;  %v406_v39 = vld [vmem:[%s1594_s25 + $0x230] sm:$0xff]  ;;  %403 = vst [vmem:[%s1599_s6 + $0x108] sm:$0xff] %v402_v37 }
  0x47   : > { %405 = vst [vmem:[%s1599_s6 + $0x110] sm:$0xff] %v404_v38  ;;  %407 = vst [vmem:[%s1599_s6 + $0x118] sm:$0xff] %v406_v39  ;;  %v408_v40 = vld [vmem:[%s1594_s25 + $0x240] sm:$0xff]  ;;  %v410_v41 = vld [vmem:[%s1594_s25 + $0x250] sm:$0xff] }
  0x48   : > { %v412_v42 = vld [vmem:[%s1594_s25 + $0x260] sm:$0xff]  ;;  %409 = vst [vmem:[%s1599_s6 + $0x120] sm:$0xff] %v408_v40  ;;  %411 = vst [vmem:[%s1599_s6 + $0x128] sm:$0xff] %v410_v41  ;;  %v414_v43 = vld [vmem:[%s1594_s25 + $0x270] sm:$0xff] }
  0x49   : > { %413 = vst [vmem:[%s1599_s6 + $0x130] sm:$0xff] %v412_v42  ;;  %v416_v44 = vld [vmem:[%s1594_s25 + $0x280] sm:$0xff]  ;;  %v418_v45 = vld [vmem:[%s1594_s25 + $0x290] sm:$0xff]  ;;  %415 = vst [vmem:[%s1599_s6 + $0x138] sm:$0xff] %v414_v43 }
  0x4a   : > { %417 = vst [vmem:[%s1599_s6 + $0x140] sm:$0xff] %v416_v44  ;;  %419 = vst [vmem:[%s1599_s6 + $0x148] sm:$0xff] %v418_v45  ;;  %v420_v46 = vld [vmem:[%s1594_s25 + $0x2a0] sm:$0xff]  ;;  %v422_v47 = vld [vmem:[%s1594_s25 + $0x2b0] sm:$0xff] }
  0x4b   : > { %v424_v48 = vld [vmem:[%s1594_s25 + $0x2c0] sm:$0xff]  ;;  %421 = vst [vmem:[%s1599_s6 + $0x150] sm:$0xff] %v420_v46  ;;  %423 = vst [vmem:[%s1599_s6 + $0x158] sm:$0xff] %v422_v47  ;;  %v426_v49 = vld [vmem:[%s1594_s25 + $0x2d0] sm:$0xff] }
  0x4c   : > { %425 = vst [vmem:[%s1599_s6 + $0x160] sm:$0xff] %v424_v48  ;;  %v428_v50 = vld [vmem:[%s1594_s25 + $0x2e0] sm:$0xff]  ;;  %v430_v51 = vld [vmem:[%s1594_s25 + $0x2f0] sm:$0xff]  ;;  %427 = vst [vmem:[%s1599_s6 + $0x168] sm:$0xff] %v426_v49 }
  0x4d   : > { %429 = vst [vmem:[%s1599_s6 + $0x170] sm:$0xff] %v428_v50  ;;  %431 = vst [vmem:[%s1599_s6 + $0x178] sm:$0xff] %v430_v51 }
  0x4e PF: > { %p1128_p0 = scmp.ge.s32.totalorder %s1456_s22, 1  ;;  %p444_p1 = scmp.lt.s32.totalorder %s1456_s22, 13 }
  0x50   : > { %p445_p2 = pnand %p1128_p0, %p444_p1 }
  0x51   : > { %s451_s0 = sand.u32 (!%p445_p2), 1, %s1432_s16   ;;  %s458_s5 = sand.u32 (!%p445_p2), 1, %s1424_s14  }
  0x52   : > { %448 = sbr.rel (%p445_p2) target bundleno = 403 (0x193), region = 88  ;;  %s485_s28 = sand.u32 (!%p445_p2), 1, %s1416_s12  }
  0x53   : > { %s1202_s23 = smul.u32 (!%p445_p2), 24, %s451_s0  ;;  %s1129_s7 = sshll.u32 (!%p445_p2), %s485_s28, 4 }
  0x54   : > { %s1203_s25 = smul.u32 (!%p445_p2), 384, %s458_s5  ;;  %s1130_s11 = sshll.u32 (!%p445_p2), %s1444_s19, 1 }
  0x55   : > { %p493_p3 = scmp.lt.s32.totalorder (!%p445_p2), %s1130_s11, 3  ;;  %s1706_s27 = scalar_lea.vmem (!%p445_p2), [#allocation3], %s1202_s23 }
  0x56   : > { %s1708_s6 = scalar_lea.vmem (!%p445_p2), [#allocation4], %s1203_s25  ;;  %s1710_s1 = scalar_lea.vmem (!%p445_p2), [#allocation5], %s1129_s7 }
  0x57   : > { %p1131_p4 = scmp.ne.s32.totalorder (!%p445_p2), %s1440_s18, 0 }
  0x59   : > { %s1844_s11 = smov (!%p493_p3, %s1130_s11), 3  ;;  %503 = sbr.rel (%p1131_p4) target bundleno = 96 (0x60), region = 100 }
  0x5a   : > { %s495_s4 = scalar_lea.vmem %s1815_s2, %s1844_s11  ;;  %v1458_v52 = vmov (!%p1131_p4), 0.0  }
  0x5b   : > { %504 = vst [vmem:[#allocation2] sm:$0xff] (!%p1131_p4), %v1458_v52  ;;  %505 = vst [vmem:[#allocation2 + $0x8] sm:$0xff] (!%p1131_p4), %v1458_v52 }
  0x5c   : > { %506 = vst [vmem:[#allocation2 + $0x10] sm:$0xff] (!%p1131_p4), %v1458_v52  ;;  %507 = vst [vmem:[#allocation2 + $0x18] sm:$0xff] (!%p1131_p4), %v1458_v52 }
  0x60 PF: > { %v1294_v53 = vld [vmem:[%s1708_s6 + $0x4] ss:$8 sps:$4 sm:$0xff]   ;;  %v1296_v54 = vld [vmem:[%s1708_s6] ss:$8 sps:$4 sm:$0xff]   ;;  %v1459_v55 = vmov 0   ;;  %p1183_p5 = scmp.ne.s32.totalorder %s1440_s18, 5 }
  0x61   : > { %895 = vmatprep.mubr.bf16.mxu0 %v1459_v55  ;;  %820 = vmatprep.subr.bf16.mxu1 %v1294_v53  ;;  %v1297_v56 = vld [vmem:[%s1708_s6 + $0x14] ss:$8 sps:$4 sm:$0xff]   ;;  %v1299_v57 = vld [vmem:[%s1708_s6 + $0x10] ss:$8 sps:$4 sm:$0xff]   ;;  %v1300_v58 = vld [vmem:[%s1708_s6 + $0x24] ss:$8 sps:$4 sm:$0xff]  }
  0x62   : > { %821 = vmatpush1.bf16.msra.mxu1 %v1296_v54  ;;  %v1302_v59 = vld [vmem:[%s1708_s6 + $0x20] ss:$8 sps:$4 sm:$0xff]   ;;  %v1303_v60 = vld [vmem:[%s1708_s6 + $0x34] ss:$8 sps:$4 sm:$0xff]   ;;  %v1305_v61 = vld [vmem:[%s1708_s6 + $0x30] ss:$8 sps:$4 sm:$0xff]  }
  0x63   : > { %822 = vmatprep.subr.bf16.mxu1 %v1297_v56  ;;  %v1318_v62 = vld [vmem:[%s1708_s6 + $0x104] ss:$8 sps:$4 sm:$0xff]   ;;  %v1320_v63 = vld [vmem:[%s1708_s6 + $0x100] ss:$8 sps:$4 sm:$0xff]   ;;  %v1324_v1 = vld [vmem:[%s1708_s6 + $0x114] ss:$8 sps:$4 sm:$0xff]  }
  0x64   : > { %v1306_v0 = vld [vmem:[%s1708_s6 + $0x44] ss:$8 sps:$4 sm:$0xff]   ;;  %863 = vmatprep.subr.bf16.mxu0 %v1318_v62  ;;  %v1326_v2 = vld [vmem:[%s1708_s6 + $0x110] ss:$8 sps:$4 sm:$0xff]   ;;  %v1308_v3 = vld [vmem:[%s1708_s6 + $0x40] ss:$8 sps:$4 sm:$0xff]  }
  0x65   : > { %864 = vmatpush1.bf16.msra.mxu0 %v1320_v63  ;;  %v1309_v4 = vld [vmem:[%s1708_s6 + $0x54] ss:$8 sps:$4 sm:$0xff]   ;;  %v1330_v5 = vld [vmem:[%s1708_s6 + $0x124] ss:$8 sps:$4 sm:$0xff]   ;;  %v1332_v6 = vld [vmem:[%s1708_s6 + $0x120] ss:$8 sps:$4 sm:$0xff]  }
  0x66   : > { %823 = vmatpush1.bf16.msra.mxu1 %v1299_v57  ;;  %865 = vmatprep.subr.bf16.mxu0 %v1324_v1  ;;  %v1311_v7 = vld [vmem:[%s1708_s6 + $0x50] ss:$8 sps:$4 sm:$0xff]   ;;  %v1336_v8 = vld [vmem:[%s1708_s6 + $0x134] ss:$8 sps:$4 sm:$0xff]   ;;  %v1312_v9 = vld [vmem:[%s1708_s6 + $0x64] ss:$8 sps:$4 sm:$0xff]  }
  0x67   : > { %824 = vmatprep.subr.bf16.mxu1 %v1300_v58  ;;  %v1338_v10 = vld [vmem:[%s1708_s6 + $0x130] ss:$8 sps:$4 sm:$0xff]   ;;  %v1314_v11 = vld [vmem:[%s1708_s6 + $0x60] ss:$8 sps:$4 sm:$0xff]   ;;  %v1342_v12 = vld [vmem:[%s1708_s6 + $0x144] ss:$8 sps:$4 sm:$0xff]  }
  0x68   : > { %v1315_v13 = vld [vmem:[%s1708_s6 + $0x74] ss:$8 sps:$4 sm:$0xff]   ;;  %v1344_v14 = vld [vmem:[%s1708_s6 + $0x140] ss:$8 sps:$4 sm:$0xff]   ;;  %v1317_v15 = vld [vmem:[%s1708_s6 + $0x70] ss:$8 sps:$4 sm:$0xff]  }
  0x69   : > { %866 = vmatpush1.bf16.msra.mxu0 %v1326_v2  ;;  %v1348_v16 = vld [vmem:[%s1708_s6 + $0x154] ss:$8 sps:$4 sm:$0xff]   ;;  %v1321_v17 = vld [vmem:[%s1708_s6 + $0x84] ss:$8 sps:$4 sm:$0xff]   ;;  %v1350_v18 = vld [vmem:[%s1708_s6 + $0x150] ss:$8 sps:$4 sm:$0xff]  }
  0x6a   : > { %825 = vmatpush1.bf16.msra.mxu1 %v1302_v59  ;;  %867 = vmatprep.subr.bf16.mxu0 %v1330_v5  ;;  %v1323_v19 = vld [vmem:[%s1708_s6 + $0x80] ss:$8 sps:$4 sm:$0xff]   ;;  %v1354_v20 = vld [vmem:[%s1708_s6 + $0x164] ss:$8 sps:$4 sm:$0xff]   ;;  %v1327_v21 = vld [vmem:[%s1708_s6 + $0x94] ss:$8 sps:$4 sm:$0xff]  }
  0x6b   : > { %826 = vmatprep.subr.bf16.mxu1 %v1303_v60  ;;  %v1356_v22 = vld [vmem:[%s1708_s6 + $0x160] ss:$8 sps:$4 sm:$0xff]   ;;  %v1329_v24 = vld [vmem:[%s1708_s6 + $0x90] ss:$8 sps:$4 sm:$0xff]   ;;  %v1360_v25 = vld [vmem:[%s1708_s6 + $0x174] ss:$8 sps:$4 sm:$0xff]  }
  0x6c   : > { %v1369_v23 = vld [vmem:[%s1706_s27 + $0x4] ss:$12 sps:$4 sm:$0xff]   ;;  %v1366_v30 = vld [vmem:[%s1706_s27 + $0x8] ss:$12 sps:$4 sm:$0xff]   ;;  %v1367_v40 = vld [vmem:[%s1706_s27] ss:$12 sps:$4 sm:$0xff]  }
  0x6d   : > { %868 = vmatpush1.bf16.msra.mxu0 %v1332_v6  ;;  %v1333_v26 = vld [vmem:[%s1708_s6 + $0xa4] ss:$8 sps:$4 sm:$0xff]   ;;  %852 = vmatprep.mubr.bf16.mxu1 %v1369_v23  ;;  %v1362_v27 = vld [vmem:[%s1708_s6 + $0x170] ss:$8 sps:$4 sm:$0xff]   ;;  %v1335_v28 = vld [vmem:[%s1708_s6 + $0xa0] ss:$8 sps:$4 sm:$0xff]  }
  0x6e   : > { %827 = vmatpush1.bf16.msra.mxu1 %v1305_v61  ;;  %869 = vmatprep.subr.bf16.mxu0 %v1336_v8  ;;  %v1339_v29 = vld [vmem:[%s1708_s6 + $0xb4] ss:$8 sps:$4 sm:$0xff]   ;;  %v1341_v31 = vld [vmem:[%s1708_s6 + $0xb0] ss:$8 sps:$4 sm:$0xff]   ;;  %v1345_v32 = vld [vmem:[%s1708_s6 + $0xc4] ss:$8 sps:$4 sm:$0xff]   ;;  %v924_v61 = vlaneseq (!%p1183_p5) }
  0x6f   : > { %828 = vmatprep.subr.bf16.mxu1 %v1306_v0  ;;  %v1347_v33 = vld [vmem:[%s1708_s6 + $0xc0] ss:$8 sps:$4 sm:$0xff]   ;;  %v1351_v34 = vld [vmem:[%s1708_s6 + $0xd4] ss:$8 sps:$4 sm:$0xff]   ;;  %v1353_v35 = vld [vmem:[%s1708_s6 + $0xd0] ss:$8 sps:$4 sm:$0xff]  }
  0x70   : > { %v1357_v36 = vld [vmem:[%s1708_s6 + $0xe4] ss:$8 sps:$4 sm:$0xff]   ;;  %v1359_v37 = vld [vmem:[%s1708_s6 + $0xe0] ss:$8 sps:$4 sm:$0xff]   ;;  %v1363_v38 = vld [vmem:[%s1708_s6 + $0xf4] ss:$8 sps:$4 sm:$0xff]  }
  0x71   : > { %870 = vmatpush1.bf16.msra.mxu0 %v1338_v10  ;;  %v1365_v39 = vld [vmem:[%s1708_s6 + $0xf0] ss:$8 sps:$4 sm:$0xff]   ;;  %v510_v51 = vld [vmem:[#allocation2 + $0x10] sm:$0xff]  ;;  %v511_v55 = vld [vmem:[#allocation2 + $0x18] sm:$0xff]  ;;  %v925_v62 = vshrl.u32 (!%p1183_p5), %v924_v61, 7 }
  0x72   : > { %829 = vmatpush1.bf16.msra.mxu1 %v1308_v3  ;;  %871 = vmatprep.subr.bf16.mxu0 %v1342_v12  ;;  %v508_v45 = vld [vmem:[#allocation2] sm:$0xff]  ;;  %v509_v48 = vld [vmem:[#allocation2 + $0x8] sm:$0xff] }
  0x73   : > { %830 = vmatprep.subr.bf16.mxu1 %v1309_v4  ;;  %v922_v63 = vld [vmem:[%s495_s4] sm:$0x3] (!%p1183_p5)  ;;  %v926_v1 = vsub.s32 (!%p1183_p5), 0, %v925_v62  ;;  %v930_v2 = vsub.s32 (!%p1183_p5), 1, %v925_v62 }
  0x75   : > { %872 = vmatpush1.bf16.msra.mxu0 %v1344_v14  ;;  %v927_v6 = vrot.slane (!%p1183_p5), %v922_v63, %v926_v1 }
  0x76   : > { %831 = vmatpush1.bf16.msra.mxu1 %v1311_v7  ;;  %873 = vmatprep.subr.bf16.mxu0 %v1348_v16  ;;  %v931_v7 = vrot.slane (!%p1183_p5), %v922_v63, %v930_v2 }
  0x77   : > { %832 = vmatprep.subr.bf16.mxu1 %v1312_v9 }
  0x79   : > { %874 = vmatpush1.bf16.msra.mxu0 %v1350_v18 }
  0x7a   : > { %833 = vmatpush1.bf16.msra.mxu1 %v1314_v11  ;;  %875 = vmatprep.subr.bf16.mxu0 %v1354_v20 }
  0x7b   : > { %834 = vmatprep.subr.bf16.mxu1 %v1315_v13 }
  0x7d   : > { %876 = vmatpush1.bf16.msra.mxu0 %v1356_v22 }
  0x7e   : > { %835 = vmatpush1.bf16.msra.mxu1 %v1317_v15  ;;  %877 = vmatprep.subr.bf16.mxu0 %v1360_v25 }
  0x7f   : > { %836 = vmatprep.subr.bf16.mxu1 %v1321_v17 }
  0x81   : > { %878 = vmatpush1.bf16.msra.mxu0 %v1362_v27 }
  0x82   : > { %837 = vmatpush1.bf16.msra.mxu1 %v1323_v19 }
  0x83   : > { %838 = vmatprep.subr.bf16.mxu1 %v1327_v21 }
  0x84   : > { %896 = vmatmul.mubr.bf16.vlgmr.msra.gmra.mrb[0].mxu0 %v1366_v30 }
  0x86   : > { %839 = vmatpush1.bf16.msra.mxu1 %v1329_v24 }
  0x87   : > { %840 = vmatprep.subr.bf16.mxu1 %v1333_v26 }
  0x8a   : > { %841 = vmatpush1.bf16.msra.mxu1 %v1335_v28 }
  0x8b   : > { %842 = vmatprep.subr.bf16.mxu1 %v1339_v29 }
  0x8e   : > { %843 = vmatpush1.bf16.msra.mxu1 %v1341_v31 }
  0x8f   : > { %844 = vmatprep.subr.bf16.mxu1 %v1345_v32 }
  0x92   : > { %845 = vmatpush1.bf16.msra.mxu1 %v1347_v33 }
  0x93   : > { %846 = vmatprep.subr.bf16.mxu1 %v1351_v34 }
  0x96   : > { %847 = vmatpush1.bf16.msra.mxu1 %v1353_v35 }
  0x97   : > { %848 = vmatprep.subr.bf16.mxu1 %v1357_v36 }
  0x9a   : > { %849 = vmatpush1.bf16.msra.mxu1 %v1359_v37 }
  0x9b   : > { %850 = vmatprep.subr.bf16.mxu1 %v1363_v38 }
  0x9e   : > { %851 = vmatpush1.bf16.msra.mxu1 %v1365_v39 }
  0xa1   : > { %853 = vmatmul.mubr.bf16.vlgmr.msra.gmra.mrb[0].mxu1 %v1367_v40 }
 0x157   : > { %v897_v41 = vpop.f32.mrb[0].mxu0 }
 0x158   : > { %v899_v42 = vpop.f32.mrb[1].mxu0 }
 0x159   : > { %v901_v43 = vpop.f32.mrb[2].mxu0 }
 0x15a   : > { %v903_v44 = vpop.f32.mrb[3].mxu0 }
 0x174   : > { %v854_v46 = vpop.f32.mrb[0].mxu1 }
 0x175   : > { %v898_v47 = vadd.f32 %v897_v41, %v854_v46  ;;  %v856_v49 = vpop.f32.mrb[1].mxu1 }
 0x176   : > { %v900_v50 = vadd.f32 %v899_v42, %v856_v49  ;;  %v858_v52 = vpop.f32.mrb[2].mxu1  ;;  %917 = sbr.rel (%p1183_p5) target bundleno = 395 (0x18b), region = 104 }
 0x177   : > { %v906_v53 = vadd.f32 %v898_v47, %v508_v45  ;;  %v902_v54 = vadd.f32 %v901_v43, %v858_v52  ;;  %v860_v56 = vpop.f32.mrb[3].mxu1 }
 0x178   : > { %v907_v57 = vadd.f32 %v900_v50, %v509_v48  ;;  %v904_v58 = vadd.f32 %v903_v44, %v860_v56 }
 0x179   : > { %910 = vst [vmem:[#allocation2] sm:$0xff] %v906_v53  ;;  %v908_v59 = vadd.f32 %v902_v54, %v510_v51 }
 0x17a   : > { %911 = vst [vmem:[#allocation2 + $0x8] sm:$0xff] %v907_v57  ;;  %v909_v60 = vadd.f32 %v904_v58, %v511_v55 }
 0x17b   : > { %912 = vst [vmem:[#allocation2 + $0x10] sm:$0xff] %v908_v59 }
 0x17c   : > { %913 = vst [vmem:[#allocation2 + $0x18] sm:$0xff] %v909_v60 }
 0x180   : > { %v918_v0 = vld [vmem:[#allocation2] sm:$0xff] }
 0x181   : > { %v919_v3 = vld [vmem:[#allocation2 + $0x8] sm:$0xff]  ;;  %v934_v8 = vadd.f32 %v927_v6, %v918_v0 }
 0x182   : > { %v920_v4 = vld [vmem:[#allocation2 + $0x10] sm:$0xff]  ;;  %v935_v9 = vadd.f32 %v931_v7, %v919_v3 }
 0x183   : > { %v921_v5 = vld [vmem:[#allocation2 + $0x18] sm:$0xff]  ;;  %v936_v10 = vadd.f32 %v927_v6, %v920_v4  ;;  %v938_v12 = vmax.f32 %v934_v8, 0.0 }
 0x184   : > { %v937_v11 = vadd.f32 %v931_v7, %v921_v5  ;;  %v939_v13 = vmax.f32 %v935_v9, 0.0 }
 0x185   : > { %v940_v14 = vmax.f32 %v936_v10, 0.0 }
 0x186   : > { %v941_v15 = vmax.f32 %v937_v11, 0.0  ;;  %v1193_v16 = vpack.c.bf16 %v939_v13, %v938_v12 }
 0x188   : > { %v1194_v17 = vpack.c.bf16 %v941_v15, %v940_v14  ;;  %954 = vst [vmem:[%s1710_s1] sm:$0xff] %v1193_v16 }
 0x18a   : > { %955 = vst [vmem:[%s1710_s1 + $0x8] sm:$0xff] %v1194_v17 }
 0x18b PF: > { %962 = sbr.rel (!%p1574_p12) target bundleno = 403 (0x193), region = 108  ;;  %s1195_s16 = sshll.u32 (%p1574_p12), %s1444_s19, 3 }
 0x18c   : > { %s968_s5 = scalar_lea.vmem (%p1574_p12), %s1816_s3, %s1195_s16 }
 0x18f   : > { %v998_v18 = vld [vmem:[%s1710_s1] sm:$0xff] (%p1574_p12) }
 0x190   : > { %999 = vst [vmem:[%s968_s5] sm:$0xff] (%p1574_p12), %v998_v18 }
 0x191   : > { %v1000_v19 = vld [vmem:[%s1710_s1 + $0x8] sm:$0xff] (%p1574_p12) }
 0x192   : > { %1001 = vst [vmem:[%s968_s5 + $0x10] sm:$0xff] %v1000_v19 }
 0x193 PF: > { %s13_s22 = sadd.s32 1, %s1456_s22   ;;  %s1826_s1 = sld [smem:[#allocation6_spill]] }
 0x194   : > { %p10_p6 = scmp.ge.s32.totalorder %s13_s22, 14   ;;  %s1827_s12 = smov %s1420_s13 }
 0x195   : > { %s1828_s13 = smov %s1572_s9  ;;  %s1829_s14 = smov %s1428_s15 }
 0x196   : > { %s1830_s15 = smov %s1569_s8  ;;  %s1831_s16 = smov %s1436_s17 }
 0x197   : > { %s1832_s17 = smov %s1555_s30  ;;  %s1833_s18 = smov %s1448_s20 }
 0x198   : > { %s1834_s19 = smov %s1452_s21  ;;  %s1835_s20 = smov %s1838_s24 }
 0x199   : > { %s1836_s21 = smov %s1826_s1  ;;  %12 = sbr.rel (!%p10_p6) target bundleno = 9 (0x9), region = 194 }

// kernel: gaze3inputs_forward.36
= control target key start
LH: loop header
LB: loop body
LE: loop exit
PB: predicated region body
PF: predicated region fallthrough
CT: control target
= control target key end

     0   :  { %s2210_s0 = inlined_call_operand.vmem [shape: bf16[16,4608], index: 0, kind: input, shape index: {}]   ;;  %s2211_s1 = inlined_call_operand.vmem [shape: bf16[4608,512], index: 1, kind: input, shape index: {}]   ;;  %s2212_s2 = inlined_call_operand.vmem [shape: f32[1,512], index: 2, kind: input, shape index: {}]   ;;  %s2213_s3 = inlined_call_operand.vmem [shape: bf16[16,512], index: 3, kind: input, shape index: {}]   ;;  %s2214_s4 = inlined_call_operand.vmem [shape: bf16[16,512], index: 4, kind: output, shape index: {}]  }
   0x1   :  { %2217 = sst [smem:[#allocation10_spill]] %s2210_s0 }
   0x2   :  { %s1803_s15 = smov 0   ;;  %s1805_s16 = smov 0  }
   0x3   :  { %s1807_s17 = smov 0   ;;  %s1809_s18 = smov 0  }
   0x4   :  { %s1811_s19 = smov 0   ;;  %s1813_s20 = smov 0  }
   0x5   :  { %s1815_s21 = smov 0   ;;  %s1817_s22 = smov 0  }
   0x6   :  { %s1819_s23 = smov 0   ;;  %s1821_s24 = smov 0  }
   0x7   :  { %s1823_s25 = smov 0  }
   0x8 LB: > { %s1390_s26 = sadd.s32 4294967295, %s1775_s25   ;;  %s26_s27 = sadd.s32 1, %s1767_s23  ;;  %s1775_s25 = sphi %s1823_s25, %s14_s25   ;;  %s1771_s24 = sphi %s1821_s24, %s2238_s24   ;;  %s1767_s23 = sphi %s1819_s23, %s2237_s23   ;;  %s1763_s22 = sphi %s1817_s22, %s2236_s22   ;;  %s1759_s21 = sphi %s1815_s21, %s2235_s21   ;;  %s1755_s20 = sphi %s1813_s20, %s2234_s20   ;;  %s1751_s19 = sphi %s1811_s19, %s2233_s19   ;;  %s1747_s18 = sphi %s1809_s18, %s2232_s18   ;;  %s1743_s17 = sphi %s1807_s17, %s2231_s17   ;;  %s1739_s16 = sphi %s1805_s16, %s2230_s16   ;;  %s1735_s15 = sphi %s1803_s15, %s2229_s15  }
   0x9   : > { %p27_p0 = scmp.ge.s32.totalorder %s26_s27, 9  ;;  %s29_s28 = sadd.s32 1, %s1771_s24 }
   0xa   : > { %s42_s29 = sadd.s32 1, %s1755_s20  ;;  %p49_p1 = scmp.ne.s32.totalorder %s1755_s20, %s1751_s19 }
   0xb   : > { %s2240_s27 = smov (%p27_p0, %s26_s27), 0  ;;  %s2242_s28 = smov (!%p27_p0, %s29_s28), %s1771_s24 }
   0xc   : > { %2218 = sst [smem:[#allocation7_spill]] %s2240_s27  ;;  %s38_s30 = ssub.s32 %s1767_s23, %s2240_s27 }
   0xd   : > { %p50_p2 = scmp.eq.s32.totalorder %s1775_s25, 0  ;;  %p31_p3 = scmp.ge.s32.totalorder %s2242_s28, 2 }
   0xe   : > { %p40_p4 = scmp.eq.s32.totalorder %s38_s30, 0  ;;  %s70_s6 = sadd.s32 1, %s1747_s18 }
   0xf   : > { %p1872_p5 = por %p50_p2, %p49_p1  ;;  %s2244_s28 = smov (%p31_p3, %s2242_s28), 0 }
  0x10   : > { %2220 = sst [smem:[#allocation8_spill]] %s2244_s28  ;;  %s66_s8 = ssub.s32 %s1771_s24, %s2244_s28 }
  0x11   : > { %s1880_s7 = scalar_select %p40_p4, %s1755_s20, %s42_s29  }
  0x12   : > { %p77_p6 = scmp.ne.s32.totalorder %s1747_s18, %s1743_s17  ;;  %s67_s9 = sor.u32 %s66_s8, %s38_s30 }
  0x13   : > { %2221 = sst [smem:[#allocation9_spill]] %s1880_s7  ;;  %p122_p7 = scmp.eq.s32.totalorder %s66_s8, 0 }
  0x14   : > { %p68_p8 = scmp.eq.s32.totalorder %s67_s9, 0  ;;  %p1888_p9 = por %p77_p6, %p50_p2 }
  0x15   : > { %s124_s11 = sadd.s32 1, %s1739_s16  ;;  %p131_p10 = scmp.ne.s32.totalorder %s1739_s16, %s1735_s15 }
  0x16   : > { %s1896_s12 = scalar_select %p68_p8, %s1747_s18, %s70_s6  }
  0x17   : > { %s1899_s13 = scalar_select %p122_p7, %s1739_s16, %s124_s11  }
  0x18   : > { %p1903_p11 = por %p131_p10, %p50_p2  ;;  %p163_p12 = scmp.eq.s32.totalorder %s1390_s26, 17 }
  0x19   : > { %p1393_p0 = scmp.ge.s32.totalorder %s1775_s25, 18 }
  0x1a   : > { %p1907_p13 = por %p163_p12, %p131_p10 }
  0x1b   : > { %185 = sbr.rel (%p1393_p0) target bundleno = 92 (0x5c), region = 16 }
  0x22   : > { %188 = sbr.rel (!%p1872_p5) target bundleno = 46 (0x2e), region = 20  ;;  %s190_s30 = sand.u32 (%p1872_p5), 1, %s1755_s20  }
  0x23   : > { %s1488_s6 = sshll.u32 (%p1872_p5), %s1767_s23, 4  ;;  %s1394_s8 = sshll.u32 (%p1872_p5), %s190_s30, 5 }
  0x24   : > { %s2225_s0 = sld [smem:[#allocation10_spill]] (%p1872_p5)  ;;  %s192_s26 = scalar_lea.vmem (%p1872_p5), [#allocation3], %s1394_s8 }
  0x2a   : > { %s198_s28 = scalar_lea.vmem %s2225_s0, %s1488_s6 }
  0x2b   : > { %v211_v0 = vld [vmem:[%s198_s28] sm:$0xff]  ;;  %v213_v1 = vld [vmem:[%s198_s28 + $0x8] sm:$0xff]  ;;  %v215_v2 = vld [vmem:[%s198_s28 + $0x90] sm:$0xff] }
  0x2c   : > { %212 = vst [vmem:[%s192_s26] sm:$0xff] %v211_v0  ;;  %214 = vst [vmem:[%s192_s26 + $0x8] sm:$0xff] %v213_v1  ;;  %v217_v3 = vld [vmem:[%s198_s28 + $0x98] sm:$0xff] }
  0x2d   : > { %216 = vst [vmem:[%s192_s26 + $0x10] sm:$0xff] %v215_v2  ;;  %218 = vst [vmem:[%s192_s26 + $0x18] sm:$0xff] %v217_v3 }
  0x2e PF: > { %224 = sbr.rel (!%p1888_p9) target bundleno = 85 (0x55), region = 43  ;;  %s226_s5 = sand.u32 (%p1888_p9), 1, %s1747_s18  }
  0x2f   : > { %s1399_s30 = sshll.u32 (%p1888_p9), %s1771_s24, 1  ;;  %s1397_s9 = sshll.u32 (%p1888_p9), %s226_s5, 9 }
  0x30   : > { %s1489_s6 = sshll.u32 (%p1888_p9), %s1767_s23, 8  ;;  %s1932_s28 = scalar_lea.vmem (%p1888_p9), [#allocation4], %s1397_s9 }
  0x31   : > { %s232_s11 = sadd.s32 (%p1888_p9), %s1489_s6, %s1399_s30 }
  0x32   : > { %s1401_s0 = sshll.u32 (%p1888_p9), %s232_s11, 2 }
  0x33   : > { %s1927_s7 = scalar_lea.vmem (%p1888_p9), %s2211_s1, %s1401_s0 }
  0x34   : > { %v388_v4 = vld [vmem:[%s1927_s7] sm:$0xff] (%p1888_p9)  ;;  %v390_v5 = vld [vmem:[%s1927_s7 + $0x10] sm:$0xff] (%p1888_p9) }
  0x35   : > { %v392_v6 = vld [vmem:[%s1927_s7 + $0x20] sm:$0xff]  ;;  %389 = vst [vmem:[%s1932_s28] sm:$0xff] %v388_v4  ;;  %391 = vst [vmem:[%s1932_s28 + $0x8] sm:$0xff] %v390_v5  ;;  %v394_v7 = vld [vmem:[%s1927_s7 + $0x30] sm:$0xff] }
  0x36   : > { %393 = vst [vmem:[%s1932_s28 + $0x10] sm:$0xff] %v392_v6  ;;  %v396_v8 = vld [vmem:[%s1927_s7 + $0x40] sm:$0xff]  ;;  %v398_v9 = vld [vmem:[%s1927_s7 + $0x50] sm:$0xff]  ;;  %395 = vst [vmem:[%s1932_s28 + $0x18] sm:$0xff] %v394_v7 }
  0x37   : > { %397 = vst [vmem:[%s1932_s28 + $0x20] sm:$0xff] %v396_v8  ;;  %399 = vst [vmem:[%s1932_s28 + $0x28] sm:$0xff] %v398_v9  ;;  %v400_v10 = vld [vmem:[%s1927_s7 + $0x60] sm:$0xff]  ;;  %v402_v11 = vld [vmem:[%s1927_s7 + $0x70] sm:$0xff] }
  0x38   : > { %v404_v12 = vld [vmem:[%s1927_s7 + $0x80] sm:$0xff]  ;;  %401 = vst [vmem:[%s1932_s28 + $0x30] sm:$0xff] %v400_v10  ;;  %403 = vst [vmem:[%s1932_s28 + $0x38] sm:$0xff] %v402_v11  ;;  %v406_v13 = vld [vmem:[%s1927_s7 + $0x90] sm:$0xff] }
  0x39   : > { %405 = vst [vmem:[%s1932_s28 + $0x40] sm:$0xff] %v404_v12  ;;  %v408_v14 = vld [vmem:[%s1927_s7 + $0xa0] sm:$0xff]  ;;  %v410_v15 = vld [vmem:[%s1927_s7 + $0xb0] sm:$0xff]  ;;  %407 = vst [vmem:[%s1932_s28 + $0x48] sm:$0xff] %v406_v13 }
  0x3a   : > { %409 = vst [vmem:[%s1932_s28 + $0x50] sm:$0xff] %v408_v14  ;;  %411 = vst [vmem:[%s1932_s28 + $0x58] sm:$0xff] %v410_v15  ;;  %v412_v16 = vld [vmem:[%s1927_s7 + $0xc0] sm:$0xff]  ;;  %v414_v17 = vld [vmem:[%s1927_s7 + $0xd0] sm:$0xff] }
  0x3b   : > { %v416_v18 = vld [vmem:[%s1927_s7 + $0xe0] sm:$0xff]  ;;  %413 = vst [vmem:[%s1932_s28 + $0x60] sm:$0xff] %v412_v16  ;;  %415 = vst [vmem:[%s1932_s28 + $0x68] sm:$0xff] %v414_v17  ;;  %v418_v19 = vld [vmem:[%s1927_s7 + $0xf0] sm:$0xff] }
  0x3c   : > { %417 = vst [vmem:[%s1932_s28 + $0x70] sm:$0xff] %v416_v18  ;;  %v420_v20 = vld [vmem:[%s1927_s7 + $0x100] sm:$0xff]  ;;  %v422_v21 = vld [vmem:[%s1927_s7 + $0x110] sm:$0xff]  ;;  %419 = vst [vmem:[%s1932_s28 + $0x78] sm:$0xff] %v418_v19 }
  0x3d   : > { %421 = vst [vmem:[%s1932_s28 + $0x80] sm:$0xff] %v420_v20  ;;  %423 = vst [vmem:[%s1932_s28 + $0x88] sm:$0xff] %v422_v21  ;;  %v424_v22 = vld [vmem:[%s1927_s7 + $0x120] sm:$0xff]  ;;  %v426_v23 = vld [vmem:[%s1927_s7 + $0x130] sm:$0xff] }
  0x3e   : > { %v428_v24 = vld [vmem:[%s1927_s7 + $0x140] sm:$0xff]  ;;  %425 = vst [vmem:[%s1932_s28 + $0x90] sm:$0xff] %v424_v22  ;;  %427 = vst [vmem:[%s1932_s28 + $0x98] sm:$0xff] %v426_v23  ;;  %v430_v25 = vld [vmem:[%s1927_s7 + $0x150] sm:$0xff] }
  0x3f   : > { %429 = vst [vmem:[%s1932_s28 + $0xa0] sm:$0xff] %v428_v24  ;;  %v432_v26 = vld [vmem:[%s1927_s7 + $0x160] sm:$0xff]  ;;  %v434_v27 = vld [vmem:[%s1927_s7 + $0x170] sm:$0xff]  ;;  %431 = vst [vmem:[%s1932_s28 + $0xa8] sm:$0xff] %v430_v25 }
  0x40   : > { %433 = vst [vmem:[%s1932_s28 + $0xb0] sm:$0xff] %v432_v26  ;;  %435 = vst [vmem:[%s1932_s28 + $0xb8] sm:$0xff] %v434_v27  ;;  %v436_v28 = vld [vmem:[%s1927_s7 + $0x180] sm:$0xff]  ;;  %v438_v29 = vld [vmem:[%s1927_s7 + $0x190] sm:$0xff] }
  0x41   : > { %v440_v30 = vld [vmem:[%s1927_s7 + $0x1a0] sm:$0xff]  ;;  %437 = vst [vmem:[%s1932_s28 + $0xc0] sm:$0xff] %v436_v28  ;;  %439 = vst [vmem:[%s1932_s28 + $0xc8] sm:$0xff] %v438_v29  ;;  %v442_v31 = vld [vmem:[%s1927_s7 + $0x1b0] sm:$0xff] }
  0x42   : > { %441 = vst [vmem:[%s1932_s28 + $0xd0] sm:$0xff] %v440_v30  ;;  %v444_v32 = vld [vmem:[%s1927_s7 + $0x1c0] sm:$0xff]  ;;  %v446_v33 = vld [vmem:[%s1927_s7 + $0x1d0] sm:$0xff]  ;;  %443 = vst [vmem:[%s1932_s28 + $0xd8] sm:$0xff] %v442_v31 }
  0x43   : > { %445 = vst [vmem:[%s1932_s28 + $0xe0] sm:$0xff] %v444_v32  ;;  %447 = vst [vmem:[%s1932_s28 + $0xe8] sm:$0xff] %v446_v33  ;;  %v448_v34 = vld [vmem:[%s1927_s7 + $0x1e0] sm:$0xff]  ;;  %v450_v35 = vld [vmem:[%s1927_s7 + $0x1f0] sm:$0xff] }
  0x44   : > { %v452_v36 = vld [vmem:[%s1927_s7 + $0x200] sm:$0xff]  ;;  %449 = vst [vmem:[%s1932_s28 + $0xf0] sm:$0xff] %v448_v34  ;;  %451 = vst [vmem:[%s1932_s28 + $0xf8] sm:$0xff] %v450_v35  ;;  %v454_v37 = vld [vmem:[%s1927_s7 + $0x210] sm:$0xff] }
  0x45   : > { %453 = vst [vmem:[%s1932_s28 + $0x100] sm:$0xff] %v452_v36  ;;  %v456_v38 = vld [vmem:[%s1927_s7 + $0x220] sm:$0xff]  ;;  %v458_v39 = vld [vmem:[%s1927_s7 + $0x230] sm:$0xff]  ;;  %455 = vst [vmem:[%s1932_s28 + $0x108] sm:$0xff] %v454_v37 }
  0x46   : > { %457 = vst [vmem:[%s1932_s28 + $0x110] sm:$0xff] %v456_v38  ;;  %459 = vst [vmem:[%s1932_s28 + $0x118] sm:$0xff] %v458_v39  ;;  %v460_v40 = vld [vmem:[%s1927_s7 + $0x240] sm:$0xff]  ;;  %v462_v41 = vld [vmem:[%s1927_s7 + $0x250] sm:$0xff] }
  0x47   : > { %v464_v42 = vld [vmem:[%s1927_s7 + $0x260] sm:$0xff]  ;;  %461 = vst [vmem:[%s1932_s28 + $0x120] sm:$0xff] %v460_v40  ;;  %463 = vst [vmem:[%s1932_s28 + $0x128] sm:$0xff] %v462_v41  ;;  %v466_v43 = vld [vmem:[%s1927_s7 + $0x270] sm:$0xff] }
  0x48   : > { %465 = vst [vmem:[%s1932_s28 + $0x130] sm:$0xff] %v464_v42  ;;  %v468_v44 = vld [vmem:[%s1927_s7 + $0x280] sm:$0xff]  ;;  %v470_v45 = vld [vmem:[%s1927_s7 + $0x290] sm:$0xff]  ;;  %467 = vst [vmem:[%s1932_s28 + $0x138] sm:$0xff] %v466_v43 }
  0x49   : > { %469 = vst [vmem:[%s1932_s28 + $0x140] sm:$0xff] %v468_v44  ;;  %471 = vst [vmem:[%s1932_s28 + $0x148] sm:$0xff] %v470_v45  ;;  %v472_v46 = vld [vmem:[%s1927_s7 + $0x2a0] sm:$0xff]  ;;  %v474_v47 = vld [vmem:[%s1927_s7 + $0x2b0] sm:$0xff] }
  0x4a   : > { %v476_v48 = vld [vmem:[%s1927_s7 + $0x2c0] sm:$0xff]  ;;  %473 = vst [vmem:[%s1932_s28 + $0x150] sm:$0xff] %v472_v46  ;;  %475 = vst [vmem:[%s1932_s28 + $0x158] sm:$0xff] %v474_v47  ;;  %v478_v49 = vld [vmem:[%s1927_s7 + $0x2d0] sm:$0xff] }
  0x4b   : > { %477 = vst [vmem:[%s1932_s28 + $0x160] sm:$0xff] %v476_v48  ;;  %v480_v50 = vld [vmem:[%s1927_s7 + $0x2e0] sm:$0xff]  ;;  %v482_v51 = vld [vmem:[%s1927_s7 + $0x2f0] sm:$0xff]  ;;  %479 = vst [vmem:[%s1932_s28 + $0x168] sm:$0xff] %v478_v49 }
  0x4c   : > { %481 = vst [vmem:[%s1932_s28 + $0x170] sm:$0xff] %v480_v50  ;;  %483 = vst [vmem:[%s1932_s28 + $0x178] sm:$0xff] %v482_v51  ;;  %v484_v52 = vld [vmem:[%s1927_s7 + $0x300] sm:$0xff]  ;;  %v486_v53 = vld [vmem:[%s1927_s7 + $0x310] sm:$0xff] }
  0x4d   : > { %v488_v54 = vld [vmem:[%s1927_s7 + $0x320] sm:$0xff]  ;;  %485 = vst [vmem:[%s1932_s28 + $0x180] sm:$0xff] %v484_v52  ;;  %487 = vst [vmem:[%s1932_s28 + $0x188] sm:$0xff] %v486_v53  ;;  %v490_v55 = vld [vmem:[%s1927_s7 + $0x330] sm:$0xff] }
  0x4e   : > { %489 = vst [vmem:[%s1932_s28 + $0x190] sm:$0xff] %v488_v54  ;;  %v492_v56 = vld [vmem:[%s1927_s7 + $0x340] sm:$0xff]  ;;  %v494_v57 = vld [vmem:[%s1927_s7 + $0x350] sm:$0xff]  ;;  %491 = vst [vmem:[%s1932_s28 + $0x198] sm:$0xff] %v490_v55 }
  0x4f   : > { %493 = vst [vmem:[%s1932_s28 + $0x1a0] sm:$0xff] %v492_v56  ;;  %495 = vst [vmem:[%s1932_s28 + $0x1a8] sm:$0xff] %v494_v57  ;;  %v496_v58 = vld [vmem:[%s1927_s7 + $0x360] sm:$0xff]  ;;  %v498_v59 = vld [vmem:[%s1927_s7 + $0x370] sm:$0xff] }
  0x50   : > { %v500_v60 = vld [vmem:[%s1927_s7 + $0x380] sm:$0xff]  ;;  %497 = vst [vmem:[%s1932_s28 + $0x1b0] sm:$0xff] %v496_v58  ;;  %499 = vst [vmem:[%s1932_s28 + $0x1b8] sm:$0xff] %v498_v59  ;;  %v502_v61 = vld [vmem:[%s1927_s7 + $0x390] sm:$0xff] }
  0x51   : > { %501 = vst [vmem:[%s1932_s28 + $0x1c0] sm:$0xff] %v500_v60  ;;  %v504_v62 = vld [vmem:[%s1927_s7 + $0x3a0] sm:$0xff]  ;;  %v506_v63 = vld [vmem:[%s1927_s7 + $0x3b0] sm:$0xff]  ;;  %503 = vst [vmem:[%s1932_s28 + $0x1c8] sm:$0xff] %v502_v61 }
  0x52   : > { %505 = vst [vmem:[%s1932_s28 + $0x1d0] sm:$0xff] %v504_v62  ;;  %507 = vst [vmem:[%s1932_s28 + $0x1d8] sm:$0xff] %v506_v63  ;;  %v508_v0 = vld [vmem:[%s1927_s7 + $0x3c0] sm:$0xff]  ;;  %v510_v1 = vld [vmem:[%s1927_s7 + $0x3d0] sm:$0xff] }
  0x53   : > { %v512_v2 = vld [vmem:[%s1927_s7 + $0x3e0] sm:$0xff]  ;;  %509 = vst [vmem:[%s1932_s28 + $0x1e0] sm:$0xff] %v508_v0  ;;  %511 = vst [vmem:[%s1932_s28 + $0x1e8] sm:$0xff] %v510_v1  ;;  %v514_v3 = vld [vmem:[%s1927_s7 + $0x3f0] sm:$0xff] }
  0x54   : > { %513 = vst [vmem:[%s1932_s28 + $0x1f0] sm:$0xff] %v512_v2  ;;  %515 = vst [vmem:[%s1932_s28 + $0x1f8] sm:$0xff] %v514_v3 }
  0x55 PF: > { %529 = sbr.rel (!%p1903_p11) target bundleno = 92 (0x5c), region = 85  ;;  %s531_s0 = sand.u32 (%p1903_p11), 1, %s1739_s16  }
  0x56   : > { %s1490_s27 = sshll.u32 (%p1903_p11), %s1771_s24, 3  ;;  %s1402_s10 = sshll.u32 (%p1903_p11), %s531_s0, 4 }
  0x57   : > { %s539_s30 = scalar_lea.vmem (%p1903_p11), %s2213_s3, %s1490_s27  ;;  %s533_s9 = scalar_lea.vmem (%p1903_p11), [#allocation5], %s1402_s10 }
  0x58   : > { %v569_v4 = vld [vmem:[%s539_s30] sm:$0xff] (%p1903_p11)  ;;  %v571_v5 = vld [vmem:[%s539_s30 + $0x10] sm:$0xff] (%p1903_p11) }
  0x59   : > { %570 = vst [vmem:[%s533_s9] sm:$0xff] (%p1903_p11), %v569_v4  ;;  %572 = vst [vmem:[%s533_s9 + $0x8] sm:$0xff] (%p1903_p11), %v571_v5 }
  0x5c PF: > { %p1405_p1 = scmp.ge.s32.totalorder %s1775_s25, 1  ;;  %p577_p2 = scmp.lt.s32.totalorder %s1775_s25, 19 }
  0x5e   : > { %p578_p3 = pnand %p1405_p1, %p577_p2 }
  0x5f   : > { %s584_s7 = sand.u32 (!%p578_p3), 1, %s1751_s19   ;;  %s591_s14 = sand.u32 (!%p578_p3), 1, %s1743_s17  }
  0x60   : > { %581 = sbr.rel (%p578_p3) target bundleno = 420 (0x1a4), region = 123  ;;  %s1406_s6 = sshll.u32 (!%p578_p3), %s584_s7, 5 }
  0x61   : > { %s1407_s11 = sshll.u32 (!%p578_p3), %s591_s14, 9  ;;  %s598_s8 = sand.u32 (!%p578_p3), 1, %s1735_s15  }
  0x62   : > { %s1410_s28 = sshll.u32 (!%p578_p3), %s1763_s22, 1  ;;  %s2072_s0 = sshll.u32 (!%p578_p3), %s598_s8, 4 }
  0x63   : > { %p639_p4 = scmp.lt.s32.totalorder (!%p578_p3), %s1410_s28, 3  ;;  %s2080_s5 = scalar_lea.vmem (!%p578_p3), [#allocation3], %s1406_s6 }
  0x64   : > { %s2082_s19 = scalar_lea.vmem (!%p578_p3), [#allocation4], %s1407_s11  ;;  %s600_s17 = scalar_lea.vmem (!%p578_p3), [#allocation5], %s2072_s0 }
  0x65   : > { %s2086_s30 = scalar_lea.vmem (!%p578_p3), [#allocation6], %s2072_s0  ;;  %p1411_p5 = scmp.ne.s32.totalorder (!%p578_p3), %s1759_s21, 0 }
  0x67   : > { %s2246_s28 = smov (!%p639_p4, %s1410_s28), 3  ;;  %650 = sbr.rel (%p1411_p5) target bundleno = 110 (0x6e), region = 139 }
  0x68   : > { %s641_s26 = scalar_lea.vmem %s2212_s2, %s2246_s28  ;;  %v1777_v6 = vmov (!%p1411_p5), 0.0  }
  0x69   : > { %651 = vst [vmem:[#allocation2] sm:$0xff] (!%p1411_p5), %v1777_v6  ;;  %652 = vst [vmem:[#allocation2 + $0x8] sm:$0xff] (!%p1411_p5), %v1777_v6 }
  0x6a   : > { %653 = vst [vmem:[#allocation2 + $0x10] sm:$0xff] (!%p1411_p5), %v1777_v6  ;;  %654 = vst [vmem:[#allocation2 + $0x18] sm:$0xff] (!%p1411_p5), %v1777_v6 }
  0x6e PF: > { %v1587_v7 = vld [vmem:[%s2082_s19 + $0x4] ss:$8 sps:$4 sm:$0xff]   ;;  %v1591_v9 = vld [vmem:[%s2082_s19] ss:$8 sps:$4 sm:$0xff]   ;;  %v1593_v11 = vld [vmem:[%s2082_s19 + $0x14] ss:$8 sps:$4 sm:$0xff]  }
  0x6f   : > { %v1589_v8 = vld [vmem:[%s2082_s19 + $0x104] ss:$8 sps:$4 sm:$0xff]   ;;  %1067 = vmatprep.subr.bf16.mxu1 %v1587_v7  ;;  %v1592_v10 = vld [vmem:[%s2082_s19 + $0x100] ss:$8 sps:$4 sm:$0xff]   ;;  %v1595_v12 = vld [vmem:[%s2082_s19 + $0x114] ss:$8 sps:$4 sm:$0xff]  }
  0x70   : > { %1110 = vmatprep.subr.bf16.mxu0 %v1589_v8  ;;  %1068 = vmatpush1.bf16.msra.mxu1 %v1591_v9  ;;  %v1597_v13 = vld [vmem:[%s2082_s19 + $0x10] ss:$8 sps:$4 sm:$0xff]   ;;  %v1599_v15 = vld [vmem:[%s2082_s19 + $0x24] ss:$8 sps:$4 sm:$0xff]   ;;  %v1603_v17 = vld [vmem:[%s2082_s19 + $0x20] ss:$8 sps:$4 sm:$0xff]  }
  0x71   : > { %1111 = vmatpush1.bf16.msra.mxu0 %v1592_v10  ;;  %1069 = vmatprep.subr.bf16.mxu1 %v1593_v11  ;;  %v1598_v14 = vld [vmem:[%s2082_s19 + $0x110] ss:$8 sps:$4 sm:$0xff]   ;;  %v1601_v16 = vld [vmem:[%s2082_s19 + $0x124] ss:$8 sps:$4 sm:$0xff]   ;;  %v1604_v18 = vld [vmem:[%s2082_s19 + $0x120] ss:$8 sps:$4 sm:$0xff]  }
  0x72   : > { %1112 = vmatprep.subr.bf16.mxu0 %v1595_v12  ;;  %v1605_v19 = vld [vmem:[%s2082_s19 + $0x34] ss:$8 sps:$4 sm:$0xff]   ;;  %v1609_v21 = vld [vmem:[%s2082_s19 + $0x30] ss:$8 sps:$4 sm:$0xff]   ;;  %v1611_v23 = vld [vmem:[%s2082_s19 + $0x44] ss:$8 sps:$4 sm:$0xff]  }
  0x73   : > { %v1607_v20 = vld [vmem:[%s2082_s19 + $0x134] ss:$8 sps:$4 sm:$0xff]   ;;  %v1610_v22 = vld [vmem:[%s2082_s19 + $0x130] ss:$8 sps:$4 sm:$0xff]   ;;  %v1613_v24 = vld [vmem:[%s2082_s19 + $0x144] ss:$8 sps:$4 sm:$0xff]  }
  0x74   : > { %1070 = vmatpush1.bf16.msra.mxu1 %v1597_v13  ;;  %v1615_v25 = vld [vmem:[%s2082_s19 + $0x40] ss:$8 sps:$4 sm:$0xff]   ;;  %v1617_v27 = vld [vmem:[%s2082_s19 + $0x54] ss:$8 sps:$4 sm:$0xff]   ;;  %v1621_v29 = vld [vmem:[%s2082_s19 + $0x50] ss:$8 sps:$4 sm:$0xff]  }
  0x75   : > { %1113 = vmatpush1.bf16.msra.mxu0 %v1598_v14  ;;  %1071 = vmatprep.subr.bf16.mxu1 %v1599_v15  ;;  %v1616_v26 = vld [vmem:[%s2082_s19 + $0x140] ss:$8 sps:$4 sm:$0xff]   ;;  %v1619_v28 = vld [vmem:[%s2082_s19 + $0x154] ss:$8 sps:$4 sm:$0xff]   ;;  %v1622_v30 = vld [vmem:[%s2082_s19 + $0x150] ss:$8 sps:$4 sm:$0xff]  }
  0x76   : > { %1114 = vmatprep.subr.bf16.mxu0 %v1601_v16  ;;  %v1623_v31 = vld [vmem:[%s2082_s19 + $0x64] ss:$8 sps:$4 sm:$0xff]   ;;  %v1627_v33 = vld [vmem:[%s2082_s19 + $0x60] ss:$8 sps:$4 sm:$0xff]   ;;  %v1629_v35 = vld [vmem:[%s2082_s19 + $0x74] ss:$8 sps:$4 sm:$0xff]  }
  0x77   : > { %v1625_v32 = vld [vmem:[%s2082_s19 + $0x164] ss:$8 sps:$4 sm:$0xff]   ;;  %v1628_v34 = vld [vmem:[%s2082_s19 + $0x160] ss:$8 sps:$4 sm:$0xff]   ;;  %v1631_v36 = vld [vmem:[%s2082_s19 + $0x174] ss:$8 sps:$4 sm:$0xff]  }
  0x78   : > { %1072 = vmatpush1.bf16.msra.mxu1 %v1603_v17  ;;  %v1633_v37 = vld [vmem:[%s2082_s19 + $0x70] ss:$8 sps:$4 sm:$0xff]   ;;  %v1635_v39 = vld [vmem:[%s2082_s19 + $0x84] ss:$8 sps:$4 sm:$0xff]   ;;  %v1639_v41 = vld [vmem:[%s2082_s19 + $0x80] ss:$8 sps:$4 sm:$0xff]  }
  0x79   : > { %1115 = vmatpush1.bf16.msra.mxu0 %v1604_v18  ;;  %1073 = vmatprep.subr.bf16.mxu1 %v1605_v19  ;;  %v1634_v38 = vld [vmem:[%s2082_s19 + $0x170] ss:$8 sps:$4 sm:$0xff]   ;;  %v1637_v40 = vld [vmem:[%s2082_s19 + $0x184] ss:$8 sps:$4 sm:$0xff]   ;;  %v1640_v42 = vld [vmem:[%s2082_s19 + $0x180] ss:$8 sps:$4 sm:$0xff]  }
  0x7a   : > { %1116 = vmatprep.subr.bf16.mxu0 %v1607_v20  ;;  %v1641_v43 = vld [vmem:[%s2082_s19 + $0x94] ss:$8 sps:$4 sm:$0xff]   ;;  %v1645_v45 = vld [vmem:[%s2082_s19 + $0x90] ss:$8 sps:$4 sm:$0xff]   ;;  %v1647_v47 = vld [vmem:[%s2082_s19 + $0xa4] ss:$8 sps:$4 sm:$0xff]  }
  0x7b   : > { %v1643_v44 = vld [vmem:[%s2082_s19 + $0x194] ss:$8 sps:$4 sm:$0xff]   ;;  %v1646_v46 = vld [vmem:[%s2082_s19 + $0x190] ss:$8 sps:$4 sm:$0xff]   ;;  %v1649_v48 = vld [vmem:[%s2082_s19 + $0x1a4] ss:$8 sps:$4 sm:$0xff]  }
  0x7c   : > { %1074 = vmatpush1.bf16.msra.mxu1 %v1609_v21  ;;  %v1651_v49 = vld [vmem:[%s2082_s19 + $0xa0] ss:$8 sps:$4 sm:$0xff]   ;;  %v1653_v51 = vld [vmem:[%s2082_s19 + $0xb4] ss:$8 sps:$4 sm:$0xff]   ;;  %v1657_v53 = vld [vmem:[%s2082_s19 + $0xb0] ss:$8 sps:$4 sm:$0xff]  }
  0x7d   : > { %1117 = vmatpush1.bf16.msra.mxu0 %v1610_v22  ;;  %1075 = vmatprep.subr.bf16.mxu1 %v1611_v23  ;;  %v1652_v50 = vld [vmem:[%s2082_s19 + $0x1a0] ss:$8 sps:$4 sm:$0xff]   ;;  %v1655_v52 = vld [vmem:[%s2082_s19 + $0x1b4] ss:$8 sps:$4 sm:$0xff]   ;;  %v1658_v55 = vld [vmem:[%s2082_s19 + $0x1b0] ss:$8 sps:$4 sm:$0xff]  }
  0x7e   : > { %1118 = vmatprep.subr.bf16.mxu0 %v1613_v24  ;;  %v1685_v54 = vld [vmem:[%s2080_s5 + $0x4] ss:$16 sps:$4 sm:$0xff]   ;;  %v1688_v58 = vld [vmem:[%s2080_s5 + $0xc] ss:$16 sps:$4 sm:$0xff]   ;;  %v1663_v59 = vld [vmem:[%s2082_s19 + $0xc0] ss:$8 sps:$4 sm:$0xff]  }
  0x7f   : > { %v1659_v56 = vld [vmem:[%s2082_s19 + $0xc4] ss:$8 sps:$4 sm:$0xff]   ;;  %1099 = vmatprep.mubr.bf16.mxu1 %v1685_v54  ;;  %1142 = vmatprep.mubr.bf16.mxu0 %v1688_v58  ;;  %v1664_v60 = vld [vmem:[%s2082_s19 + $0x1c0] ss:$8 sps:$4 sm:$0xff]   ;;  %v1665_v61 = vld [vmem:[%s2082_s19 + $0xd4] ss:$8 sps:$4 sm:$0xff]  }
  0x80   : > { %1076 = vmatpush1.bf16.msra.mxu1 %v1615_v25  ;;  %v1661_v57 = vld [vmem:[%s2082_s19 + $0x1c4] ss:$8 sps:$4 sm:$0xff]   ;;  %v1667_v62 = vld [vmem:[%s2082_s19 + $0x1d4] ss:$8 sps:$4 sm:$0xff]   ;;  %v1669_v63 = vld [vmem:[%s2082_s19 + $0xd0] ss:$8 sps:$4 sm:$0xff]  }
  0x81   : > { %1119 = vmatpush1.bf16.msra.mxu0 %v1616_v26  ;;  %1077 = vmatprep.subr.bf16.mxu1 %v1617_v27  ;;  %v1670_v0 = vld [vmem:[%s2082_s19 + $0x1d0] ss:$8 sps:$4 sm:$0xff]   ;;  %v1671_v1 = vld [vmem:[%s2082_s19 + $0xe4] ss:$8 sps:$4 sm:$0xff]   ;;  %v1675_v3 = vld [vmem:[%s2082_s19 + $0xe0] ss:$8 sps:$4 sm:$0xff]  }
  0x82   : > { %1120 = vmatprep.subr.bf16.mxu0 %v1619_v28  ;;  %v1673_v2 = vld [vmem:[%s2082_s19 + $0x1e4] ss:$8 sps:$4 sm:$0xff]   ;;  %v1676_v4 = vld [vmem:[%s2082_s19 + $0x1e0] ss:$8 sps:$4 sm:$0xff]   ;;  %v1677_v5 = vld [vmem:[%s2082_s19 + $0xf4] ss:$8 sps:$4 sm:$0xff]  }
  0x83   : > { %v1679_v6 = vld [vmem:[%s2082_s19 + $0x1f4] ss:$8 sps:$4 sm:$0xff]   ;;  %v1681_v7 = vld [vmem:[%s2082_s19 + $0xf0] ss:$8 sps:$4 sm:$0xff]   ;;  %v655_v12 = vld [vmem:[#allocation2] sm:$0xff]  ;;  %p1480_p6 = scmp.ne.s32.totalorder %s1759_s21, 8 }
  0x84   : > { %1078 = vmatpush1.bf16.msra.mxu1 %v1621_v29  ;;  %v1682_v8 = vld [vmem:[%s2082_s19 + $0x1f0] ss:$8 sps:$4 sm:$0xff]   ;;  %v656_v16 = vld [vmem:[#allocation2 + $0x8] sm:$0xff] }
  0x85   : > { %1121 = vmatpush1.bf16.msra.mxu0 %v1622_v30  ;;  %1079 = vmatprep.subr.bf16.mxu1 %v1623_v31  ;;  %v1683_v9 = vld [vmem:[%s2080_s5] ss:$16 sps:$4 sm:$0xff]   ;;  %v1686_v10 = vld [vmem:[%s2080_s5 + $0x8] ss:$16 sps:$4 sm:$0xff]   ;;  %v1171_v31 = vlaneseq (!%p1480_p6) }
  0x86   : > { %1122 = vmatprep.subr.bf16.mxu0 %v1625_v32  ;;  %v657_v20 = vld [vmem:[#allocation2 + $0x10] sm:$0xff]  ;;  %v658_v25 = vld [vmem:[#allocation2 + $0x18] sm:$0xff] }
  0x87   : > { %v1172_v32 = vshrl.u32 (!%p1480_p6), %v1171_v31, 7 }
  0x88   : > { %1080 = vmatpush1.bf16.msra.mxu1 %v1627_v33  ;;  %v1185_v33 = vld [vmem:[%s600_s17] sm:$0xff] (!%p1480_p6) }
  0x89   : > { %1123 = vmatpush1.bf16.msra.mxu0 %v1628_v34  ;;  %1081 = vmatprep.subr.bf16.mxu1 %v1629_v35  ;;  %v1169_v34 = vld [vmem:[%s641_s26] sm:$0x3] (!%p1480_p6)  ;;  %v1186_v35 = vld [vmem:[%s600_s17 + $0x8] sm:$0xff] (!%p1480_p6) }
  0x8a   : > { %1124 = vmatprep.subr.bf16.mxu0 %v1631_v36 }
  0x8c   : > { %1082 = vmatpush1.bf16.msra.mxu1 %v1633_v37  ;;  %v1173_v37 = vsub.s32 (!%p1480_p6), 0, %v1172_v32 }
  0x8d   : > { %1125 = vmatpush1.bf16.msra.mxu0 %v1634_v38  ;;  %1083 = vmatprep.subr.bf16.mxu1 %v1635_v39  ;;  %v1177_v38 = vsub.s32 (!%p1480_p6), 1, %v1172_v32 }
  0x8e   : > { %1126 = vmatprep.subr.bf16.mxu0 %v1637_v40  ;;  %v1187_v40 = vunpack.c.l.bf16 (!%p1480_p6), %v1185_v33 }
  0x90   : > { %1084 = vmatpush1.bf16.msra.mxu1 %v1639_v41  ;;  %v1188_v41 = vunpack.c.h.bf16 (!%p1480_p6), %v1185_v33 }
  0x91   : > { %1127 = vmatpush1.bf16.msra.mxu0 %v1640_v42  ;;  %1085 = vmatprep.subr.bf16.mxu1 %v1641_v43 }
  0x92   : > { %1128 = vmatprep.subr.bf16.mxu0 %v1643_v44  ;;  %v1174_v44 = vrot.slane (!%p1480_p6), %v1169_v34, %v1173_v37 }
  0x94   : > { %1086 = vmatpush1.bf16.msra.mxu1 %v1645_v45  ;;  %v1178_v45 = vrot.slane (!%p1480_p6), %v1169_v34, %v1177_v38 }
  0x95   : > { %1129 = vmatpush1.bf16.msra.mxu0 %v1646_v46  ;;  %1087 = vmatprep.subr.bf16.mxu1 %v1647_v47  ;;  %v1189_v46 = vunpack.c.l.bf16 (!%p1480_p6), %v1186_v35  ;;  %v1190_v47 = vunpack.c.h.bf16 (!%p1480_p6), %v1186_v35 }
  0x96   : > { %1130 = vmatprep.subr.bf16.mxu0 %v1649_v48 }
  0x98   : > { %1088 = vmatpush1.bf16.msra.mxu1 %v1651_v49 }
  0x99   : > { %1131 = vmatpush1.bf16.msra.mxu0 %v1652_v50  ;;  %1089 = vmatprep.subr.bf16.mxu1 %v1653_v51 }
  0x9a   : > { %1132 = vmatprep.subr.bf16.mxu0 %v1655_v52 }
  0x9c   : > { %1090 = vmatpush1.bf16.msra.mxu1 %v1657_v53 }
  0x9d   : > { %1133 = vmatpush1.bf16.msra.mxu0 %v1658_v55  ;;  %1091 = vmatprep.subr.bf16.mxu1 %v1659_v56 }
  0x9e   : > { %1134 = vmatprep.subr.bf16.mxu0 %v1661_v57 }
  0xa0   : > { %1092 = vmatpush1.bf16.msra.mxu1 %v1663_v59 }
  0xa1   : > { %1135 = vmatpush1.bf16.msra.mxu0 %v1664_v60  ;;  %1093 = vmatprep.subr.bf16.mxu1 %v1665_v61 }
  0xa2   : > { %1136 = vmatprep.subr.bf16.mxu0 %v1667_v62 }
  0xa4   : > { %1094 = vmatpush1.bf16.msra.mxu1 %v1669_v63 }
  0xa5   : > { %1137 = vmatpush1.bf16.msra.mxu0 %v1670_v0  ;;  %1095 = vmatprep.subr.bf16.mxu1 %v1671_v1 }
  0xa6   : > { %1138 = vmatprep.subr.bf16.mxu0 %v1673_v2 }
  0xa8   : > { %1096 = vmatpush1.bf16.msra.mxu1 %v1675_v3 }
  0xa9   : > { %1139 = vmatpush1.bf16.msra.mxu0 %v1676_v4  ;;  %1097 = vmatprep.subr.bf16.mxu1 %v1677_v5 }
  0xaa   : > { %1140 = vmatprep.subr.bf16.mxu0 %v1679_v6 }
  0xac   : > { %1098 = vmatpush1.bf16.msra.mxu1 %v1681_v7 }
  0xad   : > { %1141 = vmatpush1.bf16.msra.mxu0 %v1682_v8 }
  0xaf   : > { %1100 = vmatmul.mubr.bf16.vlgmr.msra.gmra.mrb[0].mxu1 %v1683_v9 }
  0xb0   : > { %1143 = vmatmul.mubr.bf16.vlgmr.msra.gmra.mrb[0].mxu0 %v1686_v10 }
 0x182   : > { %v1101_v11 = vpop.f32.mrb[0].mxu1 }
 0x183   : > { %v1144_v13 = vpop.f32.mrb[0].mxu0  ;;  %v1103_v15 = vpop.f32.mrb[1].mxu1 }
 0x184   : > { %v1145_v14 = vadd.f32 %v1144_v13, %v1101_v11  ;;  %v1146_v17 = vpop.f32.mrb[1].mxu0  ;;  %v1105_v19 = vpop.f32.mrb[2].mxu1 }
 0x185   : > { %v1147_v18 = vadd.f32 %v1146_v17, %v1103_v15  ;;  %v1148_v21 = vpop.f32.mrb[2].mxu0  ;;  %v1107_v24 = vpop.f32.mrb[3].mxu1  ;;  %1164 = sbr.rel (%p1480_p6) target bundleno = 412 (0x19c), region = 143 }
 0x186   : > { %v1153_v22 = vadd.f32 %v1145_v14, %v655_v12  ;;  %v1149_v23 = vadd.f32 %v1148_v21, %v1105_v19  ;;  %v1150_v26 = vpop.f32.mrb[3].mxu0 }
 0x187   : > { %v1154_v27 = vadd.f32 %v1147_v18, %v656_v16  ;;  %v1151_v28 = vadd.f32 %v1150_v26, %v1107_v24 }
 0x188   : > { %1157 = vst [vmem:[#allocation2] sm:$0xff] %v1153_v22  ;;  %v1155_v29 = vadd.f32 %v1149_v23, %v657_v20 }
 0x189   : > { %1158 = vst [vmem:[#allocation2 + $0x8] sm:$0xff] %v1154_v27  ;;  %v1156_v30 = vadd.f32 %v1151_v28, %v658_v25 }
 0x18a   : > { %1159 = vst [vmem:[#allocation2 + $0x10] sm:$0xff] %v1155_v29 }
 0x18b   : > { %1160 = vst [vmem:[#allocation2 + $0x18] sm:$0xff] %v1156_v30 }
 0x18f   : > { %v1165_v36 = vld [vmem:[#allocation2] sm:$0xff] }
 0x190   : > { %v1166_v39 = vld [vmem:[#allocation2 + $0x8] sm:$0xff]  ;;  %v1181_v48 = vadd.f32 %v1174_v44, %v1165_v36 }
 0x191   : > { %v1167_v42 = vld [vmem:[#allocation2 + $0x10] sm:$0xff]  ;;  %v1182_v49 = vadd.f32 %v1178_v45, %v1166_v39 }
 0x192   : > { %v1168_v43 = vld [vmem:[#allocation2 + $0x18] sm:$0xff]  ;;  %v1183_v50 = vadd.f32 %v1174_v44, %v1167_v42  ;;  %v1191_v52 = vadd.f32 %v1187_v40, %v1181_v48 }
 0x193   : > { %v1184_v51 = vadd.f32 %v1178_v45, %v1168_v43  ;;  %v1192_v53 = vadd.f32 %v1188_v41, %v1182_v49 }
 0x194   : > { %v1193_v54 = vadd.f32 %v1189_v46, %v1183_v50  ;;  %v1195_v56 = vmax.f32 %v1191_v52, 0.0 }
 0x195   : > { %v1194_v55 = vadd.f32 %v1190_v47, %v1184_v51  ;;  %v1196_v57 = vmax.f32 %v1192_v53, 0.0 }
 0x196   : > { %v1197_v58 = vmax.f32 %v1193_v54, 0.0 }
 0x197   : > { %v1198_v59 = vmax.f32 %v1194_v55, 0.0  ;;  %v1491_v60 = vpack.c.bf16 %v1196_v57, %v1195_v56 }
 0x199   : > { %v1492_v61 = vpack.c.bf16 %v1198_v59, %v1197_v58  ;;  %1211 = vst [vmem:[%s2086_s30] sm:$0xff] %v1491_v60 }
 0x19b   : > { %1212 = vst [vmem:[%s2086_s30 + $0x8] sm:$0xff] %v1492_v61 }
 0x19c PF: > { %1219 = sbr.rel (!%p1907_p13) target bundleno = 420 (0x1a4), region = 147  ;;  %s1493_s21 = sshll.u32 (%p1907_p13), %s1763_s22, 3 }
 0x19d   : > { %s1225_s6 = scalar_lea.vmem (%p1907_p13), %s2214_s4, %s1493_s21 }
 0x1a0   : > { %v1255_v62 = vld [vmem:[%s2086_s30] sm:$0xff] (%p1907_p13) }
 0x1a1   : > { %1256 = vst [vmem:[%s1225_s6] sm:$0xff] (%p1907_p13), %v1255_v62 }
 0x1a2   : > { %v1257_v63 = vld [vmem:[%s2086_s30 + $0x8] sm:$0xff] (%p1907_p13) }
 0x1a3   : > { %1258 = vst [vmem:[%s1225_s6 + $0x10] sm:$0xff] %v1257_v63 }
 0x1a4 PF: > { %s14_s25 = sadd.s32 1, %s1775_s25   ;;  %s2226_s29 = sld [smem:[#allocation9_spill]] }
 0x1a5   : > { %p11_p7 = scmp.ge.s32.totalorder %s14_s25, 20   ;;  %s2227_s11 = sld [smem:[#allocation7_spill]] }
 0x1a6   : > { %s2228_s8 = sld [smem:[#allocation8_spill]]  ;;  %s2229_s15 = smov %s1739_s16 }
 0x1a7   : > { %s2230_s16 = smov %s1899_s13  ;;  %s2231_s17 = smov %s1747_s18 }
 0x1a8   : > { %s2232_s18 = smov %s1896_s12  ;;  %s2233_s19 = smov %s1755_s20 }
 0x1a9   : > { %s2235_s21 = smov %s1767_s23  ;;  %s2236_s22 = smov %s1771_s24 }
 0x1aa   : > { %s2234_s20 = smov %s2226_s29  ;;  %13 = sbr.rel (!%p11_p7) target bundleno = 8 (0x8), region = 235 }
 0x1ab   : > { %s2237_s23 = smov %s2227_s11 }
 0x1ac   : > { %s2238_s24 = smov %s2228_s8 }

// kernel: gaze3inputs_forward.37
= control target key start
LH: loop header
LB: loop body
LE: loop exit
PB: predicated region body
PF: predicated region fallthrough
CT: control target
= control target key end

     0   :  { %s1744_s12 = smov 0   ;;  %s1746_s13 = smov 0   ;;  %s1918_s0 = inlined_call_operand.vmem [shape: bf16[1024,256], index: 0, kind: input, shape index: {}]   ;;  %s1919_s1 = inlined_call_operand.vmem [shape: bf16[256,128], index: 1, kind: input, shape index: {}]   ;;  %s1920_s2 = inlined_call_operand.vmem [shape: f32[1,128], index: 2, kind: input, shape index: {}]   ;;  %s1921_s3 = inlined_call_operand.vmem [shape: bf16[1024,128], index: 3, kind: output, shape index: {}]  }
   0x1   :  { %s1748_s14 = smov 0  }
   0x2 LB: > { %s32_s15 = sadd.s32 1, %s1718_s13  ;;  %p1267_p0 = scmp.ge.s32.totalorder %s1722_s14, 1  ;;  %s1722_s14 = sphi %s1748_s14, %s13_s14   ;;  %s1718_s13 = sphi %s1746_s13, %s1923_s13   ;;  %s1714_s12 = sphi %s1744_s12, %s1922_s12  }
   0x3   : > { %p34_p1 = scmp.ge.s32.totalorder %s32_s15, 4  ;;  %p191_p2 = scmp.lt.s32.totalorder %s1722_s14, 5 }
   0x5   : > { %s1925_s15 = smov (%p34_p1, %s32_s15), 0  ;;  %p192_p3 = pnand %p1267_p0, %p191_p2 }
   0x6   : > { %v1636_v0 = vld [vmem:[%s1919_s1 + $0x40] sm:$0xff] (!%p192_p3)   ;;  %s1268_s18 = sshll.u32 (!%p192_p3), %s1714_s12, 5  ;;  %v1638_v2 = vld [vmem:[%s1919_s1 + $0x48] sm:$0xff] (!%p192_p3)   ;;  %v1640_v4 = vld [vmem:[%s1919_s1 + $0x50] sm:$0xff] (!%p192_p3)  }
   0x7   : > { %195 = sbr.rel (%p192_p3) target bundleno = 320 (0x140), region = 32  ;;  %v1637_v1 = vld [vmem:[%s1919_s1] sm:$0xff] (!%p192_p3)   ;;  %1484 = vmatprep.subr.bf16.mxu0 (!%p192_p3), %v1636_v0  ;;  %1596 = vmatprep.subr.bf16.mxu1 (!%p192_p3), %v1636_v0  ;;  %v1639_v3 = vld [vmem:[%s1919_s1 + $0x8] sm:$0xff] (!%p192_p3)   ;;  %p236_p4 = scmp.lt.s32.totalorder (!%p192_p3), %s1268_s18, 127  ;;  %v1641_v5 = vld [vmem:[%s1919_s1 + $0x10] sm:$0xff] (!%p192_p3)  }
   0x8   : > { %1485 = vmatpush3.bf16.msra.mxu0 (!%p192_p3), %v1637_v1  ;;  %1604 = vmatpush3.bf16.msra.mxu1 (!%p192_p3), %v1637_v1  ;;  %v1642_v6 = vld [vmem:[%s1919_s1 + $0x58] sm:$0xff] (!%p192_p3)   ;;  %v1644_v8 = vld [vmem:[%s1919_s1 + $0x60] sm:$0xff] (!%p192_p3)   ;;  %v1646_v10 = vld [vmem:[%s1919_s1 + $0x68] sm:$0xff] (!%p192_p3)  }
   0x9   : > { %1486 = vmatprep.subr.bf16.mxu0 (!%p192_p3), %v1638_v2  ;;  %1597 = vmatprep.subr.bf16.mxu1 (!%p192_p3), %v1638_v2  ;;  %v1643_v7 = vld [vmem:[%s1919_s1 + $0x18] sm:$0xff] (!%p192_p3)   ;;  %v1645_v9 = vld [vmem:[%s1919_s1 + $0x20] sm:$0xff] (!%p192_p3)   ;;  %v1647_v13 = vld [vmem:[%s1919_s1 + $0x28] sm:$0xff] (!%p192_p3)  }
   0xa   : > { %v1648_v14 = vld [vmem:[%s1919_s1 + $0x70] sm:$0xff] (!%p192_p3)   ;;  %v1650_v16 = vld [vmem:[%s1919_s1 + $0x78] sm:$0xff] (!%p192_p3)   ;;  %v1853_v51 = vld [vmem:[%s1920_s2] ss:$0 sm:$0xff] (!%p192_p3) }
   0xb   : > { %v1649_v15 = vld [vmem:[%s1919_s1 + $0x30] sm:$0xff] (!%p192_p3)   ;;  %v1651_v17 = vld [vmem:[%s1919_s1 + $0x38] sm:$0xff] (!%p192_p3)  }
   0xc   : > { %1487 = vmatpush3.bf16.msra.mxu0 (!%p192_p3), %v1639_v3  ;;  %1605 = vmatpush3.bf16.msra.mxu1 (!%p192_p3), %v1639_v3 }
   0xd   : > { %1488 = vmatprep.subr.bf16.mxu0 (!%p192_p3), %v1640_v4  ;;  %1598 = vmatprep.subr.bf16.mxu1 (!%p192_p3), %v1640_v4 }
   0xe   : > { %s1927_s18 = smov (!%p236_p4, %s1268_s18), 127 }
   0xf   : > { %s1356_s6 = sshll.u32 %s1927_s18, 3  ;;  %s1272_s5 = sshll.u32 %s1927_s18, 2 }
  0x10   : > { %1489 = vmatpush3.bf16.msra.mxu0 %v1641_v5  ;;  %1606 = vmatpush3.bf16.msra.mxu1 %v1641_v5  ;;  %s1795_s11 = scalar_lea.vmem %s1918_s0, %s1356_s6  ;;  %s1863_s8 = scalar_lea.vmem %s1921_s3, %s1272_s5 }
  0x11   : > { %1490 = vmatprep.subr.bf16.mxu0 %v1642_v6  ;;  %1599 = vmatprep.subr.bf16.mxu1 %v1642_v6  ;;  %v1654_v11 = vld [vmem:[%s1795_s11 + $0x4] ss:$8 sps:$4 sm:$0xff]   ;;  %v1652_v18 = vld [vmem:[%s1795_s11] ss:$8 sps:$4 sm:$0xff]   ;;  %v1658_v20 = vld [vmem:[%s1795_s11 + $0x14] ss:$8 sps:$4 sm:$0xff]  }
  0x12   : > { %v1657_v12 = vld [vmem:[%s1795_s11 + $0x84] ss:$8 sps:$4 sm:$0xff]   ;;  %688 = vmatprep.mubr.bf16.mxu0 %v1654_v11  ;;  %v1655_v19 = vld [vmem:[%s1795_s11 + $0x80] ss:$8 sps:$4 sm:$0xff]   ;;  %v1660_v21 = vld [vmem:[%s1795_s11 + $0x94] ss:$8 sps:$4 sm:$0xff]  }
  0x13   : > { %752 = vmatprep.mubr.bf16.mxu1 %v1657_v12  ;;  %v1662_v22 = vld [vmem:[%s1795_s11 + $0x10] ss:$8 sps:$4 sm:$0xff]   ;;  %v1664_v24 = vld [vmem:[%s1795_s11 + $0x24] ss:$8 sps:$4 sm:$0xff]   ;;  %v1668_v26 = vld [vmem:[%s1795_s11 + $0x20] ss:$8 sps:$4 sm:$0xff]  }
  0x14   : > { %1491 = vmatpush3.bf16.msra.mxu0 %v1643_v7  ;;  %1607 = vmatpush3.bf16.msra.mxu1 %v1643_v7  ;;  %v1663_v23 = vld [vmem:[%s1795_s11 + $0x90] ss:$8 sps:$4 sm:$0xff]   ;;  %v1666_v25 = vld [vmem:[%s1795_s11 + $0xa4] ss:$8 sps:$4 sm:$0xff]   ;;  %v1669_v27 = vld [vmem:[%s1795_s11 + $0xa0] ss:$8 sps:$4 sm:$0xff]  }
  0x15   : > { %1492 = vmatprep.subr.bf16.mxu0 %v1644_v8  ;;  %1600 = vmatprep.subr.bf16.mxu1 %v1644_v8  ;;  %v1670_v28 = vld [vmem:[%s1795_s11 + $0x34] ss:$8 sps:$4 sm:$0xff]   ;;  %v1674_v30 = vld [vmem:[%s1795_s11 + $0x30] ss:$8 sps:$4 sm:$0xff]   ;;  %v1676_v32 = vld [vmem:[%s1795_s11 + $0x44] ss:$8 sps:$4 sm:$0xff]  }
  0x16   : > { %v1672_v29 = vld [vmem:[%s1795_s11 + $0xb4] ss:$8 sps:$4 sm:$0xff]   ;;  %v1675_v31 = vld [vmem:[%s1795_s11 + $0xb0] ss:$8 sps:$4 sm:$0xff]   ;;  %v1678_v33 = vld [vmem:[%s1795_s11 + $0xc4] ss:$8 sps:$4 sm:$0xff]  }
  0x17   : > { %v1680_v34 = vld [vmem:[%s1795_s11 + $0x40] ss:$8 sps:$4 sm:$0xff]   ;;  %v1682_v36 = vld [vmem:[%s1795_s11 + $0x54] ss:$8 sps:$4 sm:$0xff]   ;;  %v1686_v38 = vld [vmem:[%s1795_s11 + $0x50] ss:$8 sps:$4 sm:$0xff]  }
  0x18   : > { %1493 = vmatpush3.bf16.msra.mxu0 %v1645_v9  ;;  %1608 = vmatpush3.bf16.msra.mxu1 %v1645_v9  ;;  %v1681_v35 = vld [vmem:[%s1795_s11 + $0xc0] ss:$8 sps:$4 sm:$0xff]   ;;  %v1684_v37 = vld [vmem:[%s1795_s11 + $0xd4] ss:$8 sps:$4 sm:$0xff]   ;;  %v1687_v39 = vld [vmem:[%s1795_s11 + $0xd0] ss:$8 sps:$4 sm:$0xff]  }
  0x19   : > { %1494 = vmatprep.subr.bf16.mxu0 %v1646_v10  ;;  %1601 = vmatprep.subr.bf16.mxu1 %v1646_v10  ;;  %v1688_v40 = vld [vmem:[%s1795_s11 + $0x64] ss:$8 sps:$4 sm:$0xff]   ;;  %v1692_v42 = vld [vmem:[%s1795_s11 + $0x60] ss:$8 sps:$4 sm:$0xff]   ;;  %v1694_v44 = vld [vmem:[%s1795_s11 + $0x74] ss:$8 sps:$4 sm:$0xff]  }
  0x1a   : > { %v1690_v41 = vld [vmem:[%s1795_s11 + $0xe4] ss:$8 sps:$4 sm:$0xff]   ;;  %v1693_v43 = vld [vmem:[%s1795_s11 + $0xe0] ss:$8 sps:$4 sm:$0xff]   ;;  %v1696_v45 = vld [vmem:[%s1795_s11 + $0xf4] ss:$8 sps:$4 sm:$0xff]  }
  0x1b   : > { %v1698_v46 = vld [vmem:[%s1795_s11 + $0x70] ss:$8 sps:$4 sm:$0xff]  }
  0x1c   : > { %1495 = vmatpush3.bf16.msra.mxu0 %v1647_v13  ;;  %1609 = vmatpush3.bf16.msra.mxu1 %v1647_v13  ;;  %v1699_v47 = vld [vmem:[%s1795_s11 + $0xf0] ss:$8 sps:$4 sm:$0xff]  }
  0x1d   : > { %1496 = vmatprep.subr.bf16.mxu0 %v1648_v14  ;;  %1602 = vmatprep.subr.bf16.mxu1 %v1648_v14 }
  0x20   : > { %1497 = vmatpush3.bf16.msra.mxu0 %v1649_v15  ;;  %1610 = vmatpush3.bf16.msra.mxu1 %v1649_v15 }
  0x21   : > { %1498 = vmatprep.subr.bf16.mxu0 %v1650_v16  ;;  %1603 = vmatprep.subr.bf16.mxu1 %v1650_v16 }
  0x24   : > { %1499 = vmatpush3.bf16.msra.mxu0 %v1651_v17  ;;  %1611 = vmatpush3.bf16.msra.mxu1 %v1651_v17 }
  0x27   : > { %689 = vmatmul.mubr.bf16.vlgmr.msra.gmra.mrb[0].mxu0 %v1652_v18  ;;  %753 = vmatmul.mubr.bf16.vlgmr.msra.gmra.mrb[0].mxu1 %v1655_v19 }
  0x28   : > { %696 = vmatprep.mubr.bf16.mxu0 %v1658_v20  ;;  %760 = vmatprep.mubr.bf16.mxu1 %v1660_v21 }
  0x2f   : > { %697 = vmatmul.mubr.bf16.gmra.mrb[4].mxu0 %v1662_v22  ;;  %761 = vmatmul.mubr.bf16.gmra.mrb[4].mxu1 %v1663_v23 }
  0x30   : > { %704 = vmatprep.mubr.bf16.mxu0 %v1664_v24  ;;  %768 = vmatprep.mubr.bf16.mxu1 %v1666_v25 }
  0x37   : > { %705 = vmatmul.mubr.bf16.gmra.mrb[8].mxu0 %v1668_v26  ;;  %769 = vmatmul.mubr.bf16.gmra.mrb[8].mxu1 %v1669_v27 }
  0x38   : > { %712 = vmatprep.mubr.bf16.mxu0 %v1670_v28  ;;  %776 = vmatprep.mubr.bf16.mxu1 %v1672_v29 }
  0x3f   : > { %713 = vmatmul.mubr.bf16.gmra.mrb[12].mxu0 %v1674_v30  ;;  %777 = vmatmul.mubr.bf16.gmra.mrb[12].mxu1 %v1675_v31 }
  0x40   : > { %720 = vmatprep.mubr.bf16.mxu0 %v1676_v32  ;;  %784 = vmatprep.mubr.bf16.mxu1 %v1678_v33 }
  0x47   : > { %721 = vmatmul.mubr.bf16.gmra.mrb[16].mxu0 %v1680_v34  ;;  %785 = vmatmul.mubr.bf16.gmra.mrb[16].mxu1 %v1681_v35 }
  0x48   : > { %728 = vmatprep.mubr.bf16.mxu0 %v1682_v36  ;;  %792 = vmatprep.mubr.bf16.mxu1 %v1684_v37 }
  0x4f   : > { %729 = vmatmul.mubr.bf16.gmra.mrb[20].mxu0 %v1686_v38  ;;  %793 = vmatmul.mubr.bf16.gmra.mrb[20].mxu1 %v1687_v39 }
  0x50   : > { %736 = vmatprep.mubr.bf16.mxu0 %v1688_v40  ;;  %800 = vmatprep.mubr.bf16.mxu1 %v1690_v41 }
  0x57   : > { %737 = vmatmul.mubr.bf16.gmra.mrb[24].mxu0 %v1692_v42  ;;  %801 = vmatmul.mubr.bf16.gmra.mrb[24].mxu1 %v1693_v43 }
  0x58   : > { %744 = vmatprep.mubr.bf16.mxu0 %v1694_v44  ;;  %808 = vmatprep.mubr.bf16.mxu1 %v1696_v45 }
  0x5f   : > { %745 = vmatmul.mubr.bf16.gmra.mrb[28].mxu0 %v1698_v46  ;;  %809 = vmatmul.mubr.bf16.gmra.mrb[28].mxu1 %v1699_v47 }
  0xfa   : > { %v1500_v48 = vpop.f32.mrb[0].mxu0  ;;  %v1548_v49 = vpop.f32.mrb[0].mxu1 }
  0xfb   : > { %v1501_v50 = vpop.f32.mrb[1].mxu0  ;;  %v1549_v52 = vpop.f32.mrb[1].mxu1 }
  0xfc   : > { %v1502_v53 = vadd.f32 %v1501_v50, %v1500_v48  ;;  %v1550_v54 = vadd.f32 %v1549_v52, %v1548_v49  ;;  %v1503_v55 = vpop.f32.mrb[2].mxu0  ;;  %v1551_v56 = vpop.f32.mrb[2].mxu1 }
  0xfd   : > { %v1504_v57 = vpop.f32.mrb[3].mxu0  ;;  %v1552_v58 = vpop.f32.mrb[3].mxu1 }
  0xfe   : > { %v923_v59 = vadd.f32 %v1502_v53, %v1853_v51  ;;  %v939_v60 = vadd.f32 %v1550_v54, %v1853_v51  ;;  %v1505_v61 = vadd.f32 %v1504_v57, %v1503_v55  ;;  %v1553_v62 = vadd.f32 %v1552_v58, %v1551_v56 }
 0x100   : > { %v924_v63 = vadd.f32 %v1505_v61, %v1853_v51  ;;  %v940_v0 = vadd.f32 %v1553_v62, %v1853_v51  ;;  %v955_v1 = vmax.f32 %v923_v59, 0.0  ;;  %v971_v2 = vmax.f32 %v939_v60, 0.0 }
 0x102   : > { %v956_v3 = vmax.f32 %v924_v63, 0.0  ;;  %v972_v4 = vmax.f32 %v940_v0, 0.0  ;;  %v1506_v5 = vpop.f32.mrb[4].mxu0  ;;  %v1554_v6 = vpop.f32.mrb[4].mxu1 }
 0x103   : > { %v1507_v7 = vpop.f32.mrb[5].mxu0  ;;  %v1555_v8 = vpop.f32.mrb[5].mxu1 }
 0x104   : > { %v1392_v9 = vpack.c.bf16 %v956_v3, %v955_v1  ;;  %v1432_v10 = vpack.c.bf16 %v972_v4, %v971_v2  ;;  %v1508_v11 = vadd.f32 %v1507_v7, %v1506_v5  ;;  %v1556_v12 = vadd.f32 %v1555_v8, %v1554_v6  ;;  %v1509_v13 = vpop.f32.mrb[6].mxu0  ;;  %v1557_v14 = vpop.f32.mrb[6].mxu1 }
 0x105   : > { %v1510_v15 = vpop.f32.mrb[7].mxu0  ;;  %v1558_v16 = vpop.f32.mrb[7].mxu1 }
 0x106   : > { %1393 = vst [vmem:[%s1863_s8] sm:$0xff] %v1392_v9   ;;  %1476 = vst [vmem:[%s1863_s8 + $0x40] sm:$0xff] %v1432_v10   ;;  %v925_v17 = vadd.f32 %v1508_v11, %v1853_v51  ;;  %v941_v18 = vadd.f32 %v1556_v12, %v1853_v51  ;;  %v1511_v19 = vadd.f32 %v1510_v15, %v1509_v13 }
 0x107   : > { %v1559_v20 = vadd.f32 %v1558_v16, %v1557_v14 }
 0x108   : > { %v926_v21 = vadd.f32 %v1511_v19, %v1853_v51  ;;  %v957_v23 = vmax.f32 %v925_v17, 0.0  ;;  %v973_v24 = vmax.f32 %v941_v18, 0.0 }
 0x109   : > { %v942_v22 = vadd.f32 %v1559_v20, %v1853_v51 }
 0x10a   : > { %v958_v25 = vmax.f32 %v926_v21, 0.0  ;;  %v1512_v27 = vpop.f32.mrb[8].mxu0  ;;  %v1560_v28 = vpop.f32.mrb[8].mxu1 }
 0x10b   : > { %v974_v26 = vmax.f32 %v942_v22, 0.0  ;;  %v1513_v29 = vpop.f32.mrb[9].mxu0  ;;  %v1561_v30 = vpop.f32.mrb[9].mxu1 }
 0x10c   : > { %v1397_v31 = vpack.c.bf16 %v958_v25, %v957_v23  ;;  %v1514_v33 = vadd.f32 %v1513_v29, %v1512_v27  ;;  %v1562_v34 = vadd.f32 %v1561_v30, %v1560_v28  ;;  %v1515_v35 = vpop.f32.mrb[10].mxu0  ;;  %v1563_v36 = vpop.f32.mrb[10].mxu1 }
 0x10d   : > { %v1437_v32 = vpack.c.bf16 %v974_v26, %v973_v24  ;;  %v1516_v37 = vpop.f32.mrb[11].mxu0  ;;  %v1564_v38 = vpop.f32.mrb[11].mxu1 }
 0x10e   : > { %1469 = vst [vmem:[%s1863_s8 + $0x8] sm:$0xff] %v1397_v31   ;;  %v927_v39 = vadd.f32 %v1514_v33, %v1853_v51  ;;  %v943_v40 = vadd.f32 %v1562_v34, %v1853_v51  ;;  %v1517_v41 = vadd.f32 %v1516_v37, %v1515_v35  ;;  %v1565_v42 = vadd.f32 %v1564_v38, %v1563_v36 }
 0x10f   : > { %1477 = vst [vmem:[%s1863_s8 + $0x48] sm:$0xff] %v1437_v32  }
 0x110   : > { %v928_v43 = vadd.f32 %v1517_v41, %v1853_v51  ;;  %v944_v44 = vadd.f32 %v1565_v42, %v1853_v51  ;;  %v959_v45 = vmax.f32 %v927_v39, 0.0  ;;  %v975_v46 = vmax.f32 %v943_v40, 0.0 }
 0x112   : > { %v960_v47 = vmax.f32 %v928_v43, 0.0  ;;  %v976_v48 = vmax.f32 %v944_v44, 0.0  ;;  %v1518_v49 = vpop.f32.mrb[12].mxu0  ;;  %v1566_v50 = vpop.f32.mrb[12].mxu1 }
 0x113   : > { %v1519_v52 = vpop.f32.mrb[13].mxu0  ;;  %v1567_v53 = vpop.f32.mrb[13].mxu1 }
 0x114   : > { %v1402_v54 = vpack.c.bf16 %v960_v47, %v959_v45  ;;  %v1442_v55 = vpack.c.bf16 %v976_v48, %v975_v46  ;;  %v1520_v56 = vadd.f32 %v1519_v52, %v1518_v49  ;;  %v1568_v57 = vadd.f32 %v1567_v53, %v1566_v50  ;;  %v1521_v58 = vpop.f32.mrb[14].mxu0  ;;  %v1569_v59 = vpop.f32.mrb[14].mxu1 }
 0x115   : > { %v1522_v60 = vpop.f32.mrb[15].mxu0  ;;  %v1570_v61 = vpop.f32.mrb[15].mxu1 }
 0x116   : > { %1470 = vst [vmem:[%s1863_s8 + $0x10] sm:$0xff] %v1402_v54   ;;  %1478 = vst [vmem:[%s1863_s8 + $0x50] sm:$0xff] %v1442_v55   ;;  %v929_v62 = vadd.f32 %v1520_v56, %v1853_v51  ;;  %v945_v63 = vadd.f32 %v1568_v57, %v1853_v51  ;;  %v1523_v0 = vadd.f32 %v1522_v60, %v1521_v58 }
 0x117   : > { %v1571_v1 = vadd.f32 %v1570_v61, %v1569_v59 }
 0x118   : > { %v930_v2 = vadd.f32 %v1523_v0, %v1853_v51  ;;  %v961_v4 = vmax.f32 %v929_v62, 0.0  ;;  %v977_v5 = vmax.f32 %v945_v63, 0.0 }
 0x119   : > { %v946_v3 = vadd.f32 %v1571_v1, %v1853_v51 }
 0x11a   : > { %v962_v6 = vmax.f32 %v930_v2, 0.0  ;;  %v1524_v8 = vpop.f32.mrb[16].mxu0  ;;  %v1572_v9 = vpop.f32.mrb[16].mxu1 }
 0x11b   : > { %v978_v7 = vmax.f32 %v946_v3, 0.0  ;;  %v1525_v10 = vpop.f32.mrb[17].mxu0  ;;  %v1573_v11 = vpop.f32.mrb[17].mxu1 }
 0x11c   : > { %v1407_v12 = vpack.c.bf16 %v962_v6, %v961_v4  ;;  %v1526_v14 = vadd.f32 %v1525_v10, %v1524_v8  ;;  %v1574_v15 = vadd.f32 %v1573_v11, %v1572_v9  ;;  %v1527_v16 = vpop.f32.mrb[18].mxu0  ;;  %v1575_v17 = vpop.f32.mrb[18].mxu1 }
 0x11d   : > { %v1447_v13 = vpack.c.bf16 %v978_v7, %v977_v5  ;;  %v1528_v18 = vpop.f32.mrb[19].mxu0  ;;  %v1576_v19 = vpop.f32.mrb[19].mxu1 }
 0x11e   : > { %1471 = vst [vmem:[%s1863_s8 + $0x18] sm:$0xff] %v1407_v12   ;;  %v931_v20 = vadd.f32 %v1526_v14, %v1853_v51  ;;  %v947_v21 = vadd.f32 %v1574_v15, %v1853_v51  ;;  %v1529_v22 = vadd.f32 %v1528_v18, %v1527_v16  ;;  %v1577_v23 = vadd.f32 %v1576_v19, %v1575_v17 }
 0x11f   : > { %1479 = vst [vmem:[%s1863_s8 + $0x58] sm:$0xff] %v1447_v13  }
 0x120   : > { %v932_v24 = vadd.f32 %v1529_v22, %v1853_v51  ;;  %v948_v25 = vadd.f32 %v1577_v23, %v1853_v51  ;;  %v963_v26 = vmax.f32 %v931_v20, 0.0  ;;  %v979_v27 = vmax.f32 %v947_v21, 0.0 }
 0x122   : > { %v964_v28 = vmax.f32 %v932_v24, 0.0  ;;  %v980_v29 = vmax.f32 %v948_v25, 0.0  ;;  %v1530_v30 = vpop.f32.mrb[20].mxu0  ;;  %v1578_v31 = vpop.f32.mrb[20].mxu1 }
 0x123   : > { %v1531_v32 = vpop.f32.mrb[21].mxu0  ;;  %v1579_v33 = vpop.f32.mrb[21].mxu1 }
 0x124   : > { %v1412_v34 = vpack.c.bf16 %v964_v28, %v963_v26  ;;  %v1452_v35 = vpack.c.bf16 %v980_v29, %v979_v27  ;;  %v1532_v36 = vadd.f32 %v1531_v32, %v1530_v30  ;;  %v1580_v37 = vadd.f32 %v1579_v33, %v1578_v31  ;;  %v1533_v38 = vpop.f32.mrb[22].mxu0  ;;  %v1581_v39 = vpop.f32.mrb[22].mxu1 }
 0x125   : > { %v1534_v40 = vpop.f32.mrb[23].mxu0  ;;  %v1582_v41 = vpop.f32.mrb[23].mxu1 }
 0x126   : > { %1472 = vst [vmem:[%s1863_s8 + $0x20] sm:$0xff] %v1412_v34   ;;  %1480 = vst [vmem:[%s1863_s8 + $0x60] sm:$0xff] %v1452_v35   ;;  %v933_v42 = vadd.f32 %v1532_v36, %v1853_v51  ;;  %v949_v43 = vadd.f32 %v1580_v37, %v1853_v51  ;;  %v1535_v44 = vadd.f32 %v1534_v40, %v1533_v38 }
 0x127   : > { %v1583_v45 = vadd.f32 %v1582_v41, %v1581_v39 }
 0x128   : > { %v934_v46 = vadd.f32 %v1535_v44, %v1853_v51  ;;  %v965_v48 = vmax.f32 %v933_v42, 0.0  ;;  %v981_v49 = vmax.f32 %v949_v43, 0.0 }
 0x129   : > { %v950_v47 = vadd.f32 %v1583_v45, %v1853_v51 }
 0x12a   : > { %v966_v50 = vmax.f32 %v934_v46, 0.0  ;;  %v1536_v53 = vpop.f32.mrb[24].mxu0  ;;  %v1584_v54 = vpop.f32.mrb[24].mxu1 }
 0x12b   : > { %v982_v52 = vmax.f32 %v950_v47, 0.0  ;;  %v1537_v55 = vpop.f32.mrb[25].mxu0  ;;  %v1585_v56 = vpop.f32.mrb[25].mxu1 }
 0x12c   : > { %v1417_v57 = vpack.c.bf16 %v966_v50, %v965_v48  ;;  %v1538_v59 = vadd.f32 %v1537_v55, %v1536_v53  ;;  %v1586_v60 = vadd.f32 %v1585_v56, %v1584_v54  ;;  %v1539_v61 = vpop.f32.mrb[26].mxu0  ;;  %v1587_v62 = vpop.f32.mrb[26].mxu1 }
 0x12d   : > { %v1457_v58 = vpack.c.bf16 %v982_v52, %v981_v49  ;;  %v1540_v63 = vpop.f32.mrb[27].mxu0  ;;  %v1588_v0 = vpop.f32.mrb[27].mxu1 }
 0x12e   : > { %1473 = vst [vmem:[%s1863_s8 + $0x28] sm:$0xff] %v1417_v57   ;;  %v935_v1 = vadd.f32 %v1538_v59, %v1853_v51  ;;  %v951_v2 = vadd.f32 %v1586_v60, %v1853_v51  ;;  %v1541_v3 = vadd.f32 %v1540_v63, %v1539_v61  ;;  %v1589_v4 = vadd.f32 %v1588_v0, %v1587_v62 }
 0x12f   : > { %1481 = vst [vmem:[%s1863_s8 + $0x68] sm:$0xff] %v1457_v58  }
 0x130   : > { %v936_v5 = vadd.f32 %v1541_v3, %v1853_v51  ;;  %v952_v6 = vadd.f32 %v1589_v4, %v1853_v51  ;;  %v967_v7 = vmax.f32 %v935_v1, 0.0  ;;  %v983_v8 = vmax.f32 %v951_v2, 0.0 }
 0x132   : > { %v968_v9 = vmax.f32 %v936_v5, 0.0  ;;  %v984_v10 = vmax.f32 %v952_v6, 0.0  ;;  %v1542_v11 = vpop.f32.mrb[28].mxu0  ;;  %v1590_v12 = vpop.f32.mrb[28].mxu1 }
 0x133   : > { %v1543_v13 = vpop.f32.mrb[29].mxu0  ;;  %v1591_v14 = vpop.f32.mrb[29].mxu1 }
 0x134   : > { %v1422_v15 = vpack.c.bf16 %v968_v9, %v967_v7  ;;  %v1462_v16 = vpack.c.bf16 %v984_v10, %v983_v8  ;;  %v1544_v17 = vadd.f32 %v1543_v13, %v1542_v11  ;;  %v1592_v18 = vadd.f32 %v1591_v14, %v1590_v12  ;;  %v1545_v19 = vpop.f32.mrb[30].mxu0  ;;  %v1593_v20 = vpop.f32.mrb[30].mxu1 }
 0x135   : > { %v1546_v21 = vpop.f32.mrb[31].mxu0  ;;  %v1594_v22 = vpop.f32.mrb[31].mxu1 }
 0x136   : > { %1474 = vst [vmem:[%s1863_s8 + $0x30] sm:$0xff] %v1422_v15   ;;  %1482 = vst [vmem:[%s1863_s8 + $0x70] sm:$0xff] %v1462_v16   ;;  %v937_v23 = vadd.f32 %v1544_v17, %v1853_v51  ;;  %v953_v24 = vadd.f32 %v1592_v18, %v1853_v51  ;;  %v1547_v25 = vadd.f32 %v1546_v21, %v1545_v19 }
 0x137   : > { %v1595_v26 = vadd.f32 %v1594_v22, %v1593_v20 }
 0x138   : > { %v938_v27 = vadd.f32 %v1547_v25, %v1853_v51  ;;  %v969_v29 = vmax.f32 %v937_v23, 0.0  ;;  %v985_v30 = vmax.f32 %v953_v24, 0.0 }
 0x139   : > { %v954_v28 = vadd.f32 %v1595_v26, %v1853_v51 }
 0x13a   : > { %v970_v31 = vmax.f32 %v938_v27, 0.0 }
 0x13b   : > { %v986_v32 = vmax.f32 %v954_v28, 0.0 }
 0x13c   : > { %v1427_v33 = vpack.c.bf16 %v970_v31, %v969_v29 }
 0x13d   : > { %v1467_v34 = vpack.c.bf16 %v986_v32, %v985_v30 }
 0x13e   : > { %1475 = vst [vmem:[%s1863_s8 + $0x38] sm:$0xff] %v1427_v33  }
 0x13f   : > { %1483 = vst [vmem:[%s1863_s8 + $0x78] sm:$0xff] %v1467_v34  }
 0x140 PF: > { %s13_s14 = sadd.s32 1, %s1722_s14   ;;  %s1922_s12 = smov %s1718_s13 }
 0x141   : > { %p10_p5 = scmp.ge.s32.totalorder %s13_s14, 6   ;;  %s1923_s13 = smov %s1925_s15 }
 0x143   :  { %12 = sbr.rel (!%p10_p5) target bundleno = 2 (0x2), region = 76 }

// kernel: gaze3inputs_forward.38
= control target key start
LH: loop header
LB: loop body
LE: loop exit
PB: predicated region body
PF: predicated region fallthrough
CT: control target
= control target key end

     0   :  { %s1694_s12 = smov 0   ;;  %s1696_s13 = smov 0   ;;  %s1942_s0 = inlined_call_operand.vmem [shape: bf16[256,640], index: 0, kind: input, shape index: {}]   ;;  %s1943_s1 = inlined_call_operand.vmem [shape: bf16[640,128], index: 1, kind: input, shape index: {}]   ;;  %s1944_s2 = inlined_call_operand.vmem [shape: f32[1,128], index: 2, kind: input, shape index: {}]   ;;  %s1945_s3 = inlined_call_operand.vmem [shape: bf16[256,128], index: 3, kind: output, shape index: {}]  }
   0x1   :  { %s1698_s14 = smov 0   ;;  %s1700_s15 = smov 0  }
   0x2   :  { %s1702_s16 = smov 0  }
   0x3 LB: > { %s25_s17 = sadd.s32 1, %s1667_s15  ;;  %p48_p1 = scmp.ne.s32.totalorder %s1659_s13, %s1655_s12  ;;  %s1671_s16 = sphi %s1702_s16, %s13_s16   ;;  %s1667_s15 = sphi %s1700_s15, %s1949_s15   ;;  %s1663_s14 = sphi %s1698_s14, %s1948_s14   ;;  %s1659_s13 = sphi %s1696_s13, %s1947_s13   ;;  %s1655_s12 = sphi %s1694_s12, %s1946_s12  }
   0x4   : > { %p26_p0 = scmp.ge.s32.totalorder %s25_s17, 5  ;;  %p49_p2 = scmp.eq.s32.totalorder %s1671_s16, 0 }
   0x5   : > { %s41_s19 = sadd.s32 1, %s1659_s13  ;;  %p1283_p5 = scmp.ge.s32.totalorder %s1671_s16, 5 }
   0x6   : > { %s1951_s17 = smov (%p26_p0, %s25_s17), 0  ;;  %p50_p3 = por %p49_p2, %p48_p1 }
   0x7   : > { %s37_s18 = ssub.s32 %s1667_s15, %s1951_s17  ;;  %162 = sbr.rel (%p1283_p5) target bundleno = 39 (0x27), region = 20 }
   0x8   : > { %p39_p4 = scmp.eq.s32.totalorder %s37_s18, 0 }
   0xa   : > { %s1729_s20 = scalar_select %p39_p4, %s1659_s13, %s41_s19  }
   0xe   : > { %165 = sbr.rel (!%p50_p3) target bundleno = 39 (0x27), region = 24  ;;  %s167_s21 = sand.u32 (%p50_p3), 1, %s1659_s13  }
   0xf   : > { %s1285_s22 = sshll.u32 (%p50_p3), %s1667_s15, 2  ;;  %s1284_s23 = sshll.u32 (%p50_p3), %s167_s21, 7 }
  0x10   : > { %s1737_s26 = scalar_lea.vmem (%p50_p3), %s1942_s0, %s1285_s22  ;;  %s1741_s27 = scalar_lea.vmem (%p50_p3), [#allocation3], %s1284_s23 }
  0x11   : > { %v190_v0 = vld [vmem:[%s1737_s26] sm:$0xf] (%p50_p3)  ;;  %v192_v1 = vld [vmem:[%s1737_s26 + $0x14] sm:$0xf] (%p50_p3)  ;;  %v194_v2 = vld [vmem:[%s1737_s26 + $0x28] sm:$0xf] (%p50_p3) }
  0x12   : > { %191 = vst [vmem:[%s1741_s27] sm:$0xf] (%p50_p3), %v190_v0  ;;  %193 = vst [vmem:[%s1741_s27 + $0x4] sm:$0xf] (%p50_p3), %v192_v1  ;;  %v196_v3 = vld [vmem:[%s1737_s26 + $0x3c] sm:$0xf] (%p50_p3) }
  0x13   : > { %v198_v4 = vld [vmem:[%s1737_s26 + $0x50] sm:$0xf] (%p50_p3)  ;;  %195 = vst [vmem:[%s1741_s27 + $0x8] sm:$0xf] (%p50_p3), %v194_v2  ;;  %197 = vst [vmem:[%s1741_s27 + $0xc] sm:$0xf] (%p50_p3), %v196_v3 }
  0x14   : > { %199 = vst [vmem:[%s1741_s27 + $0x10] sm:$0xf] (%p50_p3), %v198_v4  ;;  %v200_v5 = vld [vmem:[%s1737_s26 + $0x64] sm:$0xf] (%p50_p3)  ;;  %v202_v6 = vld [vmem:[%s1737_s26 + $0x78] sm:$0xf] (%p50_p3) }
  0x15   : > { %v204_v7 = vld [vmem:[%s1737_s26 + $0x8c] sm:$0xf]  ;;  %201 = vst [vmem:[%s1741_s27 + $0x14] sm:$0xf] %v200_v5  ;;  %203 = vst [vmem:[%s1741_s27 + $0x18] sm:$0xf] %v202_v6 }
  0x16   : > { %205 = vst [vmem:[%s1741_s27 + $0x1c] sm:$0xf] %v204_v7  ;;  %v206_v8 = vld [vmem:[%s1737_s26 + $0xa0] sm:$0xf]  ;;  %v208_v9 = vld [vmem:[%s1737_s26 + $0xb4] sm:$0xf] }
  0x17   : > { %v210_v10 = vld [vmem:[%s1737_s26 + $0xc8] sm:$0xf]  ;;  %207 = vst [vmem:[%s1741_s27 + $0x20] sm:$0xf] %v206_v8  ;;  %209 = vst [vmem:[%s1741_s27 + $0x24] sm:$0xf] %v208_v9 }
  0x18   : > { %211 = vst [vmem:[%s1741_s27 + $0x28] sm:$0xf] %v210_v10  ;;  %v212_v11 = vld [vmem:[%s1737_s26 + $0xdc] sm:$0xf]  ;;  %v214_v12 = vld [vmem:[%s1737_s26 + $0xf0] sm:$0xf] }
  0x19   : > { %v216_v13 = vld [vmem:[%s1737_s26 + $0x104] sm:$0xf]  ;;  %213 = vst [vmem:[%s1741_s27 + $0x2c] sm:$0xf] %v212_v11  ;;  %215 = vst [vmem:[%s1741_s27 + $0x30] sm:$0xf] %v214_v12 }
  0x1a   : > { %217 = vst [vmem:[%s1741_s27 + $0x34] sm:$0xf] %v216_v13  ;;  %v218_v14 = vld [vmem:[%s1737_s26 + $0x118] sm:$0xf]  ;;  %v220_v15 = vld [vmem:[%s1737_s26 + $0x12c] sm:$0xf] }
  0x1b   : > { %v222_v16 = vld [vmem:[%s1737_s26 + $0x140] sm:$0xf]  ;;  %219 = vst [vmem:[%s1741_s27 + $0x38] sm:$0xf] %v218_v14  ;;  %221 = vst [vmem:[%s1741_s27 + $0x3c] sm:$0xf] %v220_v15 }
  0x1c   : > { %223 = vst [vmem:[%s1741_s27 + $0x40] sm:$0xf] %v222_v16  ;;  %v224_v17 = vld [vmem:[%s1737_s26 + $0x154] sm:$0xf]  ;;  %v226_v18 = vld [vmem:[%s1737_s26 + $0x168] sm:$0xf] }
  0x1d   : > { %v228_v19 = vld [vmem:[%s1737_s26 + $0x17c] sm:$0xf]  ;;  %225 = vst [vmem:[%s1741_s27 + $0x44] sm:$0xf] %v224_v17  ;;  %227 = vst [vmem:[%s1741_s27 + $0x48] sm:$0xf] %v226_v18 }
  0x1e   : > { %229 = vst [vmem:[%s1741_s27 + $0x4c] sm:$0xf] %v228_v19  ;;  %v230_v20 = vld [vmem:[%s1737_s26 + $0x190] sm:$0xf]  ;;  %v232_v21 = vld [vmem:[%s1737_s26 + $0x1a4] sm:$0xf] }
  0x1f   : > { %v234_v22 = vld [vmem:[%s1737_s26 + $0x1b8] sm:$0xf]  ;;  %231 = vst [vmem:[%s1741_s27 + $0x50] sm:$0xf] %v230_v20  ;;  %233 = vst [vmem:[%s1741_s27 + $0x54] sm:$0xf] %v232_v21 }
  0x20   : > { %235 = vst [vmem:[%s1741_s27 + $0x58] sm:$0xf] %v234_v22  ;;  %v236_v23 = vld [vmem:[%s1737_s26 + $0x1cc] sm:$0xf]  ;;  %v238_v24 = vld [vmem:[%s1737_s26 + $0x1e0] sm:$0xf] }
  0x21   : > { %v240_v25 = vld [vmem:[%s1737_s26 + $0x1f4] sm:$0xf]  ;;  %237 = vst [vmem:[%s1741_s27 + $0x5c] sm:$0xf] %v236_v23  ;;  %239 = vst [vmem:[%s1741_s27 + $0x60] sm:$0xf] %v238_v24 }
  0x22   : > { %241 = vst [vmem:[%s1741_s27 + $0x64] sm:$0xf] %v240_v25  ;;  %v242_v26 = vld [vmem:[%s1737_s26 + $0x208] sm:$0xf]  ;;  %v244_v27 = vld [vmem:[%s1737_s26 + $0x21c] sm:$0xf] }
  0x23   : > { %v246_v28 = vld [vmem:[%s1737_s26 + $0x230] sm:$0xf]  ;;  %243 = vst [vmem:[%s1741_s27 + $0x68] sm:$0xf] %v242_v26  ;;  %245 = vst [vmem:[%s1741_s27 + $0x6c] sm:$0xf] %v244_v27 }
  0x24   : > { %247 = vst [vmem:[%s1741_s27 + $0x70] sm:$0xf] %v246_v28  ;;  %v248_v29 = vld [vmem:[%s1737_s26 + $0x244] sm:$0xf]  ;;  %v250_v30 = vld [vmem:[%s1737_s26 + $0x258] sm:$0xf] }
  0x25   : > { %v252_v31 = vld [vmem:[%s1737_s26 + $0x26c] sm:$0xf]  ;;  %249 = vst [vmem:[%s1741_s27 + $0x74] sm:$0xf] %v248_v29  ;;  %251 = vst [vmem:[%s1741_s27 + $0x78] sm:$0xf] %v250_v30 }
  0x26   : > { %253 = vst [vmem:[%s1741_s27 + $0x7c] sm:$0xf] %v252_v31 }
  0x27 PF: > { %p1286_p6 = scmp.ge.s32.totalorder %s1671_s16, 1  ;;  %p351_p7 = scmp.lt.s32.totalorder %s1671_s16, 6 }
  0x29   : > { %p352_p8 = pnand %p1286_p6, %p351_p7 }
  0x2a   : > { %s358_s28 = sand.u32 (!%p352_p8), 1, %s1655_s12   ;;  %s1288_s29 = sshll.u32 (!%p352_p8), %s1663_s14, 4 }
  0x2b   : > { %355 = sbr.rel (%p352_p8) target bundleno = 359 (0x167), region = 69  ;;  %s1287_s30 = sshll.u32 (!%p352_p8), %s358_s28, 7 }
  0x2c   : > { %p397_p9 = scmp.lt.s32.totalorder (!%p352_p8), %s1288_s29, 79  ;;  %s1814_s8 = scalar_lea.vmem (!%p352_p8), [#allocation3], %s1287_s30 }
  0x2d   : > { %p1290_p10 = scmp.ne.s32.totalorder (!%p352_p8), %s1663_s14, 0 }
  0x32   : > { %s1953_s29 = smov (!%p397_p9, %s1288_s29), 79  ;;  %421 = sbr.rel (%p1290_p10) target bundleno = 68 (0x44), region = 77 }
  0x33   : > { %s1289_s4 = sshll.u32 %s1953_s29, 2  ;;  %v1673_v32 = vmov (!%p1290_p10), 0.0  }
  0x34   : > { %s1812_s7 = scalar_lea.vmem %s1943_s1, %s1289_s4  ;;  %422 = vst [vmem:[#allocation2] sm:$0xff] (!%p1290_p10), %v1673_v32  ;;  %423 = vst [vmem:[#allocation2 + $0x8] sm:$0xff] (!%p1290_p10), %v1673_v32 }
  0x35   : > { %424 = vst [vmem:[#allocation2 + $0x10] sm:$0xff] (!%p1290_p10), %v1673_v32  ;;  %425 = vst [vmem:[#allocation2 + $0x18] sm:$0xff] (!%p1290_p10), %v1673_v32 }
  0x36   : > { %426 = vst [vmem:[#allocation2 + $0x20] sm:$0xff] (!%p1290_p10), %v1673_v32  ;;  %427 = vst [vmem:[#allocation2 + $0x28] sm:$0xff] (!%p1290_p10), %v1673_v32 }
  0x37   : > { %428 = vst [vmem:[#allocation2 + $0x30] sm:$0xff] (!%p1290_p10), %v1673_v32  ;;  %429 = vst [vmem:[#allocation2 + $0x38] sm:$0xff] (!%p1290_p10), %v1673_v32 }
  0x38   : > { %430 = vst [vmem:[#allocation2 + $0x40] sm:$0xff] (!%p1290_p10), %v1673_v32  ;;  %431 = vst [vmem:[#allocation2 + $0x48] sm:$0xff] (!%p1290_p10), %v1673_v32 }
  0x39   : > { %432 = vst [vmem:[#allocation2 + $0x50] sm:$0xff] %v1673_v32  ;;  %433 = vst [vmem:[#allocation2 + $0x58] sm:$0xff] %v1673_v32 }
  0x3a   : > { %434 = vst [vmem:[#allocation2 + $0x60] sm:$0xff] %v1673_v32  ;;  %435 = vst [vmem:[#allocation2 + $0x68] sm:$0xff] %v1673_v32 }
  0x3b   : > { %436 = vst [vmem:[#allocation2 + $0x70] sm:$0xff] %v1673_v32  ;;  %437 = vst [vmem:[#allocation2 + $0x78] sm:$0xff] %v1673_v32 }
  0x3c   : > { %438 = vst [vmem:[#allocation2 + $0x80] sm:$0xff] %v1673_v32  ;;  %439 = vst [vmem:[#allocation2 + $0x88] sm:$0xff] %v1673_v32 }
  0x3d   : > { %440 = vst [vmem:[#allocation2 + $0x90] sm:$0xff] %v1673_v32  ;;  %441 = vst [vmem:[#allocation2 + $0x98] sm:$0xff] %v1673_v32 }
  0x3e   : > { %442 = vst [vmem:[#allocation2 + $0xa0] sm:$0xff] %v1673_v32  ;;  %443 = vst [vmem:[#allocation2 + $0xa8] sm:$0xff] %v1673_v32 }
  0x3f   : > { %444 = vst [vmem:[#allocation2 + $0xb0] sm:$0xff] %v1673_v32  ;;  %445 = vst [vmem:[#allocation2 + $0xb8] sm:$0xff] %v1673_v32 }
  0x40   : > { %446 = vst [vmem:[#allocation2 + $0xc0] sm:$0xff] %v1673_v32  ;;  %447 = vst [vmem:[#allocation2 + $0xc8] sm:$0xff] %v1673_v32 }
  0x41   : > { %448 = vst [vmem:[#allocation2 + $0xd0] sm:$0xff] %v1673_v32  ;;  %449 = vst [vmem:[#allocation2 + $0xd8] sm:$0xff] %v1673_v32 }
  0x42   : > { %450 = vst [vmem:[#allocation2 + $0xe0] sm:$0xff] %v1673_v32  ;;  %451 = vst [vmem:[#allocation2 + $0xe8] sm:$0xff] %v1673_v32 }
  0x43   : > { %452 = vst [vmem:[#allocation2 + $0xf0] sm:$0xff] %v1673_v32  ;;  %453 = vst [vmem:[#allocation2 + $0xf8] sm:$0xff] %v1673_v32 }
  0x44 PF: > { %v1609_v33 = vld [vmem:[%s1812_s7] sm:$0xff]   ;;  %v1610_v34 = vld [vmem:[%s1812_s7 + $0x8] sm:$0xff]   ;;  %v1611_v35 = vld [vmem:[%s1812_s7 + $0x10] sm:$0xff]   ;;  %p1315_p11 = scmp.ne.s32.totalorder %s1663_s14, 4 }
  0x45   : > { %1504 = vmatprep.subr.bf16.mxu0 %v1609_v33  ;;  %1552 = vmatprep.subr.bf16.mxu1 %v1609_v33  ;;  %v1612_v36 = vld [vmem:[%s1812_s7 + $0x18] sm:$0xff]   ;;  %v1617_v37 = vld [vmem:[%s1814_s8] sm:$0xff]   ;;  %v1614_v40 = vld [vmem:[%s1812_s7 + $0x28] sm:$0xff]  }
  0x46   : > { %1505 = vmatpush3.bf16.msra.mxu0 %v1609_v33  ;;  %1560 = vmatpush3.bf16.msra.mxu1 %v1609_v33  ;;  %v1618_v38 = vld [vmem:[%s1814_s8 + $0x40] sm:$0xff]   ;;  %v1615_v41 = vld [vmem:[%s1812_s7 + $0x30] sm:$0xff]   ;;  %v1616_v42 = vld [vmem:[%s1812_s7 + $0x38] sm:$0xff]  }
  0x47   : > { %1506 = vmatprep.subr.bf16.mxu0 %v1610_v34  ;;  %1553 = vmatprep.subr.bf16.mxu1 %v1610_v34  ;;  %v1613_v39 = vld [vmem:[%s1812_s7 + $0x20] sm:$0xff]   ;;  %v1619_v43 = vld [vmem:[%s1814_s8 + $0x8] sm:$0xff]   ;;  %v1621_v45 = vld [vmem:[%s1814_s8 + $0x10] sm:$0xff]  }
  0x48   : > { %1520 = vmatprep.mubr.bf16.mxu0 %v1617_v37  ;;  %1536 = vmatprep.mubr.bf16.mxu1 %v1618_v38  ;;  %v1620_v44 = vld [vmem:[%s1814_s8 + $0x48] sm:$0xff]   ;;  %v1622_v46 = vld [vmem:[%s1814_s8 + $0x50] sm:$0xff]   ;;  %v1623_v47 = vld [vmem:[%s1814_s8 + $0x18] sm:$0xff]  }
  0x49   : > { %v1624_v48 = vld [vmem:[%s1814_s8 + $0x58] sm:$0xff]   ;;  %v1625_v49 = vld [vmem:[%s1814_s8 + $0x20] sm:$0xff]   ;;  %v1627_v51 = vld [vmem:[%s1814_s8 + $0x28] sm:$0xff]  }
  0x4a   : > { %1507 = vmatpush3.bf16.msra.mxu0 %v1610_v34  ;;  %1561 = vmatpush3.bf16.msra.mxu1 %v1610_v34  ;;  %v1626_v50 = vld [vmem:[%s1814_s8 + $0x60] sm:$0xff]   ;;  %v1628_v52 = vld [vmem:[%s1814_s8 + $0x68] sm:$0xff]   ;;  %v1629_v53 = vld [vmem:[%s1814_s8 + $0x30] sm:$0xff]  }
  0x4b   : > { %1508 = vmatprep.subr.bf16.mxu0 %v1611_v35  ;;  %1554 = vmatprep.subr.bf16.mxu1 %v1611_v35  ;;  %v1630_v54 = vld [vmem:[%s1814_s8 + $0x70] sm:$0xff]   ;;  %v1631_v55 = vld [vmem:[%s1814_s8 + $0x38] sm:$0xff]   ;;  %v454_v59 = vld [vmem:[#allocation2] sm:$0xff] }
  0x4c   : > { %v1632_v56 = vld [vmem:[%s1814_s8 + $0x78] sm:$0xff]   ;;  %v456_v57 = vld [vmem:[#allocation2 + $0x10] sm:$0xff]  ;;  %v470_v60 = vld [vmem:[#allocation2 + $0x80] sm:$0xff] }
  0x4d   : > { %v472_v58 = vld [vmem:[#allocation2 + $0x90] sm:$0xff]  ;;  %v457_v63 = vld [vmem:[#allocation2 + $0x18] sm:$0xff]  ;;  %v455_v5 = vld [vmem:[#allocation2 + $0x8] sm:$0xff] }
  0x4e   : > { %1509 = vmatpush3.bf16.msra.mxu0 %v1611_v35  ;;  %1562 = vmatpush3.bf16.msra.mxu1 %v1611_v35  ;;  %v473_v0 = vld [vmem:[#allocation2 + $0x98] sm:$0xff]  ;;  %v471_v6 = vld [vmem:[#allocation2 + $0x88] sm:$0xff]  ;;  %v460_v17 = vld [vmem:[#allocation2 + $0x30] sm:$0xff] }
  0x4f   : > { %1510 = vmatprep.subr.bf16.mxu0 %v1612_v36  ;;  %1555 = vmatprep.subr.bf16.mxu1 %v1612_v36  ;;  %v476_v18 = vld [vmem:[#allocation2 + $0xb0] sm:$0xff]  ;;  %v458_v19 = vld [vmem:[#allocation2 + $0x20] sm:$0xff]  ;;  %v461_v23 = vld [vmem:[#allocation2 + $0x38] sm:$0xff] }
  0x50   : > { %v474_v20 = vld [vmem:[#allocation2 + $0xa0] sm:$0xff]  ;;  %v477_v24 = vld [vmem:[#allocation2 + $0xb8] sm:$0xff]  ;;  %v459_v29 = vld [vmem:[#allocation2 + $0x28] sm:$0xff] }
  0x51   : > { %v475_v30 = vld [vmem:[#allocation2 + $0xa8] sm:$0xff] }
  0x52   : > { %1511 = vmatpush3.bf16.msra.mxu0 %v1612_v36  ;;  %1563 = vmatpush3.bf16.msra.mxu1 %v1612_v36 }
  0x53   : > { %1512 = vmatprep.subr.bf16.mxu0 %v1613_v39  ;;  %1556 = vmatprep.subr.bf16.mxu1 %v1613_v39 }
  0x56   : > { %1513 = vmatpush3.bf16.msra.mxu0 %v1613_v39  ;;  %1564 = vmatpush3.bf16.msra.mxu1 %v1613_v39 }
  0x57   : > { %1514 = vmatprep.subr.bf16.mxu0 %v1614_v40  ;;  %1557 = vmatprep.subr.bf16.mxu1 %v1614_v40 }
  0x5a   : > { %1515 = vmatpush3.bf16.msra.mxu0 %v1614_v40  ;;  %1565 = vmatpush3.bf16.msra.mxu1 %v1614_v40 }
  0x5b   : > { %1516 = vmatprep.subr.bf16.mxu0 %v1615_v41  ;;  %1558 = vmatprep.subr.bf16.mxu1 %v1615_v41 }
  0x5e   : > { %1517 = vmatpush3.bf16.msra.mxu0 %v1615_v41  ;;  %1566 = vmatpush3.bf16.msra.mxu1 %v1615_v41  ;;  %v464_v41 = vld [vmem:[#allocation2 + $0x50] sm:$0xff] }
  0x5f   : > { %1518 = vmatprep.subr.bf16.mxu0 %v1616_v42  ;;  %1559 = vmatprep.subr.bf16.mxu1 %v1616_v42 }
  0x62   : > { %1519 = vmatpush3.bf16.msra.mxu0 %v1616_v42  ;;  %1567 = vmatpush3.bf16.msra.mxu1 %v1616_v42  ;;  %v480_v42 = vld [vmem:[#allocation2 + $0xd0] sm:$0xff] }
  0x65   : > { %1521 = vmatmul.mubr.bf16.vlgmr.msra.gmra.mrb[0].mxu0 %v1619_v43  ;;  %1537 = vmatmul.mubr.bf16.vlgmr.msra.gmra.mrb[0].mxu1 %v1620_v44  ;;  %v462_v43 = vld [vmem:[#allocation2 + $0x40] sm:$0xff] }
  0x66   : > { %1524 = vmatprep.mubr.bf16.mxu0 %v1621_v45  ;;  %1540 = vmatprep.mubr.bf16.mxu1 %v1622_v46  ;;  %v478_v44 = vld [vmem:[#allocation2 + $0xc0] sm:$0xff] }
  0x6d   : > { %1525 = vmatmul.mubr.bf16.gmra.mrb[4].mxu0 %v1623_v47  ;;  %1541 = vmatmul.mubr.bf16.gmra.mrb[4].mxu1 %v1624_v48  ;;  %v465_v47 = vld [vmem:[#allocation2 + $0x58] sm:$0xff] }
  0x6e   : > { %1528 = vmatprep.mubr.bf16.mxu0 %v1625_v49  ;;  %1544 = vmatprep.mubr.bf16.mxu1 %v1626_v50  ;;  %v481_v48 = vld [vmem:[#allocation2 + $0xd8] sm:$0xff] }
  0x75   : > { %1529 = vmatmul.mubr.bf16.gmra.mrb[8].mxu0 %v1627_v51  ;;  %1545 = vmatmul.mubr.bf16.gmra.mrb[8].mxu1 %v1628_v52 }
  0x76   : > { %1532 = vmatprep.mubr.bf16.mxu0 %v1629_v53  ;;  %1548 = vmatprep.mubr.bf16.mxu1 %v1630_v54  ;;  %v463_v53 = vld [vmem:[#allocation2 + $0x48] sm:$0xff] }
  0x77   : > { %v479_v54 = vld [vmem:[#allocation2 + $0xc8] sm:$0xff] }
  0x7d   : > { %1533 = vmatmul.mubr.bf16.gmra.mrb[12].mxu0 %v1631_v55  ;;  %1549 = vmatmul.mubr.bf16.gmra.mrb[12].mxu1 %v1632_v56 }
 0x138   : > { %v1522_v61 = vpop.f32.mrb[0].mxu0  ;;  %v1538_v62 = vpop.f32.mrb[0].mxu1 }
 0x139   : > { %v841_v1 = vadd.f32 %v1522_v61, %v456_v57  ;;  %v857_v2 = vadd.f32 %v1538_v62, %v472_v58  ;;  %v712_v3 = vpop.f32.mrb[1].mxu0  ;;  %v776_v4 = vpop.f32.mrb[1].mxu1 }
 0x13a   : > { %v839_v7 = vadd.f32 %v712_v3, %v454_v59  ;;  %v855_v8 = vadd.f32 %v776_v4, %v470_v60  ;;  %v1523_v9 = vpop.f32.mrb[2].mxu0  ;;  %v1539_v10 = vpop.f32.mrb[2].mxu1  ;;  %v466_v3 = vld [vmem:[#allocation2 + $0x60] sm:$0xff] }
 0x13b   : > { %873 = vst [vmem:[#allocation2 + $0x10] sm:$0xff] %v841_v1  ;;  %889 = vst [vmem:[#allocation2 + $0x90] sm:$0xff] %v857_v2  ;;  %v842_v11 = vadd.f32 %v1523_v9, %v457_v63  ;;  %v858_v12 = vadd.f32 %v1539_v10, %v473_v0  ;;  %v715_v13 = vpop.f32.mrb[3].mxu0  ;;  %v779_v14 = vpop.f32.mrb[3].mxu1  ;;  %v468_v1 = vld [vmem:[#allocation2 + $0x70] sm:$0xff]  ;;  %v482_v4 = vld [vmem:[#allocation2 + $0xe0] sm:$0xff] }
 0x13c   : > { %871 = vst [vmem:[#allocation2] sm:$0xff] %v839_v7  ;;  %887 = vst [vmem:[#allocation2 + $0x80] sm:$0xff] %v855_v8  ;;  %v840_v15 = vadd.f32 %v715_v13, %v455_v5  ;;  %v856_v16 = vadd.f32 %v779_v14, %v471_v6  ;;  %v484_v2 = vld [vmem:[#allocation2 + $0xf0] sm:$0xff]  ;;  %v469_v7 = vld [vmem:[#allocation2 + $0x78] sm:$0xff] }
 0x13d   : > { %874 = vst [vmem:[#allocation2 + $0x18] sm:$0xff] %v842_v11  ;;  %890 = vst [vmem:[#allocation2 + $0x98] sm:$0xff] %v858_v12  ;;  %v485_v8 = vld [vmem:[#allocation2 + $0xf8] sm:$0xff]  ;;  %v467_v13 = vld [vmem:[#allocation2 + $0x68] sm:$0xff] }
 0x13e   : > { %872 = vst [vmem:[#allocation2 + $0x8] sm:$0xff] %v840_v15  ;;  %888 = vst [vmem:[#allocation2 + $0x88] sm:$0xff] %v856_v16  ;;  %v483_v14 = vld [vmem:[#allocation2 + $0xe8] sm:$0xff] }
 0x140   : > { %v1526_v21 = vpop.f32.mrb[4].mxu0  ;;  %v1542_v22 = vpop.f32.mrb[4].mxu1 }
 0x141   : > { %v845_v25 = vadd.f32 %v1526_v21, %v460_v17  ;;  %v861_v26 = vadd.f32 %v1542_v22, %v476_v18  ;;  %v728_v27 = vpop.f32.mrb[5].mxu0  ;;  %v792_v28 = vpop.f32.mrb[5].mxu1 }
 0x142   : > { %v843_v31 = vadd.f32 %v728_v27, %v458_v19  ;;  %v859_v32 = vadd.f32 %v792_v28, %v474_v20  ;;  %v1527_v33 = vpop.f32.mrb[6].mxu0  ;;  %v1543_v34 = vpop.f32.mrb[6].mxu1  ;;  %v1845_v27 = vld [vmem:[%s1944_s2] ss:$0 sm:$0xff] (!%p1315_p11) }
 0x143   : > { %877 = vst [vmem:[#allocation2 + $0x30] sm:$0xff] %v845_v25  ;;  %893 = vst [vmem:[#allocation2 + $0xb0] sm:$0xff] %v861_v26  ;;  %v846_v35 = vadd.f32 %v1527_v33, %v461_v23  ;;  %v862_v36 = vadd.f32 %v1543_v34, %v477_v24  ;;  %v731_v37 = vpop.f32.mrb[7].mxu0  ;;  %v795_v38 = vpop.f32.mrb[7].mxu1  ;;  %v907_v25 = vld [vmem:[#allocation2] sm:$0xff] (!%p1315_p11) }
 0x144   : > { %875 = vst [vmem:[#allocation2 + $0x20] sm:$0xff] %v843_v31  ;;  %891 = vst [vmem:[#allocation2 + $0xa0] sm:$0xff] %v859_v32  ;;  %v844_v39 = vadd.f32 %v731_v37, %v459_v29  ;;  %v860_v40 = vadd.f32 %v795_v38, %v475_v30  ;;  %v946_v28 = vadd.f32 (!%p1315_p11), %v1845_v27, %v907_v25  ;;  %v909_v30 = vld [vmem:[#allocation2 + $0x10] sm:$0xff] (!%p1315_p11)  ;;  %v910_v31 = vld [vmem:[#allocation2 + $0x18] sm:$0xff] (!%p1315_p11) }
 0x145   : > { %878 = vst [vmem:[#allocation2 + $0x38] sm:$0xff] %v846_v35  ;;  %894 = vst [vmem:[#allocation2 + $0xb8] sm:$0xff] %v862_v36  ;;  %v908_v26 = vld [vmem:[#allocation2 + $0x8] sm:$0xff] (!%p1315_p11)  ;;  %v948_v33 = vadd.f32 (!%p1315_p11), %v1845_v27, %v909_v30  ;;  %v949_v34 = vadd.f32 (!%p1315_p11), %v1845_v27, %v910_v31 }
 0x146   : > { %876 = vst [vmem:[#allocation2 + $0x28] sm:$0xff] %v844_v39  ;;  %892 = vst [vmem:[#allocation2 + $0xa8] sm:$0xff] %v860_v40  ;;  %v947_v29 = vadd.f32 (!%p1315_p11), %v1845_v27, %v908_v26  ;;  %v978_v39 = vmax.f32 (!%p1315_p11), %v946_v28, 0.0 }
 0x148   : > { %v1530_v45 = vpop.f32.mrb[8].mxu0  ;;  %v1546_v46 = vpop.f32.mrb[8].mxu1  ;;  %v979_v40 = vmax.f32 (!%p1315_p11), %v947_v29, 0.0 }
 0x149   : > { %v849_v49 = vadd.f32 %v1530_v45, %v464_v41  ;;  %v865_v50 = vadd.f32 %v1546_v46, %v480_v42  ;;  %v744_v51 = vpop.f32.mrb[9].mxu0  ;;  %v808_v52 = vpop.f32.mrb[9].mxu1  ;;  %v980_v46 = vmax.f32 (!%p1315_p11), %v948_v33, 0.0 }
 0x14a   : > { %v847_v55 = vadd.f32 %v744_v51, %v462_v43  ;;  %v863_v56 = vadd.f32 %v808_v52, %v478_v44  ;;  %v1531_v57 = vpop.f32.mrb[10].mxu0  ;;  %v1547_v58 = vpop.f32.mrb[10].mxu1  ;;  %v913_v37 = vld [vmem:[#allocation2 + $0x30] sm:$0xff] (!%p1315_p11)  ;;  %v1388_v52 = vpack.c.bf16 (!%p1315_p11), %v979_v40, %v978_v39 }
 0x14b   : > { %881 = vst [vmem:[#allocation2 + $0x50] sm:$0xff] %v849_v49  ;;  %897 = vst [vmem:[#allocation2 + $0xd0] sm:$0xff] %v865_v50  ;;  %v850_v59 = vadd.f32 %v1531_v57, %v465_v47  ;;  %v866_v60 = vadd.f32 %v1547_v58, %v481_v48  ;;  %v747_v61 = vpop.f32.mrb[11].mxu0  ;;  %v811_v62 = vpop.f32.mrb[11].mxu1  ;;  %v911_v32 = vld [vmem:[#allocation2 + $0x20] sm:$0xff] (!%p1315_p11)  ;;  %v952_v42 = vadd.f32 (!%p1315_p11), %v1845_v27, %v913_v37  ;;  %v981_v47 = vmax.f32 (!%p1315_p11), %v949_v34, 0.0 }
 0x14c   : > { %879 = vst [vmem:[#allocation2 + $0x40] sm:$0xff] %v847_v55  ;;  %895 = vst [vmem:[#allocation2 + $0xc0] sm:$0xff] %v863_v56  ;;  %v848_v63 = vadd.f32 %v747_v61, %v463_v53  ;;  %v864_v0 = vadd.f32 %v811_v62, %v479_v54  ;;  %v950_v36 = vadd.f32 (!%p1315_p11), %v1845_v27, %v911_v32  ;;  %v914_v38 = vld [vmem:[#allocation2 + $0x38] sm:$0xff] (!%p1315_p11)  ;;  %v929_v25 = vld [vmem:[#allocation2 + $0xb0] sm:$0xff] (!%p1315_p11) }
 0x14d   : > { %882 = vst [vmem:[#allocation2 + $0x58] sm:$0xff] %v850_v59  ;;  %898 = vst [vmem:[#allocation2 + $0xd8] sm:$0xff] %v866_v60  ;;  %v912_v35 = vld [vmem:[#allocation2 + $0x28] sm:$0xff] (!%p1315_p11)  ;;  %v953_v49 = vadd.f32 (!%p1315_p11), %v1845_v27, %v914_v38  ;;  %v984_v54 = vmax.f32 (!%p1315_p11), %v952_v42, 0.0  ;;  %v1393_v57 = vpack.c.bf16 (!%p1315_p11), %v981_v47, %v980_v46  ;;  %v930_v26 = vld [vmem:[#allocation2 + $0xb8] sm:$0xff] (!%p1315_p11) }
 0x14e   : > { %880 = vst [vmem:[#allocation2 + $0x48] sm:$0xff] %v848_v63  ;;  %896 = vst [vmem:[#allocation2 + $0xc8] sm:$0xff] %v864_v0  ;;  %v951_v41 = vadd.f32 (!%p1315_p11), %v1845_v27, %v912_v35  ;;  %v982_v48 = vmax.f32 (!%p1315_p11), %v950_v36, 0.0  ;;  %v969_v42 = vadd.f32 (!%p1315_p11), %v1845_v27, %v930_v26 }
 0x14f   : > { %v985_v58 = vmax.f32 (!%p1315_p11), %v953_v49, 0.0  ;;  %1389 = vst [vmem:[%s1945_s3] sm:$0xff] (!%p1315_p11), %v1388_v52   ;;  %1465 = vst [vmem:[%s1945_s3 + $0x8] sm:$0xff] (!%p1315_p11), %v1393_v57  }
 0x150   : > { %v1534_v5 = vpop.f32.mrb[12].mxu0  ;;  %v1550_v6 = vpop.f32.mrb[12].mxu1  ;;  %906 = sbr.rel (%p1315_p11) target bundleno = 359 (0x167), region = 81  ;;  %v983_v53 = vmax.f32 (!%p1315_p11), %v951_v41, 0.0  ;;  %v968_v41 = vadd.f32 (!%p1315_p11), %v1845_v27, %v929_v25  ;;  %v1001_v52 = vmax.f32 (!%p1315_p11), %v969_v42, 0.0 }
 0x151   : > { %v853_v9 = vadd.f32 %v1534_v5, %v468_v1  ;;  %v869_v10 = vadd.f32 %v1550_v6, %v484_v2  ;;  %v760_v11 = vpop.f32.mrb[13].mxu0  ;;  %v824_v12 = vpop.f32.mrb[13].mxu1  ;;  %v1403_v5 = vpack.c.bf16 (!%p1315_p11), %v985_v58, %v984_v54 }
 0x152   : > { %v851_v15 = vadd.f32 %v760_v11, %v466_v3  ;;  %v867_v16 = vadd.f32 %v824_v12, %v482_v4  ;;  %v1535_v17 = vpop.f32.mrb[14].mxu0  ;;  %v1551_v18 = vpop.f32.mrb[14].mxu1  ;;  %v917_v45 = vld [vmem:[#allocation2 + $0x50] sm:$0xff] (!%p1315_p11)  ;;  %v1398_v63 = vpack.c.bf16 (!%p1315_p11), %v983_v53, %v982_v48  ;;  %v923_v3 = vld [vmem:[#allocation2 + $0x80] sm:$0xff] (!%p1315_p11)  ;;  %v924_v4 = vld [vmem:[#allocation2 + $0x88] sm:$0xff] (!%p1315_p11) }
 0x153   : > { %885 = vst [vmem:[#allocation2 + $0x70] sm:$0xff] %v853_v9  ;;  %901 = vst [vmem:[#allocation2 + $0xf0] sm:$0xff] %v869_v10  ;;  %v854_v19 = vadd.f32 %v1535_v17, %v469_v7  ;;  %v870_v20 = vadd.f32 %v1551_v18, %v485_v8  ;;  %v763_v21 = vpop.f32.mrb[15].mxu0  ;;  %v827_v22 = vpop.f32.mrb[15].mxu1  ;;  %v915_v43 = vld [vmem:[#allocation2 + $0x40] sm:$0xff] (!%p1315_p11)  ;;  %v956_v60 = vadd.f32 (!%p1315_p11), %v1845_v27, %v917_v45  ;;  %v925_v9 = vld [vmem:[#allocation2 + $0x90] sm:$0xff] (!%p1315_p11) }
 0x154   : > { %883 = vst [vmem:[#allocation2 + $0x60] sm:$0xff] %v851_v15  ;;  %899 = vst [vmem:[#allocation2 + $0xe0] sm:$0xff] %v867_v16  ;;  %v852_v23 = vadd.f32 %v763_v21, %v467_v13  ;;  %v868_v24 = vadd.f32 %v827_v22, %v483_v14  ;;  %v918_v50 = vld [vmem:[#allocation2 + $0x58] sm:$0xff] (!%p1315_p11)  ;;  %v954_v55 = vadd.f32 (!%p1315_p11), %v1845_v27, %v915_v43  ;;  %v931_v32 = vld [vmem:[#allocation2 + $0xc0] sm:$0xff] (!%p1315_p11) }
 0x155   : > { %886 = vst [vmem:[#allocation2 + $0x78] sm:$0xff] %v854_v19  ;;  %902 = vst [vmem:[#allocation2 + $0xf8] sm:$0xff] %v870_v20  ;;  %v916_v44 = vld [vmem:[#allocation2 + $0x48] sm:$0xff] (!%p1315_p11)  ;;  %v957_v1 = vadd.f32 (!%p1315_p11), %v1845_v27, %v918_v50  ;;  %v988_v7 = vmax.f32 (!%p1315_p11), %v956_v60, 0.0  ;;  %v926_v14 = vld [vmem:[#allocation2 + $0x98] sm:$0xff] (!%p1315_p11)  ;;  %v962_v17 = vadd.f32 (!%p1315_p11), %v1845_v27, %v923_v3  ;;  %v963_v18 = vadd.f32 (!%p1315_p11), %v1845_v27, %v924_v4 }
 0x156   : > { %884 = vst [vmem:[#allocation2 + $0x68] sm:$0xff] %v852_v23  ;;  %900 = vst [vmem:[#allocation2 + $0xe8] sm:$0xff] %v868_v24  ;;  %v955_v59 = vadd.f32 (!%p1315_p11), %v1845_v27, %v916_v44  ;;  %v986_v0 = vmax.f32 (!%p1315_p11), %v954_v55, 0.0  ;;  %v927_v19 = vld [vmem:[#allocation2 + $0xa0] sm:$0xff] (!%p1315_p11)  ;;  %v928_v20 = vld [vmem:[#allocation2 + $0xa8] sm:$0xff] (!%p1315_p11)  ;;  %v964_v24 = vadd.f32 (!%p1315_p11), %v1845_v27, %v925_v9  ;;  %v965_v31 = vadd.f32 (!%p1315_p11), %v1845_v27, %v926_v14 }
 0x157   : > { %1466 = vst [vmem:[%s1945_s3 + $0x10] sm:$0xff] %v1398_v63   ;;  %v989_v10 = vmax.f32 %v957_v1, 0.0  ;;  %1467 = vst [vmem:[%s1945_s3 + $0x18] sm:$0xff] %v1403_v5   ;;  %v994_v29 = vmax.f32 %v962_v17, 0.0  ;;  %v995_v30 = vmax.f32 %v963_v18, 0.0  ;;  %v932_v33 = vld [vmem:[#allocation2 + $0xc8] sm:$0xff]  ;;  %v966_v36 = vadd.f32 %v1845_v27, %v927_v19 }
 0x158   : > { %v987_v6 = vmax.f32 %v955_v59, 0.0  ;;  %v996_v35 = vmax.f32 %v964_v24, 0.0  ;;  %v967_v37 = vadd.f32 %v1845_v27, %v928_v20  ;;  %v933_v38 = vld [vmem:[#allocation2 + $0xd0] sm:$0xff]  ;;  %v997_v40 = vmax.f32 %v965_v31, 0.0  ;;  %v934_v43 = vld [vmem:[#allocation2 + $0xd8] sm:$0xff] }
 0x159   : > { %v1413_v21 = vpack.c.bf16 %v989_v10, %v988_v7  ;;  %v1428_v39 = vpack.c.bf16 %v995_v30, %v994_v29  ;;  %v998_v44 = vmax.f32 %v966_v36, 0.0  ;;  %v970_v46 = vadd.f32 %v1845_v27, %v931_v32 }
 0x15a   : > { %v921_v61 = vld [vmem:[#allocation2 + $0x70] sm:$0xff]  ;;  %v1408_v15 = vpack.c.bf16 %v987_v6, %v986_v0  ;;  %v999_v45 = vmax.f32 %v967_v37, 0.0  ;;  %v971_v47 = vadd.f32 %v1845_v27, %v932_v33  ;;  %v1433_v50 = vpack.c.bf16 %v997_v40, %v996_v35 }
 0x15b   : > { %v919_v51 = vld [vmem:[#allocation2 + $0x60] sm:$0xff]  ;;  %v960_v12 = vadd.f32 %v1845_v27, %v921_v61  ;;  %1469 = vst [vmem:[%s1945_s3 + $0x28] sm:$0xff] %v1413_v21   ;;  %1472 = vst [vmem:[%s1945_s3 + $0x40] sm:$0xff] %v1428_v39   ;;  %v972_v53 = vadd.f32 %v1845_v27, %v933_v38  ;;  %v937_v54 = vld [vmem:[#allocation2 + $0xf0] sm:$0xff]  ;;  %v1002_v57 = vmax.f32 %v970_v46, 0.0  ;;  %v973_v59 = vadd.f32 %v1845_v27, %v934_v43 }
 0x15c   : > { %v922_v62 = vld [vmem:[#allocation2 + $0x78] sm:$0xff]  ;;  %v958_v2 = vadd.f32 %v1845_v27, %v919_v51  ;;  %1468 = vst [vmem:[%s1945_s3 + $0x20] sm:$0xff] %v1408_v15   ;;  %v935_v48 = vld [vmem:[#allocation2 + $0xe0] sm:$0xff]  ;;  %v1000_v51 = vmax.f32 %v968_v41, 0.0  ;;  %v1003_v58 = vmax.f32 %v971_v47, 0.0  ;;  %1473 = vst [vmem:[%s1945_s3 + $0x48] sm:$0xff] %v1433_v50  }
 0x15d   : > { %v920_v56 = vld [vmem:[#allocation2 + $0x68] sm:$0xff]  ;;  %v961_v13 = vadd.f32 %v1845_v27, %v922_v62  ;;  %v992_v22 = vmax.f32 %v960_v12, 0.0  ;;  %v938_v55 = vld [vmem:[#allocation2 + $0xf8] sm:$0xff]  ;;  %v1004_v61 = vmax.f32 %v972_v53, 0.0  ;;  %v974_v62 = vadd.f32 %v1845_v27, %v935_v48 }
 0x15e   : > { %v959_v8 = vadd.f32 %v1845_v27, %v920_v56  ;;  %v990_v11 = vmax.f32 %v958_v2, 0.0  ;;  %v936_v49 = vld [vmem:[#allocation2 + $0xe8] sm:$0xff]  ;;  %v1438_v56 = vpack.c.bf16 %v999_v45, %v998_v44  ;;  %v1443_v60 = vpack.c.bf16 %v1001_v52, %v1000_v51 }
 0x15f   : > { %v993_v23 = vmax.f32 %v961_v13, 0.0  ;;  %v975_v63 = vadd.f32 %v1845_v27, %v936_v49  ;;  %v1448_v0 = vpack.c.bf16 %v1003_v58, %v1002_v57  ;;  %v1005_v1 = vmax.f32 %v973_v59, 0.0 }
 0x160   : > { %v991_v16 = vmax.f32 %v959_v8, 0.0  ;;  %1474 = vst [vmem:[%s1945_s3 + $0x50] sm:$0xff] %v1438_v56   ;;  %v976_v2 = vadd.f32 %v1845_v27, %v937_v54  ;;  %v977_v3 = vadd.f32 %v1845_v27, %v938_v55  ;;  %1475 = vst [vmem:[%s1945_s3 + $0x58] sm:$0xff] %v1443_v60   ;;  %v1006_v4 = vmax.f32 %v974_v62, 0.0 }
 0x161   : > { %v1423_v34 = vpack.c.bf16 %v993_v23, %v992_v22  ;;  %v1007_v5 = vmax.f32 %v975_v63, 0.0  ;;  %1476 = vst [vmem:[%s1945_s3 + $0x60] sm:$0xff] %v1448_v0   ;;  %v1453_v6 = vpack.c.bf16 %v1005_v1, %v1004_v61 }
 0x162   : > { %v1418_v28 = vpack.c.bf16 %v991_v16, %v990_v11  ;;  %v1008_v7 = vmax.f32 %v976_v2, 0.0  ;;  %v1009_v8 = vmax.f32 %v977_v3, 0.0 }
 0x163   : > { %1471 = vst [vmem:[%s1945_s3 + $0x38] sm:$0xff] %v1423_v34   ;;  %v1458_v9 = vpack.c.bf16 %v1007_v5, %v1006_v4  ;;  %1477 = vst [vmem:[%s1945_s3 + $0x68] sm:$0xff] %v1453_v6  }
 0x164   : > { %1470 = vst [vmem:[%s1945_s3 + $0x30] sm:$0xff] %v1418_v28   ;;  %v1463_v10 = vpack.c.bf16 %v1009_v8, %v1008_v7 }
 0x165   : > { %1478 = vst [vmem:[%s1945_s3 + $0x70] sm:$0xff] %v1458_v9  }
 0x166   : > { %1479 = vst [vmem:[%s1945_s3 + $0x78] sm:$0xff] %v1463_v10  }
 0x167 PF: > { %s13_s16 = sadd.s32 1, %s1671_s16   ;;  %s1946_s12 = smov %s1659_s13 }
 0x168   : > { %p10_p12 = scmp.ge.s32.totalorder %s13_s16, 7   ;;  %s1947_s13 = smov %s1729_s20 }
 0x169   : > { %s1948_s14 = smov %s1667_s15  ;;  %s1949_s15 = smov %s1951_s17 }
 0x16a   :  { %12 = sbr.rel (!%p10_p12) target bundleno = 3 (0x3), region = 122 }

// kernel: gaze3inputs_forward.39
= control target key start
LH: loop header
LB: loop body
LE: loop exit
PB: predicated region body
PF: predicated region fallthrough
CT: control target
= control target key end

     0   :  { %s1953_s15 = smov 0   ;;  %s1955_s16 = smov 0   ;;  %s2249_s0 = inlined_call_operand.vmem [shape: bf16[256,640], index: 0, kind: input, shape index: {}]   ;;  %s2250_s1 = inlined_call_operand.vmem [shape: bf16[640,128], index: 1, kind: input, shape index: {}]   ;;  %s2251_s2 = inlined_call_operand.vmem [shape: f32[1,128], index: 2, kind: input, shape index: {}]   ;;  %s2252_s3 = inlined_call_operand.vmem [shape: bf16[256,128], index: 3, kind: input, shape index: {}]   ;;  %s2253_s4 = inlined_call_operand.vmem [shape: bf16[256,128], index: 4, kind: output, shape index: {}]  }
   0x1   :  { %s1957_s17 = smov 0   ;;  %s1959_s18 = smov 0  }
   0x2   :  { %s1961_s19 = smov 0  }
   0x3 LB: > { %s26_s20 = sadd.s32 1, %s1921_s18  ;;  %p49_p1 = scmp.ne.s32.totalorder %s1913_s16, %s1909_s15  ;;  %s1925_s19 = sphi %s1961_s19, %s14_s19   ;;  %s1921_s18 = sphi %s1959_s18, %s2257_s18   ;;  %s1917_s17 = sphi %s1957_s17, %s2256_s17   ;;  %s1913_s16 = sphi %s1955_s16, %s2255_s16   ;;  %s1909_s15 = sphi %s1953_s15, %s2254_s15  }
   0x4   : > { %p27_p0 = scmp.ge.s32.totalorder %s26_s20, 5  ;;  %p50_p2 = scmp.eq.s32.totalorder %s1925_s19, 0 }
   0x5   : > { %s42_s22 = sadd.s32 1, %s1913_s16  ;;  %p1458_p5 = scmp.ge.s32.totalorder %s1925_s19, 5 }
   0x6   : > { %s2259_s20 = smov (%p27_p0, %s26_s20), 0  ;;  %p51_p3 = por %p50_p2, %p49_p1 }
   0x7   : > { %s38_s21 = ssub.s32 %s1921_s18, %s2259_s20  ;;  %203 = sbr.rel (%p1458_p5) target bundleno = 39 (0x27), region = 24 }
   0x8   : > { %p40_p4 = scmp.eq.s32.totalorder %s38_s21, 0 }
   0xa   : > { %s1988_s23 = scalar_select %p40_p4, %s1913_s16, %s42_s22  }
   0xe   : > { %206 = sbr.rel (!%p51_p3) target bundleno = 39 (0x27), region = 28  ;;  %s208_s24 = sand.u32 (%p51_p3), 1, %s1913_s16  }
   0xf   : > { %s1460_s25 = sshll.u32 (%p51_p3), %s1921_s18, 2  ;;  %s1459_s26 = sshll.u32 (%p51_p3), %s208_s24, 7 }
  0x10   : > { %s1996_s29 = scalar_lea.vmem (%p51_p3), %s2249_s0, %s1460_s25  ;;  %s2000_s30 = scalar_lea.vmem (%p51_p3), [#allocation3], %s1459_s26 }
  0x11   : > { %v231_v0 = vld [vmem:[%s1996_s29] sm:$0xf] (%p51_p3)  ;;  %v233_v1 = vld [vmem:[%s1996_s29 + $0x14] sm:$0xf] (%p51_p3)  ;;  %v235_v2 = vld [vmem:[%s1996_s29 + $0x28] sm:$0xf] (%p51_p3) }
  0x12   : > { %232 = vst [vmem:[%s2000_s30] sm:$0xf] (%p51_p3), %v231_v0  ;;  %234 = vst [vmem:[%s2000_s30 + $0x4] sm:$0xf] (%p51_p3), %v233_v1  ;;  %v237_v3 = vld [vmem:[%s1996_s29 + $0x3c] sm:$0xf] (%p51_p3) }
  0x13   : > { %v239_v4 = vld [vmem:[%s1996_s29 + $0x50] sm:$0xf] (%p51_p3)  ;;  %236 = vst [vmem:[%s2000_s30 + $0x8] sm:$0xf] (%p51_p3), %v235_v2  ;;  %238 = vst [vmem:[%s2000_s30 + $0xc] sm:$0xf] (%p51_p3), %v237_v3 }
  0x14   : > { %240 = vst [vmem:[%s2000_s30 + $0x10] sm:$0xf] (%p51_p3), %v239_v4  ;;  %v241_v5 = vld [vmem:[%s1996_s29 + $0x64] sm:$0xf] (%p51_p3)  ;;  %v243_v6 = vld [vmem:[%s1996_s29 + $0x78] sm:$0xf] (%p51_p3) }
  0x15   : > { %v245_v7 = vld [vmem:[%s1996_s29 + $0x8c] sm:$0xf]  ;;  %242 = vst [vmem:[%s2000_s30 + $0x14] sm:$0xf] %v241_v5  ;;  %244 = vst [vmem:[%s2000_s30 + $0x18] sm:$0xf] %v243_v6 }
  0x16   : > { %246 = vst [vmem:[%s2000_s30 + $0x1c] sm:$0xf] %v245_v7  ;;  %v247_v8 = vld [vmem:[%s1996_s29 + $0xa0] sm:$0xf]  ;;  %v249_v9 = vld [vmem:[%s1996_s29 + $0xb4] sm:$0xf] }
  0x17   : > { %v251_v10 = vld [vmem:[%s1996_s29 + $0xc8] sm:$0xf]  ;;  %248 = vst [vmem:[%s2000_s30 + $0x20] sm:$0xf] %v247_v8  ;;  %250 = vst [vmem:[%s2000_s30 + $0x24] sm:$0xf] %v249_v9 }
  0x18   : > { %252 = vst [vmem:[%s2000_s30 + $0x28] sm:$0xf] %v251_v10  ;;  %v253_v11 = vld [vmem:[%s1996_s29 + $0xdc] sm:$0xf]  ;;  %v255_v12 = vld [vmem:[%s1996_s29 + $0xf0] sm:$0xf] }
  0x19   : > { %v257_v13 = vld [vmem:[%s1996_s29 + $0x104] sm:$0xf]  ;;  %254 = vst [vmem:[%s2000_s30 + $0x2c] sm:$0xf] %v253_v11  ;;  %256 = vst [vmem:[%s2000_s30 + $0x30] sm:$0xf] %v255_v12 }
  0x1a   : > { %258 = vst [vmem:[%s2000_s30 + $0x34] sm:$0xf] %v257_v13  ;;  %v259_v14 = vld [vmem:[%s1996_s29 + $0x118] sm:$0xf]  ;;  %v261_v15 = vld [vmem:[%s1996_s29 + $0x12c] sm:$0xf] }
  0x1b   : > { %v263_v16 = vld [vmem:[%s1996_s29 + $0x140] sm:$0xf]  ;;  %260 = vst [vmem:[%s2000_s30 + $0x38] sm:$0xf] %v259_v14  ;;  %262 = vst [vmem:[%s2000_s30 + $0x3c] sm:$0xf] %v261_v15 }
  0x1c   : > { %264 = vst [vmem:[%s2000_s30 + $0x40] sm:$0xf] %v263_v16  ;;  %v265_v17 = vld [vmem:[%s1996_s29 + $0x154] sm:$0xf]  ;;  %v267_v18 = vld [vmem:[%s1996_s29 + $0x168] sm:$0xf] }
  0x1d   : > { %v269_v19 = vld [vmem:[%s1996_s29 + $0x17c] sm:$0xf]  ;;  %266 = vst [vmem:[%s2000_s30 + $0x44] sm:$0xf] %v265_v17  ;;  %268 = vst [vmem:[%s2000_s30 + $0x48] sm:$0xf] %v267_v18 }
  0x1e   : > { %270 = vst [vmem:[%s2000_s30 + $0x4c] sm:$0xf] %v269_v19  ;;  %v271_v20 = vld [vmem:[%s1996_s29 + $0x190] sm:$0xf]  ;;  %v273_v21 = vld [vmem:[%s1996_s29 + $0x1a4] sm:$0xf] }
  0x1f   : > { %v275_v22 = vld [vmem:[%s1996_s29 + $0x1b8] sm:$0xf]  ;;  %272 = vst [vmem:[%s2000_s30 + $0x50] sm:$0xf] %v271_v20  ;;  %274 = vst [vmem:[%s2000_s30 + $0x54] sm:$0xf] %v273_v21 }
  0x20   : > { %276 = vst [vmem:[%s2000_s30 + $0x58] sm:$0xf] %v275_v22  ;;  %v277_v23 = vld [vmem:[%s1996_s29 + $0x1cc] sm:$0xf]  ;;  %v279_v24 = vld [vmem:[%s1996_s29 + $0x1e0] sm:$0xf] }
  0x21   : > { %v281_v25 = vld [vmem:[%s1996_s29 + $0x1f4] sm:$0xf]  ;;  %278 = vst [vmem:[%s2000_s30 + $0x5c] sm:$0xf] %v277_v23  ;;  %280 = vst [vmem:[%s2000_s30 + $0x60] sm:$0xf] %v279_v24 }
  0x22   : > { %282 = vst [vmem:[%s2000_s30 + $0x64] sm:$0xf] %v281_v25  ;;  %v283_v26 = vld [vmem:[%s1996_s29 + $0x208] sm:$0xf]  ;;  %v285_v27 = vld [vmem:[%s1996_s29 + $0x21c] sm:$0xf] }
  0x23   : > { %v287_v28 = vld [vmem:[%s1996_s29 + $0x230] sm:$0xf]  ;;  %284 = vst [vmem:[%s2000_s30 + $0x68] sm:$0xf] %v283_v26  ;;  %286 = vst [vmem:[%s2000_s30 + $0x6c] sm:$0xf] %v285_v27 }
  0x24   : > { %288 = vst [vmem:[%s2000_s30 + $0x70] sm:$0xf] %v287_v28  ;;  %v289_v29 = vld [vmem:[%s1996_s29 + $0x244] sm:$0xf]  ;;  %v291_v30 = vld [vmem:[%s1996_s29 + $0x258] sm:$0xf] }
  0x25   : > { %v293_v31 = vld [vmem:[%s1996_s29 + $0x26c] sm:$0xf]  ;;  %290 = vst [vmem:[%s2000_s30 + $0x74] sm:$0xf] %v289_v29  ;;  %292 = vst [vmem:[%s2000_s30 + $0x78] sm:$0xf] %v291_v30 }
  0x26   : > { %294 = vst [vmem:[%s2000_s30 + $0x7c] sm:$0xf] %v293_v31 }
  0x27 PF: > { %p1461_p6 = scmp.ge.s32.totalorder %s1925_s19, 1  ;;  %p392_p7 = scmp.lt.s32.totalorder %s1925_s19, 6 }
  0x29   : > { %p393_p8 = pnand %p1461_p6, %p392_p7 }
  0x2a   : > { %s399_s5 = sand.u32 (!%p393_p8), 1, %s1909_s15   ;;  %s1463_s6 = sshll.u32 (!%p393_p8), %s1917_s17, 4 }
  0x2b   : > { %396 = sbr.rel (%p393_p8) target bundleno = 375 (0x177), region = 73  ;;  %s1462_s7 = sshll.u32 (!%p393_p8), %s399_s5, 7 }
  0x2c   : > { %p448_p9 = scmp.lt.s32.totalorder (!%p393_p8), %s1463_s6, 79  ;;  %s2073_s12 = scalar_lea.vmem (!%p393_p8), [#allocation3], %s1462_s7 }
  0x2d   : > { %p1465_p10 = scmp.ne.s32.totalorder (!%p393_p8), %s1917_s17, 0 }
  0x32   : > { %s2261_s6 = smov (!%p448_p9, %s1463_s6), 79  ;;  %481 = sbr.rel (%p1465_p10) target bundleno = 68 (0x44), region = 81 }
  0x33   : > { %s1464_s8 = sshll.u32 %s2261_s6, 2  ;;  %v1927_v32 = vmov (!%p1465_p10), 0.0  }
  0x34   : > { %s2071_s11 = scalar_lea.vmem %s2250_s1, %s1464_s8  ;;  %482 = vst [vmem:[#allocation2] sm:$0xff] (!%p1465_p10), %v1927_v32  ;;  %483 = vst [vmem:[#allocation2 + $0x8] sm:$0xff] (!%p1465_p10), %v1927_v32 }
  0x35   : > { %484 = vst [vmem:[#allocation2 + $0x10] sm:$0xff] (!%p1465_p10), %v1927_v32  ;;  %485 = vst [vmem:[#allocation2 + $0x18] sm:$0xff] (!%p1465_p10), %v1927_v32 }
  0x36   : > { %486 = vst [vmem:[#allocation2 + $0x20] sm:$0xff] (!%p1465_p10), %v1927_v32  ;;  %487 = vst [vmem:[#allocation2 + $0x28] sm:$0xff] (!%p1465_p10), %v1927_v32 }
  0x37   : > { %488 = vst [vmem:[#allocation2 + $0x30] sm:$0xff] (!%p1465_p10), %v1927_v32  ;;  %489 = vst [vmem:[#allocation2 + $0x38] sm:$0xff] (!%p1465_p10), %v1927_v32 }
  0x38   : > { %490 = vst [vmem:[#allocation2 + $0x40] sm:$0xff] (!%p1465_p10), %v1927_v32  ;;  %491 = vst [vmem:[#allocation2 + $0x48] sm:$0xff] (!%p1465_p10), %v1927_v32 }
  0x39   : > { %492 = vst [vmem:[#allocation2 + $0x50] sm:$0xff] %v1927_v32  ;;  %493 = vst [vmem:[#allocation2 + $0x58] sm:$0xff] %v1927_v32 }
  0x3a   : > { %494 = vst [vmem:[#allocation2 + $0x60] sm:$0xff] %v1927_v32  ;;  %495 = vst [vmem:[#allocation2 + $0x68] sm:$0xff] %v1927_v32 }
  0x3b   : > { %496 = vst [vmem:[#allocation2 + $0x70] sm:$0xff] %v1927_v32  ;;  %497 = vst [vmem:[#allocation2 + $0x78] sm:$0xff] %v1927_v32 }
  0x3c   : > { %498 = vst [vmem:[#allocation2 + $0x80] sm:$0xff] %v1927_v32  ;;  %499 = vst [vmem:[#allocation2 + $0x88] sm:$0xff] %v1927_v32 }
  0x3d   : > { %500 = vst [vmem:[#allocation2 + $0x90] sm:$0xff] %v1927_v32  ;;  %501 = vst [vmem:[#allocation2 + $0x98] sm:$0xff] %v1927_v32 }
  0x3e   : > { %502 = vst [vmem:[#allocation2 + $0xa0] sm:$0xff] %v1927_v32  ;;  %503 = vst [vmem:[#allocation2 + $0xa8] sm:$0xff] %v1927_v32 }
  0x3f   : > { %504 = vst [vmem:[#allocation2 + $0xb0] sm:$0xff] %v1927_v32  ;;  %505 = vst [vmem:[#allocation2 + $0xb8] sm:$0xff] %v1927_v32 }
  0x40   : > { %506 = vst [vmem:[#allocation2 + $0xc0] sm:$0xff] %v1927_v32  ;;  %507 = vst [vmem:[#allocation2 + $0xc8] sm:$0xff] %v1927_v32 }
  0x41   : > { %508 = vst [vmem:[#allocation2 + $0xd0] sm:$0xff] %v1927_v32  ;;  %509 = vst [vmem:[#allocation2 + $0xd8] sm:$0xff] %v1927_v32 }
  0x42   : > { %510 = vst [vmem:[#allocation2 + $0xe0] sm:$0xff] %v1927_v32  ;;  %511 = vst [vmem:[#allocation2 + $0xe8] sm:$0xff] %v1927_v32 }
  0x43   : > { %512 = vst [vmem:[#allocation2 + $0xf0] sm:$0xff] %v1927_v32  ;;  %513 = vst [vmem:[#allocation2 + $0xf8] sm:$0xff] %v1927_v32 }
  0x44 PF: > { %v1863_v33 = vld [vmem:[%s2071_s11] sm:$0xff]   ;;  %v1864_v34 = vld [vmem:[%s2071_s11 + $0x8] sm:$0xff]   ;;  %v1865_v35 = vld [vmem:[%s2071_s11 + $0x10] sm:$0xff]   ;;  %p1490_p11 = scmp.ne.s32.totalorder %s1917_s17, 4 }
  0x45   : > { %1758 = vmatprep.subr.bf16.mxu0 %v1863_v33  ;;  %1806 = vmatprep.subr.bf16.mxu1 %v1863_v33  ;;  %v1866_v36 = vld [vmem:[%s2071_s11 + $0x18] sm:$0xff]   ;;  %v1871_v37 = vld [vmem:[%s2073_s12] sm:$0xff]   ;;  %v1868_v40 = vld [vmem:[%s2071_s11 + $0x28] sm:$0xff]  }
  0x46   : > { %1759 = vmatpush3.bf16.msra.mxu0 %v1863_v33  ;;  %1814 = vmatpush3.bf16.msra.mxu1 %v1863_v33  ;;  %v1872_v38 = vld [vmem:[%s2073_s12 + $0x40] sm:$0xff]   ;;  %v1869_v41 = vld [vmem:[%s2071_s11 + $0x30] sm:$0xff]   ;;  %v1870_v42 = vld [vmem:[%s2071_s11 + $0x38] sm:$0xff]  }
  0x47   : > { %1760 = vmatprep.subr.bf16.mxu0 %v1864_v34  ;;  %1807 = vmatprep.subr.bf16.mxu1 %v1864_v34  ;;  %v1867_v39 = vld [vmem:[%s2071_s11 + $0x20] sm:$0xff]   ;;  %v1873_v43 = vld [vmem:[%s2073_s12 + $0x8] sm:$0xff]   ;;  %v1875_v45 = vld [vmem:[%s2073_s12 + $0x10] sm:$0xff]  }
  0x48   : > { %1774 = vmatprep.mubr.bf16.mxu0 %v1871_v37  ;;  %1790 = vmatprep.mubr.bf16.mxu1 %v1872_v38  ;;  %v1874_v44 = vld [vmem:[%s2073_s12 + $0x48] sm:$0xff]   ;;  %v1876_v46 = vld [vmem:[%s2073_s12 + $0x50] sm:$0xff]   ;;  %v1877_v47 = vld [vmem:[%s2073_s12 + $0x18] sm:$0xff]  }
  0x49   : > { %v1878_v48 = vld [vmem:[%s2073_s12 + $0x58] sm:$0xff]   ;;  %v1879_v49 = vld [vmem:[%s2073_s12 + $0x20] sm:$0xff]   ;;  %v1881_v51 = vld [vmem:[%s2073_s12 + $0x28] sm:$0xff]  }
  0x4a   : > { %1761 = vmatpush3.bf16.msra.mxu0 %v1864_v34  ;;  %1815 = vmatpush3.bf16.msra.mxu1 %v1864_v34  ;;  %v1880_v50 = vld [vmem:[%s2073_s12 + $0x60] sm:$0xff]   ;;  %v1882_v52 = vld [vmem:[%s2073_s12 + $0x68] sm:$0xff]   ;;  %v1883_v53 = vld [vmem:[%s2073_s12 + $0x30] sm:$0xff]  }
  0x4b   : > { %1762 = vmatprep.subr.bf16.mxu0 %v1865_v35  ;;  %1808 = vmatprep.subr.bf16.mxu1 %v1865_v35  ;;  %v1884_v54 = vld [vmem:[%s2073_s12 + $0x70] sm:$0xff]   ;;  %v1885_v55 = vld [vmem:[%s2073_s12 + $0x38] sm:$0xff]   ;;  %v514_v59 = vld [vmem:[#allocation2] sm:$0xff] }
  0x4c   : > { %v1886_v56 = vld [vmem:[%s2073_s12 + $0x78] sm:$0xff]   ;;  %v516_v57 = vld [vmem:[#allocation2 + $0x10] sm:$0xff]  ;;  %v530_v60 = vld [vmem:[#allocation2 + $0x80] sm:$0xff] }
  0x4d   : > { %v532_v58 = vld [vmem:[#allocation2 + $0x90] sm:$0xff]  ;;  %v517_v63 = vld [vmem:[#allocation2 + $0x18] sm:$0xff]  ;;  %v515_v5 = vld [vmem:[#allocation2 + $0x8] sm:$0xff] }
  0x4e   : > { %1763 = vmatpush3.bf16.msra.mxu0 %v1865_v35  ;;  %1816 = vmatpush3.bf16.msra.mxu1 %v1865_v35  ;;  %v533_v0 = vld [vmem:[#allocation2 + $0x98] sm:$0xff]  ;;  %v531_v6 = vld [vmem:[#allocation2 + $0x88] sm:$0xff]  ;;  %v520_v17 = vld [vmem:[#allocation2 + $0x30] sm:$0xff] }
  0x4f   : > { %1764 = vmatprep.subr.bf16.mxu0 %v1866_v36  ;;  %1809 = vmatprep.subr.bf16.mxu1 %v1866_v36  ;;  %v536_v18 = vld [vmem:[#allocation2 + $0xb0] sm:$0xff]  ;;  %v518_v19 = vld [vmem:[#allocation2 + $0x20] sm:$0xff]  ;;  %v521_v23 = vld [vmem:[#allocation2 + $0x38] sm:$0xff] }
  0x50   : > { %v534_v20 = vld [vmem:[#allocation2 + $0xa0] sm:$0xff]  ;;  %v537_v24 = vld [vmem:[#allocation2 + $0xb8] sm:$0xff]  ;;  %v519_v29 = vld [vmem:[#allocation2 + $0x28] sm:$0xff] }
  0x51   : > { %v535_v30 = vld [vmem:[#allocation2 + $0xa8] sm:$0xff] }
  0x52   : > { %1765 = vmatpush3.bf16.msra.mxu0 %v1866_v36  ;;  %1817 = vmatpush3.bf16.msra.mxu1 %v1866_v36 }
  0x53   : > { %1766 = vmatprep.subr.bf16.mxu0 %v1867_v39  ;;  %1810 = vmatprep.subr.bf16.mxu1 %v1867_v39 }
  0x56   : > { %1767 = vmatpush3.bf16.msra.mxu0 %v1867_v39  ;;  %1818 = vmatpush3.bf16.msra.mxu1 %v1867_v39 }
  0x57   : > { %1768 = vmatprep.subr.bf16.mxu0 %v1868_v40  ;;  %1811 = vmatprep.subr.bf16.mxu1 %v1868_v40 }
  0x5a   : > { %1769 = vmatpush3.bf16.msra.mxu0 %v1868_v40  ;;  %1819 = vmatpush3.bf16.msra.mxu1 %v1868_v40 }
  0x5b   : > { %1770 = vmatprep.subr.bf16.mxu0 %v1869_v41  ;;  %1812 = vmatprep.subr.bf16.mxu1 %v1869_v41 }
  0x5e   : > { %1771 = vmatpush3.bf16.msra.mxu0 %v1869_v41  ;;  %1820 = vmatpush3.bf16.msra.mxu1 %v1869_v41  ;;  %v524_v41 = vld [vmem:[#allocation2 + $0x50] sm:$0xff] }
  0x5f   : > { %1772 = vmatprep.subr.bf16.mxu0 %v1870_v42  ;;  %1813 = vmatprep.subr.bf16.mxu1 %v1870_v42 }
  0x62   : > { %1773 = vmatpush3.bf16.msra.mxu0 %v1870_v42  ;;  %1821 = vmatpush3.bf16.msra.mxu1 %v1870_v42  ;;  %v540_v42 = vld [vmem:[#allocation2 + $0xd0] sm:$0xff] }
  0x65   : > { %1775 = vmatmul.mubr.bf16.vlgmr.msra.gmra.mrb[0].mxu0 %v1873_v43  ;;  %1791 = vmatmul.mubr.bf16.vlgmr.msra.gmra.mrb[0].mxu1 %v1874_v44  ;;  %v522_v43 = vld [vmem:[#allocation2 + $0x40] sm:$0xff] }
  0x66   : > { %1778 = vmatprep.mubr.bf16.mxu0 %v1875_v45  ;;  %1794 = vmatprep.mubr.bf16.mxu1 %v1876_v46  ;;  %v538_v44 = vld [vmem:[#allocation2 + $0xc0] sm:$0xff] }
  0x6d   : > { %1779 = vmatmul.mubr.bf16.gmra.mrb[4].mxu0 %v1877_v47  ;;  %1795 = vmatmul.mubr.bf16.gmra.mrb[4].mxu1 %v1878_v48  ;;  %v525_v47 = vld [vmem:[#allocation2 + $0x58] sm:$0xff] }
  0x6e   : > { %1782 = vmatprep.mubr.bf16.mxu0 %v1879_v49  ;;  %1798 = vmatprep.mubr.bf16.mxu1 %v1880_v50  ;;  %v541_v48 = vld [vmem:[#allocation2 + $0xd8] sm:$0xff] }
  0x75   : > { %1783 = vmatmul.mubr.bf16.gmra.mrb[8].mxu0 %v1881_v51  ;;  %1799 = vmatmul.mubr.bf16.gmra.mrb[8].mxu1 %v1882_v52 }
  0x76   : > { %1786 = vmatprep.mubr.bf16.mxu0 %v1883_v53  ;;  %1802 = vmatprep.mubr.bf16.mxu1 %v1884_v54  ;;  %v523_v53 = vld [vmem:[#allocation2 + $0x48] sm:$0xff] }
  0x77   : > { %v539_v54 = vld [vmem:[#allocation2 + $0xc8] sm:$0xff] }
  0x7d   : > { %1787 = vmatmul.mubr.bf16.gmra.mrb[12].mxu0 %v1885_v55  ;;  %1803 = vmatmul.mubr.bf16.gmra.mrb[12].mxu1 %v1886_v56 }
 0x138   : > { %v1776_v61 = vpop.f32.mrb[0].mxu0  ;;  %v1792_v62 = vpop.f32.mrb[0].mxu1 }
 0x139   : > { %v901_v1 = vadd.f32 %v1776_v61, %v516_v57  ;;  %v917_v2 = vadd.f32 %v1792_v62, %v532_v58  ;;  %v772_v3 = vpop.f32.mrb[1].mxu0  ;;  %v836_v4 = vpop.f32.mrb[1].mxu1 }
 0x13a   : > { %v899_v7 = vadd.f32 %v772_v3, %v514_v59  ;;  %v915_v8 = vadd.f32 %v836_v4, %v530_v60  ;;  %v1777_v9 = vpop.f32.mrb[2].mxu0  ;;  %v1793_v10 = vpop.f32.mrb[2].mxu1  ;;  %v526_v3 = vld [vmem:[#allocation2 + $0x60] sm:$0xff] }
 0x13b   : > { %933 = vst [vmem:[#allocation2 + $0x10] sm:$0xff] %v901_v1  ;;  %949 = vst [vmem:[#allocation2 + $0x90] sm:$0xff] %v917_v2  ;;  %v902_v11 = vadd.f32 %v1777_v9, %v517_v63  ;;  %v918_v12 = vadd.f32 %v1793_v10, %v533_v0  ;;  %v775_v13 = vpop.f32.mrb[3].mxu0  ;;  %v839_v14 = vpop.f32.mrb[3].mxu1  ;;  %v528_v1 = vld [vmem:[#allocation2 + $0x70] sm:$0xff]  ;;  %v542_v4 = vld [vmem:[#allocation2 + $0xe0] sm:$0xff] }
 0x13c   : > { %931 = vst [vmem:[#allocation2] sm:$0xff] %v899_v7  ;;  %947 = vst [vmem:[#allocation2 + $0x80] sm:$0xff] %v915_v8  ;;  %v900_v15 = vadd.f32 %v775_v13, %v515_v5  ;;  %v916_v16 = vadd.f32 %v839_v14, %v531_v6  ;;  %v544_v2 = vld [vmem:[#allocation2 + $0xf0] sm:$0xff]  ;;  %v529_v7 = vld [vmem:[#allocation2 + $0x78] sm:$0xff] }
 0x13d   : > { %934 = vst [vmem:[#allocation2 + $0x18] sm:$0xff] %v902_v11  ;;  %950 = vst [vmem:[#allocation2 + $0x98] sm:$0xff] %v918_v12  ;;  %v545_v8 = vld [vmem:[#allocation2 + $0xf8] sm:$0xff]  ;;  %v527_v13 = vld [vmem:[#allocation2 + $0x68] sm:$0xff] }
 0x13e   : > { %932 = vst [vmem:[#allocation2 + $0x8] sm:$0xff] %v900_v15  ;;  %948 = vst [vmem:[#allocation2 + $0x88] sm:$0xff] %v916_v16  ;;  %v543_v14 = vld [vmem:[#allocation2 + $0xe8] sm:$0xff] }
 0x140   : > { %v1780_v21 = vpop.f32.mrb[4].mxu0  ;;  %v1796_v22 = vpop.f32.mrb[4].mxu1 }
 0x141   : > { %v905_v25 = vadd.f32 %v1780_v21, %v520_v17  ;;  %v921_v26 = vadd.f32 %v1796_v22, %v536_v18  ;;  %v788_v27 = vpop.f32.mrb[5].mxu0  ;;  %v852_v28 = vpop.f32.mrb[5].mxu1 }
 0x142   : > { %v903_v31 = vadd.f32 %v788_v27, %v518_v19  ;;  %v919_v32 = vadd.f32 %v852_v28, %v534_v20  ;;  %v1781_v33 = vpop.f32.mrb[6].mxu0  ;;  %v1797_v34 = vpop.f32.mrb[6].mxu1  ;;  %v2104_v27 = vld [vmem:[%s2251_s2] ss:$0 sm:$0xff] (!%p1490_p11) }
 0x143   : > { %937 = vst [vmem:[#allocation2 + $0x30] sm:$0xff] %v905_v25  ;;  %953 = vst [vmem:[#allocation2 + $0xb0] sm:$0xff] %v921_v26  ;;  %v906_v35 = vadd.f32 %v1781_v33, %v521_v23  ;;  %v922_v36 = vadd.f32 %v1797_v34, %v537_v24  ;;  %v791_v37 = vpop.f32.mrb[7].mxu0  ;;  %v855_v38 = vpop.f32.mrb[7].mxu1  ;;  %v967_v25 = vld [vmem:[#allocation2] sm:$0xff] (!%p1490_p11) }
 0x144   : > { %935 = vst [vmem:[#allocation2 + $0x20] sm:$0xff] %v903_v31  ;;  %951 = vst [vmem:[#allocation2 + $0xa0] sm:$0xff] %v919_v32  ;;  %v904_v39 = vadd.f32 %v791_v37, %v519_v29  ;;  %v920_v40 = vadd.f32 %v855_v38, %v535_v30  ;;  %v1006_v28 = vadd.f32 (!%p1490_p11), %v2104_v27, %v967_v25  ;;  %v1561_v30 = vld [vmem:[%s2252_s3] sm:$0xff] (!%p1490_p11)   ;;  %v969_v31 = vld [vmem:[#allocation2 + $0x10] sm:$0xff] (!%p1490_p11) }
 0x145   : > { %938 = vst [vmem:[#allocation2 + $0x38] sm:$0xff] %v906_v35  ;;  %954 = vst [vmem:[#allocation2 + $0xb8] sm:$0xff] %v922_v36  ;;  %v968_v26 = vld [vmem:[#allocation2 + $0x8] sm:$0xff] (!%p1490_p11)  ;;  %v970_v32 = vld [vmem:[#allocation2 + $0x18] sm:$0xff] (!%p1490_p11)  ;;  %v1562_v33 = vunpack.c.l.bf16 (!%p1490_p11), %v1561_v30  ;;  %v1563_v34 = vunpack.c.h.bf16 (!%p1490_p11), %v1561_v30  ;;  %v1008_v35 = vadd.f32 (!%p1490_p11), %v2104_v27, %v969_v31 }
 0x146   : > { %936 = vst [vmem:[#allocation2 + $0x28] sm:$0xff] %v904_v39  ;;  %952 = vst [vmem:[#allocation2 + $0xa8] sm:$0xff] %v920_v40  ;;  %v1007_v29 = vadd.f32 (!%p1490_p11), %v2104_v27, %v968_v26  ;;  %v1009_v36 = vadd.f32 (!%p1490_p11), %v2104_v27, %v970_v32  ;;  %v1704_v37 = vld [vmem:[%s2252_s3 + $0x8] sm:$0xff] (!%p1490_p11)  }
 0x147   : > { %v1566_v40 = vunpack.c.l.bf16 (!%p1490_p11), %v1704_v37 }
 0x148   : > { %v1784_v45 = vpop.f32.mrb[8].mxu0  ;;  %v1800_v46 = vpop.f32.mrb[8].mxu1 }
 0x149   : > { %v909_v49 = vadd.f32 %v1784_v45, %v524_v41  ;;  %v925_v50 = vadd.f32 %v1800_v46, %v540_v42  ;;  %v804_v51 = vpop.f32.mrb[9].mxu0  ;;  %v868_v52 = vpop.f32.mrb[9].mxu1  ;;  %v1567_v41 = vunpack.c.h.bf16 (!%p1490_p11), %v1704_v37 }
 0x14a   : > { %v907_v55 = vadd.f32 %v804_v51, %v522_v43  ;;  %v923_v56 = vadd.f32 %v868_v52, %v538_v44  ;;  %v1785_v57 = vpop.f32.mrb[10].mxu0  ;;  %v1801_v58 = vpop.f32.mrb[10].mxu1  ;;  %v1705_v44 = vld [vmem:[%s2252_s3 + $0x10] sm:$0xff] (!%p1490_p11)   ;;  %v1706_v51 = vld [vmem:[%s2252_s3 + $0x18] sm:$0xff] (!%p1490_p11)   ;;  %v1104_v52 = vadd.f32 (!%p1490_p11), %v1566_v40, %v1008_v35 }
 0x14b   : > { %941 = vst [vmem:[#allocation2 + $0x50] sm:$0xff] %v909_v49  ;;  %957 = vst [vmem:[#allocation2 + $0xd0] sm:$0xff] %v925_v50  ;;  %v910_v59 = vadd.f32 %v1785_v57, %v525_v47  ;;  %v926_v60 = vadd.f32 %v1801_v58, %v541_v48  ;;  %v807_v61 = vpop.f32.mrb[11].mxu0  ;;  %v871_v62 = vpop.f32.mrb[11].mxu1  ;;  %v971_v38 = vld [vmem:[#allocation2 + $0x20] sm:$0xff] (!%p1490_p11)  ;;  %v973_v45 = vld [vmem:[#allocation2 + $0x30] sm:$0xff] (!%p1490_p11)  ;;  %v1102_v47 = vadd.f32 (!%p1490_p11), %v1562_v33, %v1006_v28  ;;  %v1570_v49 = vunpack.c.l.bf16 (!%p1490_p11), %v1705_v44 }
 0x14c   : > { %939 = vst [vmem:[#allocation2 + $0x40] sm:$0xff] %v907_v55  ;;  %955 = vst [vmem:[#allocation2 + $0xc0] sm:$0xff] %v923_v56  ;;  %v908_v63 = vadd.f32 %v807_v61, %v523_v53  ;;  %v924_v0 = vadd.f32 %v871_v62, %v539_v54  ;;  %v1010_v42 = vadd.f32 (!%p1490_p11), %v2104_v27, %v971_v38  ;;  %v974_v46 = vld [vmem:[#allocation2 + $0x38] sm:$0xff] (!%p1490_p11)  ;;  %v1571_v50 = vunpack.c.h.bf16 (!%p1490_p11), %v1705_v44 }
 0x14d   : > { %942 = vst [vmem:[#allocation2 + $0x58] sm:$0xff] %v910_v59  ;;  %958 = vst [vmem:[#allocation2 + $0xd8] sm:$0xff] %v926_v60  ;;  %v972_v39 = vld [vmem:[#allocation2 + $0x28] sm:$0xff] (!%p1490_p11)  ;;  %v1103_v48 = vadd.f32 (!%p1490_p11), %v1563_v34, %v1007_v29  ;;  %v1105_v53 = vadd.f32 (!%p1490_p11), %v1567_v41, %v1009_v36  ;;  %v1012_v54 = vadd.f32 (!%p1490_p11), %v2104_v27, %v973_v45  ;;  %v1134_v57 = vmax.f32 (!%p1490_p11), %v1102_v47, 0.0  ;;  %v1710_v36 = vld [vmem:[%s2252_s3 + $0x38] sm:$0xff] (!%p1490_p11)  }
 0x14e   : > { %940 = vst [vmem:[#allocation2 + $0x48] sm:$0xff] %v908_v63  ;;  %956 = vst [vmem:[#allocation2 + $0xc8] sm:$0xff] %v924_v0  ;;  %v1011_v43 = vadd.f32 (!%p1490_p11), %v2104_v27, %v972_v39  ;;  %v1013_v55 = vadd.f32 (!%p1490_p11), %v2104_v27, %v974_v46  ;;  %v1106_v59 = vadd.f32 (!%p1490_p11), %v1570_v49, %v1010_v42  ;;  %v1136_v62 = vmax.f32 (!%p1490_p11), %v1104_v52, 0.0  ;;  %v983_v41 = vld [vmem:[#allocation2 + $0x80] sm:$0xff] (!%p1490_p11)  ;;  %v984_v42 = vld [vmem:[#allocation2 + $0x88] sm:$0xff] (!%p1490_p11) }
 0x14f   : > { %v1135_v58 = vmax.f32 (!%p1490_p11), %v1103_v48, 0.0  ;;  %v1137_v63 = vmax.f32 (!%p1490_p11), %v1105_v53, 0.0  ;;  %v1574_v0 = vunpack.c.l.bf16 (!%p1490_p11), %v1706_v51  ;;  %v1711_v47 = vld [vmem:[%s2252_s3 + $0x40] sm:$0xff] (!%p1490_p11)   ;;  %v985_v52 = vld [vmem:[#allocation2 + $0x90] sm:$0xff] (!%p1490_p11)  ;;  %v986_v53 = vld [vmem:[#allocation2 + $0x98] sm:$0xff] (!%p1490_p11) }
 0x150   : > { %v1788_v5 = vpop.f32.mrb[12].mxu0  ;;  %v1804_v6 = vpop.f32.mrb[12].mxu1  ;;  %966 = sbr.rel (%p1490_p11) target bundleno = 375 (0x177), region = 85  ;;  %v1107_v60 = vadd.f32 (!%p1490_p11), %v1571_v50, %v1011_v43 }
 0x151   : > { %v913_v9 = vadd.f32 %v1788_v5, %v528_v1  ;;  %v929_v10 = vadd.f32 %v1804_v6, %v544_v2  ;;  %v820_v11 = vpop.f32.mrb[13].mxu0  ;;  %v884_v12 = vpop.f32.mrb[13].mxu1  ;;  %v1575_v1 = vunpack.c.h.bf16 (!%p1490_p11), %v1706_v51  ;;  %v1707_v2 = vld [vmem:[%s2252_s3 + $0x20] sm:$0xff] (!%p1490_p11)   ;;  %v1138_v5 = vmax.f32 (!%p1490_p11), %v1106_v59, 0.0 }
 0x152   : > { %v911_v15 = vadd.f32 %v820_v11, %v526_v3  ;;  %v927_v16 = vadd.f32 %v884_v12, %v542_v4  ;;  %v1789_v17 = vpop.f32.mrb[14].mxu0  ;;  %v1805_v18 = vpop.f32.mrb[14].mxu1  ;;  %v977_v3 = vld [vmem:[#allocation2 + $0x50] sm:$0xff] (!%p1490_p11)  ;;  %v1627_v4 = vpack.c.bf16 (!%p1490_p11), %v1135_v58, %v1134_v57  ;;  %v1139_v6 = vmax.f32 (!%p1490_p11), %v1107_v60, 0.0  ;;  %v1712_v58 = vld [vmem:[%s2252_s3 + $0x48] sm:$0xff] (!%p1490_p11)  }
 0x153   : > { %945 = vst [vmem:[#allocation2 + $0x70] sm:$0xff] %v913_v9  ;;  %961 = vst [vmem:[#allocation2 + $0xf0] sm:$0xff] %v929_v10  ;;  %v914_v19 = vadd.f32 %v1789_v17, %v529_v7  ;;  %v930_v20 = vadd.f32 %v1805_v18, %v545_v8  ;;  %v823_v21 = vpop.f32.mrb[15].mxu0  ;;  %v887_v22 = vpop.f32.mrb[15].mxu1  ;;  %v975_v56 = vld [vmem:[#allocation2 + $0x40] sm:$0xff] (!%p1490_p11)  ;;  %v1708_v9 = vld [vmem:[%s2252_s3 + $0x28] sm:$0xff] (!%p1490_p11)   ;;  %v1632_v10 = vpack.c.bf16 (!%p1490_p11), %v1137_v63, %v1136_v62  ;;  %v1579_v17 = vunpack.c.h.bf16 (!%p1490_p11), %v1707_v2 }
 0x154   : > { %943 = vst [vmem:[#allocation2 + $0x60] sm:$0xff] %v911_v15  ;;  %959 = vst [vmem:[#allocation2 + $0xe0] sm:$0xff] %v927_v16  ;;  %v912_v23 = vadd.f32 %v823_v21, %v527_v13  ;;  %v928_v24 = vadd.f32 %v887_v22, %v543_v14  ;;  %v1014_v7 = vadd.f32 (!%p1490_p11), %v2104_v27, %v975_v56  ;;  %v978_v8 = vld [vmem:[#allocation2 + $0x58] sm:$0xff] (!%p1490_p11)  ;;  %v1578_v16 = vunpack.c.l.bf16 (!%p1490_p11), %v1707_v2  ;;  %v987_v63 = vld [vmem:[#allocation2 + $0xa0] sm:$0xff] (!%p1490_p11) }
 0x155   : > { %946 = vst [vmem:[#allocation2 + $0x78] sm:$0xff] %v914_v19  ;;  %962 = vst [vmem:[#allocation2 + $0xf8] sm:$0xff] %v930_v20  ;;  %v976_v61 = vld [vmem:[#allocation2 + $0x48] sm:$0xff] (!%p1490_p11)  ;;  %v1108_v11 = vadd.f32 (!%p1490_p11), %v1574_v0, %v1012_v54  ;;  %v1109_v12 = vadd.f32 (!%p1490_p11), %v1575_v1, %v1013_v55  ;;  %v1637_v15 = vpack.c.bf16 (!%p1490_p11), %v1139_v6, %v1138_v5  ;;  %v1709_v20 = vld [vmem:[%s2252_s3 + $0x30] sm:$0xff] (!%p1490_p11)   ;;  %v1583_v28 = vunpack.c.h.bf16 (!%p1490_p11), %v1708_v9 }
 0x156   : > { %944 = vst [vmem:[#allocation2 + $0x68] sm:$0xff] %v912_v23  ;;  %960 = vst [vmem:[#allocation2 + $0xe8] sm:$0xff] %v928_v24  ;;  %v1015_v13 = vadd.f32 (!%p1490_p11), %v2104_v27, %v976_v61  ;;  %v1016_v18 = vadd.f32 (!%p1490_p11), %v2104_v27, %v977_v3  ;;  %v1017_v23 = vadd.f32 (!%p1490_p11), %v2104_v27, %v978_v8  ;;  %v1582_v24 = vunpack.c.l.bf16 (!%p1490_p11), %v1708_v9  ;;  %v1713_v5 = vld [vmem:[%s2252_s3 + $0x50] sm:$0xff] (!%p1490_p11)  }
 0x157   : > { %1628 = vst [vmem:[%s2253_s4] sm:$0xff] %v1627_v4   ;;  %1719 = vst [vmem:[%s2253_s4 + $0x8] sm:$0xff] %v1632_v10   ;;  %v1140_v21 = vmax.f32 %v1108_v11, 0.0  ;;  %v1141_v22 = vmax.f32 %v1109_v12, 0.0  ;;  %v1110_v25 = vadd.f32 %v1578_v16, %v1014_v7  ;;  %v1586_v35 = vunpack.c.l.bf16 %v1709_v20  ;;  %v988_v4 = vld [vmem:[#allocation2 + $0xa8] sm:$0xff] }
 0x158   : > { %1720 = vst [vmem:[%s2253_s4 + $0x10] sm:$0xff] %v1637_v15   ;;  %v1111_v26 = vadd.f32 %v1579_v17, %v1015_v13  ;;  %v1112_v33 = vadd.f32 %v1582_v24, %v1016_v18  ;;  %v1113_v39 = vadd.f32 %v1583_v28, %v1017_v23  ;;  %v1587_v40 = vunpack.c.h.bf16 %v1709_v20  ;;  %v990_v15 = vld [vmem:[#allocation2 + $0xb8] sm:$0xff] }
 0x159   : > { %v1642_v32 = vpack.c.bf16 %v1141_v22, %v1140_v21  ;;  %v1142_v37 = vmax.f32 %v1110_v25, 0.0  ;;  %v1590_v51 = vunpack.c.l.bf16 %v1710_v36  ;;  %v1591_v55 = vunpack.c.h.bf16 %v1710_v36  ;;  %v1714_v20 = vld [vmem:[%s2252_s3 + $0x58] sm:$0xff]   ;;  %v991_v25 = vld [vmem:[#allocation2 + $0xc0] sm:$0xff] }
 0x15a   : > { %v981_v30 = vld [vmem:[#allocation2 + $0x70] sm:$0xff]  ;;  %v1143_v38 = vmax.f32 %v1111_v26, 0.0  ;;  %v1144_v43 = vmax.f32 %v1112_v33, 0.0  ;;  %v1145_v49 = vmax.f32 %v1113_v39, 0.0  ;;  %v1022_v56 = vadd.f32 %v2104_v27, %v983_v41  ;;  %v992_v26 = vld [vmem:[#allocation2 + $0xc8] sm:$0xff] }
 0x15b   : > { %v979_v14 = vld [vmem:[#allocation2 + $0x60] sm:$0xff]  ;;  %1721 = vst [vmem:[%s2253_s4 + $0x18] sm:$0xff] %v1642_v32   ;;  %v1020_v45 = vadd.f32 %v2104_v27, %v981_v30  ;;  %v1023_v57 = vadd.f32 %v2104_v27, %v984_v42  ;;  %v1594_v62 = vunpack.c.l.bf16 %v1711_v47  ;;  %v1595_v1 = vunpack.c.h.bf16 %v1711_v47 }
 0x15c   : > { %v1018_v29 = vadd.f32 %v2104_v27, %v979_v14  ;;  %v982_v31 = vld [vmem:[#allocation2 + $0x78] sm:$0xff]  ;;  %v1647_v48 = vpack.c.bf16 %v1143_v38, %v1142_v37  ;;  %v1652_v59 = vpack.c.bf16 %v1145_v49, %v1144_v43  ;;  %v1024_v2 = vadd.f32 %v2104_v27, %v985_v52  ;;  %v989_v14 = vld [vmem:[#allocation2 + $0xb0] sm:$0xff]  ;;  %v1715_v32 = vld [vmem:[%s2252_s3 + $0x60] sm:$0xff]  }
 0x15d   : > { %v980_v19 = vld [vmem:[#allocation2 + $0x68] sm:$0xff]  ;;  %v1021_v46 = vadd.f32 %v2104_v27, %v982_v31  ;;  %v1116_v61 = vadd.f32 %v1590_v51, %v1020_v45  ;;  %v1025_v3 = vadd.f32 %v2104_v27, %v986_v53  ;;  %v1118_v8 = vadd.f32 %v1594_v62, %v1022_v56  ;;  %v993_v37 = vld [vmem:[#allocation2 + $0xd0] sm:$0xff]  ;;  %v994_v38 = vld [vmem:[#allocation2 + $0xd8] sm:$0xff] }
 0x15e   : > { %v1019_v34 = vadd.f32 %v2104_v27, %v980_v19  ;;  %v1114_v44 = vadd.f32 %v1586_v35, %v1018_v29  ;;  %1722 = vst [vmem:[%s2253_s4 + $0x20] sm:$0xff] %v1647_v48   ;;  %1723 = vst [vmem:[%s2253_s4 + $0x28] sm:$0xff] %v1652_v59   ;;  %v1598_v9 = vunpack.c.l.bf16 %v1712_v58  ;;  %v1119_v11 = vadd.f32 %v1595_v1, %v1023_v57  ;;  %v1716_v43 = vld [vmem:[%s2252_s3 + $0x68] sm:$0xff]   ;;  %v995_v48 = vld [vmem:[#allocation2 + $0xe0] sm:$0xff] }
 0x15f   : > { %v1117_v0 = vadd.f32 %v1591_v55, %v1021_v46  ;;  %v1148_v7 = vmax.f32 %v1116_v61, 0.0  ;;  %v1599_v12 = vunpack.c.h.bf16 %v1712_v58  ;;  %v1026_v13 = vadd.f32 %v2104_v27, %v987_v63  ;;  %v996_v53 = vld [vmem:[#allocation2 + $0xe8] sm:$0xff]  ;;  %v997_v63 = vld [vmem:[#allocation2 + $0xf0] sm:$0xff] }
 0x160   : > { %v1115_v50 = vadd.f32 %v1587_v40, %v1019_v34  ;;  %v1146_v54 = vmax.f32 %v1114_v44, 0.0  ;;  %v1150_v16 = vmax.f32 %v1118_v8, 0.0  ;;  %v1120_v17 = vadd.f32 %v1598_v9, %v1024_v2 }
 0x161   : > { %v1149_v10 = vmax.f32 %v1117_v0, 0.0  ;;  %v1027_v18 = vadd.f32 %v2104_v27, %v988_v4  ;;  %v1602_v19 = vunpack.c.l.bf16 %v1713_v5  ;;  %v1151_v22 = vmax.f32 %v1119_v11, 0.0  ;;  %v998_v0 = vld [vmem:[#allocation2 + $0xf8] sm:$0xff] }
 0x162   : > { %v1147_v60 = vmax.f32 %v1115_v50, 0.0  ;;  %v1121_v23 = vadd.f32 %v1599_v12, %v1025_v3  ;;  %v1603_v24 = vunpack.c.h.bf16 %v1713_v5  ;;  %v1152_v28 = vmax.f32 %v1120_v17, 0.0  ;;  %v1718_v5 = vld [vmem:[%s2252_s3 + $0x78] sm:$0xff]  }
 0x163   : > { %v1662_v21 = vpack.c.bf16 %v1149_v10, %v1148_v7  ;;  %v1122_v29 = vadd.f32 %v1602_v19, %v1026_v13  ;;  %v1028_v30 = vadd.f32 %v2104_v27, %v989_v14  ;;  %v1029_v31 = vadd.f32 %v2104_v27, %v990_v15 }
 0x164   : > { %v1657_v6 = vpack.c.bf16 %v1147_v60, %v1146_v54  ;;  %v1667_v33 = vpack.c.bf16 %v1151_v22, %v1150_v16  ;;  %v1153_v34 = vmax.f32 %v1121_v23, 0.0  ;;  %v1123_v35 = vadd.f32 %v1603_v24, %v1027_v18  ;;  %v1717_v54 = vld [vmem:[%s2252_s3 + $0x70] sm:$0xff]  }
 0x165   : > { %1725 = vst [vmem:[%s2253_s4 + $0x38] sm:$0xff] %v1662_v21   ;;  %v1606_v36 = vunpack.c.l.bf16 %v1714_v20  ;;  %v1154_v39 = vmax.f32 %v1122_v29, 0.0  ;;  %v1607_v40 = vunpack.c.h.bf16 %v1714_v20  ;;  %v1030_v41 = vadd.f32 %v2104_v27, %v991_v25 }
 0x166   : > { %1724 = vst [vmem:[%s2253_s4 + $0x30] sm:$0xff] %v1657_v6   ;;  %v1031_v42 = vadd.f32 %v2104_v27, %v992_v26  ;;  %1726 = vst [vmem:[%s2253_s4 + $0x40] sm:$0xff] %v1667_v33   ;;  %v1672_v44 = vpack.c.bf16 %v1153_v34, %v1152_v28  ;;  %v1155_v45 = vmax.f32 %v1123_v35, 0.0  ;;  %v1610_v47 = vunpack.c.l.bf16 %v1715_v32 }
 0x167   : > { %v1124_v46 = vadd.f32 %v1606_v36, %v1028_v30  ;;  %v1125_v49 = vadd.f32 %v1607_v40, %v1029_v31  ;;  %v1611_v50 = vunpack.c.h.bf16 %v1715_v32  ;;  %v1032_v51 = vadd.f32 %v2104_v27, %v993_v37 }
 0x168   : > { %v1033_v52 = vadd.f32 %v2104_v27, %v994_v38  ;;  %1727 = vst [vmem:[%s2253_s4 + $0x48] sm:$0xff] %v1672_v44   ;;  %v1677_v55 = vpack.c.bf16 %v1155_v45, %v1154_v39  ;;  %v1126_v57 = vadd.f32 %v1610_v47, %v1030_v41  ;;  %v1614_v58 = vunpack.c.l.bf16 %v1716_v43 }
 0x169   : > { %v1156_v56 = vmax.f32 %v1124_v46, 0.0  ;;  %v1157_v59 = vmax.f32 %v1125_v49, 0.0  ;;  %v1127_v60 = vadd.f32 %v1611_v50, %v1031_v42  ;;  %v1615_v61 = vunpack.c.h.bf16 %v1716_v43 }
 0x16a   : > { %v1034_v62 = vadd.f32 %v2104_v27, %v995_v48  ;;  %1728 = vst [vmem:[%s2253_s4 + $0x50] sm:$0xff] %v1677_v55   ;;  %v1158_v1 = vmax.f32 %v1126_v57, 0.0  ;;  %v1128_v2 = vadd.f32 %v1614_v58, %v1032_v51  ;;  %v1035_v3 = vadd.f32 %v2104_v27, %v996_v53 }
 0x16b   : > { %v1618_v4 = vunpack.c.l.bf16 %v1717_v54  ;;  %v1682_v6 = vpack.c.bf16 %v1157_v59, %v1156_v56  ;;  %v1159_v7 = vmax.f32 %v1127_v60, 0.0  ;;  %v1129_v8 = vadd.f32 %v1615_v61, %v1033_v52 }
 0x16c   : > { %v1619_v9 = vunpack.c.h.bf16 %v1717_v54  ;;  %v1160_v10 = vmax.f32 %v1128_v2, 0.0  ;;  %v1036_v12 = vadd.f32 %v2104_v27, %v997_v63  ;;  %v1037_v13 = vadd.f32 %v2104_v27, %v998_v0 }
 0x16d   : > { %v1130_v11 = vadd.f32 %v1618_v4, %v1034_v62  ;;  %1729 = vst [vmem:[%s2253_s4 + $0x58] sm:$0xff] %v1682_v6   ;;  %v1687_v14 = vpack.c.bf16 %v1159_v7, %v1158_v1  ;;  %v1161_v15 = vmax.f32 %v1129_v8, 0.0  ;;  %v1622_v17 = vunpack.c.l.bf16 %v1718_v5 }
 0x16e   : > { %v1131_v16 = vadd.f32 %v1619_v9, %v1035_v3  ;;  %v1623_v19 = vunpack.c.h.bf16 %v1718_v5 }
 0x16f   : > { %v1162_v18 = vmax.f32 %v1130_v11, 0.0  ;;  %1730 = vst [vmem:[%s2253_s4 + $0x60] sm:$0xff] %v1687_v14   ;;  %v1692_v20 = vpack.c.bf16 %v1161_v15, %v1160_v10  ;;  %v1132_v22 = vadd.f32 %v1622_v17, %v1036_v12 }
 0x170   : > { %v1163_v21 = vmax.f32 %v1131_v16, 0.0  ;;  %v1133_v23 = vadd.f32 %v1623_v19, %v1037_v13 }
 0x171   : > { %1731 = vst [vmem:[%s2253_s4 + $0x68] sm:$0xff] %v1692_v20   ;;  %v1164_v24 = vmax.f32 %v1132_v22, 0.0 }
 0x172   : > { %v1697_v27 = vpack.c.bf16 %v1163_v21, %v1162_v18  ;;  %v1165_v25 = vmax.f32 %v1133_v23, 0.0 }
 0x174   : > { %1732 = vst [vmem:[%s2253_s4 + $0x70] sm:$0xff] %v1697_v27   ;;  %v1702_v26 = vpack.c.bf16 %v1165_v25, %v1164_v24 }
 0x176   : > { %1733 = vst [vmem:[%s2253_s4 + $0x78] sm:$0xff] %v1702_v26  }
 0x177 PF: > { %s14_s19 = sadd.s32 1, %s1925_s19   ;;  %s2254_s15 = smov %s1913_s16 }
 0x178   : > { %p11_p12 = scmp.ge.s32.totalorder %s14_s19, 7   ;;  %s2255_s16 = smov %s1988_s23 }
 0x179   : > { %s2256_s17 = smov %s1921_s18  ;;  %s2257_s18 = smov %s2259_s20 }
 0x17a   :  { %13 = sbr.rel (!%p11_p12) target bundleno = 3 (0x3), region = 129 }

// kernel: gaze3inputs_forward.41
= control target key start
LH: loop header
LB: loop body
LE: loop exit
PB: predicated region body
PF: predicated region fallthrough
CT: control target
= control target key end

     0   :  { %s938_s12 = smov 0   ;;  %s940_s13 = smov 0   ;;  %s1036_s0 = inlined_call_operand.vmem [shape: bf16[64,640], index: 0, kind: input, shape index: {}]   ;;  %s1037_s1 = inlined_call_operand.vmem [shape: bf16[640,128], index: 1, kind: input, shape index: {}]   ;;  %s1038_s2 = inlined_call_operand.vmem [shape: f32[1,128], index: 2, kind: input, shape index: {}]   ;;  %s1039_s3 = inlined_call_operand.vmem [shape: bf16[64,128], index: 3, kind: output, shape index: {}]  }
   0x1   :  { %s942_s14 = smov 0   ;;  %s944_s15 = smov 0  }
   0x2   :  { %s946_s16 = smov 0  }
   0x3 LB: > { %s25_s17 = sadd.s32 1, %s911_s15  ;;  %p48_p1 = scmp.ne.s32.totalorder %s903_s13, %s899_s12  ;;  %s915_s16 = sphi %s946_s16, %s13_s16   ;;  %s911_s15 = sphi %s944_s15, %s1043_s15   ;;  %s907_s14 = sphi %s942_s14, %s1042_s14   ;;  %s903_s13 = sphi %s940_s13, %s1041_s13   ;;  %s899_s12 = sphi %s938_s12, %s1040_s12  }
   0x4   : > { %p26_p0 = scmp.ge.s32.totalorder %s25_s17, 5  ;;  %p49_p2 = scmp.eq.s32.totalorder %s915_s16, 0 }
   0x5   : > { %s41_s19 = sadd.s32 1, %s903_s13  ;;  %p707_p5 = scmp.ge.s32.totalorder %s915_s16, 5 }
   0x6   : > { %s1045_s17 = smov (%p26_p0, %s25_s17), 0  ;;  %p50_p3 = por %p49_p2, %p48_p1 }
   0x7   : > { %s37_s18 = ssub.s32 %s911_s15, %s1045_s17  ;;  %162 = sbr.rel (%p707_p5) target bundleno = 23 (0x17), region = 20 }
   0x8   : > { %p39_p4 = scmp.eq.s32.totalorder %s37_s18, 0 }
   0xa   : > { %s973_s20 = scalar_select %p39_p4, %s903_s13, %s41_s19  }
   0xe   : > { %165 = sbr.rel (!%p50_p3) target bundleno = 23 (0x17), region = 24  ;;  %s167_s21 = sand.u32 (%p50_p3), 1, %s903_s13  }
   0xf   : > { %s709_s22 = sshll.u32 (%p50_p3), %s911_s15, 2  ;;  %s708_s23 = sshll.u32 (%p50_p3), %s167_s21, 5 }
  0x10   : > { %s174_s26 = scalar_lea.vmem (%p50_p3), %s1036_s0, %s709_s22  ;;  %s169_s27 = scalar_lea.vmem (%p50_p3), [#allocation3], %s708_s23 }
  0x11   : > { %v190_v0 = vld [vmem:[%s174_s26] sm:$0xf] (%p50_p3)  ;;  %v192_v1 = vld [vmem:[%s174_s26 + $0x14] sm:$0xf] (%p50_p3)  ;;  %v194_v2 = vld [vmem:[%s174_s26 + $0x28] sm:$0xf] (%p50_p3) }
  0x12   : > { %191 = vst [vmem:[%s169_s27] sm:$0xf] (%p50_p3), %v190_v0  ;;  %193 = vst [vmem:[%s169_s27 + $0x4] sm:$0xf] (%p50_p3), %v192_v1  ;;  %v196_v3 = vld [vmem:[%s174_s26 + $0x3c] sm:$0xf] (%p50_p3) }
  0x13   : > { %v198_v4 = vld [vmem:[%s174_s26 + $0x50] sm:$0xf] (%p50_p3)  ;;  %195 = vst [vmem:[%s169_s27 + $0x8] sm:$0xf] (%p50_p3), %v194_v2  ;;  %197 = vst [vmem:[%s169_s27 + $0xc] sm:$0xf] (%p50_p3), %v196_v3 }
  0x14   : > { %199 = vst [vmem:[%s169_s27 + $0x10] sm:$0xf] (%p50_p3), %v198_v4  ;;  %v200_v5 = vld [vmem:[%s174_s26 + $0x64] sm:$0xf] (%p50_p3)  ;;  %v202_v6 = vld [vmem:[%s174_s26 + $0x78] sm:$0xf] (%p50_p3) }
  0x15   : > { %v204_v7 = vld [vmem:[%s174_s26 + $0x8c] sm:$0xf]  ;;  %201 = vst [vmem:[%s169_s27 + $0x14] sm:$0xf] %v200_v5  ;;  %203 = vst [vmem:[%s169_s27 + $0x18] sm:$0xf] %v202_v6 }
  0x16   : > { %205 = vst [vmem:[%s169_s27 + $0x1c] sm:$0xf] %v204_v7 }
  0x17 PF: > { %p710_p6 = scmp.ge.s32.totalorder %s915_s16, 1  ;;  %p255_p7 = scmp.lt.s32.totalorder %s915_s16, 6 }
  0x19   : > { %p256_p8 = pnand %p710_p6, %p255_p7 }
  0x1a   : > { %s262_s28 = sand.u32 (!%p256_p8), 1, %s899_s12   ;;  %s712_s29 = sshll.u32 (!%p256_p8), %s907_s14, 4 }
  0x1b   : > { %259 = sbr.rel (%p256_p8) target bundleno = 307 (0x133), region = 69  ;;  %s711_s30 = sshll.u32 (!%p256_p8), %s262_s28, 5 }
  0x1c   : > { %p301_p9 = scmp.lt.s32.totalorder (!%p256_p8), %s712_s29, 79  ;;  %s990_s8 = scalar_lea.vmem (!%p256_p8), [#allocation3], %s711_s30 }
  0x1d   : > { %p714_p10 = scmp.ne.s32.totalorder (!%p256_p8), %s907_s14, 0 }
  0x22   : > { %s1047_s29 = smov (!%p301_p9, %s712_s29), 79  ;;  %325 = sbr.rel (%p714_p10) target bundleno = 41 (0x29), region = 77 }
  0x23   : > { %s713_s4 = sshll.u32 %s1047_s29, 2  ;;  %v917_v8 = vmov (!%p714_p10), 0.0  }
  0x24   : > { %s988_s7 = scalar_lea.vmem %s1037_s1, %s713_s4  ;;  %326 = vst [vmem:[#allocation2] sm:$0xff] (!%p714_p10), %v917_v8  ;;  %327 = vst [vmem:[#allocation2 + $0x8] sm:$0xff] (!%p714_p10), %v917_v8 }
  0x25   : > { %328 = vst [vmem:[#allocation2 + $0x10] sm:$0xff] (!%p714_p10), %v917_v8  ;;  %329 = vst [vmem:[#allocation2 + $0x18] sm:$0xff] (!%p714_p10), %v917_v8 }
  0x26   : > { %330 = vst [vmem:[#allocation2 + $0x20] sm:$0xff] (!%p714_p10), %v917_v8  ;;  %331 = vst [vmem:[#allocation2 + $0x28] sm:$0xff] (!%p714_p10), %v917_v8 }
  0x27   : > { %332 = vst [vmem:[#allocation2 + $0x30] sm:$0xff] (!%p714_p10), %v917_v8  ;;  %333 = vst [vmem:[#allocation2 + $0x38] sm:$0xff] (!%p714_p10), %v917_v8 }
  0x29 PF: > { %v865_v9 = vld [vmem:[%s988_s7] sm:$0xff]   ;;  %v866_v10 = vld [vmem:[%s988_s7 + $0x8] sm:$0xff]   ;;  %v867_v11 = vld [vmem:[%s988_s7 + $0x10] sm:$0xff]   ;;  %p727_p11 = scmp.ne.s32.totalorder %s907_s14, 4 }
  0x2a   : > { %784 = vmatprep.subr.bf16.mxu0 %v865_v9  ;;  %808 = vmatprep.subr.bf16.mxu1 %v865_v9  ;;  %v868_v12 = vld [vmem:[%s988_s7 + $0x18] sm:$0xff]   ;;  %v873_v13 = vld [vmem:[%s990_s8] sm:$0xff]   ;;  %v874_v14 = vld [vmem:[%s990_s8 + $0x10] sm:$0xff]  }
  0x2b   : > { %785 = vmatpush3.bf16.msra.mxu0 %v865_v9  ;;  %816 = vmatpush3.bf16.msra.mxu1 %v865_v9  ;;  %v869_v15 = vld [vmem:[%s988_s7 + $0x20] sm:$0xff]   ;;  %v870_v16 = vld [vmem:[%s988_s7 + $0x28] sm:$0xff]   ;;  %v871_v17 = vld [vmem:[%s988_s7 + $0x30] sm:$0xff]  }
  0x2c   : > { %786 = vmatprep.subr.bf16.mxu0 %v866_v10  ;;  %809 = vmatprep.subr.bf16.mxu1 %v866_v10  ;;  %v872_v18 = vld [vmem:[%s988_s7 + $0x38] sm:$0xff]   ;;  %v875_v19 = vld [vmem:[%s990_s8 + $0x8] sm:$0xff]   ;;  %v336_v21 = vld [vmem:[#allocation2 + $0x10] sm:$0xff] }
  0x2d   : > { %800 = vmatprep.mubr.bf16.mxu0 %v873_v13  ;;  %804 = vmatprep.mubr.bf16.mxu1 %v874_v14  ;;  %v876_v20 = vld [vmem:[%s990_s8 + $0x18] sm:$0xff]   ;;  %v334_v23 = vld [vmem:[#allocation2] sm:$0xff]  ;;  %v335_v33 = vld [vmem:[#allocation2 + $0x8] sm:$0xff] }
  0x2e   : > { %v340_v22 = vld [vmem:[#allocation2 + $0x30] sm:$0xff]  ;;  %v338_v24 = vld [vmem:[#allocation2 + $0x20] sm:$0xff]  ;;  %v337_v27 = vld [vmem:[#allocation2 + $0x18] sm:$0xff] }
  0x2f   : > { %787 = vmatpush3.bf16.msra.mxu0 %v866_v10  ;;  %817 = vmatpush3.bf16.msra.mxu1 %v866_v10  ;;  %v341_v28 = vld [vmem:[#allocation2 + $0x38] sm:$0xff]  ;;  %v339_v34 = vld [vmem:[#allocation2 + $0x28] sm:$0xff]  ;;  %v728_v47 = vld [vmem:[%s1038_s2] ss:$0 sm:$0xff] (!%p727_p11) }
  0x30   : > { %788 = vmatprep.subr.bf16.mxu0 %v867_v11  ;;  %810 = vmatprep.subr.bf16.mxu1 %v867_v11 }
  0x33   : > { %789 = vmatpush3.bf16.msra.mxu0 %v867_v11  ;;  %818 = vmatpush3.bf16.msra.mxu1 %v867_v11 }
  0x34   : > { %790 = vmatprep.subr.bf16.mxu0 %v868_v12  ;;  %811 = vmatprep.subr.bf16.mxu1 %v868_v12 }
  0x37   : > { %791 = vmatpush3.bf16.msra.mxu0 %v868_v12  ;;  %819 = vmatpush3.bf16.msra.mxu1 %v868_v12 }
  0x38   : > { %792 = vmatprep.subr.bf16.mxu0 %v869_v15  ;;  %812 = vmatprep.subr.bf16.mxu1 %v869_v15 }
  0x3b   : > { %793 = vmatpush3.bf16.msra.mxu0 %v869_v15  ;;  %820 = vmatpush3.bf16.msra.mxu1 %v869_v15 }
  0x3c   : > { %794 = vmatprep.subr.bf16.mxu0 %v870_v16  ;;  %813 = vmatprep.subr.bf16.mxu1 %v870_v16 }
  0x3f   : > { %795 = vmatpush3.bf16.msra.mxu0 %v870_v16  ;;  %821 = vmatpush3.bf16.msra.mxu1 %v870_v16 }
  0x40   : > { %796 = vmatprep.subr.bf16.mxu0 %v871_v17  ;;  %814 = vmatprep.subr.bf16.mxu1 %v871_v17 }
  0x43   : > { %797 = vmatpush3.bf16.msra.mxu0 %v871_v17  ;;  %822 = vmatpush3.bf16.msra.mxu1 %v871_v17 }
  0x44   : > { %798 = vmatprep.subr.bf16.mxu0 %v872_v18  ;;  %815 = vmatprep.subr.bf16.mxu1 %v872_v18 }
  0x47   : > { %799 = vmatpush3.bf16.msra.mxu0 %v872_v18  ;;  %823 = vmatpush3.bf16.msra.mxu1 %v872_v18 }
  0x4a   : > { %801 = vmatmul.mubr.bf16.vlgmr.msra.gmra.mrb[0].mxu0 %v875_v19  ;;  %805 = vmatmul.mubr.bf16.vlgmr.msra.gmra.mrb[0].mxu1 %v876_v20 }
 0x11d   : > { %v802_v25 = vpop.f32.mrb[0].mxu0  ;;  %v806_v26 = vpop.f32.mrb[0].mxu1  ;;  %522 = sbr.rel (%p727_p11) target bundleno = 307 (0x133), region = 81 }
 0x11e   : > { %v505_v29 = vadd.f32 %v802_v25, %v336_v21  ;;  %v509_v30 = vadd.f32 %v806_v26, %v340_v22  ;;  %v472_v31 = vpop.f32.mrb[1].mxu0  ;;  %v488_v32 = vpop.f32.mrb[1].mxu1 }
 0x11f   : > { %v503_v35 = vadd.f32 %v472_v31, %v334_v23  ;;  %v507_v36 = vadd.f32 %v488_v32, %v338_v24  ;;  %v803_v37 = vpop.f32.mrb[2].mxu0  ;;  %v807_v38 = vpop.f32.mrb[2].mxu1 }
 0x120   : > { %513 = vst [vmem:[#allocation2 + $0x10] sm:$0xff] %v505_v29  ;;  %517 = vst [vmem:[#allocation2 + $0x30] sm:$0xff] %v509_v30  ;;  %v506_v39 = vadd.f32 %v803_v37, %v337_v27  ;;  %v510_v40 = vadd.f32 %v807_v38, %v341_v28  ;;  %v475_v41 = vpop.f32.mrb[3].mxu0  ;;  %v491_v42 = vpop.f32.mrb[3].mxu1 }
 0x121   : > { %511 = vst [vmem:[#allocation2] sm:$0xff] %v503_v35  ;;  %515 = vst [vmem:[#allocation2 + $0x20] sm:$0xff] %v507_v36  ;;  %v504_v43 = vadd.f32 %v475_v41, %v335_v33  ;;  %v508_v44 = vadd.f32 %v491_v42, %v339_v34 }
 0x122   : > { %514 = vst [vmem:[#allocation2 + $0x18] sm:$0xff] %v506_v39  ;;  %518 = vst [vmem:[#allocation2 + $0x38] sm:$0xff] %v510_v40 }
 0x123   : > { %512 = vst [vmem:[#allocation2 + $0x8] sm:$0xff] %v504_v43  ;;  %516 = vst [vmem:[#allocation2 + $0x28] sm:$0xff] %v508_v44 }
 0x127   : > { %v525_v50 = vld [vmem:[#allocation2 + $0x10] sm:$0xff] }
 0x128   : > { %v523_v45 = vld [vmem:[#allocation2] sm:$0xff]  ;;  %v540_v53 = vadd.f32 %v728_v47, %v525_v50  ;;  %v529_v57 = vld [vmem:[#allocation2 + $0x30] sm:$0xff] }
 0x129   : > { %v538_v48 = vadd.f32 %v728_v47, %v523_v45  ;;  %v526_v51 = vld [vmem:[#allocation2 + $0x18] sm:$0xff]  ;;  %v527_v52 = vld [vmem:[#allocation2 + $0x20] sm:$0xff]  ;;  %v544_v62 = vadd.f32 %v728_v47, %v529_v57 }
 0x12a   : > { %v524_v46 = vld [vmem:[#allocation2 + $0x8] sm:$0xff]  ;;  %v541_v54 = vadd.f32 %v728_v47, %v526_v51  ;;  %v542_v56 = vadd.f32 %v728_v47, %v527_v52  ;;  %v530_v58 = vld [vmem:[#allocation2 + $0x38] sm:$0xff]  ;;  %v548_v63 = vmax.f32 %v540_v53, 0.0 }
 0x12b   : > { %v539_v49 = vadd.f32 %v728_v47, %v524_v46  ;;  %v528_v55 = vld [vmem:[#allocation2 + $0x28] sm:$0xff]  ;;  %v546_v59 = vmax.f32 %v538_v48, 0.0  ;;  %v545_v2 = vadd.f32 %v728_v47, %v530_v58  ;;  %v552_v5 = vmax.f32 %v544_v62, 0.0 }
 0x12c   : > { %v543_v61 = vadd.f32 %v728_v47, %v528_v55  ;;  %v549_v0 = vmax.f32 %v541_v54, 0.0  ;;  %v550_v1 = vmax.f32 %v542_v56, 0.0 }
 0x12d   : > { %v547_v60 = vmax.f32 %v539_v49, 0.0  ;;  %v553_v7 = vmax.f32 %v545_v2, 0.0 }
 0x12e   : > { %v551_v4 = vmax.f32 %v543_v61, 0.0  ;;  %v757_v6 = vpack.c.bf16 %v549_v0, %v548_v63 }
 0x12f   : > { %v752_v3 = vpack.c.bf16 %v547_v60, %v546_v59  ;;  %v767_v9 = vpack.c.bf16 %v553_v7, %v552_v5 }
 0x130   : > { %v762_v8 = vpack.c.bf16 %v551_v4, %v550_v1  ;;  %769 = vst [vmem:[%s1039_s3 + $0x8] sm:$0xff] %v757_v6  }
 0x131   : > { %753 = vst [vmem:[%s1039_s3] sm:$0xff] %v752_v3   ;;  %771 = vst [vmem:[%s1039_s3 + $0x18] sm:$0xff] %v767_v9  }
 0x132   : > { %770 = vst [vmem:[%s1039_s3 + $0x10] sm:$0xff] %v762_v8  }
 0x133 PF: > { %s13_s16 = sadd.s32 1, %s915_s16   ;;  %s1040_s12 = smov %s903_s13 }
 0x134   : > { %p10_p12 = scmp.ge.s32.totalorder %s13_s16, 7   ;;  %s1041_s13 = smov %s973_s20 }
 0x135   : > { %s1042_s14 = smov %s911_s15  ;;  %s1043_s15 = smov %s1045_s17 }
 0x136   :  { %12 = sbr.rel (!%p10_p12) target bundleno = 3 (0x3), region = 122 }

// kernel: gaze3inputs_forward.42
= control target key start
LH: loop header
LB: loop body
LE: loop exit
PB: predicated region body
PF: predicated region fallthrough
CT: control target
= control target key end

     0   :  { %s1394_s15 = smov 0   ;;  %s1396_s16 = smov 0   ;;  %s1546_s0 = inlined_call_operand.vmem [shape: bf16[64,1152], index: 0, kind: input, shape index: {}]   ;;  %s1547_s1 = inlined_call_operand.vmem [shape: bf16[1152,128], index: 1, kind: input, shape index: {}]   ;;  %s1548_s2 = inlined_call_operand.vmem [shape: f32[1,128], index: 2, kind: input, shape index: {}]   ;;  %s1549_s3 = inlined_call_operand.vmem [shape: bf16[64,128], index: 3, kind: input, shape index: {}]   ;;  %s1550_s4 = inlined_call_operand.vmem [shape: bf16[64,128], index: 4, kind: output, shape index: {}]  }
   0x1   :  { %s1398_s17 = smov 0   ;;  %s1400_s18 = smov 0  }
   0x2   :  { %s1402_s19 = smov 0  }
   0x3 LB: > { %s26_s20 = sadd.s32 1, %s1362_s18  ;;  %p49_p1 = scmp.ne.s32.totalorder %s1354_s16, %s1350_s15  ;;  %s1366_s19 = sphi %s1402_s19, %s14_s19   ;;  %s1362_s18 = sphi %s1400_s18, %s1554_s18   ;;  %s1358_s17 = sphi %s1398_s17, %s1553_s17   ;;  %s1354_s16 = sphi %s1396_s16, %s1552_s16   ;;  %s1350_s15 = sphi %s1394_s15, %s1551_s15  }
   0x4   : > { %p27_p0 = scmp.ge.s32.totalorder %s26_s20, 3  ;;  %p50_p2 = scmp.eq.s32.totalorder %s1366_s19, 0 }
   0x5   : > { %s42_s22 = sadd.s32 1, %s1354_s16  ;;  %p1047_p5 = scmp.ge.s32.totalorder %s1366_s19, 3 }
   0x6   : > { %s1556_s20 = smov (%p27_p0, %s26_s20), 0  ;;  %p51_p3 = por %p50_p2, %p49_p1 }
   0x7   : > { %s38_s21 = ssub.s32 %s1362_s18, %s1556_s20  ;;  %203 = sbr.rel (%p1047_p5) target bundleno = 28 (0x1c), region = 24 }
   0x8   : > { %p40_p4 = scmp.eq.s32.totalorder %s38_s21, 0 }
   0xa   : > { %s1429_s23 = scalar_select %p40_p4, %s1354_s16, %s42_s22  }
   0xe   : > { %206 = sbr.rel (!%p51_p3) target bundleno = 28 (0x1c), region = 28  ;;  %s208_s24 = sand.u32 (%p51_p3), 1, %s1354_s16  }
   0xf   : > { %s1118_s25 = smul.u32 (%p51_p3), 12, %s1362_s18 }
  0x10   : > { %s1245_s26 = smul.u32 (%p51_p3), 96, %s208_s24 }
  0x11   : > { %s1437_s29 = scalar_lea.vmem (%p51_p3), %s1546_s0, %s1118_s25 }
  0x12   : > { %v231_v0 = vld [vmem:[%s1437_s29] sm:$0xff] (%p51_p3)  ;;  %v235_v2 = vld [vmem:[%s1437_s29 + $0x48] sm:$0xff] (%p51_p3)  ;;  %s210_s30 = scalar_lea.vmem (%p51_p3), [#allocation3], %s1245_s26  ;;  %v239_v4 = vld [vmem:[%s1437_s29 + $0x90] sm:$0xff] (%p51_p3) }
  0x13   : > { %v233_v1 = vld [vmem:[%s1437_s29 + $0x24] sm:$0xff] (%p51_p3)  ;;  %232 = vst [vmem:[%s210_s30] sm:$0xff] (%p51_p3), %v231_v0  ;;  %236 = vst [vmem:[%s210_s30 + $0x18] sm:$0xff] (%p51_p3), %v235_v2  ;;  %v237_v3 = vld [vmem:[%s1437_s29 + $0x6c] sm:$0xff] (%p51_p3) }
  0x14   : > { %234 = vst [vmem:[%s210_s30 + $0xc] sm:$0xff] (%p51_p3), %v233_v1  ;;  %v241_v5 = vld [vmem:[%s1437_s29 + $0xb4] sm:$0xff] (%p51_p3)  ;;  %238 = vst [vmem:[%s210_s30 + $0x24] sm:$0xff] (%p51_p3), %v237_v3  ;;  %v245_v7 = vld [vmem:[%s1437_s29 + $0xfc] sm:$0xff] (%p51_p3) }
  0x15   : > { %240 = vst [vmem:[%s210_s30 + $0x30] sm:$0xff] %v239_v4  ;;  %242 = vst [vmem:[%s210_s30 + $0x3c] sm:$0xff] %v241_v5  ;;  %v243_v6 = vld [vmem:[%s1437_s29 + $0xd8] sm:$0xff]  ;;  %v1049_v8 = vld [vmem:[%s1437_s29 + $0x8] sm:$0xf] }
  0x16   : > { %244 = vst [vmem:[%s210_s30 + $0x48] sm:$0xff] %v243_v6  ;;  %246 = vst [vmem:[%s210_s30 + $0x54] sm:$0xff] %v245_v7  ;;  %v1051_v9 = vld [vmem:[%s1437_s29 + $0x2c] sm:$0xf]  ;;  %v1053_v10 = vld [vmem:[%s1437_s29 + $0x50] sm:$0xf] }
  0x17   : > { %1050 = vst [vmem:[%s210_s30 + $0x8] sm:$0xf] %v1049_v8  ;;  %v1055_v11 = vld [vmem:[%s1437_s29 + $0x74] sm:$0xf]  ;;  %1052 = vst [vmem:[%s210_s30 + $0x14] sm:$0xf] %v1051_v9 }
  0x18   : > { %1054 = vst [vmem:[%s210_s30 + $0x20] sm:$0xf] %v1053_v10  ;;  %1056 = vst [vmem:[%s210_s30 + $0x2c] sm:$0xf] %v1055_v11  ;;  %v1057_v12 = vld [vmem:[%s1437_s29 + $0x98] sm:$0xf] }
  0x19   : > { %v1059_v13 = vld [vmem:[%s1437_s29 + $0xbc] sm:$0xf]  ;;  %v1061_v14 = vld [vmem:[%s1437_s29 + $0xe0] sm:$0xf]  ;;  %1058 = vst [vmem:[%s210_s30 + $0x38] sm:$0xf] %v1057_v12 }
  0x1a   : > { %1060 = vst [vmem:[%s210_s30 + $0x44] sm:$0xf] %v1059_v13  ;;  %1062 = vst [vmem:[%s210_s30 + $0x50] sm:$0xf] %v1061_v14  ;;  %v1063_v15 = vld [vmem:[%s1437_s29 + $0x104] sm:$0xf] }
  0x1b   : > { %1064 = vst [vmem:[%s210_s30 + $0x5c] sm:$0xf] %v1063_v15 }
  0x1c PF: > { %p1065_p6 = scmp.ge.s32.totalorder %s1366_s19, 1  ;;  %p286_p7 = scmp.lt.s32.totalorder %s1366_s19, 4 }
  0x1e   : > { %p287_p8 = pnand %p1065_p6, %p286_p7 }
  0x1f   : > { %s293_s5 = sand.u32 (!%p287_p8), 1, %s1350_s15   ;;  %s342_s6 = smul.u32 (!%p287_p8), 48, %s1358_s17 }
  0x20   : > { %290 = sbr.rel (%p287_p8) target bundleno = 341 (0x155), region = 58  ;;  %p1067_p10 = scmp.ne.s32.totalorder (!%p287_p8), %s1358_s17, 0 }
  0x21   : > { %s1246_s7 = smul.u32 (!%p287_p8), 96, %s293_s5  ;;  %p343_p9 = scmp.lt.s32.totalorder (!%p287_p8), %s342_s6, 143 }
  0x23   : > { %s1464_s12 = scalar_lea.vmem (!%p287_p8), [#allocation3], %s1246_s7 }
  0x27   : > { %s1558_s6 = smov (!%p343_p9, %s342_s6), 143  ;;  %376 = sbr.rel (%p1067_p10) target bundleno = 46 (0x2e), region = 66 }
  0x28   : > { %s1066_s8 = sshll.u32 %s1558_s6, 2  ;;  %v1368_v16 = vmov (!%p1067_p10), 0.0  }
  0x29   : > { %s1462_s11 = scalar_lea.vmem %s1547_s1, %s1066_s8  ;;  %377 = vst [vmem:[#allocation2] sm:$0xff] (!%p1067_p10), %v1368_v16  ;;  %378 = vst [vmem:[#allocation2 + $0x8] sm:$0xff] (!%p1067_p10), %v1368_v16 }
  0x2a   : > { %379 = vst [vmem:[#allocation2 + $0x10] sm:$0xff] (!%p1067_p10), %v1368_v16  ;;  %380 = vst [vmem:[#allocation2 + $0x18] sm:$0xff] (!%p1067_p10), %v1368_v16 }
  0x2b   : > { %381 = vst [vmem:[#allocation2 + $0x20] sm:$0xff] (!%p1067_p10), %v1368_v16  ;;  %382 = vst [vmem:[#allocation2 + $0x28] sm:$0xff] (!%p1067_p10), %v1368_v16 }
  0x2c   : > { %383 = vst [vmem:[#allocation2 + $0x30] sm:$0xff] (!%p1067_p10), %v1368_v16  ;;  %384 = vst [vmem:[#allocation2 + $0x38] sm:$0xff] (!%p1067_p10), %v1368_v16 }
  0x2e PF: > { %v1288_v17 = vld [vmem:[%s1462_s11 + $0x40] sm:$0xff]   ;;  %v1291_v20 = vld [vmem:[%s1462_s11 + $0x48] sm:$0xff]   ;;  %v1294_v23 = vld [vmem:[%s1462_s11 + $0x50] sm:$0xff]   ;;  %p1104_p11 = scmp.ne.s32.totalorder %s1358_s17, 2 }
  0x2f   : > { %v1289_v18 = vld [vmem:[%s1462_s11] sm:$0xff]   ;;  %1169 = vmatprep.subr.bf16.mxu0 %v1288_v17  ;;  %v1292_v21 = vld [vmem:[%s1462_s11 + $0x8] sm:$0xff]   ;;  %v1295_v24 = vld [vmem:[%s1462_s11 + $0x10] sm:$0xff]  }
  0x30   : > { %v1290_v19 = vld [vmem:[%s1462_s11 + $0x80] sm:$0xff]   ;;  %1170 = vmatpush3.bf16.msra.mxu0 %v1289_v18  ;;  %v1293_v22 = vld [vmem:[%s1462_s11 + $0x88] sm:$0xff]   ;;  %v1296_v25 = vld [vmem:[%s1462_s11 + $0x90] sm:$0xff]  }
  0x31   : > { %1221 = vmatprep.subr.bf16.mxu1 %v1290_v19  ;;  %1171 = vmatprep.subr.bf16.mxu0 %v1291_v20  ;;  %v1297_v26 = vld [vmem:[%s1462_s11 + $0x58] sm:$0xff]   ;;  %v1300_v29 = vld [vmem:[%s1462_s11 + $0x60] sm:$0xff]   ;;  %v1303_v32 = vld [vmem:[%s1462_s11 + $0x68] sm:$0xff]  }
  0x32   : > { %1222 = vmatpush3.bf16.msra.mxu1 %v1290_v19  ;;  %v1298_v27 = vld [vmem:[%s1462_s11 + $0x18] sm:$0xff]   ;;  %v1302_v30 = vld [vmem:[%s1462_s11 + $0xa0] sm:$0xff]   ;;  %v1305_v33 = vld [vmem:[%s1462_s11 + $0xa8] sm:$0xff]  }
  0x33   : > { %1223 = vmatprep.subr.bf16.mxu1 %v1293_v22  ;;  %v1299_v28 = vld [vmem:[%s1462_s11 + $0x98] sm:$0xff]   ;;  %v1301_v31 = vld [vmem:[%s1462_s11 + $0x20] sm:$0xff]   ;;  %v1304_v34 = vld [vmem:[%s1462_s11 + $0x28] sm:$0xff]  }
  0x34   : > { %1172 = vmatpush3.bf16.msra.mxu0 %v1292_v21  ;;  %v1306_v35 = vld [vmem:[%s1462_s11 + $0x70] sm:$0xff]   ;;  %v1309_v38 = vld [vmem:[%s1462_s11 + $0x78] sm:$0xff]   ;;  %v1312_v43 = vld [vmem:[%s1464_s12] ss:$12 sps:$4 sm:$0xff]  }
  0x35   : > { %1173 = vmatprep.subr.bf16.mxu0 %v1294_v23  ;;  %v1307_v36 = vld [vmem:[%s1462_s11 + $0x30] sm:$0xff]   ;;  %v1311_v39 = vld [vmem:[%s1462_s11 + $0xb8] sm:$0xff]   ;;  %v1316_v45 = vld [vmem:[%s1464_s12 + $0x20] ss:$12 sps:$4 sm:$0xff]  }
  0x36   : > { %1224 = vmatpush3.bf16.msra.mxu1 %v1293_v22  ;;  %v1308_v37 = vld [vmem:[%s1462_s11 + $0xb0] sm:$0xff]   ;;  %v1310_v42 = vld [vmem:[%s1462_s11 + $0x38] sm:$0xff]   ;;  %v385_v59 = vld [vmem:[#allocation2] sm:$0xff] }
  0x37   : > { %1225 = vmatprep.subr.bf16.mxu1 %v1296_v25  ;;  %v1314_v40 = vld [vmem:[%s1464_s12 + $0x4] ss:$12 sps:$4 sm:$0xff]   ;;  %v1315_v41 = vld [vmem:[%s1464_s12 + $0x8] ss:$12 sps:$4 sm:$0xff]   ;;  %v1325_v51 = vld [vmem:[%s1464_s12 + $0x4c] ss:$12 sps:$4 sm:$0xff]  }
  0x38   : > { %1174 = vmatpush3.bf16.msra.mxu0 %v1295_v24  ;;  %697 = vmatprep.mubr.bf16.mxu0 %v1314_v40  ;;  %v1317_v44 = vld [vmem:[%s1464_s12 + $0x1c] ss:$12 sps:$4 sm:$0xff]   ;;  %v1323_v46 = vld [vmem:[%s1464_s12 + $0x38] ss:$12 sps:$4 sm:$0xff]   ;;  %v1320_v48 = vld [vmem:[%s1464_s12 + $0x34] ss:$12 sps:$4 sm:$0xff]  }
  0x39   : > { %1175 = vmatprep.subr.bf16.mxu0 %v1297_v26  ;;  %1237 = vmatprep.mubr.bf16.mxu1 %v1315_v41  ;;  %v1319_v47 = vld [vmem:[%s1464_s12 + $0x18] ss:$12 sps:$4 sm:$0xff]   ;;  %v1324_v49 = vld [vmem:[%s1464_s12 + $0x50] ss:$12 sps:$4 sm:$0xff]   ;;  %v1327_v52 = vld [vmem:[%s1464_s12 + $0x48] ss:$12 sps:$4 sm:$0xff]  }
  0x3a   : > { %1226 = vmatpush3.bf16.msra.mxu1 %v1296_v25  ;;  %v1322_v50 = vld [vmem:[%s1464_s12 + $0x30] ss:$12 sps:$4 sm:$0xff]   ;;  %v386_v0 = vld [vmem:[#allocation2 + $0x8] sm:$0xff]  ;;  %v389_v26 = vld [vmem:[#allocation2 + $0x20] sm:$0xff] }
  0x3b   : > { %1227 = vmatprep.subr.bf16.mxu1 %v1299_v28  ;;  %v387_v10 = vld [vmem:[#allocation2 + $0x10] sm:$0xff]  ;;  %v388_v16 = vld [vmem:[#allocation2 + $0x18] sm:$0xff] }
  0x3c   : > { %1176 = vmatpush3.bf16.msra.mxu0 %v1298_v27  ;;  %v392_v41 = vld [vmem:[#allocation2 + $0x38] sm:$0xff] }
  0x3d   : > { %1177 = vmatprep.subr.bf16.mxu0 %v1300_v29  ;;  %v390_v29 = vld [vmem:[#allocation2 + $0x28] sm:$0xff] }
  0x3e   : > { %1228 = vmatpush3.bf16.msra.mxu1 %v1299_v28 }
  0x3f   : > { %1229 = vmatprep.subr.bf16.mxu1 %v1302_v30 }
  0x40   : > { %1178 = vmatpush3.bf16.msra.mxu0 %v1301_v31 }
  0x41   : > { %1179 = vmatprep.subr.bf16.mxu0 %v1303_v32 }
  0x42   : > { %1230 = vmatpush3.bf16.msra.mxu1 %v1302_v30 }
  0x43   : > { %1231 = vmatprep.subr.bf16.mxu1 %v1305_v33 }
  0x44   : > { %1180 = vmatpush3.bf16.msra.mxu0 %v1304_v34 }
  0x45   : > { %1181 = vmatprep.subr.bf16.mxu0 %v1306_v35 }
  0x46   : > { %1232 = vmatpush3.bf16.msra.mxu1 %v1305_v33 }
  0x47   : > { %1233 = vmatprep.subr.bf16.mxu1 %v1308_v37 }
  0x48   : > { %1182 = vmatpush3.bf16.msra.mxu0 %v1307_v36 }
  0x49   : > { %1183 = vmatprep.subr.bf16.mxu0 %v1309_v38 }
  0x4a   : > { %1234 = vmatpush3.bf16.msra.mxu1 %v1308_v37  ;;  %v391_v37 = vld [vmem:[#allocation2 + $0x30] sm:$0xff] }
  0x4b   : > { %1235 = vmatprep.subr.bf16.mxu1 %v1311_v39 }
  0x4c   : > { %1184 = vmatpush3.bf16.msra.mxu0 %v1310_v42 }
  0x4e   : > { %1236 = vmatpush3.bf16.msra.mxu1 %v1311_v39 }
  0x4f   : > { %698 = vmatmul.mubr.bf16.vlgmr.msra.gmra.mrb[0].mxu0 %v1312_v43 }
  0x50   : > { %705 = vmatprep.mubr.bf16.mxu0 %v1317_v44 }
  0x51   : > { %1238 = vmatmul.mubr.bf16.vlgmr.msra.gmra.mrb[0].mxu1 %v1316_v45 }
  0x52   : > { %1241 = vmatprep.mubr.bf16.mxu1 %v1323_v46 }
  0x57   : > { %706 = vmatmul.mubr.bf16.gmra.mrb[4].mxu0 %v1319_v47  ;;  %v1105_v47 = vld [vmem:[%s1548_s2] ss:$0 sm:$0xff] (!%p1104_p11) }
  0x58   : > { %713 = vmatprep.mubr.bf16.mxu0 %v1320_v48 }
  0x59   : > { %1242 = vmatmul.mubr.bf16.gmra.mrb[4].mxu1 %v1324_v49 }
  0x5f   : > { %714 = vmatmul.mubr.bf16.gmra.mrb[8].mxu0 %v1322_v50  ;;  %v1128_v50 = vld [vmem:[%s1549_s3] sm:$0xff] (!%p1104_p11)  }
  0x60   : > { %721 = vmatprep.mubr.bf16.mxu0 %v1325_v51 }
  0x67   : > { %722 = vmatmul.mubr.bf16.gmra.mrb[12].mxu0 %v1327_v52 }
 0x122   : > { %v1185_v53 = vpop.f32.mrb[0].mxu0 }
 0x123   : > { %v1186_v54 = vpop.f32.mrb[1].mxu0 }
 0x124   : > { %v1187_v55 = vadd.f32 %v1186_v54, %v1185_v53  ;;  %v1188_v56 = vpop.f32.mrb[2].mxu0  ;;  %v1239_v57 = vpop.f32.mrb[0].mxu1  ;;  %v1129_v53 = vunpack.c.l.bf16 (!%p1104_p11), %v1128_v50  ;;  %v1130_v54 = vunpack.c.h.bf16 (!%p1104_p11), %v1128_v50 }
 0x125   : > { %v1189_v58 = vpop.f32.mrb[3].mxu0  ;;  %v764_v60 = vpop.f32.mrb[1].mxu1 }
 0x126   : > { %v1190_v61 = vadd.f32 %v1189_v58, %v1188_v56  ;;  %v765_v62 = vadd.f32 %v1187_v55, %v764_v60  ;;  %v1240_v63 = vpop.f32.mrb[2].mxu1 }
 0x127   : > { %v767_v1 = vpop.f32.mrb[3].mxu1 }
 0x128   : > { %v795_v2 = vadd.f32 %v765_v62, %v385_v59  ;;  %v768_v3 = vadd.f32 %v1190_v61, %v767_v1 }
 0x12a   : > { %803 = vst [vmem:[#allocation2] sm:$0xff] %v795_v2  ;;  %v796_v4 = vadd.f32 %v768_v3, %v386_v0  ;;  %v1191_v5 = vpop.f32.mrb[4].mxu0  ;;  %v1164_v0 = vld [vmem:[%s1549_s3 + $0x10] sm:$0xff] (!%p1104_p11)  }
 0x12b   : > { %v1192_v6 = vpop.f32.mrb[5].mxu0 }
 0x12c   : > { %804 = vst [vmem:[#allocation2 + $0x8] sm:$0xff] %v796_v4  ;;  %v1193_v7 = vadd.f32 %v1192_v6, %v1191_v5  ;;  %v1194_v8 = vpop.f32.mrb[6].mxu0  ;;  %v1243_v9 = vpop.f32.mrb[4].mxu1  ;;  %v1137_v5 = vunpack.c.l.bf16 (!%p1104_p11), %v1164_v0  ;;  %v1138_v6 = vunpack.c.h.bf16 (!%p1104_p11), %v1164_v0 }
 0x12d   : > { %v1195_v11 = vpop.f32.mrb[7].mxu0  ;;  %v780_v12 = vpop.f32.mrb[5].mxu1 }
 0x12e   : > { %v773_v13 = vadd.f32 %v1239_v57, %v1193_v7  ;;  %v1196_v14 = vadd.f32 %v1195_v11, %v1194_v8  ;;  %v1244_v15 = vpop.f32.mrb[6].mxu1  ;;  %v1163_v57 = vld [vmem:[%s1549_s3 + $0x8] sm:$0xff] (!%p1104_p11)   ;;  %v1165_v7 = vld [vmem:[%s1549_s3 + $0x18] sm:$0xff] (!%p1104_p11)  }
 0x12f   : > { %v783_v17 = vpop.f32.mrb[7].mxu1  ;;  %v1133_v60 = vunpack.c.l.bf16 (!%p1104_p11), %v1163_v57  ;;  %v1134_v61 = vunpack.c.h.bf16 (!%p1104_p11), %v1163_v57 }
 0x130   : > { %v797_v18 = vadd.f32 %v773_v13, %v387_v10  ;;  %v776_v19 = vadd.f32 %v1240_v63, %v1196_v14 }
 0x131   : > { %v815_v45 = vld [vmem:[#allocation2] sm:$0xff] (!%p1104_p11) }
 0x132   : > { %805 = vst [vmem:[#allocation2 + $0x10] sm:$0xff] %v797_v18  ;;  %v798_v20 = vadd.f32 %v776_v19, %v388_v16  ;;  %v1197_v21 = vpop.f32.mrb[8].mxu0  ;;  %v830_v48 = vadd.f32 (!%p1104_p11), %v1105_v47, %v815_v45  ;;  %v1141_v18 = vunpack.c.l.bf16 (!%p1104_p11), %v1165_v7  ;;  %v1142_v19 = vunpack.c.h.bf16 (!%p1104_p11), %v1165_v7 }
 0x133   : > { %v1198_v22 = vpop.f32.mrb[9].mxu0  ;;  %v816_v46 = vld [vmem:[#allocation2 + $0x8] sm:$0xff] (!%p1104_p11) }
 0x134   : > { %806 = vst [vmem:[#allocation2 + $0x18] sm:$0xff] %v798_v20  ;;  %v1199_v23 = vadd.f32 %v1198_v22, %v1197_v21  ;;  %v1200_v24 = vpop.f32.mrb[10].mxu0  ;;  %v831_v49 = vadd.f32 (!%p1104_p11), %v1105_v47, %v816_v46  ;;  %v854_v3 = vadd.f32 (!%p1104_p11), %v1129_v53, %v830_v48 }
 0x135   : > { %v1201_v25 = vpop.f32.mrb[11].mxu0 }
 0x136   : > { %v1202_v27 = vadd.f32 %v1201_v25, %v1200_v24  ;;  %v781_v28 = vadd.f32 %v1199_v23, %v780_v12  ;;  %v855_v4 = vadd.f32 (!%p1104_p11), %v1130_v54, %v831_v49  ;;  %v862_v12 = vmax.f32 (!%p1104_p11), %v854_v3, 0.0 }
 0x138   : > { %v799_v30 = vadd.f32 %v781_v28, %v389_v26  ;;  %v784_v31 = vadd.f32 %v1202_v27, %v783_v17  ;;  %v863_v13 = vmax.f32 (!%p1104_p11), %v855_v4, 0.0 }
 0x139   : > { %v817_v51 = vld [vmem:[#allocation2 + $0x10] sm:$0xff] (!%p1104_p11) }
 0x13a   : > { %807 = vst [vmem:[#allocation2 + $0x20] sm:$0xff] %v799_v30  ;;  %v800_v32 = vadd.f32 %v784_v31, %v390_v29  ;;  %v1203_v33 = vpop.f32.mrb[12].mxu0  ;;  %v832_v55 = vadd.f32 (!%p1104_p11), %v1105_v47, %v817_v51  ;;  %v1146_v20 = vpack.c.bf16 (!%p1104_p11), %v863_v13, %v862_v12 }
 0x13b   : > { %v1204_v34 = vpop.f32.mrb[13].mxu0  ;;  %v818_v52 = vld [vmem:[#allocation2 + $0x18] sm:$0xff] (!%p1104_p11) }
 0x13c   : > { %808 = vst [vmem:[#allocation2 + $0x28] sm:$0xff] %v800_v32  ;;  %v1205_v35 = vadd.f32 %v1204_v34, %v1203_v33  ;;  %v1206_v36 = vpop.f32.mrb[14].mxu0  ;;  %v833_v56 = vadd.f32 (!%p1104_p11), %v1105_v47, %v818_v52  ;;  %v856_v8 = vadd.f32 (!%p1104_p11), %v1133_v60, %v832_v55  ;;  %1147 = vst [vmem:[%s1550_s4] sm:$0xff] (!%p1104_p11), %v1146_v20  }
 0x13d   : > { %v1207_v38 = vpop.f32.mrb[15].mxu0 }
 0x13e   : > { %v789_v39 = vadd.f32 %v1243_v9, %v1205_v35  ;;  %v1208_v40 = vadd.f32 %v1207_v38, %v1206_v36  ;;  %814 = sbr.rel (%p1104_p11) target bundleno = 341 (0x155), region = 70  ;;  %v857_v9 = vadd.f32 (!%p1104_p11), %v1134_v61, %v833_v56  ;;  %v864_v16 = vmax.f32 (!%p1104_p11), %v856_v8, 0.0 }
 0x140   : > { %v801_v42 = vadd.f32 %v789_v39, %v391_v37  ;;  %v792_v43 = vadd.f32 %v1244_v15, %v1208_v40  ;;  %v865_v17 = vmax.f32 (!%p1104_p11), %v857_v9, 0.0 }
 0x141   : > { %v819_v58 = vld [vmem:[#allocation2 + $0x20] sm:$0xff] (!%p1104_p11) }
 0x142   : > { %809 = vst [vmem:[#allocation2 + $0x30] sm:$0xff] %v801_v42  ;;  %v802_v44 = vadd.f32 %v792_v43, %v392_v41  ;;  %v834_v62 = vadd.f32 (!%p1104_p11), %v1105_v47, %v819_v58  ;;  %v1151_v23 = vpack.c.bf16 (!%p1104_p11), %v865_v17, %v864_v16 }
 0x143   : > { %v820_v59 = vld [vmem:[#allocation2 + $0x28] sm:$0xff] (!%p1104_p11) }
 0x144   : > { %810 = vst [vmem:[#allocation2 + $0x38] sm:$0xff] %v802_v44  ;;  %v835_v63 = vadd.f32 (!%p1104_p11), %v1105_v47, %v820_v59  ;;  %v858_v14 = vadd.f32 (!%p1104_p11), %v1137_v5, %v834_v62  ;;  %1166 = vst [vmem:[%s1550_s4 + $0x8] sm:$0xff] (!%p1104_p11), %v1151_v23  }
 0x146   : > { %v859_v15 = vadd.f32 %v1138_v6, %v835_v63  ;;  %v866_v21 = vmax.f32 %v858_v14, 0.0 }
 0x148   : > { %v867_v22 = vmax.f32 %v859_v15, 0.0 }
 0x149   : > { %v821_v1 = vld [vmem:[#allocation2 + $0x30] sm:$0xff] }
 0x14a   : > { %v836_v10 = vadd.f32 %v1105_v47, %v821_v1  ;;  %v1156_v26 = vpack.c.bf16 %v867_v22, %v866_v21 }
 0x14b   : > { %v822_v2 = vld [vmem:[#allocation2 + $0x38] sm:$0xff] }
 0x14c   : > { %v837_v11 = vadd.f32 %v1105_v47, %v822_v2  ;;  %v860_v24 = vadd.f32 %v1141_v18, %v836_v10  ;;  %1167 = vst [vmem:[%s1550_s4 + $0x10] sm:$0xff] %v1156_v26  }
 0x14e   : > { %v861_v25 = vadd.f32 %v1142_v19, %v837_v11  ;;  %v868_v27 = vmax.f32 %v860_v24, 0.0 }
 0x150   : > { %v869_v28 = vmax.f32 %v861_v25, 0.0 }
 0x152   : > { %v1161_v29 = vpack.c.bf16 %v869_v28, %v868_v27 }
 0x154   : > { %1168 = vst [vmem:[%s1550_s4 + $0x18] sm:$0xff] %v1161_v29  }
 0x155 PF: > { %s14_s19 = sadd.s32 1, %s1366_s19   ;;  %s1551_s15 = smov %s1354_s16 }
 0x156   : > { %p11_p12 = scmp.ge.s32.totalorder %s14_s19, 5   ;;  %s1552_s16 = smov %s1429_s23 }
 0x157   : > { %s1553_s17 = smov %s1362_s18  ;;  %s1554_s18 = smov %s1556_s20 }
 0x158   :  { %13 = sbr.rel (!%p11_p12) target bundleno = 3 (0x3), region = 120 }

// kernel: gaze3inputs_forward.40
= control target key start
LH: loop header
LB: loop body
LE: loop exit
PB: predicated region body
PF: predicated region fallthrough
CT: control target
= control target key end

     0   :  { %s469_s1 = inlined_call_operand.vmem [shape: bf16[128,128], index: 1, kind: input, shape index: {}]   ;;  %s470_s0 = inlined_call_operand.vmem [shape: bf16[64,128], index: 0, kind: input, shape index: {}]   ;;  %s471_s2 = inlined_call_operand.vmem [shape: f32[1,128], index: 2, kind: input, shape index: {}]   ;;  %s472_s3 = inlined_call_operand.vmem [shape: bf16[64,128], index: 3, kind: output, shape index: {}]  }
   0x1   :  { %v386_v0 = vld [vmem:[%s469_s1] sm:$0xff]   ;;  %v387_v1 = vld [vmem:[%s469_s1 + $0x8] sm:$0xff]   ;;  %v388_v2 = vld [vmem:[%s469_s1 + $0x10] sm:$0xff]  }
   0x2   :  { %346 = vmatprep.subr.bf16.mxu0 %v386_v0  ;;  %370 = vmatprep.subr.bf16.mxu1 %v386_v0  ;;  %v389_v3 = vld [vmem:[%s469_s1 + $0x18] sm:$0xff]   ;;  %v394_v4 = vld [vmem:[%s470_s0] sm:$0xff]   ;;  %v395_v5 = vld [vmem:[%s470_s0 + $0x10] sm:$0xff]  }
   0x3   :  { %347 = vmatpush3.bf16.msra.mxu0 %v386_v0  ;;  %378 = vmatpush3.bf16.msra.mxu1 %v386_v0  ;;  %v390_v6 = vld [vmem:[%s469_s1 + $0x20] sm:$0xff]   ;;  %v391_v7 = vld [vmem:[%s469_s1 + $0x28] sm:$0xff]   ;;  %v392_v8 = vld [vmem:[%s469_s1 + $0x30] sm:$0xff]  }
   0x4   :  { %348 = vmatprep.subr.bf16.mxu0 %v387_v1  ;;  %371 = vmatprep.subr.bf16.mxu1 %v387_v1  ;;  %v393_v9 = vld [vmem:[%s469_s1 + $0x38] sm:$0xff]   ;;  %v396_v10 = vld [vmem:[%s470_s0 + $0x8] sm:$0xff]   ;;  %v294_v13 = vld [vmem:[%s471_s2] ss:$0 sm:$0xff] }
   0x5   :  { %362 = vmatprep.mubr.bf16.mxu0 %v394_v4  ;;  %366 = vmatprep.mubr.bf16.mxu1 %v395_v5  ;;  %v397_v11 = vld [vmem:[%s470_s0 + $0x18] sm:$0xff]  }
   0x7   :  { %349 = vmatpush3.bf16.msra.mxu0 %v387_v1  ;;  %379 = vmatpush3.bf16.msra.mxu1 %v387_v1 }
   0x8   :  { %350 = vmatprep.subr.bf16.mxu0 %v388_v2  ;;  %372 = vmatprep.subr.bf16.mxu1 %v388_v2 }
   0xb   :  { %351 = vmatpush3.bf16.msra.mxu0 %v388_v2  ;;  %380 = vmatpush3.bf16.msra.mxu1 %v388_v2 }
   0xc   :  { %352 = vmatprep.subr.bf16.mxu0 %v389_v3  ;;  %373 = vmatprep.subr.bf16.mxu1 %v389_v3 }
   0xf   :  { %353 = vmatpush3.bf16.msra.mxu0 %v389_v3  ;;  %381 = vmatpush3.bf16.msra.mxu1 %v389_v3 }
  0x10   :  { %354 = vmatprep.subr.bf16.mxu0 %v390_v6  ;;  %374 = vmatprep.subr.bf16.mxu1 %v390_v6 }
  0x13   :  { %355 = vmatpush3.bf16.msra.mxu0 %v390_v6  ;;  %382 = vmatpush3.bf16.msra.mxu1 %v390_v6 }
  0x14   :  { %356 = vmatprep.subr.bf16.mxu0 %v391_v7  ;;  %375 = vmatprep.subr.bf16.mxu1 %v391_v7 }
  0x17   :  { %357 = vmatpush3.bf16.msra.mxu0 %v391_v7  ;;  %383 = vmatpush3.bf16.msra.mxu1 %v391_v7 }
  0x18   :  { %358 = vmatprep.subr.bf16.mxu0 %v392_v8  ;;  %376 = vmatprep.subr.bf16.mxu1 %v392_v8 }
  0x1b   :  { %359 = vmatpush3.bf16.msra.mxu0 %v392_v8  ;;  %384 = vmatpush3.bf16.msra.mxu1 %v392_v8 }
  0x1c   :  { %360 = vmatprep.subr.bf16.mxu0 %v393_v9  ;;  %377 = vmatprep.subr.bf16.mxu1 %v393_v9 }
  0x1f   :  { %361 = vmatpush3.bf16.msra.mxu0 %v393_v9  ;;  %385 = vmatpush3.bf16.msra.mxu1 %v393_v9 }
  0x22   :  { %363 = vmatmul.mubr.bf16.vlgmr.msra.gmra.mrb[0].mxu0 %v396_v10  ;;  %367 = vmatmul.mubr.bf16.vlgmr.msra.gmra.mrb[0].mxu1 %v397_v11 }
  0xf5   :  { %v364_v12 = vpop.f32.mrb[0].mxu0  ;;  %v368_v14 = vpop.f32.mrb[0].mxu1 }
  0xf6   :  { %v165_v15 = vpop.f32.mrb[1].mxu0  ;;  %v181_v16 = vpop.f32.mrb[1].mxu1  ;;  %v232_v19 = vadd.f32 %v364_v12, %v294_v13  ;;  %v236_v20 = vadd.f32 %v368_v14, %v294_v13 }
  0xf7   :  { %v365_v17 = vpop.f32.mrb[2].mxu0  ;;  %v369_v18 = vpop.f32.mrb[2].mxu1  ;;  %v230_v25 = vadd.f32 %v294_v13, %v165_v15  ;;  %v234_v26 = vadd.f32 %v294_v13, %v181_v16 }
  0xf8   :  { %v233_v21 = vadd.f32 %v365_v17, %v294_v13  ;;  %v237_v22 = vadd.f32 %v369_v18, %v294_v13  ;;  %v168_v23 = vpop.f32.mrb[3].mxu0  ;;  %v184_v24 = vpop.f32.mrb[3].mxu1 }
  0xf9   :  { %v231_v27 = vadd.f32 %v294_v13, %v168_v23  ;;  %v235_v28 = vadd.f32 %v294_v13, %v184_v24 }
  0xfa   :  { %v319_v29 = vpack.c.bf16 %v233_v21, %v232_v19  ;;  %v329_v30 = vpack.c.bf16 %v237_v22, %v236_v20 }
  0xfb   :  { %v314_v31 = vpack.c.bf16 %v231_v27, %v230_v25  ;;  %v324_v32 = vpack.c.bf16 %v235_v28, %v234_v26 }
  0xfc   :  { %331 = vst [vmem:[%s472_s3 + $0x8] sm:$0xff] %v319_v29   ;;  %333 = vst [vmem:[%s472_s3 + $0x18] sm:$0xff] %v329_v30  }
  0xfd   :  { %315 = vst [vmem:[%s472_s3] sm:$0xff] %v314_v31   ;;  %332 = vst [vmem:[%s472_s3 + $0x10] sm:$0xff] %v324_v32  }

// kernel: gaze3inputs_forward.49
= control target key start
LH: loop header
LB: loop body
LE: loop exit
PB: predicated region body
PF: predicated region fallthrough
CT: control target
= control target key end

     0   :  { %s1021_s12 = smov 0   ;;  %s1023_s13 = smov 0   ;;  %s1137_s0 = inlined_call_operand.vmem [shape: bf16[16,1536], index: 0, kind: input, shape index: {}]   ;;  %s1138_s1 = inlined_call_operand.vmem [shape: bf16[1536,128], index: 1, kind: input, shape index: {}]   ;;  %s1139_s2 = inlined_call_operand.vmem [shape: f32[1,128], index: 2, kind: input, shape index: {}]   ;;  %s1140_s3 = inlined_call_operand.vmem [shape: f32[16,128], index: 3, kind: output, shape index: {}]  }
   0x1   :  { %s1025_s14 = smov 0   ;;  %s1027_s15 = smov 0  }
   0x2   :  { %s1029_s16 = smov 0  }
   0x3 LB: > { %s25_s17 = sadd.s32 1, %s994_s15  ;;  %p48_p1 = scmp.ne.s32.totalorder %s986_s13, %s982_s12  ;;  %s998_s16 = sphi %s1029_s16, %s13_s16   ;;  %s994_s15 = sphi %s1027_s15, %s1144_s15   ;;  %s990_s14 = sphi %s1025_s14, %s1143_s14   ;;  %s986_s13 = sphi %s1023_s13, %s1142_s13   ;;  %s982_s12 = sphi %s1021_s12, %s1141_s12  }
   0x4   : > { %p26_p0 = scmp.ge.s32.totalorder %s25_s17, 3  ;;  %p49_p2 = scmp.eq.s32.totalorder %s998_s16, 0 }
   0x5   : > { %s41_s19 = sadd.s32 1, %s986_s13  ;;  %p785_p5 = scmp.ge.s32.totalorder %s998_s16, 3 }
   0x6   : > { %s1146_s17 = smov (%p26_p0, %s25_s17), 0  ;;  %p50_p3 = por %p49_p2, %p48_p1 }
   0x7   : > { %s37_s18 = ssub.s32 %s994_s15, %s1146_s17  ;;  %162 = sbr.rel (%p785_p5) target bundleno = 21 (0x15), region = 20 }
   0x8   : > { %p39_p4 = scmp.eq.s32.totalorder %s37_s18, 0 }
   0xa   : > { %s1056_s20 = scalar_select %p39_p4, %s986_s13, %s41_s19  }
   0xe   : > { %165 = sbr.rel (!%p50_p3) target bundleno = 21 (0x15), region = 24  ;;  %s167_s21 = sand.u32 (%p50_p3), 1, %s986_s13  }
   0xf   : > { %s836_s22 = sshll.u32 (%p50_p3), %s994_s15, 4  ;;  %s786_s23 = sshll.u32 (%p50_p3), %s167_s21, 5 }
  0x10   : > { %s175_s26 = scalar_lea.vmem (%p50_p3), %s1137_s0, %s836_s22  ;;  %s169_s27 = scalar_lea.vmem (%p50_p3), [#allocation3], %s786_s23 }
  0x11   : > { %v188_v0 = vld [vmem:[%s175_s26] sm:$0xff] (%p50_p3)  ;;  %v190_v1 = vld [vmem:[%s175_s26 + $0x8] sm:$0xff] (%p50_p3)  ;;  %v192_v2 = vld [vmem:[%s175_s26 + $0x30] sm:$0xff] (%p50_p3) }
  0x12   : > { %189 = vst [vmem:[%s169_s27] sm:$0xff] (%p50_p3), %v188_v0  ;;  %191 = vst [vmem:[%s169_s27 + $0x8] sm:$0xff] (%p50_p3), %v190_v1  ;;  %v194_v3 = vld [vmem:[%s175_s26 + $0x38] sm:$0xff] (%p50_p3) }
  0x13   : > { %193 = vst [vmem:[%s169_s27 + $0x10] sm:$0xff] (%p50_p3), %v192_v2  ;;  %195 = vst [vmem:[%s169_s27 + $0x18] sm:$0xff] (%p50_p3), %v194_v3 }
  0x15 PF: > { %p789_p6 = scmp.ge.s32.totalorder %s998_s16, 1  ;;  %p212_p7 = scmp.lt.s32.totalorder %s998_s16, 4 }
  0x17   : > { %p213_p8 = pnand %p789_p6, %p212_p7 }
  0x18   : > { %s219_s28 = sand.u32 (!%p213_p8), 1, %s982_s12   ;;  %s791_s29 = sshll.u32 (!%p213_p8), %s990_s14, 6 }
  0x19   : > { %216 = sbr.rel (%p213_p8) target bundleno = 306 (0x132), region = 51  ;;  %s790_s30 = sshll.u32 (!%p213_p8), %s219_s28, 5 }
  0x1a   : > { %p259_p9 = scmp.lt.s32.totalorder (!%p213_p8), %s791_s29, 191  ;;  %s1073_s8 = scalar_lea.vmem (!%p213_p8), [#allocation3], %s790_s30 }
  0x1b   : > { %p793_p10 = scmp.ne.s32.totalorder (!%p213_p8), %s990_s14, 0 }
  0x20   : > { %s1148_s29 = smov (!%p259_p9, %s791_s29), 191  ;;  %283 = sbr.rel (%p793_p10) target bundleno = 39 (0x27), region = 59 }
  0x21   : > { %s792_s4 = sshll.u32 %s1148_s29, 2  ;;  %v1000_v4 = vmov (!%p793_p10), 0.0  }
  0x22   : > { %s1071_s7 = scalar_lea.vmem %s1138_s1, %s792_s4  ;;  %284 = vst [vmem:[#allocation2] sm:$0xff] (!%p793_p10), %v1000_v4  ;;  %285 = vst [vmem:[#allocation2 + $0x8] sm:$0xff] (!%p793_p10), %v1000_v4 }
  0x27 PF: > { %v922_v5 = vld [vmem:[%s1071_s7 + $0x40] sm:$0xff]   ;;  %v926_v9 = vld [vmem:[%s1071_s7 + $0x48] sm:$0xff]   ;;  %v930_v13 = vld [vmem:[%s1071_s7 + $0x50] sm:$0xff]   ;;  %p830_p11 = scmp.ne.s32.totalorder %s990_s14, 2 }
  0x28   : > { %v923_v6 = vld [vmem:[%s1071_s7 + $0xc0] sm:$0xff]   ;;  %837 = vmatprep.subr.bf16.mxu0 %v922_v5  ;;  %v927_v10 = vld [vmem:[%s1071_s7 + $0xc8] sm:$0xff]   ;;  %v931_v14 = vld [vmem:[%s1071_s7 + $0xd0] sm:$0xff]  }
  0x29   : > { %v924_v7 = vld [vmem:[%s1071_s7] sm:$0xff]   ;;  %859 = vmatprep.subr.bf16.mxu1 %v923_v6  ;;  %v928_v11 = vld [vmem:[%s1071_s7 + $0x8] sm:$0xff]   ;;  %v932_v15 = vld [vmem:[%s1071_s7 + $0x10] sm:$0xff]  }
  0x2a   : > { %v925_v8 = vld [vmem:[%s1071_s7 + $0x80] sm:$0xff]   ;;  %838 = vmatpush3.bf16.msra.mxu0 %v924_v7  ;;  %v929_v12 = vld [vmem:[%s1071_s7 + $0x88] sm:$0xff]   ;;  %v933_v16 = vld [vmem:[%s1071_s7 + $0x90] sm:$0xff]  }
  0x2b   : > { %860 = vmatpush3.bf16.msra.mxu1 %v925_v8  ;;  %839 = vmatprep.subr.bf16.mxu0 %v926_v9  ;;  %v934_v17 = vld [vmem:[%s1071_s7 + $0x58] sm:$0xff]   ;;  %v938_v21 = vld [vmem:[%s1071_s7 + $0x60] sm:$0xff]   ;;  %v942_v25 = vld [vmem:[%s1071_s7 + $0x68] sm:$0xff]  }
  0x2c   : > { %861 = vmatprep.subr.bf16.mxu1 %v927_v10  ;;  %v935_v18 = vld [vmem:[%s1071_s7 + $0xd8] sm:$0xff]   ;;  %v939_v22 = vld [vmem:[%s1071_s7 + $0xe0] sm:$0xff]   ;;  %v943_v26 = vld [vmem:[%s1071_s7 + $0xe8] sm:$0xff]  }
  0x2d   : > { %v936_v19 = vld [vmem:[%s1071_s7 + $0x18] sm:$0xff]   ;;  %v940_v23 = vld [vmem:[%s1071_s7 + $0x20] sm:$0xff]   ;;  %v944_v27 = vld [vmem:[%s1071_s7 + $0x28] sm:$0xff]  }
  0x2e   : > { %840 = vmatpush3.bf16.msra.mxu0 %v928_v11  ;;  %v937_v20 = vld [vmem:[%s1071_s7 + $0x98] sm:$0xff]   ;;  %v941_v24 = vld [vmem:[%s1071_s7 + $0xa0] sm:$0xff]   ;;  %v945_v28 = vld [vmem:[%s1071_s7 + $0xa8] sm:$0xff]  }
  0x2f   : > { %862 = vmatpush3.bf16.msra.mxu1 %v929_v12  ;;  %841 = vmatprep.subr.bf16.mxu0 %v930_v13  ;;  %v946_v29 = vld [vmem:[%s1071_s7 + $0x70] sm:$0xff]   ;;  %v950_v33 = vld [vmem:[%s1071_s7 + $0x78] sm:$0xff]   ;;  %v286_v50 = vld [vmem:[#allocation2] sm:$0xff] }
  0x30   : > { %863 = vmatprep.subr.bf16.mxu1 %v931_v14  ;;  %v947_v30 = vld [vmem:[%s1071_s7 + $0xf0] sm:$0xff]   ;;  %v951_v34 = vld [vmem:[%s1071_s7 + $0xf8] sm:$0xff]   ;;  %v287_v55 = vld [vmem:[#allocation2 + $0x8] sm:$0xff] }
  0x31   : > { %v948_v31 = vld [vmem:[%s1071_s7 + $0x30] sm:$0xff]   ;;  %v952_v35 = vld [vmem:[%s1071_s7 + $0x38] sm:$0xff]   ;;  %v831_v60 = vld [vmem:[%s1139_s2] ss:$0 sm:$0xff] (!%p830_p11) }
  0x32   : > { %842 = vmatpush3.bf16.msra.mxu0 %v932_v15  ;;  %v949_v32 = vld [vmem:[%s1071_s7 + $0xb0] sm:$0xff]   ;;  %v953_v36 = vld [vmem:[%s1071_s7 + $0xb8] sm:$0xff]  }
  0x33   : > { %864 = vmatpush3.bf16.msra.mxu1 %v933_v16  ;;  %843 = vmatprep.subr.bf16.mxu0 %v934_v17  ;;  %v954_v37 = vld [vmem:[%s1073_s8] ss:$16 sps:$4 sm:$0xff]   ;;  %v956_v38 = vld [vmem:[%s1073_s8 + $0x4] ss:$16 sps:$4 sm:$0xff]   ;;  %v957_v39 = vld [vmem:[%s1073_s8 + $0x8] ss:$16 sps:$4 sm:$0xff]  }
  0x34   : > { %865 = vmatprep.subr.bf16.mxu1 %v935_v18  ;;  %v959_v40 = vld [vmem:[%s1073_s8 + $0xc] ss:$16 sps:$4 sm:$0xff]   ;;  %600 = vmatprep.mubr.bf16.mxu0 %v956_v38 }
  0x35   : > { %641 = vmatprep.mubr.bf16.mxu1 %v959_v40 }
  0x36   : > { %844 = vmatpush3.bf16.msra.mxu0 %v936_v19 }
  0x37   : > { %866 = vmatpush3.bf16.msra.mxu1 %v937_v20  ;;  %845 = vmatprep.subr.bf16.mxu0 %v938_v21 }
  0x38   : > { %867 = vmatprep.subr.bf16.mxu1 %v939_v22 }
  0x3a   : > { %846 = vmatpush3.bf16.msra.mxu0 %v940_v23 }
  0x3b   : > { %868 = vmatpush3.bf16.msra.mxu1 %v941_v24  ;;  %847 = vmatprep.subr.bf16.mxu0 %v942_v25 }
  0x3c   : > { %869 = vmatprep.subr.bf16.mxu1 %v943_v26 }
  0x3e   : > { %848 = vmatpush3.bf16.msra.mxu0 %v944_v27 }
  0x3f   : > { %870 = vmatpush3.bf16.msra.mxu1 %v945_v28  ;;  %849 = vmatprep.subr.bf16.mxu0 %v946_v29 }
  0x40   : > { %871 = vmatprep.subr.bf16.mxu1 %v947_v30 }
  0x42   : > { %850 = vmatpush3.bf16.msra.mxu0 %v948_v31 }
  0x43   : > { %872 = vmatpush3.bf16.msra.mxu1 %v949_v32  ;;  %851 = vmatprep.subr.bf16.mxu0 %v950_v33 }
  0x44   : > { %873 = vmatprep.subr.bf16.mxu1 %v951_v34 }
  0x46   : > { %852 = vmatpush3.bf16.msra.mxu0 %v952_v35 }
  0x47   : > { %874 = vmatpush3.bf16.msra.mxu1 %v953_v36 }
  0x49   : > { %601 = vmatmul.mubr.bf16.vlgmr.msra.gmra.mrb[0].mxu0 %v954_v37 }
  0x4a   : > { %642 = vmatmul.mubr.bf16.vlgmr.msra.gmra.mrb[0].mxu1 %v957_v39 }
 0x11c   : > { %v853_v41 = vpop.f32.mrb[0].mxu0 }
 0x11d   : > { %v875_v42 = vpop.f32.mrb[0].mxu1  ;;  %v854_v43 = vpop.f32.mrb[1].mxu0 }
 0x11e   : > { %v855_v44 = vadd.f32 %v854_v43, %v853_v41  ;;  %v876_v45 = vpop.f32.mrb[1].mxu1  ;;  %v856_v46 = vpop.f32.mrb[2].mxu0 }
 0x11f   : > { %v877_v47 = vadd.f32 %v876_v45, %v875_v42  ;;  %v878_v48 = vpop.f32.mrb[2].mxu1  ;;  %v857_v49 = vpop.f32.mrb[3].mxu0 }
 0x120   : > { %v858_v51 = vadd.f32 %v857_v49, %v856_v46  ;;  %v879_v52 = vpop.f32.mrb[3].mxu1 }
 0x121   : > { %v644_v53 = vadd.f32 %v877_v47, %v855_v44  ;;  %v880_v54 = vadd.f32 %v879_v52, %v878_v48  ;;  %657 = sbr.rel (%p830_p11) target bundleno = 306 (0x132), region = 63 }
 0x123   : > { %v650_v56 = vadd.f32 %v644_v53, %v286_v50  ;;  %v647_v57 = vadd.f32 %v880_v54, %v858_v51 }
 0x125   : > { %652 = vst [vmem:[#allocation2] sm:$0xff] %v650_v56  ;;  %v651_v58 = vadd.f32 %v647_v57, %v287_v55 }
 0x127   : > { %653 = vst [vmem:[#allocation2 + $0x8] sm:$0xff] %v651_v58 }
 0x12c   : > { %v658_v59 = vld [vmem:[#allocation2] sm:$0xff] }
 0x12d   : > { %v667_v62 = vadd.f32 %v831_v60, %v658_v59 }
 0x12e   : > { %v659_v61 = vld [vmem:[#allocation2 + $0x8] sm:$0xff] }
 0x12f   : > { %v668_v63 = vadd.f32 %v831_v60, %v659_v61  ;;  %669 = vst [vmem:[%s1140_s3] sm:$0xff] %v667_v62 }
 0x131   : > { %670 = vst [vmem:[%s1140_s3 + $0x8] sm:$0xff] %v668_v63 }
 0x132 PF: > { %s13_s16 = sadd.s32 1, %s998_s16   ;;  %s1141_s12 = smov %s986_s13 }
 0x133   : > { %p10_p12 = scmp.ge.s32.totalorder %s13_s16, 5   ;;  %s1142_s13 = smov %s1056_s20 }
 0x134   : > { %s1143_s14 = smov %s994_s15  ;;  %s1144_s15 = smov %s1146_s17 }
 0x135   :  { %12 = sbr.rel (!%p10_p12) target bundleno = 3 (0x3), region = 104 }

</bundles_post_ra>
